<compile_context>
chip_gen: v6e
topology: v6e:2x2x1
jax: 0.10.0
libtpu: 0.0.40
codegen_flags: <defaults>
</compile_context>

<pallas_src>
import jax
import jax.numpy as jnp
import numpy as np
from jax.experimental import pallas as pl
from jax.experimental.pallas import tpu as pltpu

# ---- dimensions implied by decoder.__init__ ----
MLP_IN   = 2 * 2 * 1 * 20 + 2 * (2 * 1 * 30 + 2 * 1 * 8)   # 232
MLP_HID1 = MLP_IN * 2                                        # 464
MLP_OUT  = 2 * 8 * 50                                        # 800
MLP_HID2 = MLP_OUT * 2                                       # 1600
LN_EPS   = 1e-5

# flattened widths of (s1, x1, a1, s2, x2, a2)
IN_SPLITS = (40, 60, 16, 40, 60, 16)


# ----------------------- fused Pallas kernel -----------------------

def decoder_fused_kernel(s1_ref, x1_ref, a1_ref, s2_ref, x2_ref, a2_ref,
                         w1s1_ref, w1x1_ref, w1a1_ref, w1s2_ref, w1x2_ref, w1a2_ref,
                         b1_ref, g1_ref, be1_ref,
                         w2_ref, b2_ref, g2_ref, be2_ref,
                         w3_ref, b3_ref,
                         o_ref):
    """boneMLP + (folded) 1x1 conv + tanh, all in one kernel.

    Weights are bf16 in HBM/VMEM; they are upcast to f32 so that the matmul,
    LayerNorm, ReLU and tanh math is all done in f32.
    """
    f32 = jnp.float32

    def dot(a, w_ref):
        return jnp.dot(a, w_ref[...].astype(f32), preferred_element_type=f32)

    def layernorm(h, g_ref, b_ref):
        # single-pass: E[x], E[x^2]
        mu = jnp.mean(h, axis=-1, keepdims=True)
        ms = jnp.mean(h * h, axis=-1, keepdims=True)
        var = ms - mu * mu
        return (h - mu) * jax.lax.rsqrt(var + LN_EPS) * g_ref[...] + b_ref[...]

    # Layer 1: six partial matmuls replace the XLA-side concat + one big dot.
    h = (dot(s1_ref[...], w1s1_ref) + dot(x1_ref[...], w1x1_ref) +
         dot(a1_ref[...], w1a1_ref) + dot(s2_ref[...], w1s2_ref) +
         dot(x2_ref[...], w1x2_ref) + dot(a2_ref[...], w1a2_ref) +
         b1_ref[...])
    h = jnp.maximum(layernorm(h, g1_ref, be1_ref), 0.0)

    # Layer 2
    h = dot(h, w2_ref) + b2_ref[...]
    h = jnp.maximum(layernorm(h, g2_ref, be2_ref), 0.0)

    # Layer 3 (1x1 conv already folded into w3/b3) + tanh epilogue
    o_ref[...] = jnp.tanh(dot(h, w3_ref) + b3_ref[...])


# ----------------------- parameter init (faithful to the PyTorch module) -----

def init_decoder_params(key):
    ks = jax.random.split(key, 4)

    def linear(k, fin, fout):
        kw, kb = jax.random.split(k)
        bound = 1.0 / np.sqrt(fin)
        w = jax.random.uniform(kw, (fin, fout), jnp.float32, -bound, bound)  # [in, out]
        b = jax.random.uniform(kb, (1, fout), jnp.float32, -bound, bound)
        return w, b

    p = {}
    p["w1"], p["b1"] = linear(ks[0], MLP_IN, MLP_HID1)
    p["g1"]  = jnp.ones((1, MLP_HID1), jnp.float32)   # LayerNorm default affine
    p["be1"] = jnp.zeros((1, MLP_HID1), jnp.float32)
    p["w2"], p["b2"] = linear(ks[1], MLP_HID1, MLP_HID2)
    p["g2"]  = jnp.ones((1, MLP_HID2), jnp.float32)
    p["be2"] = jnp.zeros((1, MLP_HID2), jnp.float32)
    p["w3"], p["b3"] = linear(ks[2], MLP_HID2, MLP_OUT)

    # finalCNN: Conv2d(in=2, out=2, kernel_size=1)
    kcw, kcb = jax.random.split(ks[3])
    cbound = 1.0 / np.sqrt(2 * 1 * 1)
    p["cw"] = jax.random.uniform(kcw, (2, 2), jnp.float32, -cbound, cbound)   # [out_c, in_c]
    p["cb"] = jax.random.uniform(kcb, (2,), jnp.float32, -cbound, cbound)
    return p


# ----------------------- one-time param preparation for the kernel -----------

def prepare_decoder_params(p, weight_dtype=jnp.bfloat16):
    """Fold the 1x1 conv into the last Linear, split w1, cast weights to bf16."""
    # Fold: out[b, o*400+q] = sum_c cw[o,c] * (h @ w3)[b, c*400+q] + cb[o]
    w3 = p["w3"].reshape(MLP_HID2, 2, MLP_OUT // 2)          # [K, c, q]
    b3 = p["b3"].reshape(2, MLP_OUT // 2)                    # [c, q]
    cw, cb = p["cw"], p["cb"]
    w3f = jnp.einsum("kcq,oc->koq", w3, cw).reshape(MLP_HID2, MLP_OUT)
    b3f = (jnp.einsum("cq,oc->oq", b3, cw) + cb[:, None]).reshape(1, MLP_OUT)

    # Split w1 along its input dim to match the six (un-concatenated) inputs.
    split_pts = np.cumsum(IN_SPLITS)[:-1].tolist()
    w1_parts = jnp.split(p["w1"], split_pts, axis=0)

    wd = lambda w: w.astype(weight_dtype)
    return {
        "w1_parts": tuple(wd(w) for w in w1_parts),
        "b1": p["b1"], "g1": p["g1"], "be1": p["be1"],
        "w2": wd(p["w2"]), "b2": p["b2"], "g2": p["g2"], "be2": p["be2"],
        "w3": wd(w3f), "b3": b3f,
    }


# ----------------------- forward wrapper -----------------------

@jax.jit
def decoder_forward(kp, s1, x1, a1, s2, x2, a2):
    B = s1.shape[0]
    ins = [t.reshape(B, -1).astype(jnp.float32) for t in (s1, x1, a1, s2, x2, a2)]

    vmem = pl.BlockSpec(memory_space=pltpu.MemorySpace.VMEM)
    n_in = 6 + 6 + 3 + 4 + 2   # inputs, w1 parts, (b1,g1,be1), (w2,b2,g2,be2), (w3,b3)

    # TODO(synk): UWBSwinIR(is_attention=True) class definition not provided in
    # the source module; self.sigTransformer is passed through as identity here.

    out = pl.pallas_call(
        decoder_fused_kernel,
        out_shape=jax.ShapeDtypeStruct((B, MLP_OUT), jnp.float32),
        in_specs=[vmem] * n_in,
        out_specs=vmem,
        compiler_params=pltpu.CompilerParams(vmem_limit_bytes=32 * 1024 * 1024),
    )(*ins,
      *kp["w1_parts"],
      kp["b1"], kp["g1"], kp["be1"],
      kp["w2"], kp["b2"], kp["g2"], kp["be2"],
      kp["w3"], kp["b3"])

    return out.reshape(B, 2, 8, 50)


# ----------------------- pure-JAX reference (original, unfolded f32 params) ---

def decoder_ref(params, s1, x1, a1, s2, x2, a2):
    B = s1.shape[0]
    mlp_in = jnp.concatenate([t.reshape(B, -1) for t in (s1, x1, a1, s2, x2, a2)], axis=1)

    def ln(h, g, b):
        mu = h.mean(-1, keepdims=True)
        var = ((h - mu) ** 2).mean(-1, keepdims=True)
        return (h - mu) / jnp.sqrt(var + LN_EPS) * g + b

    hp = jax.lax.Precision.HIGHEST
    h = jnp.dot(mlp_in, params["w1"], precision=hp) + params["b1"]
    h = jax.nn.relu(ln(h, params["g1"], params["be1"]))
    h = jnp.dot(h, params["w2"], precision=hp) + params["b2"]
    h = jax.nn.relu(ln(h, params["g2"], params["be2"]))
    h = jnp.dot(h, params["w3"], precision=hp) + params["b3"]
    y = h.reshape(B, 2, 8, 50)
    out = jnp.einsum("oc,bchw->bohw", params["cw"], y, precision=hp)
    out = out + params["cb"][None, :, None, None]
    return jnp.tanh(out)


# ----------------------- main -----------------------

if __name__ == "__main__":
    key = jax.random.PRNGKey(0)
    kp, k1, k2, k3, k4, k5, k6 = jax.random.split(key, 7)

    params = init_decoder_params(kp)
    kernel_params = prepare_decoder_params(params)   # one-time fold / split / bf16 cast

    B = 2
    s1 = jax.random.normal(k1, (B, 2, 1, 20), jnp.float32)
    x1 = jax.random.normal(k2, (B, 2, 1, 30), jnp.float32)
    a1 = jax.random.normal(k3, (B, 2, 1, 8),  jnp.float32)
    s2 = jax.random.normal(k4, (B, 2, 1, 20), jnp.float32)
    x2 = jax.random.normal(k5, (B, 2, 1, 30), jnp.float32)
    a2 = jax.random.normal(k6, (B, 2, 1, 8),  jnp.float32)

    out = decoder_forward(kernel_params, s1, x1, a1, s2, x2, a2)
    out = jax.block_until_ready(out)

    ref = jax.block_until_ready(decoder_ref(params, s1, x1, a1, s2, x2, a2))

    assert out.shape == (B, 2, 8, 50), out.shape
    np.testing.assert_allclose(np.asarray(out), np.asarray(ref), atol=5e-2, rtol=5e-2)

    print("KERNEL_OK")
</pallas_src>

<mosaic_0001>
module attributes {stable_mosaic.version = 11 : i64} {
  func.func @decoder_fused_kernel(%arg0: memref<2x40xf32, #tpu.memory_space<vmem>>, %arg1: memref<2x60xf32, #tpu.memory_space<vmem>>, %arg2: memref<2x16xf32, #tpu.memory_space<vmem>>, %arg3: memref<2x40xf32, #tpu.memory_space<vmem>>, %arg4: memref<2x60xf32, #tpu.memory_space<vmem>>, %arg5: memref<2x16xf32, #tpu.memory_space<vmem>>, %arg6: memref<40x464xbf16, #tpu.memory_space<vmem>>, %arg7: memref<60x464xbf16, #tpu.memory_space<vmem>>, %arg8: memref<16x464xbf16, #tpu.memory_space<vmem>>, %arg9: memref<40x464xbf16, #tpu.memory_space<vmem>>, %arg10: memref<60x464xbf16, #tpu.memory_space<vmem>>, %arg11: memref<16x464xbf16, #tpu.memory_space<vmem>>, %arg12: memref<1x464xf32, #tpu.memory_space<vmem>>, %arg13: memref<1x464xf32, #tpu.memory_space<vmem>>, %arg14: memref<1x464xf32, #tpu.memory_space<vmem>>, %arg15: memref<464x1600xbf16, #tpu.memory_space<vmem>>, %arg16: memref<1x1600xf32, #tpu.memory_space<vmem>>, %arg17: memref<1x1600xf32, #tpu.memory_space<vmem>>, %arg18: memref<1x1600xf32, #tpu.memory_space<vmem>>, %arg19: memref<1600x800xbf16, #tpu.memory_space<vmem>>, %arg20: memref<1x800xf32, #tpu.memory_space<vmem>>, %arg21: memref<2x800xf32, #tpu.memory_space<vmem>>) attributes {dimension_semantics = [], scalar_prefetch = 0 : i64, scratch_operands = 0 : i64, tpu.core_type = #tpu.core_type<tc>} {
    %c0 = arith.constant 0 : index
    %c0_0 = arith.constant 0 : index
    %0 = vector.load %arg0[%c0, %c0_0] : memref<2x40xf32, #tpu.memory_space<vmem>>, vector<2x40xf32>
    %c0_1 = arith.constant 0 : index
    %c0_2 = arith.constant 0 : index
    %1 = vector.load %arg6[%c0_1, %c0_2] : memref<40x464xbf16, #tpu.memory_space<vmem>>, vector<40x464xbf16>
    %2 = arith.extf %1 : vector<40x464xbf16> to vector<40x464xf32>
    %cst = arith.constant dense<0.000000e+00> : vector<2x464xf32>
    %3 = tpu.matmul %0, %2, %cst {dimension_numbers = #tpu.dot_dimension_numbers<[1], [0], [0], [1], [0, 0, 1, 1], [], []>} : vector<2x40xf32>, vector<40x464xf32>, vector<2x464xf32> -> vector<2x464xf32>
    %c0_3 = arith.constant 0 : index
    %c0_4 = arith.constant 0 : index
    %4 = vector.load %arg1[%c0_3, %c0_4] : memref<2x60xf32, #tpu.memory_space<vmem>>, vector<2x60xf32>
    %c0_5 = arith.constant 0 : index
    %c0_6 = arith.constant 0 : index
    %5 = vector.load %arg7[%c0_5, %c0_6] : memref<60x464xbf16, #tpu.memory_space<vmem>>, vector<60x464xbf16>
    %6 = arith.extf %5 : vector<60x464xbf16> to vector<60x464xf32>
    %cst_7 = arith.constant dense<0.000000e+00> : vector<2x464xf32>
    %7 = tpu.matmul %4, %6, %cst_7 {dimension_numbers = #tpu.dot_dimension_numbers<[1], [0], [0], [1], [0, 0, 1, 1], [], []>} : vector<2x60xf32>, vector<60x464xf32>, vector<2x464xf32> -> vector<2x464xf32>
    %8 = arith.addf %3, %7 : vector<2x464xf32>
    %c0_8 = arith.constant 0 : index
    %c0_9 = arith.constant 0 : index
    %9 = vector.load %arg2[%c0_8, %c0_9] : memref<2x16xf32, #tpu.memory_space<vmem>>, vector<2x16xf32>
    %c0_10 = arith.constant 0 : index
    %c0_11 = arith.constant 0 : index
    %10 = vector.load %arg8[%c0_10, %c0_11] : memref<16x464xbf16, #tpu.memory_space<vmem>>, vector<16x464xbf16>
    %11 = arith.extf %10 : vector<16x464xbf16> to vector<16x464xf32>
    %cst_12 = arith.constant dense<0.000000e+00> : vector<2x464xf32>
    %12 = tpu.matmul %9, %11, %cst_12 {dimension_numbers = #tpu.dot_dimension_numbers<[1], [0], [0], [1], [0, 0, 1, 1], [], []>} : vector<2x16xf32>, vector<16x464xf32>, vector<2x464xf32> -> vector<2x464xf32>
    %13 = arith.addf %8, %12 : vector<2x464xf32>
    %c0_13 = arith.constant 0 : index
    %c0_14 = arith.constant 0 : index
    %14 = vector.load %arg3[%c0_13, %c0_14] : memref<2x40xf32, #tpu.memory_space<vmem>>, vector<2x40xf32>
    %c0_15 = arith.constant 0 : index
    %c0_16 = arith.constant 0 : index
    %15 = vector.load %arg9[%c0_15, %c0_16] : memref<40x464xbf16, #tpu.memory_space<vmem>>, vector<40x464xbf16>
    %16 = arith.extf %15 : vector<40x464xbf16> to vector<40x464xf32>
    %cst_17 = arith.constant dense<0.000000e+00> : vector<2x464xf32>
    %17 = tpu.matmul %14, %16, %cst_17 {dimension_numbers = #tpu.dot_dimension_numbers<[1], [0], [0], [1], [0, 0, 1, 1], [], []>} : vector<2x40xf32>, vector<40x464xf32>, vector<2x464xf32> -> vector<2x464xf32>
    %18 = arith.addf %13, %17 : vector<2x464xf32>
    %c0_18 = arith.constant 0 : index
    %c0_19 = arith.constant 0 : index
    %19 = vector.load %arg4[%c0_18, %c0_19] : memref<2x60xf32, #tpu.memory_space<vmem>>, vector<2x60xf32>
    %c0_20 = arith.constant 0 : index
    %c0_21 = arith.constant 0 : index
    %20 = vector.load %arg10[%c0_20, %c0_21] : memref<60x464xbf16, #tpu.memory_space<vmem>>, vector<60x464xbf16>
    %21 = arith.extf %20 : vector<60x464xbf16> to vector<60x464xf32>
    %cst_22 = arith.constant dense<0.000000e+00> : vector<2x464xf32>
    %22 = tpu.matmul %19, %21, %cst_22 {dimension_numbers = #tpu.dot_dimension_numbers<[1], [0], [0], [1], [0, 0, 1, 1], [], []>} : vector<2x60xf32>, vector<60x464xf32>, vector<2x464xf32> -> vector<2x464xf32>
    %23 = arith.addf %18, %22 : vector<2x464xf32>
    %c0_23 = arith.constant 0 : index
    %c0_24 = arith.constant 0 : index
    %24 = vector.load %arg5[%c0_23, %c0_24] : memref<2x16xf32, #tpu.memory_space<vmem>>, vector<2x16xf32>
    %c0_25 = arith.constant 0 : index
    %c0_26 = arith.constant 0 : index
    %25 = vector.load %arg11[%c0_25, %c0_26] : memref<16x464xbf16, #tpu.memory_space<vmem>>, vector<16x464xbf16>
    %26 = arith.extf %25 : vector<16x464xbf16> to vector<16x464xf32>
    %cst_27 = arith.constant dense<0.000000e+00> : vector<2x464xf32>
    %27 = tpu.matmul %24, %26, %cst_27 {dimension_numbers = #tpu.dot_dimension_numbers<[1], [0], [0], [1], [0, 0, 1, 1], [], []>} : vector<2x16xf32>, vector<16x464xf32>, vector<2x464xf32> -> vector<2x464xf32>
    %28 = arith.addf %23, %27 : vector<2x464xf32>
    %c0_28 = arith.constant 0 : index
    %c0_29 = arith.constant 0 : index
    %29 = vector.load %arg12[%c0_28, %c0_29] : memref<1x464xf32, #tpu.memory_space<vmem>>, vector<1x464xf32>
    %30 = vector.broadcast %29 : vector<1x464xf32> to vector<2x464xf32>
    %31 = arith.addf %28, %30 : vector<2x464xf32>
    %cst_30 = arith.constant dense<0.000000e+00> : vector<2xf32>
    %32 = vector.multi_reduction <add>, %31, %cst_30 [1] : vector<2x464xf32> to vector<2xf32>
    %33 = vector.shape_cast %32 : vector<2xf32> to vector<2x1xf32>
    %cst_31 = arith.constant 4.640000e+02 : f32
    %34 = vector.broadcast %cst_31 : f32 to vector<2x1xf32>
    %35 = arith.divf %33, %34 : vector<2x1xf32>
    %36 = arith.mulf %31, %31 : vector<2x464xf32>
    %cst_32 = arith.constant dense<0.000000e+00> : vector<2xf32>
    %37 = vector.multi_reduction <add>, %36, %cst_32 [1] : vector<2x464xf32> to vector<2xf32>
    %38 = vector.shape_cast %37 : vector<2xf32> to vector<2x1xf32>
    %cst_33 = arith.constant 4.640000e+02 : f32
    %39 = vector.broadcast %cst_33 : f32 to vector<2x1xf32>
    %40 = arith.divf %38, %39 : vector<2x1xf32>
    %41 = arith.mulf %35, %35 : vector<2x1xf32>
    %42 = arith.subf %40, %41 : vector<2x1xf32>
    %43 = vector.broadcast %35 : vector<2x1xf32> to vector<2x464xf32>
    %44 = arith.subf %31, %43 : vector<2x464xf32>
    %cst_34 = arith.constant 9.99999974E-6 : f32
    %45 = vector.broadcast %cst_34 : f32 to vector<2x1xf32>
    %46 = arith.addf %42, %45 : vector<2x1xf32>
    %47 = math.rsqrt %46 : vector<2x1xf32>
    %48 = vector.broadcast %47 : vector<2x1xf32> to vector<2x464xf32>
    %49 = arith.mulf %44, %48 : vector<2x464xf32>
    %c0_35 = arith.constant 0 : index
    %c0_36 = arith.constant 0 : index
    %50 = vector.load %arg13[%c0_35, %c0_36] : memref<1x464xf32, #tpu.memory_space<vmem>>, vector<1x464xf32>
    %51 = vector.broadcast %50 : vector<1x464xf32> to vector<2x464xf32>
    %52 = arith.mulf %49, %51 : vector<2x464xf32>
    %c0_37 = arith.constant 0 : index
    %c0_38 = arith.constant 0 : index
    %53 = vector.load %arg14[%c0_37, %c0_38] : memref<1x464xf32, #tpu.memory_space<vmem>>, vector<1x464xf32>
    %54 = vector.broadcast %53 : vector<1x464xf32> to vector<2x464xf32>
    %55 = arith.addf %52, %54 : vector<2x464xf32>
    %cst_39 = arith.constant 0.000000e+00 : f32
    %56 = vector.broadcast %cst_39 : f32 to vector<2x464xf32>
    %57 = arith.maximumf %55, %56 : vector<2x464xf32>
    %c0_40 = arith.constant 0 : index
    %c0_41 = arith.constant 0 : index
    %58 = vector.load %arg15[%c0_40, %c0_41] : memref<464x1600xbf16, #tpu.memory_space<vmem>>, vector<464x1600xbf16>
    %59 = arith.extf %58 : vector<464x1600xbf16> to vector<464x1600xf32>
    %cst_42 = arith.constant dense<0.000000e+00> : vector<2x1600xf32>
    %60 = tpu.matmul %57, %59, %cst_42 {dimension_numbers = #tpu.dot_dimension_numbers<[1], [0], [0], [1], [0, 0, 1, 1], [], []>} : vector<2x464xf32>, vector<464x1600xf32>, vector<2x1600xf32> -> vector<2x1600xf32>
    %c0_43 = arith.constant 0 : index
    %c0_44 = arith.constant 0 : index
    %61 = vector.load %arg16[%c0_43, %c0_44] : memref<1x1600xf32, #tpu.memory_space<vmem>>, vector<1x1600xf32>
    %62 = vector.broadcast %61 : vector<1x1600xf32> to vector<2x1600xf32>
    %63 = arith.addf %60, %62 : vector<2x1600xf32>
    %cst_45 = arith.constant dense<0.000000e+00> : vector<2xf32>
    %64 = vector.multi_reduction <add>, %63, %cst_45 [1] : vector<2x1600xf32> to vector<2xf32>
    %65 = vector.shape_cast %64 : vector<2xf32> to vector<2x1xf32>
    %cst_46 = arith.constant 1.600000e+03 : f32
    %66 = vector.broadcast %cst_46 : f32 to vector<2x1xf32>
    %67 = arith.divf %65, %66 : vector<2x1xf32>
    %68 = arith.mulf %63, %63 : vector<2x1600xf32>
    %cst_47 = arith.constant dense<0.000000e+00> : vector<2xf32>
    %69 = vector.multi_reduction <add>, %68, %cst_47 [1] : vector<2x1600xf32> to vector<2xf32>
    %70 = vector.shape_cast %69 : vector<2xf32> to vector<2x1xf32>
    %cst_48 = arith.constant 1.600000e+03 : f32
    %71 = vector.broadcast %cst_48 : f32 to vector<2x1xf32>
    %72 = arith.divf %70, %71 : vector<2x1xf32>
    %73 = arith.mulf %67, %67 : vector<2x1xf32>
    %74 = arith.subf %72, %73 : vector<2x1xf32>
    %75 = vector.broadcast %67 : vector<2x1xf32> to vector<2x1600xf32>
    %76 = arith.subf %63, %75 : vector<2x1600xf32>
    %cst_49 = arith.constant 9.99999974E-6 : f32
    %77 = vector.broadcast %cst_49 : f32 to vector<2x1xf32>
    %78 = arith.addf %74, %77 : vector<2x1xf32>
    %79 = math.rsqrt %78 : vector<2x1xf32>
    %80 = vector.broadcast %79 : vector<2x1xf32> to vector<2x1600xf32>
    %81 = arith.mulf %76, %80 : vector<2x1600xf32>
    %c0_50 = arith.constant 0 : index
    %c0_51 = arith.constant 0 : index
    %82 = vector.load %arg17[%c0_50, %c0_51] : memref<1x1600xf32, #tpu.memory_space<vmem>>, vector<1x1600xf32>
    %83 = vector.broadcast %82 : vector<1x1600xf32> to vector<2x1600xf32>
    %84 = arith.mulf %81, %83 : vector<2x1600xf32>
    %c0_52 = arith.constant 0 : index
    %c0_53 = arith.constant 0 : index
    %85 = vector.load %arg18[%c0_52, %c0_53] : memref<1x1600xf32, #tpu.memory_space<vmem>>, vector<1x1600xf32>
    %86 = vector.broadcast %85 : vector<1x1600xf32> to vector<2x1600xf32>
    %87 = arith.addf %84, %86 : vector<2x1600xf32>
    %cst_54 = arith.constant 0.000000e+00 : f32
    %88 = vector.broadcast %cst_54 : f32 to vector<2x1600xf32>
    %89 = arith.maximumf %87, %88 : vector<2x1600xf32>
    %c0_55 = arith.constant 0 : index
    %c0_56 = arith.constant 0 : index
    %90 = vector.load %arg19[%c0_55, %c0_56] : memref<1600x800xbf16, #tpu.memory_space<vmem>>, vector<1600x800xbf16>
    %91 = arith.extf %90 : vector<1600x800xbf16> to vector<1600x800xf32>
    %cst_57 = arith.constant dense<0.000000e+00> : vector<2x800xf32>
    %92 = tpu.matmul %89, %91, %cst_57 {dimension_numbers = #tpu.dot_dimension_numbers<[1], [0], [0], [1], [0, 0, 1, 1], [], []>} : vector<2x1600xf32>, vector<1600x800xf32>, vector<2x800xf32> -> vector<2x800xf32>
    %c0_58 = arith.constant 0 : index
    %c0_59 = arith.constant 0 : index
    %93 = vector.load %arg20[%c0_58, %c0_59] : memref<1x800xf32, #tpu.memory_space<vmem>>, vector<1x800xf32>
    %94 = vector.broadcast %93 : vector<1x800xf32> to vector<2x800xf32>
    %95 = arith.addf %92, %94 : vector<2x800xf32>
    %96 = math.tanh %95 : vector<2x800xf32>
    %c0_60 = arith.constant 0 : index
    %c0_61 = arith.constant 0 : index
    %97 = vector.load %arg21[%c0_60, %c0_61] : memref<2x800xf32, #tpu.memory_space<vmem>>, vector<2x800xf32>
    tpu.vector_store %arg21[%c0_60, %c0_61], %96 {strides = array<i32>} : memref<2x800xf32, #tpu.memory_space<vmem>>, vector<2x800xf32>,
    return
  }
}

</mosaic_0001>

<bundles_post_ra>
// kernel: decoder_forward.1
= control target key start
LH: loop header
LB: loop body
LE: loop exit
PB: predicated region body
PF: predicated region fallthrough
CT: control target
= control target key end

     0   :  { %vm152_vm0 = vcmask 1043456   ;;  %v8399_v3 = vmov 0.0   ;;  %vm148_vm1 = vcmask 490496   ;;  %vm307_vm2 = vcmask 326656   ;;  %s12563_s7 = inlined_call_operand.vmem [shape: bf16[60,464], index: 7, kind: input, shape index: {}]   ;;  %s12564_s6 = inlined_call_operand.vmem [shape: bf16[40,464], index: 6, kind: input, shape index: {}]   ;;  %s12565_s1 = inlined_call_operand.vmem [shape: f32[2,60], index: 1, kind: input, shape index: {}]   ;;  %s12566_s8 = inlined_call_operand.vmem [shape: bf16[16,464], index: 8, kind: input, shape index: {}]   ;;  %s12567_s9 = inlined_call_operand.vmem [shape: bf16[40,464], index: 9, kind: input, shape index: {}]   ;;  %s12568_s0 = inlined_call_operand.vmem [shape: f32[2,40], index: 0, kind: input, shape index: {}]   ;;  %s12569_s2 = inlined_call_operand.vmem [shape: f32[2,16], index: 2, kind: input, shape index: {}]   ;;  %s12570_s10 = inlined_call_operand.vmem [shape: bf16[60,464], index: 10, kind: input, shape index: {}]   ;;  %s12571_s3 = inlined_call_operand.vmem [shape: f32[2,40], index: 3, kind: input, shape index: {}]   ;;  %s12572_s11 = inlined_call_operand.vmem [shape: bf16[16,464], index: 11, kind: input, shape index: {}]   ;;  %s12573_s4 = inlined_call_operand.vmem [shape: f32[2,60], index: 4, kind: input, shape index: {}]   ;;  %s12574_s5 = inlined_call_operand.vmem [shape: f32[2,16], index: 5, kind: input, shape index: {}]   ;;  %s12575_s15 = inlined_call_operand.vmem [shape: bf16[464,1600], index: 15, kind: input, shape index: {}]   ;;  %s12576_s12 = inlined_call_operand.vmem [shape: f32[1,464], index: 12, kind: input, shape index: {}]   ;;  %s12577_s13 = inlined_call_operand.vmem [shape: f32[1,464], index: 13, kind: input, shape index: {}]   ;;  %s12578_s14 = inlined_call_operand.vmem [shape: f32[1,464], index: 14, kind: input, shape index: {}]   ;;  %s12579_s19 = inlined_call_operand.vmem [shape: bf16[1600,800], index: 19, kind: input, shape index: {}]   ;;  %s12580_s16 = inlined_call_operand.vmem [shape: f32[1,1600], index: 16, kind: input, shape index: {}]   ;;  %s12581_s17 = inlined_call_operand.vmem [shape: f32[1,1600], index: 17, kind: input, shape index: {}]   ;;  %s12582_s18 = inlined_call_operand.vmem [shape: f32[1,1600], index: 18, kind: input, shape index: {}]   ;;  %s12583_s20 = inlined_call_operand.vmem [shape: f32[1,800], index: 20, kind: input, shape index: {}]   ;;  %s12584_s21 = inlined_call_operand.vmem [shape: f32[2,800], index: 21, kind: output, shape index: {}]  }
   0x1   :  { %12589 = sst [smem:[#allocation2_spill]] %s12563_s7  ;;  %300 = vmatprep.mubr.f32.mxu1 %v8399_v3  ;;  %229 = vmatprep.mubr.f32.mxu0 %v8399_v3  ;;  %vm466_vm3 = vcmask 130048   ;;  %vm1194_vm4 = vcmask 1041408   ;;  %vm1200_vm5 = vcmask 648192   ;;  %vm2518_vm6 = vcmask 654336  }
   0x2   :  { %12590 = sst [smem:[#allocation3_spill]] %s12564_s6  ;;  %vm3537_vm7 = vcmask 517120   ;;  %vm6029_vm8 = vcmask 523264   ;;  %vm8401_vm9 = vmmov 0   ;;  %vm8064_vm10 = vcmask 1043458  }
   0x3   :  { %12591 = sst [smem:[#allocation4_spill]] %s12565_s1  ;;  %vm8065_vm11 = vmor %vm8064_vm10, %vm1194_vm4  ;;  %vm8066_vm12 = vcmask 259076  }
   0x4   :  { %12592 = sst [smem:[#allocation5_spill]] %s12566_s8  ;;  %vm8067_vm13 = vmor %vm8066_vm12, %vm8065_vm11 }
   0x5   :  { %12593 = sst [smem:[#allocation6_spill]] %s12567_s9 }
   0x6   :  { %12594 = sst [smem:[#allocation7_spill]] %s12568_s0 }
   0x7   :  { %s12595_s26 = sld [smem:[#allocation2_spill]] }
   0x8   :  { %s12596_s7 = sld [smem:[#allocation3_spill]] }
   0x9   :  { %s12597_s1 = sld [smem:[#allocation4_spill]] }
   0xa   :  { %s12598_s25 = sld [smem:[#allocation5_spill]] }
   0xb   :  { %s12599_s8 = sld [smem:[#allocation6_spill]] }
   0xc   :  { %s12600_s22 = sld [smem:[#allocation7_spill]] }
   0xd   :  { %v114_v0 = vld [vmem:[%s12595_s26 + $0x70] sm:$0x33]  ;;  %v115_v1 = vld [vmem:[%s12595_s26 + $0x78] sm:$0x33]  ;;  %v112_v2 = vld [vmem:[%s12595_s26 + $0x60] sm:$0xff] }
   0xe   :  { %v144_v4 = vunpack.c.l.bf16 %v114_v0  ;;  %v145_v5 = vunpack.c.h.bf16 %v114_v0  ;;  %v146_v6 = vunpack.c.l.bf16 %v115_v1  ;;  %v147_v7 = vunpack.c.h.bf16 %v115_v1  ;;  %v113_v8 = vld [vmem:[%s12595_s26 + $0x68] sm:$0xff]  ;;  %v110_v9 = vld [vmem:[%s12595_s26 + $0x50] sm:$0xff]  ;;  %v111_v10 = vld [vmem:[%s12595_s26 + $0x58] sm:$0xff] }
   0xf   :  { %v141_v11 = vunpack.c.h.bf16 %v112_v2  ;;  %v143_v12 = vunpack.c.h.bf16 %v113_v8  ;;  %v140_v13 = vunpack.c.l.bf16 %v112_v2  ;;  %v142_v14 = vunpack.c.l.bf16 %v113_v8  ;;  %v108_v15 = vld [vmem:[%s12595_s26 + $0x40] sm:$0xff]  ;;  %v109_v16 = vld [vmem:[%s12595_s26 + $0x48] sm:$0xff]  ;;  %v106_v21 = vld [vmem:[%s12595_s26 + $0x30] sm:$0xff] }
  0x10   :  { %8073 = vmatprep.subr.msk.mxu0 %vm152_vm0, %v145_v5  ;;  %8076 = vmatprep.subr.msk.mxu1 %vm152_vm0, %v147_v7  ;;  %v137_v17 = vunpack.c.h.bf16 %v110_v9  ;;  %v139_v18 = vunpack.c.h.bf16 %v111_v10  ;;  %v136_v19 = vunpack.c.l.bf16 %v110_v9  ;;  %v138_v20 = vunpack.c.l.bf16 %v111_v10  ;;  %v107_v22 = vld [vmem:[%s12595_s26 + $0x38] sm:$0xff]  ;;  %v104_v27 = vld [vmem:[%s12595_s26 + $0x20] sm:$0xff]  ;;  %v105_v28 = vld [vmem:[%s12595_s26 + $0x28] sm:$0xff] }
  0x11   :  { %8074 = vmatpush1.msk.msra.mxu0 %vm152_vm0, %v144_v4  ;;  %8077 = vmatpush1.msk.msra.mxu1 %vm152_vm0, %v146_v6  ;;  %v133_v23 = vunpack.c.h.bf16 %v108_v15  ;;  %v135_v24 = vunpack.c.h.bf16 %v109_v16  ;;  %v132_v25 = vunpack.c.l.bf16 %v108_v15  ;;  %v134_v26 = vunpack.c.l.bf16 %v109_v16  ;;  %v102_v33 = vld [vmem:[%s12595_s26 + $0x10] sm:$0xff]  ;;  %v103_v34 = vld [vmem:[%s12595_s26 + $0x18] sm:$0xff]  ;;  %v100_v39 = vld [vmem:[%s12595_s26] sm:$0xff] }
  0x12   :  { %183 = vmatprep.subr.mxu0 %v141_v11  ;;  %254 = vmatprep.subr.mxu1 %v143_v12  ;;  %v129_v29 = vunpack.c.h.bf16 %v106_v21  ;;  %v131_v30 = vunpack.c.h.bf16 %v107_v22  ;;  %v128_v31 = vunpack.c.l.bf16 %v106_v21  ;;  %v130_v32 = vunpack.c.l.bf16 %v107_v22  ;;  %v101_v40 = vld [vmem:[%s12595_s26 + $0x8] sm:$0xff]  ;;  %v77_v45 = vld [vmem:[%s12596_s7 + $0x40] sm:$0xff]  ;;  %v75_v52 = vld [vmem:[%s12596_s7 + $0x30] sm:$0xff] }
  0x13   :  { %184 = vmatpush1.msra.mxu0 %v140_v13  ;;  %255 = vmatpush1.msra.mxu1 %v142_v14  ;;  %v125_v35 = vunpack.c.h.bf16 %v104_v27  ;;  %v127_v36 = vunpack.c.h.bf16 %v105_v28  ;;  %v124_v37 = vunpack.c.l.bf16 %v104_v27  ;;  %v126_v38 = vunpack.c.l.bf16 %v105_v28  ;;  %v78_v48 = vld [vmem:[%s12596_s7 + $0x48] sm:$0xff]  ;;  %v76_v53 = vld [vmem:[%s12596_s7 + $0x38] sm:$0xff]  ;;  %v99_v54 = vld [vmem:[%s12597_s1] sm:$0x3] }
  0x14   :  { %185 = vmatprep.subr.mxu0 %v137_v17  ;;  %256 = vmatprep.subr.mxu1 %v139_v18  ;;  %v121_v41 = vunpack.c.h.bf16 %v102_v33  ;;  %v123_v42 = vunpack.c.h.bf16 %v103_v34  ;;  %v120_v43 = vunpack.c.l.bf16 %v102_v33  ;;  %v122_v44 = vunpack.c.l.bf16 %v103_v34  ;;  %v73_v58 = vld [vmem:[%s12596_s7 + $0x20] sm:$0xff]  ;;  %v74_v59 = vld [vmem:[%s12596_s7 + $0x28] sm:$0xff]  ;;  %v71_v0 = vld [vmem:[%s12596_s7 + $0x10] sm:$0xff] }
  0x15   :  { %186 = vmatpush1.msra.mxu0 %v136_v19  ;;  %257 = vmatpush1.msra.mxu1 %v138_v20  ;;  %v117_v46 = vunpack.c.h.bf16 %v100_v39  ;;  %v119_v47 = vunpack.c.h.bf16 %v101_v40  ;;  %v116_v49 = vunpack.c.l.bf16 %v100_v39  ;;  %v118_v50 = vunpack.c.l.bf16 %v101_v40  ;;  %v72_v1 = vld [vmem:[%s12596_s7 + $0x18] sm:$0xff]  ;;  %v69_v7 = vld [vmem:[%s12596_s7] sm:$0xff]  ;;  %v70_v8 = vld [vmem:[%s12596_s7 + $0x8] sm:$0xff] }
  0x16   :  { %187 = vmatprep.subr.mxu0 %v133_v23  ;;  %258 = vmatprep.subr.mxu1 %v135_v24  ;;  %v96_v51 = vunpack.c.h.bf16 %v77_v45  ;;  %v98_v55 = vunpack.c.h.bf16 %v78_v48  ;;  %v95_v56 = vunpack.c.l.bf16 %v77_v45  ;;  %v97_v57 = vunpack.c.l.bf16 %v78_v48  ;;  %v456_v16 = vld [vmem:[%s12598_s25 + $0x10] sm:$0xff]  ;;  %v625_v17 = vld [vmem:[%s12599_s8 + $0x40] sm:$0xff]  ;;  %v457_v28 = vld [vmem:[%s12598_s25 + $0x18] sm:$0xff] }
  0x17   :  { %188 = vmatpush1.msra.mxu0 %v132_v25  ;;  %259 = vmatpush1.msra.mxu1 %v134_v26  ;;  %v92_v60 = vunpack.c.h.bf16 %v75_v52  ;;  %v94_v61 = vunpack.c.h.bf16 %v76_v53  ;;  %v91_v62 = vunpack.c.l.bf16 %v75_v52  ;;  %v93_v63 = vunpack.c.l.bf16 %v76_v53  ;;  %v454_v19 = vld [vmem:[%s12598_s25] sm:$0xff]  ;;  %v623_v20 = vld [vmem:[%s12599_s8 + $0x30] sm:$0xff] }
  0x18   :  { %189 = vmatprep.subr.mxu0 %v129_v29  ;;  %260 = vmatprep.subr.mxu1 %v131_v30  ;;  %v88_v2 = vunpack.c.h.bf16 %v73_v58  ;;  %v90_v4 = vunpack.c.h.bf16 %v74_v59  ;;  %v87_v5 = vunpack.c.l.bf16 %v73_v58  ;;  %v89_v6 = vunpack.c.l.bf16 %v74_v59  ;;  %v68_v21 = vld [vmem:[%s12600_s22] sm:$0x3]  ;;  %v619_v33 = vld [vmem:[%s12599_s8 + $0x10] sm:$0xff]  ;;  %v620_v58 = vld [vmem:[%s12599_s8 + $0x18] sm:$0xff] }
  0x19   :  { %190 = vmatpush1.msra.mxu0 %v128_v31  ;;  %261 = vmatpush1.msra.mxu1 %v130_v32  ;;  %v84_v9 = vunpack.c.h.bf16 %v71_v0  ;;  %v86_v10 = vunpack.c.h.bf16 %v72_v1  ;;  %v83_v11 = vunpack.c.l.bf16 %v71_v0  ;;  %v85_v12 = vunpack.c.l.bf16 %v72_v1  ;;  %v621_v29 = vld [vmem:[%s12599_s8 + $0x20] sm:$0xff]  ;;  %v455_v32 = vld [vmem:[%s12598_s25 + $0x8] sm:$0xff]  ;;  %v811_v48 = vld [vmem:[%s12570_s10 + $0x70] sm:$0x33] }
  0x1a   :  { %191 = vmatprep.subr.mxu0 %v125_v35  ;;  %262 = vmatprep.subr.mxu1 %v127_v36  ;;  %v80_v13 = vunpack.c.h.bf16 %v69_v7  ;;  %v82_v14 = vunpack.c.h.bf16 %v70_v8  ;;  %v79_v15 = vunpack.c.l.bf16 %v69_v7  ;;  %v81_v18 = vunpack.c.l.bf16 %v70_v8  ;;  %v453_v34 = vld [vmem:[%s12569_s2] sm:$0x3]  ;;  %v807_v59 = vld [vmem:[%s12570_s10 + $0x50] sm:$0xff]  ;;  %v618_v0 = vld [vmem:[%s12599_s8 + $0x8] sm:$0xff] }
  0x1b   :  { %192 = vmatpush1.msra.mxu0 %v124_v37  ;;  %263 = vmatpush1.msra.mxu1 %v126_v38  ;;  %v463_v22 = vunpack.c.h.bf16 %v456_v16  ;;  %v644_v23 = vunpack.c.h.bf16 %v625_v17  ;;  %v462_v24 = vunpack.c.l.bf16 %v456_v16  ;;  %v643_v25 = vunpack.c.l.bf16 %v625_v17  ;;  %v809_v52 = vld [vmem:[%s12570_s10 + $0x60] sm:$0xff] }
  0x1c   :  { %193 = vmatprep.subr.mxu0 %v121_v41  ;;  %264 = vmatprep.subr.mxu1 %v123_v42  ;;  %v459_v26 = vunpack.c.h.bf16 %v454_v19  ;;  %v640_v27 = vunpack.c.h.bf16 %v623_v20  ;;  %v458_v30 = vunpack.c.l.bf16 %v454_v19  ;;  %v639_v31 = vunpack.c.l.bf16 %v623_v20  ;;  %v617_v41 = vld [vmem:[%s12599_s8] sm:$0xff]  ;;  %v626_v42 = vld [vmem:[%s12599_s8 + $0x48] sm:$0xff]  ;;  %v799_v19 = vld [vmem:[%s12570_s10 + $0x10] sm:$0xff] }
  0x1d   :  { %194 = vmatpush1.msra.mxu0 %v120_v43  ;;  %265 = vmatpush1.msra.mxu1 %v122_v44  ;;  %v465_v35 = vunpack.c.h.bf16 %v457_v28  ;;  %v636_v36 = vunpack.c.h.bf16 %v621_v29  ;;  %v464_v37 = vunpack.c.l.bf16 %v457_v28  ;;  %v635_v38 = vunpack.c.l.bf16 %v621_v29  ;;  %v616_v53 = vld [vmem:[%s12571_s3] sm:$0x3]  ;;  %v808_v20 = vld [vmem:[%s12570_s10 + $0x58] sm:$0xff] }
  0x1e   :  { %195 = vmatprep.subr.mxu0 %v117_v46  ;;  %266 = vmatprep.subr.mxu1 %v119_v47  ;;  %v461_v39 = vunpack.c.h.bf16 %v455_v32  ;;  %v632_v40 = vunpack.c.h.bf16 %v619_v33  ;;  %v460_v43 = vunpack.c.l.bf16 %v455_v32  ;;  %v631_v44 = vunpack.c.l.bf16 %v619_v33  ;;  %v624_v47 = vld [vmem:[%s12599_s8 + $0x38] sm:$0xff]  ;;  %v805_v1 = vld [vmem:[%s12570_s10 + $0x40] sm:$0xff] }
  0x1f   :  { %196 = vmatpush1.msra.mxu0 %v116_v49  ;;  %267 = vmatpush1.msra.mxu1 %v118_v50  ;;  %v628_v45 = vunpack.c.h.bf16 %v617_v41  ;;  %v646_v46 = vunpack.c.h.bf16 %v626_v42  ;;  %v627_v49 = vunpack.c.l.bf16 %v617_v41  ;;  %v645_v50 = vunpack.c.l.bf16 %v626_v42  ;;  %v804_v33 = vld [vmem:[%s12570_s10 + $0x38] sm:$0xff] }
  0x20   :  { %8078 = vmatmul.mubr.msk.f32.vlgmr.msra.gmra.mxu1 %vm148_vm1, %v99_v54  ;;  %333 = vmatprep.subr.mxu0 %v96_v51  ;;  %v622_v51 = vld [vmem:[%s12599_s8 + $0x28] sm:$0xff]  ;;  %v630_v7 = vunpack.c.h.bf16 %v618_v0  ;;  %v830_v8 = vunpack.c.h.bf16 %v805_v1  ;;  %v836_v28 = vunpack.c.h.bf16 %v808_v20  ;;  %v817_v29 = vunpack.c.l.bf16 %v799_v19 }
  0x21   :  { %404 = vmatprep.subr.mxu1 %v98_v55  ;;  %8075 = vmatmul.mubr.msk.f32.vlgmr.msra.gmra.mxu0 %vm148_vm1, %v99_v54  ;;  %v642_v54 = vunpack.c.h.bf16 %v624_v47  ;;  %v842_v55 = vunpack.c.h.bf16 %v811_v48  ;;  %v827_v42 = vunpack.c.l.bf16 %v804_v33 }
  0x22   :  { %334 = vmatpush1.msra.mxu0 %v95_v56  ;;  %405 = vmatpush1.msra.mxu1 %v97_v57  ;;  %v641_v56 = vunpack.c.l.bf16 %v624_v47  ;;  %v841_v57 = vunpack.c.l.bf16 %v811_v48 }
  0x23   :  { %335 = vmatprep.subr.mxu0 %v92_v60  ;;  %406 = vmatprep.subr.mxu1 %v94_v61  ;;  %v638_v60 = vunpack.c.h.bf16 %v622_v51  ;;  %v838_v61 = vunpack.c.h.bf16 %v809_v52 }
  0x24   :  { %336 = vmatpush1.msra.mxu0 %v91_v62  ;;  %407 = vmatpush1.msra.mxu1 %v93_v63  ;;  %v637_v62 = vunpack.c.l.bf16 %v622_v51  ;;  %v837_v63 = vunpack.c.l.bf16 %v809_v52  ;;  %v1010_v52 = vld [vmem:[%s12572_s11 + $0x18] sm:$0xff] }
  0x25   :  { %337 = vmatprep.subr.mxu0 %v88_v2  ;;  %408 = vmatprep.subr.mxu1 %v90_v4  ;;  %v634_v2 = vunpack.c.h.bf16 %v620_v58  ;;  %v834_v4 = vunpack.c.h.bf16 %v807_v59 }
  0x26   :  { %338 = vmatpush1.msra.mxu0 %v87_v5  ;;  %409 = vmatpush1.msra.mxu1 %v89_v6  ;;  %v633_v5 = vunpack.c.l.bf16 %v620_v58  ;;  %v833_v6 = vunpack.c.l.bf16 %v807_v59  ;;  %v1017_v58 = vunpack.c.l.bf16 %v1010_v52 }
  0x27   :  { %339 = vmatprep.subr.mxu0 %v84_v9  ;;  %410 = vmatprep.subr.mxu1 %v86_v10  ;;  %v803_v9 = vld [vmem:[%s12570_s10 + $0x30] sm:$0xff]  ;;  %v812_v10 = vld [vmem:[%s12570_s10 + $0x78] sm:$0x33] }
  0x28   :  { %340 = vmatpush1.msra.mxu0 %v83_v11  ;;  %411 = vmatpush1.msra.mxu1 %v85_v12  ;;  %v629_v11 = vunpack.c.l.bf16 %v618_v0  ;;  %v829_v12 = vunpack.c.l.bf16 %v805_v1  ;;  %v844_v16 = vunpack.c.h.bf16 %v812_v10  ;;  %v825_v17 = vunpack.c.l.bf16 %v803_v9 }
  0x29   :  { %341 = vmatprep.subr.mxu0 %v80_v13  ;;  %412 = vmatprep.subr.mxu1 %v82_v14  ;;  %v801_v13 = vld [vmem:[%s12570_s10 + $0x20] sm:$0xff]  ;;  %v810_v14 = vld [vmem:[%s12570_s10 + $0x68] sm:$0xff] }
  0x2a   :  { %342 = vmatpush1.msra.mxu0 %v79_v15  ;;  %375 = vmatprep.mubr.f32.mxu0 %v8399_v3  ;;  %v826_v15 = vunpack.c.h.bf16 %v803_v9  ;;  %v1604_v9 = vld [vmem:[%s12575_s15 + $0x924] sm:$0xff] }
  0x2b   :  { %413 = vmatpush1.msra.mxu1 %v81_v18  ;;  %446 = vmatprep.mubr.f32.mxu1 %v8399_v3  ;;  %v843_v18 = vunpack.c.l.bf16 %v812_v10 }
  0x2c   :  { %8079 = vmatmul.mubr.msk.f32.vlgmr.msra.gmra.mxu0 %vm307_vm2, %v68_v21  ;;  %8080 = vmatmul.mubr.msk.f32.vlgmr.msra.gmra.mxu1 %vm307_vm2, %v68_v21  ;;  %v822_v21 = vunpack.c.h.bf16 %v801_v13 }
  0x2d   :  { %498 = vmatprep.subr.mxu1 %v463_v22  ;;  %672 = vmatprep.subr.mxu0 %v644_v23  ;;  %v840_v22 = vunpack.c.h.bf16 %v810_v14  ;;  %v821_v23 = vunpack.c.l.bf16 %v801_v13 }
  0x2e   :  { %499 = vmatpush1.msra.mxu1 %v462_v24  ;;  %673 = vmatpush1.msra.mxu0 %v643_v25  ;;  %v839_v24 = vunpack.c.l.bf16 %v810_v14  ;;  %v797_v25 = vld [vmem:[%s12570_s10] sm:$0xff] }
  0x2f   :  { %500 = vmatprep.subr.mxu1 %v459_v26  ;;  %674 = vmatprep.subr.mxu0 %v640_v27  ;;  %v806_v26 = vld [vmem:[%s12570_s10 + $0x48] sm:$0xff]  ;;  %v818_v27 = vunpack.c.h.bf16 %v799_v19 }
  0x30   :  { %501 = vmatpush1.msra.mxu1 %v458_v30  ;;  %534 = vmatprep.mubr.f32.mxu1 %v8399_v3  ;;  %v835_v30 = vunpack.c.l.bf16 %v808_v20  ;;  %v832_v32 = vunpack.c.h.bf16 %v806_v26  ;;  %v1359_v19 = vld [vmem:[%s12575_s15 + $0x208] sm:$0xff]  ;;  %v2281_v20 = vunpack.c.h.bf16 %v1604_v9 }
  0x31   :  { %675 = vmatpush1.msra.mxu0 %v639_v31  ;;  %8081 = vmatmul.mubr.msk.f32.vlgmr.msra.gmra.mxu1 %vm466_vm3, %v453_v34  ;;  %v814_v31 = vunpack.c.h.bf16 %v797_v25 }
  0x32   :  { %569 = vmatprep.subr.mxu1 %v465_v35  ;;  %676 = vmatprep.subr.mxu0 %v636_v36  ;;  %v813_v35 = vunpack.c.l.bf16 %v797_v25  ;;  %v831_v36 = vunpack.c.l.bf16 %v806_v26  ;;  %v1352_v25 = vld [vmem:[%s12575_s15 + $0x1d4] sm:$0xff] }
  0x33   :  { %570 = vmatpush1.msra.mxu1 %v464_v37  ;;  %677 = vmatpush1.msra.mxu0 %v635_v38  ;;  %v802_v37 = vld [vmem:[%s12570_s10 + $0x28] sm:$0xff]  ;;  %v1007_v38 = vld [vmem:[%s12572_s11] sm:$0xff] }
  0x34   :  { %571 = vmatprep.subr.mxu1 %v461_v39  ;;  %678 = vmatprep.subr.mxu0 %v632_v40  ;;  %v796_v39 = vld [vmem:[%s12573_s4] sm:$0x3]  ;;  %v828_v40 = vunpack.c.h.bf16 %v804_v33  ;;  %v823_v47 = vunpack.c.l.bf16 %v802_v37  ;;  %v1011_v48 = vunpack.c.l.bf16 %v1007_v38  ;;  %v1813_v33 = vunpack.c.h.bf16 %v1352_v25 }
  0x35   :  { %572 = vmatpush1.msra.mxu1 %v460_v43  ;;  %605 = vmatprep.mubr.f32.mxu1 %v8399_v3 }
  0x36   :  { %679 = vmatpush1.msra.mxu0 %v631_v44  ;;  %8082 = vmatmul.mubr.msk.f32.vlgmr.msra.gmra.mxu1 %vm466_vm3, %v453_v34  ;;  %v1009_v34 = vld [vmem:[%s12572_s11 + $0x10] sm:$0xff]  ;;  %v800_v44 = vld [vmem:[%s12570_s10 + $0x18] sm:$0xff] }
  0x37   :  { %680 = vmatprep.subr.mxu0 %v628_v45  ;;  %743 = vmatprep.subr.mxu1 %v646_v46  ;;  %v1016_v41 = vunpack.c.h.bf16 %v1009_v34  ;;  %v1015_v43 = vunpack.c.l.bf16 %v1009_v34  ;;  %v824_v45 = vunpack.c.h.bf16 %v802_v37  ;;  %v1012_v46 = vunpack.c.h.bf16 %v1007_v38  ;;  %v1338_v37 = vld [vmem:[%s12575_s15 + $0x16c] sm:$0xff] }
  0x38   :  { %681 = vmatpush1.msra.mxu0 %v627_v49  ;;  %714 = vmatprep.mubr.f32.mxu0 %v8399_v3  ;;  %v798_v49 = vld [vmem:[%s12570_s10 + $0x8] sm:$0xff]  ;;  %v819_v51 = vunpack.c.l.bf16 %v800_v44 }
  0x39   :  { %744 = vmatpush1.msra.mxu1 %v645_v50  ;;  %8083 = vmatmul.mubr.msk.f32.vlgmr.msra.gmra.mxu0 %vm307_vm2, %v616_v53  ;;  %v820_v50 = vunpack.c.h.bf16 %v800_v44 }
  0x3a   :  { %745 = vmatprep.subr.mxu1 %v642_v54  ;;  %8085 = vmatprep.subr.msk.mxu0 %vm152_vm0, %v842_v55  ;;  %v816_v54 = vunpack.c.h.bf16 %v798_v49  ;;  %v815_v55 = vunpack.c.l.bf16 %v798_v49  ;;  %v1324_v49 = vld [vmem:[%s12575_s15 + $0x104] sm:$0xff] }
  0x3b   :  { %746 = vmatpush1.msra.mxu1 %v641_v56  ;;  %8086 = vmatpush1.msk.msra.mxu0 %vm152_vm0, %v841_v57  ;;  %v1008_v56 = vld [vmem:[%s12572_s11 + $0x8] sm:$0xff]  ;;  %v1018_v57 = vunpack.c.h.bf16 %v1010_v52 }
  0x3c   :  { %747 = vmatprep.subr.mxu1 %v638_v60  ;;  %878 = vmatprep.subr.mxu0 %v838_v61  ;;  %v1014_v59 = vunpack.c.h.bf16 %v1008_v56  ;;  %v1013_v60 = vunpack.c.l.bf16 %v1008_v56  ;;  %v1394_v61 = vld [vmem:[%s12575_s15 + $0x30c] sm:$0xff] }
  0x3d   :  { %748 = vmatpush1.msra.mxu1 %v637_v62  ;;  %879 = vmatpush1.msra.mxu0 %v837_v63  ;;  %v1387_v62 = vld [vmem:[%s12575_s15 + $0x2d8] sm:$0xff]  ;;  %v1380_v63 = vld [vmem:[%s12575_s15 + $0x2a4] sm:$0xff]  ;;  %v1890_v0 = vunpack.c.l.bf16 %v1394_v61  ;;  %v1891_v1 = vunpack.c.h.bf16 %v1394_v61 }
  0x3e   :  { %749 = vmatprep.subr.mxu1 %v634_v2  ;;  %880 = vmatprep.subr.mxu0 %v834_v4  ;;  %v1878_v2 = vunpack.c.h.bf16 %v1387_v62  ;;  %v1877_v4 = vunpack.c.l.bf16 %v1387_v62  ;;  %v1864_v10 = vunpack.c.l.bf16 %v1380_v63 }
  0x3f   :  { %750 = vmatpush1.msra.mxu1 %v633_v5  ;;  %881 = vmatpush1.msra.mxu0 %v833_v6  ;;  %v1373_v5 = vld [vmem:[%s12575_s15 + $0x270] sm:$0xff] }
  0x40   :  { %751 = vmatprep.subr.mxu1 %v630_v7  ;;  %882 = vmatprep.subr.mxu0 %v830_v8  ;;  %v1618_v6 = vld [vmem:[%s12575_s15 + $0x98c] sm:$0xff]  ;;  %v1865_v7 = vunpack.c.h.bf16 %v1380_v63  ;;  %v1611_v8 = vld [vmem:[%s12575_s15 + $0x958] sm:$0xff]  ;;  %v1852_v14 = vunpack.c.h.bf16 %v1373_v5 }
  0x41   :  { %752 = vmatpush1.msra.mxu1 %v629_v11  ;;  %785 = vmatprep.mubr.f32.mxu1 %v8399_v3  ;;  %v1366_v11 = vld [vmem:[%s12575_s15 + $0x23c] sm:$0xff]  ;;  %v2307_v13 = vunpack.c.h.bf16 %v1618_v6 }
  0x42   :  { %883 = vmatpush1.msra.mxu0 %v829_v12  ;;  %8084 = vmatmul.mubr.msk.f32.vlgmr.msra.gmra.mxu1 %vm307_vm2, %v616_v53  ;;  %v1006_v53 = vld [vmem:[%s12574_s5] sm:$0x3]  ;;  %v2306_v12 = vunpack.c.l.bf16 %v1618_v6 }
  0x43   :  { %884 = vmatprep.subr.mxu0 %v826_v15  ;;  %8088 = vmatprep.subr.msk.mxu1 %vm152_vm0, %v844_v16  ;;  %v2293_v15 = vunpack.c.l.bf16 %v1611_v8  ;;  %v2294_v16 = vunpack.c.h.bf16 %v1611_v8  ;;  %v1289_v8 = vld [vmem:[%s12575_s15] sm:$0xff] }
  0x44   :  { %885 = vmatpush1.msra.mxu0 %v825_v17  ;;  %8089 = vmatpush1.msk.msra.mxu1 %vm152_vm0, %v843_v18  ;;  %v1597_v17 = vld [vmem:[%s12575_s15 + $0x8f0] sm:$0xff]  ;;  %v1851_v18 = vunpack.c.l.bf16 %v1373_v5 }
  0x45   :  { %886 = vmatprep.subr.mxu0 %v822_v21  ;;  %949 = vmatprep.subr.mxu1 %v840_v22  ;;  %v1839_v21 = vunpack.c.h.bf16 %v1366_v11  ;;  %v2280_v22 = vunpack.c.l.bf16 %v1604_v9  ;;  %v2268_v26 = vunpack.c.h.bf16 %v1597_v17  ;;  %v1296_v5 = vld [vmem:[%s12575_s15 + $0x34] sm:$0xff] }
  0x46   :  { %887 = vmatpush1.msra.mxu0 %v821_v23  ;;  %950 = vmatpush1.msra.mxu1 %v839_v24  ;;  %v1590_v23 = vld [vmem:[%s12575_s15 + $0x8bc] sm:$0xff]  ;;  %v1838_v24 = vunpack.c.l.bf16 %v1366_v11  ;;  %v1709_v9 = vunpack.c.h.bf16 %v1296_v5  ;;  %v1696_v11 = vunpack.c.h.bf16 %v1289_v8 }
  0x47   :  { %888 = vmatprep.subr.mxu0 %v818_v27  ;;  %951 = vmatprep.subr.mxu1 %v836_v28  ;;  %v1826_v27 = vunpack.c.h.bf16 %v1359_v19  ;;  %v2267_v28 = vunpack.c.l.bf16 %v1597_v17  ;;  %v2254_v34 = vunpack.c.l.bf16 %v1590_v23 }
  0x48   :  { %889 = vmatpush1.msra.mxu0 %v817_v29  ;;  %952 = vmatpush1.msra.mxu1 %v835_v30  ;;  %v1583_v29 = vld [vmem:[%s12575_s15 + $0x888] sm:$0xff]  ;;  %v1825_v30 = vunpack.c.l.bf16 %v1359_v19 }
  0x49   :  { %890 = vmatprep.subr.mxu0 %v814_v31  ;;  %953 = vmatprep.subr.mxu1 %v832_v32  ;;  %v1345_v31 = vld [vmem:[%s12575_s15 + $0x1a0] sm:$0xff]  ;;  %v2255_v32 = vunpack.c.h.bf16 %v1590_v23  ;;  %v2242_v38 = vunpack.c.h.bf16 %v1583_v29 }
  0x4a   :  { %891 = vmatpush1.msra.mxu0 %v813_v35  ;;  %924 = vmatprep.mubr.f32.mxu0 %v8399_v3  ;;  %v1576_v35 = vld [vmem:[%s12575_s15 + $0x854] sm:$0xff] }
  0x4b   :  { %954 = vmatpush1.msra.mxu1 %v831_v36  ;;  %8087 = vmatmul.mubr.msk.f32.vlgmr.msra.gmra.mxu0 %vm148_vm1, %v796_v39  ;;  %v1812_v36 = vunpack.c.l.bf16 %v1352_v25  ;;  %v2229_v44 = vunpack.c.h.bf16 %v1576_v35 }
  0x4c   :  { %955 = vmatprep.subr.mxu1 %v828_v40  ;;  %1050 = vmatprep.subr.mxu0 %v1016_v41  ;;  %v2241_v40 = vunpack.c.l.bf16 %v1583_v29  ;;  %v1569_v41 = vld [vmem:[%s12575_s15 + $0x820] sm:$0xff] }
  0x4d   :  { %956 = vmatpush1.msra.mxu1 %v827_v42  ;;  %1051 = vmatpush1.msra.mxu0 %v1015_v43  ;;  %v1799_v42 = vunpack.c.l.bf16 %v1345_v31  ;;  %v1331_v43 = vld [vmem:[%s12575_s15 + $0x138] sm:$0xff]  ;;  %v2215_v52 = vunpack.c.l.bf16 %v1569_v41 }
  0x4e   :  { %957 = vmatprep.subr.mxu1 %v824_v45  ;;  %1052 = vmatprep.subr.mxu0 %v1012_v46  ;;  %v1787_v45 = vunpack.c.h.bf16 %v1338_v37  ;;  %v2228_v46 = vunpack.c.l.bf16 %v1576_v35 }
  0x4f   :  { %958 = vmatpush1.msra.mxu1 %v823_v47  ;;  %1053 = vmatpush1.msra.mxu0 %v1011_v48  ;;  %v1562_v47 = vld [vmem:[%s12575_s15 + $0x7ec] sm:$0xff]  ;;  %v1786_v48 = vunpack.c.l.bf16 %v1338_v37 }
  0x50   :  { %1086 = vmatprep.mubr.f32.mxu0 %v8399_v3  ;;  %959 = vmatprep.subr.mxu1 %v820_v50  ;;  %v2216_v50 = vunpack.c.h.bf16 %v1569_v41  ;;  %v2203_v56 = vunpack.c.h.bf16 %v1562_v47 }
  0x51   :  { %8091 = vmatmul.mubr.msk.f32.vlgmr.msra.gmra.mxu0 %vm466_vm3, %v1006_v53  ;;  %960 = vmatpush1.msra.mxu1 %v819_v51  ;;  %v1774_v51 = vunpack.c.h.bf16 %v1331_v43 }
  0x52   :  { %961 = vmatprep.subr.mxu1 %v816_v54  ;;  %995 = vmatprep.mubr.f32.mxu1 %v8399_v3  ;;  %v1773_v54 = vunpack.c.l.bf16 %v1331_v43 }
  0x53   :  { %962 = vmatpush1.msra.mxu1 %v815_v55  ;;  %2522 = vmatprep.subr.mxu0 %v1891_v1  ;;  %v1317_v55 = vld [vmem:[%s12575_s15 + $0xd0] sm:$0xff]  ;;  %v1303_v1 = vld [vmem:[%s12575_s15 + $0x68] sm:$0xff] }
  0x54   :  { %8090 = vmatmul.mubr.msk.f32.vlgmr.msra.gmra.mxu1 %vm148_vm1, %v796_v39  ;;  %1121 = vmatprep.subr.mxu1 %v1018_v57  ;;  %v1800_v39 = vunpack.c.h.bf16 %v1345_v31  ;;  %v1761_v57 = vunpack.c.h.bf16 %v1324_v49  ;;  %v1748_v62 = vunpack.c.h.bf16 %v1317_v55  ;;  %v1722_v6 = vunpack.c.h.bf16 %v1303_v1 }
  0x55   :  { %1122 = vmatpush1.msra.mxu1 %v1017_v58  ;;  %1157 = vmatprep.mubr.f32.mxu1 %v8399_v3  ;;  %v2202_v58 = vunpack.c.l.bf16 %v1562_v47 }
  0x56   :  { %1123 = vmatprep.subr.mxu1 %v1014_v59  ;;  %2523 = vmatpush1.msra.mxu0 %v1890_v0  ;;  %v1760_v59 = vunpack.c.l.bf16 %v1324_v49  ;;  %v1747_v0 = vunpack.c.l.bf16 %v1317_v55 }
  0x57   :  { %1124 = vmatpush1.msra.mxu1 %v1013_v60  ;;  %2524 = vmatprep.subr.mxu0 %v1878_v2  ;;  %v1310_v60 = vld [vmem:[%s12575_s15 + $0x9c] sm:$0xff] }
  0x58   :  { %8092 = vmatmul.mubr.msk.f32.vlgmr.msra.gmra.mxu1 %vm466_vm3, %v1006_v53  ;;  %2525 = vmatpush1.msra.mxu0 %v1877_v4  ;;  %v1555_v53 = vld [vmem:[%s12575_s15 + $0x7b8] sm:$0xff]  ;;  %v1735_v2 = vunpack.c.h.bf16 %v1310_v60  ;;  %v1734_v4 = vunpack.c.l.bf16 %v1310_v60 }
  0x59   :  { %2593 = vmatprep.subr.mxu1 %v2307_v13  ;;  %2526 = vmatprep.subr.mxu0 %v1865_v7  ;;  %v2190_v61 = vunpack.c.h.bf16 %v1555_v53  ;;  %v2189_v63 = vunpack.c.l.bf16 %v1555_v53  ;;  %v1721_v7 = vunpack.c.l.bf16 %v1303_v1 }
  0x5a   :  { %2594 = vmatpush1.msra.mxu1 %v2306_v12  ;;  %2527 = vmatpush1.msra.mxu0 %v1864_v10  ;;  %v1708_v10 = vunpack.c.l.bf16 %v1296_v5  ;;  %v1695_v12 = vunpack.c.l.bf16 %v1289_v8 }
  0x5b   :  { %2595 = vmatprep.subr.mxu1 %v2294_v16  ;;  %2528 = vmatprep.subr.mxu0 %v1852_v14 }
  0x5c   :  { %2596 = vmatpush1.msra.mxu1 %v2293_v15  ;;  %2529 = vmatpush1.msra.mxu0 %v1851_v18 }
  0x5d   :  { %2597 = vmatprep.subr.mxu1 %v2281_v20  ;;  %2530 = vmatprep.subr.mxu0 %v1839_v21 }
  0x5e   :  { %2598 = vmatpush1.msra.mxu1 %v2280_v22  ;;  %2531 = vmatpush1.msra.mxu0 %v1838_v24  ;;  %v1170_v24 = vlaneseq }
  0x5f   :  { %2599 = vmatprep.subr.mxu1 %v2268_v26  ;;  %2532 = vmatprep.subr.mxu0 %v1826_v27 }
  0x60   :  { %2600 = vmatpush1.msra.mxu1 %v2267_v28  ;;  %2533 = vmatpush1.msra.mxu0 %v1825_v30  ;;  %v8820_v27 = vshrl.u32 %v1170_v24, 7 }
  0x61   :  { %2601 = vmatprep.subr.mxu1 %v2255_v32  ;;  %2534 = vmatprep.subr.mxu0 %v1813_v33 }
  0x62   :  { %2602 = vmatpush1.msra.mxu1 %v2254_v34  ;;  %2535 = vmatpush1.msra.mxu0 %v1812_v36  ;;  %v8823_v34 = vsub.s32 0, %v8820_v27  ;;  %v8837_v55 = vsub.s32 3, %v8820_v27 }
  0x63   :  { %2603 = vmatprep.subr.mxu1 %v2242_v38  ;;  %2536 = vmatprep.subr.mxu0 %v1800_v39  ;;  %v1168_v38 = vld [vmem:[%s12576_s12] sm:$0xf]  ;;  %v8829_v39 = vsub.s32 1, %v8820_v27 }
  0x64   :  { %2604 = vmatpush1.msra.mxu1 %v2241_v40  ;;  %2537 = vmatpush1.msra.mxu0 %v1799_v42 }
  0x65   :  { %2605 = vmatprep.subr.mxu1 %v2229_v44  ;;  %2538 = vmatprep.subr.mxu0 %v1787_v45  ;;  %v1173_v44 = vrot.slane %v1168_v38, %v8823_v34 }
  0x66   :  { %2606 = vmatpush1.msra.mxu1 %v2228_v46  ;;  %2539 = vmatpush1.msra.mxu0 %v1786_v48  ;;  %v1177_v48 = vrot.slane %v1168_v38, %v8829_v39 }
  0x67   :  { %2607 = vmatprep.subr.mxu1 %v2216_v50  ;;  %2540 = vmatprep.subr.mxu0 %v1774_v51 }
  0x68   :  { %2608 = vmatpush1.msra.mxu1 %v2215_v52  ;;  %2541 = vmatpush1.msra.mxu0 %v1773_v54  ;;  %v8834_v52 = vsub.s32 2, %v8820_v27 }
  0x69   :  { %2609 = vmatprep.subr.mxu1 %v2203_v56  ;;  %2542 = vmatprep.subr.mxu0 %v1761_v57 }
  0x6a   :  { %2610 = vmatpush1.msra.mxu1 %v2202_v58  ;;  %2543 = vmatpush1.msra.mxu0 %v1760_v59 }
  0x6b   :  { %2611 = vmatprep.subr.mxu1 %v2190_v61  ;;  %2544 = vmatprep.subr.mxu0 %v1748_v62 }
  0x6c   :  { %2612 = vmatpush1.msra.mxu1 %v2189_v63  ;;  %2545 = vmatpush1.msra.mxu0 %v1747_v0  ;;  %v1181_v63 = vrot.slane %v1168_v38, %v8834_v52 }
  0x6d   :  { %2546 = vmatprep.subr.mxu0 %v1735_v2  ;;  %v1185_v2 = vrot.slane %v1168_v38, %v8837_v55 }
  0x6e   :  { %2547 = vmatpush1.msra.mxu0 %v1734_v4 }
  0x6f   :  { %2548 = vmatprep.subr.mxu0 %v1722_v6 }
  0x70   :  { %2549 = vmatpush1.msra.mxu0 %v1721_v7 }
  0x71   :  { %2550 = vmatprep.subr.mxu0 %v1709_v9 }
  0x72   :  { %2551 = vmatpush1.msra.mxu0 %v1708_v10 }
  0x73   :  { %2552 = vmatprep.subr.mxu0 %v1696_v11 }
  0x74   :  { %2553 = vmatpush1.msra.mxu0 %v1695_v12 }
  0xe0   :  { %v302_v13 = vpop.f32.mrf.mxu1 }
  0xe1   :  { %v231_v16 = vpop.f32.mrf.mxu0 }
  0xe2   :  { %v304_v14 = vpop.f32.mrf.mxu1 }
  0xe3   :  { %v233_v18 = vpop.f32.mrf.mxu0 }
  0xec   :  { %v448_v15 = vpop.f32.mrf.mxu1  ;;  %v377_v19 = vpop.f32.mrf.mxu0 }
  0xed   :  { %v378_v28 = vadd.f32 %v377_v19, %v231_v16  ;;  %v449_v42 = vadd.f32 %v448_v15, %v302_v13 }
  0xee   :  { %v450_v17 = vpop.f32.mrf.mxu1  ;;  %v379_v21 = vpop.f32.mrf.mxu0 }
  0xef   :  { %v380_v30 = vadd.f32 %v379_v21, %v233_v18  ;;  %v451_v49 = vadd.f32 %v450_v17, %v304_v14 }
  0xf1   :  { %v536_v20 = vpop.f32.mrf.mxu1 }
  0xf2   :  { %v612_v31 = vadd.f32 %v536_v20, %v378_v28  ;;  %v1506_v28 = vld [vmem:[%s12575_s15 + $0x64c] sm:$0xff] }
  0xf3   :  { %v538_v22 = vpop.f32.mrf.mxu1 }
  0xf4   :  { %v613_v35 = vadd.f32 %v538_v22, %v380_v30  ;;  %v2099_v30 = vunpack.c.h.bf16 %v1506_v28 }
  0xf6   :  { %v607_v25 = vpop.f32.mrf.mxu1  ;;  %2554 = vmatprep.subr.mxu0 %v2099_v30  ;;  %v1436_v30 = vld [vmem:[%s12575_s15 + $0x444] sm:$0xff] }
  0xf7   :  { %v614_v50 = vadd.f32 %v607_v25, %v449_v42  ;;  %v1492_v42 = vld [vmem:[%s12575_s15 + $0x5e4] sm:$0xff] }
  0xf8   :  { %v609_v32 = vpop.f32.mrf.mxu1 }
  0xf9   :  { %v716_v23 = vpop.f32.mrf.mxu0  ;;  %v615_v56 = vadd.f32 %v609_v32, %v451_v49  ;;  %v2098_v32 = vunpack.c.l.bf16 %v1506_v28  ;;  %v1527_v49 = vld [vmem:[%s12575_s15 + $0x6e8] sm:$0xff] }
  0xfa   :  { %v792_v36 = vadd.f32 %v716_v23, %v612_v31 }
  0xfb   :  { %v718_v26 = vpop.f32.mrf.mxu0  ;;  %2555 = vmatpush2.msra.mxu0 %v2098_v32 }
  0xfc   :  { %v793_v40 = vadd.f32 %v718_v26, %v613_v35  ;;  %v1499_v35 = vld [vmem:[%s12575_s15 + $0x618] sm:$0xff] }
 0x102   :  { %v787_v37 = vpop.f32.mrf.mxu1 }
 0x103   :  { %v794_v57 = vadd.f32 %v787_v37, %v614_v50  ;;  %v2086_v37 = vunpack.c.h.bf16 %v1499_v35 }
 0x104   :  { %v789_v45 = vpop.f32.mrf.mxu1 }
 0x105   :  { %v795_v61 = vadd.f32 %v789_v45, %v615_v56  ;;  %2556 = vmatprep.subr.mxu0 %v2086_v37  ;;  %v1478_v56 = vld [vmem:[%s12575_s15 + $0x57c] sm:$0xff]  ;;  %v1429_v37 = vld [vmem:[%s12575_s15 + $0x410] sm:$0xff] }
 0x10b   :  { %v926_v29 = vpop.f32.mrf.mxu0 }
 0x10c   :  { %v1002_v41 = vadd.f32 %v926_v29, %v792_v36  ;;  %v1548_v29 = vld [vmem:[%s12575_s15 + $0x784] sm:$0xff]  ;;  %v1541_v36 = vld [vmem:[%s12575_s15 + $0x750] sm:$0xff] }
 0x10d   :  { %v928_v33 = vpop.f32.mrf.mxu0  ;;  %v2177_v31 = vunpack.c.h.bf16 %v1548_v29  ;;  %v2164_v38 = vunpack.c.h.bf16 %v1541_v36 }
 0x10e   :  { %v1003_v46 = vadd.f32 %v928_v33, %v793_v40  ;;  %v2176_v33 = vunpack.c.l.bf16 %v1548_v29  ;;  %v2085_v40 = vunpack.c.l.bf16 %v1499_v35 }
 0x10f   :  { %2613 = vmatprep.subr.mxu1 %v2177_v31  ;;  %v1660_v31 = vld [vmem:[%s12575_s15 + $0xac4] sm:$0xff] }
 0x110   :  { %2614 = vmatpush1.msra.mxu1 %v2176_v33  ;;  %2557 = vmatpush2.msra.mxu0 %v2085_v40  ;;  %v1969_v40 = vunpack.c.h.bf16 %v1436_v30 }
 0x111   :  { %v1088_v43 = vpop.f32.mrf.mxu0  ;;  %2615 = vmatprep.subr.mxu1 %v2164_v38  ;;  %v1653_v38 = vld [vmem:[%s12575_s15 + $0xa90] sm:$0xff] }
 0x112   :  { %v1164_v47 = vadd.f32 %v1088_v43, %v1002_v41  ;;  %v2163_v41 = vunpack.c.l.bf16 %v1541_v36  ;;  %v1534_v43 = vld [vmem:[%s12575_s15 + $0x71c] sm:$0xff] }
 0x113   :  { %v1090_v51 = vpop.f32.mrf.mxu0  ;;  %v2151_v45 = vunpack.c.h.bf16 %v1534_v43 }
 0x114   :  { %v1165_v53 = vadd.f32 %v1090_v51, %v1003_v46  ;;  %v997_v54 = vpop.f32.mrf.mxu1  ;;  %v8839_v58 = vadd.f32 %v1173_v44, %v1164_v47  ;;  %v2073_v44 = vunpack.c.h.bf16 %v1492_v42  ;;  %2616 = vmatpush1.msra.mxu1 %v2163_v41  ;;  %v2072_v46 = vunpack.c.l.bf16 %v1492_v42 }
 0x115   :  { %v1004_v62 = vadd.f32 %v997_v54, %v794_v57  ;;  %v2150_v47 = vunpack.c.l.bf16 %v1534_v43  ;;  %2617 = vmatprep.subr.mxu1 %v2151_v45  ;;  %v2138_v51 = vunpack.c.h.bf16 %v1527_v49  ;;  %v2137_v54 = vunpack.c.l.bf16 %v1527_v49  ;;  %v1520_v57 = vld [vmem:[%s12575_s15 + $0x6b4] sm:$0xff]  ;;  %v1646_v45 = vld [vmem:[%s12575_s15 + $0xa5c] sm:$0xff] }
 0x116   :  { %v8841_v59 = vadd.f32 %v1177_v48, %v1165_v53  ;;  %v999_v60 = vpop.f32.mrf.mxu1  ;;  %v1207_v4 = vmul.f32 %v8839_v58, %v8839_v58  ;;  %v1195_v11 = vsel %vm1194_vm4, %v8839_v58, 0.0  ;;  %v1485_v48 = vld [vmem:[%s12575_s15 + $0x5b0] sm:$0xff]  ;;  %2558 = vmatprep.subr.mxu0 %v2073_v44  ;;  %v2385_v41 = vunpack.c.h.bf16 %v1660_v31  ;;  %v1422_v44 = vld [vmem:[%s12575_s15 + $0x3dc] sm:$0xff] }
 0x117   :  { %v1005_v5 = vadd.f32 %v999_v60, %v795_v61  ;;  %v2060_v50 = vunpack.c.h.bf16 %v1485_v48  ;;  %2559 = vmatpush2.msra.mxu0 %v2072_v46  ;;  %2618 = vmatpush1.msra.mxu1 %v2150_v47  ;;  %v2059_v53 = vunpack.c.l.bf16 %v1485_v48  ;;  %v2047_v60 = vunpack.c.h.bf16 %v1478_v56 }
 0x118   :  { %v1208_v0 = vmul.f32 %v8841_v59, %v8841_v59  ;;  %v1159_v1 = vpop.f32.mrf.mxu1  ;;  %v1196_v7 = vsel %vm1194_vm4, %v8841_v59, 0.0  ;;  %v1211_v17 = vsel %vm1194_vm4, %v1207_v4, 0.0  ;;  %2619 = vmatprep.subr.mxu1 %v2138_v51  ;;  %v2125_v61 = vunpack.c.h.bf16 %v1520_v57  ;;  %v1639_v51 = vld [vmem:[%s12575_s15 + $0xa28] sm:$0xff] }
 0x119   :  { %v1166_v6 = vadd.f32 %v1159_v1, %v1004_v62  ;;  %v1197_v13 = vadd.f32 %v1196_v7, %v1195_v11  ;;  %2560 = vmatprep.subr.mxu0 %v2060_v50  ;;  %2620 = vmatpush1.msra.mxu1 %v2137_v54  ;;  %v2046_v62 = vunpack.c.l.bf16 %v1478_v56  ;;  %v1513_v1 = vld [vmem:[%s12575_s15 + $0x680] sm:$0xff]  ;;  %v1464_v7 = vld [vmem:[%s12575_s15 + $0x514] sm:$0xff]  ;;  %v1968_v42 = vunpack.c.l.bf16 %v1436_v30  ;;  %v1415_v50 = vld [vmem:[%s12575_s15 + $0x3a8] sm:$0xff] }
 0x11a   :  { %v1161_v8 = vpop.f32.mrf.mxu1  ;;  %v1212_v12 = vsel %vm1194_vm4, %v1208_v0, 0.0  ;;  %2561 = vmatpush2.msra.mxu0 %v2059_v53  ;;  %v1471_v0 = vld [vmem:[%s12575_s15 + $0x548] sm:$0xff]  ;;  %2621 = vmatprep.subr.mxu1 %v2125_v61  ;;  %v2112_v4 = vunpack.c.h.bf16 %v1513_v1  ;;  %v2020_v11 = vunpack.c.l.bf16 %v1464_v7  ;;  %v2384_v43 = vunpack.c.l.bf16 %v1660_v31  ;;  %v1632_v61 = vld [vmem:[%s12575_s15 + $0x9f4] sm:$0xff] }
 0x11b   :  { %v8851_v9 = vadd.f32 %v1181_v63, %v1166_v6  ;;  %v1167_v10 = vadd.f32 %v1161_v8, %v1005_v5  ;;  %v1213_v19 = vadd.f32 %v1212_v12, %v1211_v17  ;;  %v2124_v63 = vunpack.c.l.bf16 %v1520_v57  ;;  %2562 = vmatprep.subr.mxu0 %v2047_v60  ;;  %v1688_v8 = vld [vmem:[%s12575_s15 + $0xb94] sm:$0xff]  ;;  %v1450_v17 = vld [vmem:[%s12575_s15 + $0x4ac] sm:$0xff] }
 0x11c   :  { %2563 = vmatpush2.msra.mxu0 %v2046_v62  ;;  %v2033_v5 = vunpack.c.l.bf16 %v1471_v0  ;;  %v2111_v6 = vunpack.c.l.bf16 %v1513_v1  ;;  %v2021_v12 = vunpack.c.h.bf16 %v1464_v7  ;;  %v1994_v28 = vunpack.c.l.bf16 %v1450_v17  ;;  %v1408_v60 = vld [vmem:[%s12575_s15 + $0x374] sm:$0xff] }
 0x11d   :  { %v8856_v14 = vadd.f32 %v1185_v2, %v1167_v10  ;;  %v1198_v15 = vsel %vm1194_vm4, %v8851_v9, 0.0  ;;  %v1209_v16 = vmul.f32 %v8851_v9, %v8851_v9  ;;  %v2034_v2 = vunpack.c.h.bf16 %v1471_v0  ;;  %2622 = vmatpush1.msra.mxu1 %v2124_v63  ;;  %v1457_v10 = vld [vmem:[%s12575_s15 + $0x4e0] sm:$0xff] }
 0x11e   :  { %v1199_v18 = vadd.f32 %v1198_v15, %v1197_v13  ;;  %2623 = vmatprep.subr.mxu1 %v2112_v4  ;;  %v2436_v13 = vunpack.c.l.bf16 %v1688_v8  ;;  %v2437_v15 = vunpack.c.h.bf16 %v1688_v8  ;;  %v1956_v46 = vunpack.c.h.bf16 %v1429_v37  ;;  %v1625_v4 = vld [vmem:[%s12575_s15 + $0x9c0] sm:$0xff] }
 0x11f   :  { %v1201_v20 = vsel %vm1200_vm5, %v8856_v14, 0.0  ;;  %v1210_v21 = vmul.f32 %v8856_v14, %v8856_v14  ;;  %v1214_v22 = vsel %vm1194_vm4, %v1209_v16, 0.0  ;;  %2564 = vmatprep.subr.mxu0 %v2034_v2  ;;  %v1681_v16 = vld [vmem:[%s12575_s15 + $0xb60] sm:$0xff]  ;;  %2624 = vmatpush1.msra.mxu1 %v2111_v6  ;;  %v2372_v47 = vunpack.c.h.bf16 %v1653_v38 }
 0x120   :  { %v1202_v23 = vadd.f32 %v1201_v20, %v1199_v18  ;;  %v1215_v24 = vadd.f32 %v1214_v22, %v1213_v19  ;;  %v1674_v18 = vld [vmem:[%s12575_s15 + $0xb2c] sm:$0xff]  ;;  %2565 = vmatpush2.msra.mxu0 %v2033_v5  ;;  %v2007_v19 = vunpack.c.l.bf16 %v1457_v10  ;;  %v2008_v20 = vunpack.c.h.bf16 %v1457_v10  ;;  %2637 = vmatprep.subr.mxu1 %v2437_v15  ;;  %v1401_v2 = vld [vmem:[%s12575_s15 + $0x340] sm:$0xff]  ;;  %v8966_v15 = vld [vmem:[%s12575_s15 + $0x314] sm:$0xff] }
 0x121   :  { %v1216_v25 = vsel %vm1200_vm5, %v1210_v21, 0.0  ;;  %v2423_v21 = vunpack.c.l.bf16 %v1681_v16  ;;  %v2424_v22 = vunpack.c.h.bf16 %v1681_v16  ;;  %2566 = vmatprep.subr.mxu0 %v2021_v12  ;;  %2638 = vmatpush2.msra.mxu1 %v2436_v13  ;;  %v2410_v29 = vunpack.c.l.bf16 %v1674_v18  ;;  %v8971_v16 = vld [vmem:[%s12575_s15 + $0x994] sm:$0xff] }
 0x122   :  { %1203 = vadd.xlane.f32.xlu0 %v1202_v23  ;;  %v1217_v26 = vadd.f32 %v1216_v25, %v1215_v24  ;;  %v1443_v23 = vld [vmem:[%s12575_s15 + $0x478] sm:$0xff]  ;;  %v1995_v25 = vunpack.c.h.bf16 %v1450_v17  ;;  %2567 = vmatpush2.msra.mxu0 %v2020_v11  ;;  %v1955_v48 = vunpack.c.l.bf16 %v1429_v37  ;;  %v2371_v49 = vunpack.c.l.bf16 %v1653_v38 }
 0x123   :  { %v1667_v24 = vld [vmem:[%s12575_s15 + $0xaf8] sm:$0xff]  ;;  %2568 = vmatprep.subr.mxu0 %v2008_v20  ;;  %2639 = vmatprep.subr.mxu1 %v2424_v22  ;;  %v1982_v32 = vunpack.c.h.bf16 %v1443_v23  ;;  %v1981_v35 = vunpack.c.l.bf16 %v1443_v23  ;;  %v1943_v53 = vunpack.c.h.bf16 %v1422_v44  ;;  %v2359_v54 = vunpack.c.h.bf16 %v1646_v45 }
 0x124   :  { %v2398_v33 = vunpack.c.h.bf16 %v1667_v24  ;;  %2569 = vmatpush2.msra.mxu0 %v2007_v19  ;;  %2640 = vmatpush2.msra.mxu1 %v2423_v21  ;;  %v2397_v36 = vunpack.c.l.bf16 %v1667_v24  ;;  %v1942_v56 = vunpack.c.l.bf16 %v1422_v44  ;;  %v2358_v57 = vunpack.c.l.bf16 %v1646_v45 }
 0x125   :  { %2570 = vmatprep.subr.mxu0 %v1995_v25  ;;  %v1930_v62 = vunpack.c.h.bf16 %v1415_v50  ;;  %v2346_v63 = vunpack.c.h.bf16 %v1639_v51  ;;  %v1929_v0 = vunpack.c.l.bf16 %v1415_v50  ;;  %v2345_v1 = vunpack.c.l.bf16 %v1639_v51 }
 0x126   :  { %1218 = vadd.xlane.f32.xlu0 %v1217_v26  ;;  %v2411_v26 = vunpack.c.h.bf16 %v1674_v18  ;;  %2571 = vmatpush2.msra.mxu0 %v1994_v28  ;;  %v1917_v5 = vunpack.c.h.bf16 %v1408_v60  ;;  %v2333_v6 = vunpack.c.h.bf16 %v1632_v61  ;;  %v1916_v7 = vunpack.c.l.bf16 %v1408_v60  ;;  %v1259_v28 = vld [vmem:[%s12578_s14] sm:$0xf] }
 0x127   :  { %2572 = vmatprep.subr.mxu0 %v1982_v32  ;;  %v2332_v8 = vunpack.c.l.bf16 %v1632_v61  ;;  %v1904_v10 = vunpack.c.h.bf16 %v1401_v2  ;;  %v2320_v11 = vunpack.c.h.bf16 %v1625_v4  ;;  %v1903_v12 = vunpack.c.l.bf16 %v1401_v2  ;;  %v1605_v2 = vld [vmem:[%s12575_s15 + $0x92c] sm:$0xff] }
 0x128   :  { %2641 = vmatprep.subr.mxu1 %v2411_v26  ;;  %2573 = vmatpush2.msra.mxu0 %v1981_v35  ;;  %v2319_v13 = vunpack.c.l.bf16 %v1625_v4  ;;  %v1893_v17 = vunpack.c.h.bf16 %v8966_v15  ;;  %v2309_v18 = vunpack.c.h.bf16 %v8971_v16  ;;  %v1233_v26 = vld [vmem:[%s12577_s13] sm:$0xf] }
 0x129   :  { %2642 = vmatpush2.msra.mxu1 %v2410_v29  ;;  %2574 = vmatprep.subr.mxu0 %v1969_v40  ;;  %v1242_v29 = vrot.slane %v1233_v26, %v8829_v39  ;;  %v1250_v30 = vrot.slane %v1233_v26, %v8837_v55  ;;  %v1238_v31 = vrot.slane %v1233_v26, %v8823_v34 }
 0x12a   :  { %2643 = vmatprep.subr.mxu1 %v2398_v33  ;;  %2575 = vmatpush2.msra.mxu0 %v1968_v42  ;;  %v1246_v32 = vrot.slane %v1233_v26, %v8834_v52  ;;  %v1268_v40 = vrot.slane %v1259_v28, %v8829_v39  ;;  %v1264_v42 = vrot.slane %v1259_v28, %v8823_v34 }
 0x12b   :  { %2644 = vmatpush2.msra.mxu1 %v2397_v36  ;;  %2576 = vmatprep.subr.mxu0 %v1956_v46 }
 0x12c   :  { %2645 = vmatprep.subr.mxu1 %v2385_v41  ;;  %2577 = vmatpush2.msra.mxu0 %v1955_v48  ;;  %v1276_v41 = vrot.slane %v1259_v28, %v8837_v55 }
 0x12d   :  { %2646 = vmatpush2.msra.mxu1 %v2384_v43  ;;  %2578 = vmatprep.subr.mxu0 %v1943_v53  ;;  %v1272_v43 = vrot.slane %v1259_v28, %v8834_v52  ;;  %v1388_v53 = vld [vmem:[%s12575_s15 + $0x2e0] sm:$0xff] }
 0x12e   :  { %2647 = vmatprep.subr.mxu1 %v2372_v47  ;;  %2579 = vmatpush2.msra.mxu0 %v1942_v56  ;;  %v2308_v56 = vunpack.c.l.bf16 %v8971_v16  ;;  %v1591_v16 = vld [vmem:[%s12575_s15 + $0x8c4] sm:$0xff]  ;;  %v1353_v28 = vld [vmem:[%s12575_s15 + $0x1dc] sm:$0xff] }
 0x12f   :  { %2648 = vmatpush2.msra.mxu1 %v2371_v49  ;;  %2580 = vmatprep.subr.mxu0 %v1930_v62  ;;  %v2256_v26 = vunpack.c.l.bf16 %v1591_v16 }
 0x130   :  { %2649 = vmatprep.subr.mxu1 %v2359_v54  ;;  %2581 = vmatpush2.msra.mxu0 %v1929_v0  ;;  %v1892_v54 = vunpack.c.l.bf16 %v8966_v15  ;;  %v1880_v0 = vunpack.c.h.bf16 %v1388_v53  ;;  %v1367_v15 = vld [vmem:[%s12575_s15 + $0x244] sm:$0xff] }
 0x131   :  { %2650 = vmatpush2.msra.mxu1 %v2358_v57  ;;  %2582 = vmatprep.subr.mxu0 %v1917_v5  ;;  %v1612_v57 = vld [vmem:[%s12575_s15 + $0x960] sm:$0xff]  ;;  %v1879_v5 = vunpack.c.l.bf16 %v1388_v53 }
 0x132   :  { %2651 = vmatprep.subr.mxu1 %v2346_v63  ;;  %2583 = vmatpush2.msra.mxu0 %v1916_v7  ;;  %v2296_v4 = vunpack.c.h.bf16 %v1612_v57  ;;  %v1374_v7 = vld [vmem:[%s12575_s15 + $0x278] sm:$0xff] }
 0x133   :  { %2652 = vmatpush2.msra.mxu1 %v2345_v1  ;;  %2584 = vmatprep.subr.mxu0 %v1904_v10  ;;  %v1381_v1 = vld [vmem:[%s12575_s15 + $0x2ac] sm:$0xff] }
 0x134   :  { %2653 = vmatprep.subr.mxu1 %v2333_v6  ;;  %2585 = vmatpush2.msra.mxu0 %v1903_v12  ;;  %v2295_v6 = vunpack.c.l.bf16 %v1612_v57  ;;  %v1867_v10 = vunpack.c.h.bf16 %v1381_v1  ;;  %v1866_v12 = vunpack.c.l.bf16 %v1381_v1  ;;  %v1542_v1 = vld [vmem:[%s12575_s15 + $0x758] sm:$0xff] }
 0x135   :  { %2654 = vmatpush2.msra.mxu1 %v2332_v8  ;;  %2735 = vmatprep.subr.mxu0 %v2309_v18  ;;  %v1598_v8 = vld [vmem:[%s12575_s15 + $0x8f8] sm:$0xff] }
 0x136   :  { %2655 = vmatprep.subr.mxu1 %v2320_v11  ;;  %v2283_v11 = vunpack.c.h.bf16 %v1605_v2  ;;  %v2270_v18 = vunpack.c.h.bf16 %v1598_v8 }
 0x137   :  { %2656 = vmatpush2.msra.mxu1 %v2319_v13  ;;  %v2282_v13 = vunpack.c.l.bf16 %v1605_v2 }
 0x138   :  { %2664 = vmatprep.subr.mxu1 %v1893_v17  ;;  %v1854_v17 = vunpack.c.h.bf16 %v1374_v7 }
 0x1ab   :  { %v1204_v19 = vpop.xlane.xlu0 %1203 }
 0x1ac   :  { %v1206_v20 = vmul.f32 0.0021551724, %v1204_v19  ;;  %v1853_v19 = vunpack.c.l.bf16 %v1374_v7  ;;  %v1311_v7 = vld [vmem:[%s12575_s15 + $0xa4] sm:$0xff] }
 0x1ae   :  { %v1221_v22 = vmul.f32 %v1206_v20, %v1206_v20  ;;  %v1223_v33 = vsub.f32 %v8839_v58, %v1206_v20  ;;  %v1224_v35 = vsub.f32 %v8841_v59, %v1206_v20  ;;  %v1225_v36 = vsub.f32 %v8851_v9, %v1206_v20 }
 0x1af   :  { %v1219_v21 = vpop.xlane.xlu0 %1218  ;;  %v1226_v37 = vsub.f32 %v8856_v14, %v1206_v20  ;;  %v2269_v20 = vunpack.c.l.bf16 %v1598_v8  ;;  %v1535_v8 = vld [vmem:[%s12575_s15 + $0x724] sm:$0xff] }
 0x1b0   :  { %v1220_v23 = vmul.f32 0.0021551724, %v1219_v21  ;;  %v1360_v21 = vld [vmem:[%s12575_s15 + $0x210] sm:$0xff] }
 0x1b2   :  { %v1222_v24 = vsub.f32 %v1220_v23, %v1221_v22  ;;  %v1584_v22 = vld [vmem:[%s12575_s15 + $0x890] sm:$0xff]  ;;  %v1841_v23 = vunpack.c.h.bf16 %v1367_v15 }
 0x1b4   :  { %v1227_v25 = vadd.f32 1e-05, %v1222_v24  ;;  %v2257_v24 = vunpack.c.h.bf16 %v1591_v16  ;;  %v1528_v16 = vld [vmem:[%s12575_s15 + $0x6f0] sm:$0xff] }
 0x1b6   :  { %8380 = vrsqrt.f32 %v1227_v25  ;;  %v1840_v25 = vunpack.c.l.bf16 %v1367_v15  ;;  %v1304_v15 = vld [vmem:[%s12575_s15 + $0x70] sm:$0xff] }
 0x1c3   :  { %v8381_v38 = vpop.eup %8380 }
 0x1c4   :  { %v1230_v44 = vmul.f32 %v8381_v38, %v1224_v35  ;;  %v1232_v45 = vmul.f32 %v8381_v38, %v1226_v37  ;;  %v1229_v46 = vmul.f32 %v8381_v38, %v1223_v33  ;;  %v1231_v47 = vmul.f32 %v8381_v38, %v1225_v36  ;;  %v1346_v35 = vld [vmem:[%s12575_s15 + $0x1a8] sm:$0xff] }
 0x1c5   :  { %v2243_v33 = vunpack.c.l.bf16 %v1584_v22  ;;  %v1570_v36 = vld [vmem:[%s12575_s15 + $0x828] sm:$0xff]  ;;  %v1815_v37 = vunpack.c.h.bf16 %v1353_v28 }
 0x1c6   :  { %v1256_v58 = vmul.f32 %v1242_v29, %v1230_v44  ;;  %v1258_v48 = vmul.f32 %v1250_v30, %v1232_v45  ;;  %v1255_v59 = vmul.f32 %v1238_v31, %v1229_v46  ;;  %v1257_v49 = vmul.f32 %v1246_v32, %v1231_v47  ;;  %v1577_v29 = vld [vmem:[%s12575_s15 + $0x85c] sm:$0xff] }
 0x1c7   :  { %v1828_v30 = vunpack.c.h.bf16 %v1360_v21  ;;  %v2244_v31 = vunpack.c.h.bf16 %v1584_v22  ;;  %v1827_v32 = vunpack.c.l.bf16 %v1360_v21  ;;  %v2231_v38 = vunpack.c.h.bf16 %v1577_v29  ;;  %v1297_v21 = vld [vmem:[%s12575_s15 + $0x3c] sm:$0xff] }
 0x1c8   :  { %v1282_v9 = vadd.f32 %v1268_v40, %v1256_v58  ;;  %v1284_v50 = vadd.f32 %v1276_v41, %v1258_v48  ;;  %v1281_v14 = vadd.f32 %v1264_v42, %v1255_v59  ;;  %v1283_v51 = vadd.f32 %v1272_v43, %v1257_v49  ;;  %v1339_v42 = vld [vmem:[%s12575_s15 + $0x174] sm:$0xff]  ;;  %v1332_v58 = vld [vmem:[%s12575_s15 + $0x140] sm:$0xff] }
 0x1c9   :  { %v1814_v40 = vunpack.c.l.bf16 %v1353_v28  ;;  %v2230_v41 = vunpack.c.l.bf16 %v1577_v29  ;;  %v1563_v43 = vld [vmem:[%s12575_s15 + $0x7f4] sm:$0xff]  ;;  %v1802_v44 = vunpack.c.h.bf16 %v1346_v35  ;;  %v2218_v45 = vunpack.c.h.bf16 %v1570_v36  ;;  %v1556_v48 = vld [vmem:[%s12575_s15 + $0x7c0] sm:$0xff]  ;;  %v1290_v28 = vld [vmem:[%s12575_s15 + $0x8] sm:$0xff] }
 0x1ca   :  { %v9001_v60 = vmax.f32 %v1282_v9, 0.0  ;;  %v9003_v61 = vmax.f32 %v1284_v50, 0.0  ;;  %v9005_v62 = vmax.f32 %v1281_v14, 0.0  ;;  %v9007_v63 = vmax.f32 %v1283_v51, 0.0  ;;  %v1325_v14 = vld [vmem:[%s12575_s15 + $0x10c] sm:$0xff]  ;;  %v1521_v22 = vld [vmem:[%s12575_s15 + $0x6bc] sm:$0xff] }
 0x1cb   :  { %v1801_v46 = vunpack.c.l.bf16 %v1346_v35  ;;  %v2217_v47 = vunpack.c.l.bf16 %v1570_v36  ;;  %v1789_v59 = vunpack.c.h.bf16 %v1339_v42  ;;  %v2205_v49 = vunpack.c.h.bf16 %v1563_v43  ;;  %v1549_v51 = vld [vmem:[%s12575_s15 + $0x78c] sm:$0xff]  ;;  %v1507_v35 = vld [vmem:[%s12575_s15 + $0x654] sm:$0xff]  ;;  %v1689_v36 = vld [vmem:[%s12575_s15 + $0xb9c] sm:$0xff] }
 0x1cc   :  { %2586 = vmatprep.mubr.f32.mxu0 %v9001_v60  ;;  %8093 = vmatprep.mubr.msk.f32.mxu1 %vm2518_vm6, %v9003_v61  ;;  %v1788_v9 = vunpack.c.l.bf16 %v1339_v42  ;;  %v2204_v50 = vunpack.c.l.bf16 %v1563_v43  ;;  %v1776_v53 = vunpack.c.h.bf16 %v1332_v58  ;;  %v2191_v57 = vunpack.c.l.bf16 %v1556_v48  ;;  %v1514_v29 = vld [vmem:[%s12575_s15 + $0x688] sm:$0xff]  ;;  %v1500_v42 = vld [vmem:[%s12575_s15 + $0x620] sm:$0xff] }
 0x1cd   :  { %2587 = vmatmul.mubr.f32.vlgmr.msra.gmra.mxu0 %v9005_v62  ;;  %2658 = vmatmul.mubr.f32.vlgmr.msra.gmra.mxu1 %v9007_v63  ;;  %v1763_v2 = vunpack.c.h.bf16 %v1325_v14  ;;  %v1682_v43 = vld [vmem:[%s12575_s15 + $0xb68] sm:$0xff] }
 0x1ce   :  { %2665 = vmatpush1.msra.mxu1 %v1892_v54  ;;  %2736 = vmatpush1.msra.mxu0 %v2308_v56  ;;  %v2192_v54 = vunpack.c.h.bf16 %v1556_v48  ;;  %v1775_v56 = vunpack.c.l.bf16 %v1332_v58  ;;  %v1493_v58 = vld [vmem:[%s12575_s15 + $0x5ec] sm:$0xff]  ;;  %v1675_v48 = vld [vmem:[%s12575_s15 + $0xb34] sm:$0xff] }
 0x1cf   :  { %2666 = vmatprep.subr.mxu1 %v1880_v0  ;;  %2728 = vmatprep.mubr.f32.mxu1 %v9001_v60  ;;  %v1318_v0 = vld [vmem:[%s12575_s15 + $0xd8] sm:$0xff] }
 0x1d0   :  { %2737 = vmatprep.subr.mxu0 %v2296_v4  ;;  %8094 = vmatprep.mubr.msk.f32.mxu0 %vm2518_vm6, %v9003_v61  ;;  %v2179_v4 = vunpack.c.h.bf16 %v1549_v51 }
 0x1d1   :  { %2667 = vmatpush1.msra.mxu1 %v1879_v5  ;;  %2738 = vmatpush1.msra.mxu0 %v2295_v6  ;;  %v1762_v5 = vunpack.c.l.bf16 %v1325_v14  ;;  %v2178_v6 = vunpack.c.l.bf16 %v1549_v51  ;;  %v1486_v14 = vld [vmem:[%s12575_s15 + $0x5b8] sm:$0xff]  ;;  %v1668_v51 = vld [vmem:[%s12575_s15 + $0xb00] sm:$0xff] }
 0x1d2   :  { %2668 = vmatprep.subr.mxu1 %v1867_v10  ;;  %2739 = vmatprep.subr.mxu0 %v2283_v11  ;;  %v1750_v10 = vunpack.c.h.bf16 %v1318_v0  ;;  %v2166_v11 = vunpack.c.h.bf16 %v1542_v1 }
 0x1d3   :  { %2669 = vmatpush1.msra.mxu1 %v1866_v12  ;;  %2740 = vmatpush1.msra.mxu0 %v2282_v13  ;;  %v1749_v12 = vunpack.c.l.bf16 %v1318_v0  ;;  %v2165_v13 = vunpack.c.l.bf16 %v1542_v1  ;;  %v1479_v0 = vld [vmem:[%s12575_s15 + $0x584] sm:$0xff]  ;;  %v1661_v1 = vld [vmem:[%s12575_s15 + $0xacc] sm:$0xff] }
 0x1d4   :  { %2670 = vmatprep.subr.mxu1 %v1854_v17  ;;  %2741 = vmatprep.subr.mxu0 %v2270_v18  ;;  %v1737_v17 = vunpack.c.h.bf16 %v1311_v7  ;;  %v2153_v18 = vunpack.c.h.bf16 %v1535_v8 }
 0x1d5   :  { %2671 = vmatpush1.msra.mxu1 %v1853_v19  ;;  %2742 = vmatpush1.msra.mxu0 %v2269_v20  ;;  %v1736_v19 = vunpack.c.l.bf16 %v1311_v7  ;;  %v2152_v20 = vunpack.c.l.bf16 %v1535_v8  ;;  %v1472_v7 = vld [vmem:[%s12575_s15 + $0x550] sm:$0xff]  ;;  %v1654_v8 = vld [vmem:[%s12575_s15 + $0xa98] sm:$0xff] }
 0x1d6   :  { %2672 = vmatprep.subr.mxu1 %v1841_v23  ;;  %2743 = vmatprep.subr.mxu0 %v2257_v24  ;;  %v1724_v23 = vunpack.c.h.bf16 %v1304_v15  ;;  %v2140_v24 = vunpack.c.h.bf16 %v1528_v16 }
 0x1d7   :  { %2673 = vmatpush1.msra.mxu1 %v1840_v25  ;;  %2744 = vmatpush1.msra.mxu0 %v2256_v26  ;;  %v1723_v25 = vunpack.c.l.bf16 %v1304_v15  ;;  %v2139_v26 = vunpack.c.l.bf16 %v1528_v16  ;;  %v1465_v15 = vld [vmem:[%s12575_s15 + $0x51c] sm:$0xff]  ;;  %v1647_v16 = vld [vmem:[%s12575_s15 + $0xa64] sm:$0xff] }
 0x1d8   :  { %2674 = vmatprep.subr.mxu1 %v1828_v30  ;;  %2745 = vmatprep.subr.mxu0 %v2244_v31  ;;  %v1711_v30 = vunpack.c.h.bf16 %v1297_v21  ;;  %v2127_v31 = vunpack.c.h.bf16 %v1521_v22 }
 0x1d9   :  { %2675 = vmatpush1.msra.mxu1 %v1827_v32  ;;  %2746 = vmatpush1.msra.mxu0 %v2243_v33  ;;  %v1710_v32 = vunpack.c.l.bf16 %v1297_v21  ;;  %v2126_v33 = vunpack.c.l.bf16 %v1521_v22  ;;  %v1458_v21 = vld [vmem:[%s12575_s15 + $0x4e8] sm:$0xff]  ;;  %v1640_v22 = vld [vmem:[%s12575_s15 + $0xa30] sm:$0xff] }
 0x1da   :  { %2676 = vmatprep.subr.mxu1 %v1815_v37  ;;  %2747 = vmatprep.subr.mxu0 %v2231_v38  ;;  %v1698_v37 = vunpack.c.h.bf16 %v1290_v28  ;;  %v2114_v38 = vunpack.c.h.bf16 %v1514_v29 }
 0x1db   :  { %2677 = vmatpush1.msra.mxu1 %v1814_v40  ;;  %2748 = vmatpush1.msra.mxu0 %v2230_v41  ;;  %v1697_v40 = vunpack.c.l.bf16 %v1290_v28  ;;  %v2113_v41 = vunpack.c.l.bf16 %v1514_v29  ;;  %v1451_v28 = vld [vmem:[%s12575_s15 + $0x4b4] sm:$0xff]  ;;  %v1633_v29 = vld [vmem:[%s12575_s15 + $0x9fc] sm:$0xff] }
 0x1dc   :  { %2678 = vmatprep.subr.mxu1 %v1802_v44  ;;  %2749 = vmatprep.subr.mxu0 %v2218_v45  ;;  %v2101_v44 = vunpack.c.h.bf16 %v1507_v35  ;;  %v2439_v45 = vunpack.c.h.bf16 %v1689_v36 }
 0x1dd   :  { %2679 = vmatpush1.msra.mxu1 %v1801_v46  ;;  %2750 = vmatpush1.msra.mxu0 %v2217_v47  ;;  %v2100_v46 = vunpack.c.l.bf16 %v1507_v35  ;;  %v2438_v47 = vunpack.c.l.bf16 %v1689_v36  ;;  %v1444_v35 = vld [vmem:[%s12575_s15 + $0x480] sm:$0xff]  ;;  %v1626_v36 = vld [vmem:[%s12575_s15 + $0x9c8] sm:$0xff] }
 0x1de   :  { %2680 = vmatprep.subr.mxu1 %v1789_v59  ;;  %2751 = vmatprep.subr.mxu0 %v2205_v49  ;;  %v2088_v59 = vunpack.c.h.bf16 %v1500_v42  ;;  %v2426_v49 = vunpack.c.h.bf16 %v1682_v43 }
 0x1df   :  { %2681 = vmatpush1.msra.mxu1 %v1788_v9  ;;  %2752 = vmatpush1.msra.mxu0 %v2204_v50  ;;  %v2087_v9 = vunpack.c.l.bf16 %v1500_v42  ;;  %v2425_v50 = vunpack.c.l.bf16 %v1682_v43  ;;  %v1437_v42 = vld [vmem:[%s12575_s15 + $0x44c] sm:$0xff]  ;;  %v1984_v43 = vunpack.c.h.bf16 %v1444_v35 }
 0x1e0   :  { %2682 = vmatprep.subr.mxu1 %v1776_v53  ;;  %2753 = vmatprep.subr.mxu0 %v2192_v54  ;;  %v2075_v53 = vunpack.c.h.bf16 %v1493_v58  ;;  %v2413_v54 = vunpack.c.h.bf16 %v1675_v48 }
 0x1e1   :  { %2683 = vmatpush1.msra.mxu1 %v1775_v56  ;;  %2754 = vmatpush1.msra.mxu0 %v2191_v57  ;;  %v2074_v56 = vunpack.c.l.bf16 %v1493_v58  ;;  %v2412_v57 = vunpack.c.l.bf16 %v1675_v48  ;;  %v1971_v58 = vunpack.c.h.bf16 %v1437_v42  ;;  %v1430_v48 = vld [vmem:[%s12575_s15 + $0x418] sm:$0xff] }
 0x1e2   :  { %2684 = vmatprep.subr.mxu1 %v1763_v2  ;;  %2755 = vmatprep.subr.mxu0 %v2179_v4  ;;  %v2062_v2 = vunpack.c.h.bf16 %v1486_v14  ;;  %v2400_v4 = vunpack.c.h.bf16 %v1668_v51 }
 0x1e3   :  { %2685 = vmatpush1.msra.mxu1 %v1762_v5  ;;  %2756 = vmatpush1.msra.mxu0 %v2178_v6  ;;  %v2061_v5 = vunpack.c.l.bf16 %v1486_v14  ;;  %v2399_v6 = vunpack.c.l.bf16 %v1668_v51  ;;  %v1423_v14 = vld [vmem:[%s12575_s15 + $0x3e4] sm:$0xff]  ;;  %v1382_v51 = vld [vmem:[%s12575_s15 + $0x2b4] sm:$0xff] }
 0x1e4   :  { %2686 = vmatprep.subr.mxu1 %v1750_v10  ;;  %2757 = vmatprep.subr.mxu0 %v2166_v11  ;;  %v2049_v10 = vunpack.c.h.bf16 %v1479_v0  ;;  %v2387_v11 = vunpack.c.h.bf16 %v1661_v1 }
 0x1e5   :  { %2687 = vmatpush1.msra.mxu1 %v1749_v12  ;;  %2758 = vmatpush1.msra.mxu0 %v2165_v13  ;;  %v2048_v12 = vunpack.c.l.bf16 %v1479_v0  ;;  %v2386_v13 = vunpack.c.l.bf16 %v1661_v1  ;;  %v1416_v0 = vld [vmem:[%s12575_s15 + $0x3b0] sm:$0xff]  ;;  %v1375_v1 = vld [vmem:[%s12575_s15 + $0x280] sm:$0xff] }
 0x1e6   :  { %2688 = vmatprep.subr.mxu1 %v1737_v17  ;;  %2759 = vmatprep.subr.mxu0 %v2153_v18  ;;  %v2036_v17 = vunpack.c.h.bf16 %v1472_v7  ;;  %v2374_v18 = vunpack.c.h.bf16 %v1654_v8 }
 0x1e7   :  { %2689 = vmatpush1.msra.mxu1 %v1736_v19  ;;  %2760 = vmatpush1.msra.mxu0 %v2152_v20  ;;  %v2035_v19 = vunpack.c.l.bf16 %v1472_v7  ;;  %v2373_v20 = vunpack.c.l.bf16 %v1654_v8  ;;  %v1409_v7 = vld [vmem:[%s12575_s15 + $0x37c] sm:$0xff]  ;;  %v1368_v8 = vld [vmem:[%s12575_s15 + $0x24c] sm:$0xff] }
 0x1e8   :  { %2690 = vmatprep.subr.mxu1 %v1724_v23  ;;  %2761 = vmatprep.subr.mxu0 %v2140_v24  ;;  %v2023_v23 = vunpack.c.h.bf16 %v1465_v15  ;;  %v2361_v24 = vunpack.c.h.bf16 %v1647_v16 }
 0x1e9   :  { %2691 = vmatpush1.msra.mxu1 %v1723_v25  ;;  %2762 = vmatpush1.msra.mxu0 %v2139_v26  ;;  %v2022_v25 = vunpack.c.l.bf16 %v1465_v15  ;;  %v2360_v26 = vunpack.c.l.bf16 %v1647_v16  ;;  %v1402_v15 = vld [vmem:[%s12575_s15 + $0x348] sm:$0xff]  ;;  %v1361_v16 = vld [vmem:[%s12575_s15 + $0x218] sm:$0xff] }
 0x1ea   :  { %2692 = vmatprep.subr.mxu1 %v1711_v30  ;;  %2763 = vmatprep.subr.mxu0 %v2127_v31  ;;  %v2010_v30 = vunpack.c.h.bf16 %v1458_v21  ;;  %v2348_v31 = vunpack.c.h.bf16 %v1640_v22 }
 0x1eb   :  { %2693 = vmatpush1.msra.mxu1 %v1710_v32  ;;  %2764 = vmatpush1.msra.mxu0 %v2126_v33  ;;  %v2009_v32 = vunpack.c.l.bf16 %v1458_v21  ;;  %v2347_v33 = vunpack.c.l.bf16 %v1640_v22  ;;  %v1354_v21 = vld [vmem:[%s12575_s15 + $0x1e4] sm:$0xff]  ;;  %v1906_v22 = vunpack.c.h.bf16 %v1402_v15 }
 0x1ec   :  { %2694 = vmatprep.subr.mxu1 %v1698_v37  ;;  %2765 = vmatprep.subr.mxu0 %v2114_v38  ;;  %v1997_v37 = vunpack.c.h.bf16 %v1451_v28  ;;  %v2335_v38 = vunpack.c.h.bf16 %v1633_v29 }
 0x1ed   :  { %2695 = vmatpush1.msra.mxu1 %v1697_v40  ;;  %2766 = vmatpush1.msra.mxu0 %v2113_v41  ;;  %v1996_v40 = vunpack.c.l.bf16 %v1451_v28  ;;  %v2334_v41 = vunpack.c.l.bf16 %v1633_v29  ;;  %v1817_v28 = vunpack.c.h.bf16 %v1354_v21  ;;  %v1347_v29 = vld [vmem:[%s12575_s15 + $0x1b0] sm:$0xff] }
 0x1ee   :  { %2696 = vmatprep.subr.mxu1 %v2101_v44  ;;  %2779 = vmatprep.subr.mxu0 %v2439_v45  ;;  %v2322_v44 = vunpack.c.h.bf16 %v1626_v36  ;;  %v1396_v45 = vld [vmem:[%s12575_s15 + $0x31c] sm:$0xff] }
 0x1ef   :  { %2697 = vmatpush2.msra.mxu1 %v2100_v46  ;;  %2780 = vmatpush2.msra.mxu0 %v2438_v47  ;;  %v1983_v46 = vunpack.c.l.bf16 %v1444_v35  ;;  %v2321_v47 = vunpack.c.l.bf16 %v1626_v36  ;;  %v1340_v35 = vld [vmem:[%s12575_s15 + $0x17c] sm:$0xff]  ;;  %v1606_v36 = vld [vmem:[%s12575_s15 + $0x934] sm:$0xff] }
 0x1f0   :  { %2698 = vmatprep.subr.mxu1 %v2088_v59  ;;  %2781 = vmatprep.subr.mxu0 %v2426_v49  ;;  %v1389_v59 = vld [vmem:[%s12575_s15 + $0x2e8] sm:$0xff]  ;;  %v1970_v49 = vunpack.c.l.bf16 %v1437_v42 }
 0x1f1   :  { %2699 = vmatpush2.msra.mxu1 %v2087_v9  ;;  %2782 = vmatpush2.msra.mxu0 %v2425_v50  ;;  %v1895_v9 = vunpack.c.h.bf16 %v1396_v45  ;;  %v1894_v50 = vunpack.c.l.bf16 %v1396_v45  ;;  %v1333_v42 = vld [vmem:[%s12575_s15 + $0x148] sm:$0xff]  ;;  %v2285_v45 = vunpack.c.h.bf16 %v1606_v36 }
 0x1f2   :  { %2700 = vmatprep.subr.mxu1 %v2075_v53  ;;  %2783 = vmatprep.subr.mxu0 %v2413_v54  ;;  %v1958_v53 = vunpack.c.h.bf16 %v1430_v48  ;;  %v1882_v54 = vunpack.c.h.bf16 %v1389_v59 }
 0x1f3   :  { %2701 = vmatpush2.msra.mxu1 %v2074_v56  ;;  %2784 = vmatpush2.msra.mxu0 %v2412_v57  ;;  %v1957_v56 = vunpack.c.l.bf16 %v1430_v48  ;;  %v1881_v57 = vunpack.c.l.bf16 %v1389_v59  ;;  %v1592_v48 = vld [vmem:[%s12575_s15 + $0x8cc] sm:$0xff]  ;;  %v1778_v59 = vunpack.c.h.bf16 %v1333_v42 }
 0x1f4   :  { %2702 = vmatprep.subr.mxu1 %v2062_v2  ;;  %2785 = vmatprep.subr.mxu0 %v2400_v4  ;;  %v1945_v2 = vunpack.c.h.bf16 %v1423_v14  ;;  %v1869_v4 = vunpack.c.h.bf16 %v1382_v51 }
 0x1f5   :  { %2703 = vmatpush2.msra.mxu1 %v2061_v5  ;;  %2786 = vmatpush2.msra.mxu0 %v2399_v6  ;;  %v1944_v5 = vunpack.c.l.bf16 %v1423_v14  ;;  %v1868_v6 = vunpack.c.l.bf16 %v1382_v51  ;;  %v1319_v14 = vld [vmem:[%s12575_s15 + $0xe0] sm:$0xff]  ;;  %v1585_v51 = vld [vmem:[%s12575_s15 + $0x898] sm:$0xff] }
 0x1f6   :  { %2704 = vmatprep.subr.mxu1 %v2049_v10  ;;  %2787 = vmatprep.subr.mxu0 %v2387_v11  ;;  %v1932_v10 = vunpack.c.h.bf16 %v1416_v0  ;;  %v1856_v11 = vunpack.c.h.bf16 %v1375_v1 }
 0x1f7   :  { %2705 = vmatpush2.msra.mxu1 %v2048_v12  ;;  %2788 = vmatpush2.msra.mxu0 %v2386_v13  ;;  %v1931_v12 = vunpack.c.l.bf16 %v1416_v0  ;;  %v1855_v13 = vunpack.c.l.bf16 %v1375_v1  ;;  %v1312_v0 = vld [vmem:[%s12575_s15 + $0xac] sm:$0xff]  ;;  %v1578_v1 = vld [vmem:[%s12575_s15 + $0x864] sm:$0xff] }
 0x1f8   :  { %2706 = vmatprep.subr.mxu1 %v2036_v17  ;;  %2789 = vmatprep.subr.mxu0 %v2374_v18  ;;  %v1919_v17 = vunpack.c.h.bf16 %v1409_v7  ;;  %v1843_v18 = vunpack.c.h.bf16 %v1368_v8 }
 0x1f9   :  { %2707 = vmatpush2.msra.mxu1 %v2035_v19  ;;  %2790 = vmatpush2.msra.mxu0 %v2373_v20  ;;  %v1918_v19 = vunpack.c.l.bf16 %v1409_v7  ;;  %v1842_v20 = vunpack.c.l.bf16 %v1368_v8  ;;  %v1305_v7 = vld [vmem:[%s12575_s15 + $0x78] sm:$0xff]  ;;  %v1571_v8 = vld [vmem:[%s12575_s15 + $0x830] sm:$0xff] }
 0x1fa   :  { %2708 = vmatprep.subr.mxu1 %v2023_v23  ;;  %2791 = vmatprep.subr.mxu0 %v2361_v24  ;;  %v1830_v23 = vunpack.c.h.bf16 %v1361_v16  ;;  %v1620_v24 = vld [vmem:[%s12575_s15 + $0x99c] sm:$0xff] }
 0x1fb   :  { %2709 = vmatpush2.msra.mxu1 %v2022_v25  ;;  %2792 = vmatpush2.msra.mxu0 %v2360_v26  ;;  %v1905_v25 = vunpack.c.l.bf16 %v1402_v15  ;;  %v1829_v26 = vunpack.c.l.bf16 %v1361_v16  ;;  %v1298_v15 = vld [vmem:[%s12575_s15 + $0x44] sm:$0xff]  ;;  %v1564_v16 = vld [vmem:[%s12575_s15 + $0x7fc] sm:$0xff] }
 0x1fc   :  { %2710 = vmatprep.subr.mxu1 %v2010_v30  ;;  %2793 = vmatprep.subr.mxu0 %v2348_v31  ;;  %v1613_v30 = vld [vmem:[%s12575_s15 + $0x968] sm:$0xff]  ;;  %v1816_v31 = vunpack.c.l.bf16 %v1354_v21  ;;  %v1291_v21 = vld [vmem:[%s12575_s15 + $0x10] sm:$0xff] }
 0x1fd   :  { %2711 = vmatpush2.msra.mxu1 %v2009_v32  ;;  %2794 = vmatpush2.msra.mxu0 %v2347_v33  ;;  %v2311_v32 = vunpack.c.h.bf16 %v1620_v24  ;;  %v2310_v33 = vunpack.c.l.bf16 %v1620_v24  ;;  %v2207_v24 = vunpack.c.h.bf16 %v1564_v16 }
 0x1fe   :  { %2712 = vmatprep.subr.mxu1 %v1997_v37  ;;  %2795 = vmatprep.subr.mxu0 %v2335_v38  ;;  %v1804_v37 = vunpack.c.h.bf16 %v1347_v29  ;;  %v2298_v38 = vunpack.c.h.bf16 %v1613_v30 }
 0x1ff   :  { %2713 = vmatpush2.msra.mxu1 %v1996_v40  ;;  %2796 = vmatpush2.msra.mxu0 %v2334_v41  ;;  %v1803_v40 = vunpack.c.l.bf16 %v1347_v29  ;;  %v2297_v41 = vunpack.c.l.bf16 %v1613_v30  ;;  %v1550_v29 = vld [vmem:[%s12575_s15 + $0x794] sm:$0xff]  ;;  %v1700_v30 = vunpack.c.h.bf16 %v1291_v21 }
 0x200   :  { %2714 = vmatprep.subr.mxu1 %v1984_v43  ;;  %2797 = vmatprep.subr.mxu0 %v2322_v44  ;;  %v1599_v43 = vld [vmem:[%s12575_s15 + $0x900] sm:$0xff]  ;;  %v1791_v44 = vunpack.c.h.bf16 %v1340_v35 }
 0x201   :  { %2715 = vmatpush2.msra.mxu1 %v1983_v46  ;;  %2798 = vmatpush2.msra.mxu0 %v2321_v47  ;;  %v1790_v46 = vunpack.c.l.bf16 %v1340_v35  ;;  %v2284_v47 = vunpack.c.l.bf16 %v1606_v36  ;;  %v1501_v35 = vld [vmem:[%s12575_s15 + $0x628] sm:$0xff]  ;;  %v1543_v36 = vld [vmem:[%s12575_s15 + $0x760] sm:$0xff] }
 0x202   :  { %2716 = vmatprep.subr.mxu1 %v1971_v58  ;;  %2800 = vmatmul.mubr.f32.vlgmr.msra.gmra.mxu0 %v9007_v63  ;;  %v1326_v58 = vld [vmem:[%s12575_s15 + $0x114] sm:$0xff] }
 0x203   :  { %2806 = vmatprep.subr.mxu0 %v1895_v9  ;;  %2717 = vmatpush2.msra.mxu1 %v1970_v49  ;;  %v2272_v49 = vunpack.c.h.bf16 %v1599_v43  ;;  %v1777_v9 = vunpack.c.l.bf16 %v1333_v42  ;;  %v1494_v42 = vld [vmem:[%s12575_s15 + $0x5f4] sm:$0xff] }
 0x204   :  { %2807 = vmatpush1.msra.mxu0 %v1894_v50  ;;  %2870 = vmatprep.mubr.f32.mxu0 %v9001_v60  ;;  %v2271_v50 = vunpack.c.l.bf16 %v1599_v43  ;;  %v1536_v43 = vld [vmem:[%s12575_s15 + $0x72c] sm:$0xff] }
 0x205   :  { %2718 = vmatprep.subr.mxu1 %v1958_v53  ;;  %2808 = vmatprep.subr.mxu0 %v1882_v54  ;;  %v1765_v53 = vunpack.c.h.bf16 %v1326_v58  ;;  %v2259_v54 = vunpack.c.h.bf16 %v1592_v48 }
 0x206   :  { %2719 = vmatpush2.msra.mxu1 %v1957_v56  ;;  %2809 = vmatpush1.msra.mxu0 %v1881_v57  ;;  %v1764_v56 = vunpack.c.l.bf16 %v1326_v58  ;;  %v2258_v57 = vunpack.c.l.bf16 %v1592_v48  ;;  %v1487_v58 = vld [vmem:[%s12575_s15 + $0x5c0] sm:$0xff]  ;;  %v1529_v48 = vld [vmem:[%s12575_s15 + $0x6f8] sm:$0xff] }
 0x207   :  { %2720 = vmatprep.subr.mxu1 %v1945_v2  ;;  %2810 = vmatprep.subr.mxu0 %v1869_v4  ;;  %v1752_v2 = vunpack.c.h.bf16 %v1319_v14  ;;  %v2246_v4 = vunpack.c.h.bf16 %v1585_v51 }
 0x208   :  { %2721 = vmatpush2.msra.mxu1 %v1944_v5  ;;  %2811 = vmatpush1.msra.mxu0 %v1868_v6  ;;  %v1751_v5 = vunpack.c.l.bf16 %v1319_v14  ;;  %v2245_v6 = vunpack.c.l.bf16 %v1585_v51  ;;  %v1480_v14 = vld [vmem:[%s12575_s15 + $0x58c] sm:$0xff]  ;;  %v1522_v51 = vld [vmem:[%s12575_s15 + $0x6c4] sm:$0xff] }
 0x209   :  { %2722 = vmatprep.subr.mxu1 %v1932_v10  ;;  %2812 = vmatprep.subr.mxu0 %v1856_v11  ;;  %v1739_v10 = vunpack.c.h.bf16 %v1312_v0  ;;  %v2233_v11 = vunpack.c.h.bf16 %v1578_v1 }
 0x20a   :  { %2723 = vmatpush2.msra.mxu1 %v1931_v12  ;;  %2813 = vmatpush1.msra.mxu0 %v1855_v13  ;;  %v1738_v12 = vunpack.c.l.bf16 %v1312_v0  ;;  %v2232_v13 = vunpack.c.l.bf16 %v1578_v1  ;;  %v1473_v0 = vld [vmem:[%s12575_s15 + $0x558] sm:$0xff]  ;;  %v1515_v1 = vld [vmem:[%s12575_s15 + $0x690] sm:$0xff] }
 0x20b   :  { %2724 = vmatprep.subr.mxu1 %v1919_v17  ;;  %2814 = vmatprep.subr.mxu0 %v1843_v18  ;;  %v1726_v17 = vunpack.c.h.bf16 %v1305_v7  ;;  %v2220_v18 = vunpack.c.h.bf16 %v1571_v8 }
 0x20c   :  { %2725 = vmatpush2.msra.mxu1 %v1918_v19  ;;  %2815 = vmatpush1.msra.mxu0 %v1842_v20  ;;  %v1725_v19 = vunpack.c.l.bf16 %v1305_v7  ;;  %v2219_v20 = vunpack.c.l.bf16 %v1571_v8  ;;  %v1466_v7 = vld [vmem:[%s12575_s15 + $0x524] sm:$0xff] }
 0x20d   :  { %2726 = vmatprep.subr.mxu1 %v1906_v22  ;;  %2816 = vmatprep.subr.mxu0 %v1830_v23  ;;  %v1557_v22 = vld [vmem:[%s12575_s15 + $0x7c8] sm:$0xff]  ;;  %v1713_v23 = vunpack.c.h.bf16 %v1298_v15 }
 0x20e   :  { %2727 = vmatpush2.msra.mxu1 %v1905_v25  ;;  %2817 = vmatpush1.msra.mxu0 %v1829_v26  ;;  %v1712_v25 = vunpack.c.l.bf16 %v1298_v15  ;;  %v2206_v26 = vunpack.c.l.bf16 %v1564_v16  ;;  %v1690_v8 = vld [vmem:[%s12575_s15 + $0xba4] sm:$0xff]  ;;  %v1459_v15 = vld [vmem:[%s12575_s15 + $0x4f0] sm:$0xff] }
 0x20f   :  { %2729 = vmatmul.mubr.f32.vlgmr.msra.gmra.mxu1 %v9005_v62  ;;  %2818 = vmatprep.subr.mxu0 %v1817_v28  ;;  %v1508_v28 = vld [vmem:[%s12575_s15 + $0x65c] sm:$0xff]  ;;  %v1683_v16 = vld [vmem:[%s12575_s15 + $0xb70] sm:$0xff] }
 0x210   :  { %2877 = vmatprep.subr.mxu1 %v2311_v32  ;;  %2819 = vmatpush1.msra.mxu0 %v1816_v31  ;;  %v2194_v31 = vunpack.c.h.bf16 %v1557_v22  ;;  %v1699_v32 = vunpack.c.l.bf16 %v1291_v21  ;;  %v1452_v21 = vld [vmem:[%s12575_s15 + $0x4bc] sm:$0xff] }
 0x211   :  { %2878 = vmatpush1.msra.mxu1 %v2310_v33  ;;  %8095 = vmatprep.mubr.msk.f32.mxu1 %vm2518_vm6, %v9003_v61  ;;  %v2193_v33 = vunpack.c.l.bf16 %v1557_v22  ;;  %v1676_v22 = vld [vmem:[%s12575_s15 + $0xb3c] sm:$0xff] }
 0x212   :  { %2820 = vmatprep.subr.mxu0 %v1804_v37  ;;  %2879 = vmatprep.subr.mxu1 %v2298_v38  ;;  %v2103_v37 = vunpack.c.h.bf16 %v1508_v28  ;;  %v2181_v38 = vunpack.c.h.bf16 %v1550_v29 }
 0x213   :  { %2821 = vmatpush1.msra.mxu0 %v1803_v40  ;;  %2880 = vmatpush1.msra.mxu1 %v2297_v41  ;;  %v2102_v40 = vunpack.c.l.bf16 %v1508_v28  ;;  %v2180_v41 = vunpack.c.l.bf16 %v1550_v29  ;;  %v1445_v28 = vld [vmem:[%s12575_s15 + $0x488] sm:$0xff] }
 0x214   :  { %2822 = vmatprep.subr.mxu0 %v1791_v44  ;;  %2881 = vmatprep.subr.mxu1 %v2285_v45  ;;  %v2090_v44 = vunpack.c.h.bf16 %v1501_v35  ;;  %v2168_v45 = vunpack.c.h.bf16 %v1543_v36  ;;  %v1669_v29 = vld [vmem:[%s12575_s15 + $0xb08] sm:$0xff] }
 0x215   :  { %2823 = vmatpush1.msra.mxu0 %v1790_v46  ;;  %2882 = vmatpush1.msra.mxu1 %v2284_v47  ;;  %v2089_v46 = vunpack.c.l.bf16 %v1501_v35  ;;  %v2167_v47 = vunpack.c.l.bf16 %v1543_v36  ;;  %v1438_v35 = vld [vmem:[%s12575_s15 + $0x454] sm:$0xff] }
 0x216   :  { %2824 = vmatprep.subr.mxu0 %v1778_v59  ;;  %2883 = vmatprep.subr.mxu1 %v2272_v49  ;;  %v2077_v59 = vunpack.c.h.bf16 %v1494_v42  ;;  %v2155_v49 = vunpack.c.h.bf16 %v1536_v43  ;;  %v1662_v36 = vld [vmem:[%s12575_s15 + $0xad4] sm:$0xff] }
 0x217   :  { %2825 = vmatpush1.msra.mxu0 %v1777_v9  ;;  %2884 = vmatpush1.msra.mxu1 %v2271_v50  ;;  %v2076_v9 = vunpack.c.l.bf16 %v1494_v42  ;;  %v2154_v50 = vunpack.c.l.bf16 %v1536_v43  ;;  %v1431_v42 = vld [vmem:[%s12575_s15 + $0x420] sm:$0xff] }
 0x218   :  { %2826 = vmatprep.subr.mxu0 %v1765_v53  ;;  %2885 = vmatprep.subr.mxu1 %v2259_v54  ;;  %v2064_v53 = vunpack.c.h.bf16 %v1487_v58  ;;  %v2142_v54 = vunpack.c.h.bf16 %v1529_v48  ;;  %v1655_v43 = vld [vmem:[%s12575_s15 + $0xaa0] sm:$0xff] }
 0x219   :  { %2827 = vmatpush1.msra.mxu0 %v1764_v56  ;;  %2886 = vmatpush1.msra.mxu1 %v2258_v57  ;;  %v2063_v56 = vunpack.c.l.bf16 %v1487_v58  ;;  %v2141_v57 = vunpack.c.l.bf16 %v1529_v48  ;;  %v1424_v58 = vld [vmem:[%s12575_s15 + $0x3ec] sm:$0xff] }
 0x21a   :  { %2828 = vmatprep.subr.mxu0 %v1752_v2  ;;  %2887 = vmatprep.subr.mxu1 %v2246_v4  ;;  %v2051_v2 = vunpack.c.h.bf16 %v1480_v14  ;;  %v2129_v4 = vunpack.c.h.bf16 %v1522_v51  ;;  %v1648_v48 = vld [vmem:[%s12575_s15 + $0xa6c] sm:$0xff] }
 0x21b   :  { %2829 = vmatpush1.msra.mxu0 %v1751_v5  ;;  %2888 = vmatpush1.msra.mxu1 %v2245_v6  ;;  %v2050_v5 = vunpack.c.l.bf16 %v1480_v14  ;;  %v2128_v6 = vunpack.c.l.bf16 %v1522_v51  ;;  %v1417_v14 = vld [vmem:[%s12575_s15 + $0x3b8] sm:$0xff] }
 0x21c   :  { %2830 = vmatprep.subr.mxu0 %v1739_v10  ;;  %2889 = vmatprep.subr.mxu1 %v2233_v11  ;;  %v2038_v10 = vunpack.c.h.bf16 %v1473_v0  ;;  %v2116_v11 = vunpack.c.h.bf16 %v1515_v1  ;;  %v1641_v51 = vld [vmem:[%s12575_s15 + $0xa38] sm:$0xff] }
 0x21d   :  { %2831 = vmatpush1.msra.mxu0 %v1738_v12  ;;  %2890 = vmatpush1.msra.mxu1 %v2232_v13  ;;  %v2037_v12 = vunpack.c.l.bf16 %v1473_v0  ;;  %v2115_v13 = vunpack.c.l.bf16 %v1515_v1  ;;  %v1410_v0 = vld [vmem:[%s12575_s15 + $0x384] sm:$0xff] }
 0x21e   :  { %2832 = vmatprep.subr.mxu0 %v1726_v17  ;;  %2891 = vmatprep.subr.mxu1 %v2220_v18  ;;  %v2025_v17 = vunpack.c.h.bf16 %v1466_v7  ;;  %v2441_v18 = vunpack.c.h.bf16 %v1690_v8  ;;  %v1634_v1 = vld [vmem:[%s12575_s15 + $0xa04] sm:$0xff] }
 0x21f   :  { %2833 = vmatpush1.msra.mxu0 %v1725_v19  ;;  %2892 = vmatpush1.msra.mxu1 %v2219_v20  ;;  %v2024_v19 = vunpack.c.l.bf16 %v1466_v7  ;;  %v2440_v20 = vunpack.c.l.bf16 %v1690_v8  ;;  %v1403_v7 = vld [vmem:[%s12575_s15 + $0x350] sm:$0xff] }
 0x220   :  { %2834 = vmatprep.subr.mxu0 %v1713_v23  ;;  %2893 = vmatprep.subr.mxu1 %v2207_v24  ;;  %v2012_v23 = vunpack.c.h.bf16 %v1459_v15  ;;  %v2428_v24 = vunpack.c.h.bf16 %v1683_v16  ;;  %v1627_v8 = vld [vmem:[%s12575_s15 + $0x9d0] sm:$0xff] }
 0x221   :  { %2835 = vmatpush1.msra.mxu0 %v1712_v25  ;;  %2894 = vmatpush1.msra.mxu1 %v2206_v26  ;;  %v2011_v25 = vunpack.c.l.bf16 %v1459_v15  ;;  %v2427_v26 = vunpack.c.l.bf16 %v1683_v16  ;;  %v1908_v15 = vunpack.c.h.bf16 %v1403_v7  ;;  %v2324_v16 = vunpack.c.h.bf16 %v1627_v8 }
 0x222   :  { %2836 = vmatprep.subr.mxu0 %v1700_v30  ;;  %2895 = vmatprep.subr.mxu1 %v2194_v31  ;;  %v1999_v30 = vunpack.c.h.bf16 %v1452_v21  ;;  %v2415_v31 = vunpack.c.h.bf16 %v1676_v22 }
 0x223   :  { %2837 = vmatpush1.msra.mxu0 %v1699_v32  ;;  %2896 = vmatpush1.msra.mxu1 %v2193_v33  ;;  %v1998_v32 = vunpack.c.l.bf16 %v1452_v21  ;;  %v2414_v33 = vunpack.c.l.bf16 %v1676_v22 }
 0x224   :  { %2838 = vmatprep.subr.mxu0 %v2103_v37  ;;  %2897 = vmatprep.subr.mxu1 %v2181_v38  ;;  %v1986_v37 = vunpack.c.h.bf16 %v1445_v28  ;;  %v2402_v38 = vunpack.c.h.bf16 %v1669_v29 }
 0x225   :  { %2839 = vmatpush2.msra.mxu0 %v2102_v40  ;;  %2898 = vmatpush1.msra.mxu1 %v2180_v41  ;;  %v1985_v40 = vunpack.c.l.bf16 %v1445_v28  ;;  %v2401_v41 = vunpack.c.l.bf16 %v1669_v29  ;;  %v1383_v28 = vld [vmem:[%s12575_s15 + $0x2bc] sm:$0xff] }
 0x226   :  { %2840 = vmatprep.subr.mxu0 %v2090_v44  ;;  %2899 = vmatprep.subr.mxu1 %v2168_v45  ;;  %v1973_v44 = vunpack.c.h.bf16 %v1438_v35  ;;  %v2389_v45 = vunpack.c.h.bf16 %v1662_v36  ;;  %v1607_v29 = vld [vmem:[%s12575_s15 + $0x93c] sm:$0xff] }
 0x227   :  { %2841 = vmatpush2.msra.mxu0 %v2089_v46  ;;  %2900 = vmatpush1.msra.mxu1 %v2167_v47  ;;  %v1972_v46 = vunpack.c.l.bf16 %v1438_v35  ;;  %v2388_v47 = vunpack.c.l.bf16 %v1662_v36  ;;  %v1376_v35 = vld [vmem:[%s12575_s15 + $0x288] sm:$0xff] }
 0x228   :  { %2842 = vmatprep.subr.mxu0 %v2077_v59  ;;  %2901 = vmatprep.subr.mxu1 %v2155_v49  ;;  %v1960_v59 = vunpack.c.h.bf16 %v1431_v42  ;;  %v2376_v49 = vunpack.c.h.bf16 %v1655_v43  ;;  %v1600_v36 = vld [vmem:[%s12575_s15 + $0x908] sm:$0xff] }
 0x229   :  { %2843 = vmatpush2.msra.mxu0 %v2076_v9  ;;  %2902 = vmatpush1.msra.mxu1 %v2154_v50  ;;  %v1959_v9 = vunpack.c.l.bf16 %v1431_v42  ;;  %v2375_v50 = vunpack.c.l.bf16 %v1655_v43  ;;  %v1369_v42 = vld [vmem:[%s12575_s15 + $0x254] sm:$0xff] }
 0x22a   :  { %2844 = vmatprep.subr.mxu0 %v2064_v53  ;;  %2903 = vmatprep.subr.mxu1 %v2142_v54  ;;  %v1947_v53 = vunpack.c.h.bf16 %v1424_v58  ;;  %v2363_v54 = vunpack.c.h.bf16 %v1648_v48  ;;  %v1593_v43 = vld [vmem:[%s12575_s15 + $0x8d4] sm:$0xff] }
 0x22b   :  { %2845 = vmatpush2.msra.mxu0 %v2063_v56  ;;  %2904 = vmatpush1.msra.mxu1 %v2141_v57  ;;  %v1946_v56 = vunpack.c.l.bf16 %v1424_v58  ;;  %v2362_v57 = vunpack.c.l.bf16 %v1648_v48  ;;  %v1362_v58 = vld [vmem:[%s12575_s15 + $0x220] sm:$0xff] }
 0x22c   :  { %2846 = vmatprep.subr.mxu0 %v2051_v2  ;;  %2905 = vmatprep.subr.mxu1 %v2129_v4  ;;  %v1934_v2 = vunpack.c.h.bf16 %v1417_v14  ;;  %v2350_v4 = vunpack.c.h.bf16 %v1641_v51  ;;  %v1586_v48 = vld [vmem:[%s12575_s15 + $0x8a0] sm:$0xff] }
 0x22d   :  { %2847 = vmatpush2.msra.mxu0 %v2050_v5  ;;  %2906 = vmatpush1.msra.mxu1 %v2128_v6  ;;  %v1933_v5 = vunpack.c.l.bf16 %v1417_v14  ;;  %v2349_v6 = vunpack.c.l.bf16 %v1641_v51  ;;  %v1355_v14 = vld [vmem:[%s12575_s15 + $0x1ec] sm:$0xff] }
 0x22e   :  { %2848 = vmatprep.subr.mxu0 %v2038_v10  ;;  %2907 = vmatprep.subr.mxu1 %v2116_v11  ;;  %v1921_v10 = vunpack.c.h.bf16 %v1410_v0  ;;  %v2337_v11 = vunpack.c.h.bf16 %v1634_v1  ;;  %v1579_v51 = vld [vmem:[%s12575_s15 + $0x86c] sm:$0xff] }
 0x22f   :  { %2849 = vmatpush2.msra.mxu0 %v2037_v12  ;;  %2908 = vmatpush1.msra.mxu1 %v2115_v13  ;;  %v1920_v12 = vunpack.c.l.bf16 %v1410_v0  ;;  %v2336_v13 = vunpack.c.l.bf16 %v1634_v1  ;;  %v1348_v0 = vld [vmem:[%s12575_s15 + $0x1b8] sm:$0xff] }
 0x230   :  { %2850 = vmatprep.subr.mxu0 %v2025_v17  ;;  %2921 = vmatprep.subr.mxu1 %v2441_v18  ;;  %v1397_v17 = vld [vmem:[%s12575_s15 + $0x324] sm:$0xff]  ;;  %v1572_v1 = vld [vmem:[%s12575_s15 + $0x838] sm:$0xff] }
 0x231   :  { %2851 = vmatpush2.msra.mxu0 %v2024_v19  ;;  %2922 = vmatpush2.msra.mxu1 %v2440_v20  ;;  %v1621_v18 = vld [vmem:[%s12575_s15 + $0x9a4] sm:$0xff]  ;;  %v1907_v19 = vunpack.c.l.bf16 %v1403_v7  ;;  %v2323_v20 = vunpack.c.l.bf16 %v1627_v8  ;;  %v1897_v21 = vunpack.c.h.bf16 %v1397_v17 }
 0x232   :  { %2852 = vmatprep.subr.mxu0 %v2012_v23  ;;  %2923 = vmatprep.subr.mxu1 %v2428_v24  ;;  %v2313_v22 = vunpack.c.h.bf16 %v1621_v18  ;;  %v1390_v23 = vld [vmem:[%s12575_s15 + $0x2f0] sm:$0xff]  ;;  %v1341_v7 = vld [vmem:[%s12575_s15 + $0x184] sm:$0xff] }
 0x233   :  { %2853 = vmatpush2.msra.mxu0 %v2011_v25  ;;  %2924 = vmatpush2.msra.mxu1 %v2427_v26  ;;  %v1614_v24 = vld [vmem:[%s12575_s15 + $0x970] sm:$0xff]  ;;  %v1896_v25 = vunpack.c.l.bf16 %v1397_v17  ;;  %v2312_v26 = vunpack.c.l.bf16 %v1621_v18  ;;  %v1565_v8 = vld [vmem:[%s12575_s15 + $0x804] sm:$0xff]  ;;  %v1793_v17 = vunpack.c.h.bf16 %v1341_v7 }
 0x234   :  { %2854 = vmatprep.subr.mxu0 %v1999_v30  ;;  %2925 = vmatprep.subr.mxu1 %v2415_v31  ;;  %v1884_v30 = vunpack.c.h.bf16 %v1390_v23  ;;  %v2300_v31 = vunpack.c.h.bf16 %v1614_v24  ;;  %v2209_v18 = vunpack.c.h.bf16 %v1565_v8 }
 0x235   :  { %2855 = vmatpush2.msra.mxu0 %v1998_v32  ;;  %2926 = vmatpush2.msra.mxu1 %v2414_v33  ;;  %v1883_v32 = vunpack.c.l.bf16 %v1390_v23  ;;  %v2299_v33 = vunpack.c.l.bf16 %v1614_v24 }
 0x236   :  { %2856 = vmatprep.subr.mxu0 %v1986_v37  ;;  %2927 = vmatprep.subr.mxu1 %v2402_v38  ;;  %v1871_v37 = vunpack.c.h.bf16 %v1383_v28  ;;  %v2287_v38 = vunpack.c.h.bf16 %v1607_v29 }
 0x237   :  { %2857 = vmatpush2.msra.mxu0 %v1985_v40  ;;  %2928 = vmatpush2.msra.mxu1 %v2401_v41  ;;  %v1870_v40 = vunpack.c.l.bf16 %v1383_v28  ;;  %v2286_v41 = vunpack.c.l.bf16 %v1607_v29  ;;  %v1320_v28 = vld [vmem:[%s12575_s15 + $0xe8] sm:$0xff] }
 0x238   :  { %2858 = vmatprep.subr.mxu0 %v1973_v44  ;;  %2929 = vmatprep.subr.mxu1 %v2389_v45  ;;  %v1858_v44 = vunpack.c.h.bf16 %v1376_v35  ;;  %v2274_v45 = vunpack.c.h.bf16 %v1600_v36  ;;  %v1544_v29 = vld [vmem:[%s12575_s15 + $0x768] sm:$0xff] }
 0x239   :  { %2859 = vmatpush2.msra.mxu0 %v1972_v46  ;;  %2930 = vmatpush2.msra.mxu1 %v2388_v47  ;;  %v1857_v46 = vunpack.c.l.bf16 %v1376_v35  ;;  %v2273_v47 = vunpack.c.l.bf16 %v1600_v36  ;;  %v1313_v35 = vld [vmem:[%s12575_s15 + $0xb4] sm:$0xff] }
 0x23a   :  { %2860 = vmatprep.subr.mxu0 %v1960_v59  ;;  %2931 = vmatprep.subr.mxu1 %v2376_v49  ;;  %v1845_v59 = vunpack.c.h.bf16 %v1369_v42  ;;  %v2261_v49 = vunpack.c.h.bf16 %v1593_v43  ;;  %v1537_v36 = vld [vmem:[%s12575_s15 + $0x734] sm:$0xff] }
 0x23b   :  { %2861 = vmatpush2.msra.mxu0 %v1959_v9  ;;  %2932 = vmatpush2.msra.mxu1 %v2375_v50  ;;  %v1844_v9 = vunpack.c.l.bf16 %v1369_v42  ;;  %v2260_v50 = vunpack.c.l.bf16 %v1593_v43  ;;  %v1306_v42 = vld [vmem:[%s12575_s15 + $0x80] sm:$0xff] }
 0x23c   :  { %2862 = vmatprep.subr.mxu0 %v1947_v53  ;;  %2933 = vmatprep.subr.mxu1 %v2363_v54  ;;  %v1832_v53 = vunpack.c.h.bf16 %v1362_v58  ;;  %v2248_v54 = vunpack.c.h.bf16 %v1586_v48  ;;  %v1530_v43 = vld [vmem:[%s12575_s15 + $0x700] sm:$0xff] }
 0x23d   :  { %2863 = vmatpush2.msra.mxu0 %v1946_v56  ;;  %2934 = vmatpush2.msra.mxu1 %v2362_v57  ;;  %v1831_v56 = vunpack.c.l.bf16 %v1362_v58  ;;  %v2247_v57 = vunpack.c.l.bf16 %v1586_v48  ;;  %v1299_v58 = vld [vmem:[%s12575_s15 + $0x4c] sm:$0xff] }
 0x23e   :  { %2864 = vmatprep.subr.mxu0 %v1934_v2  ;;  %2935 = vmatprep.subr.mxu1 %v2350_v4  ;;  %v1819_v2 = vunpack.c.h.bf16 %v1355_v14  ;;  %v2235_v4 = vunpack.c.h.bf16 %v1579_v51  ;;  %v1523_v48 = vld [vmem:[%s12575_s15 + $0x6cc] sm:$0xff] }
 0x23f   :  { %2865 = vmatpush2.msra.mxu0 %v1933_v5  ;;  %2936 = vmatpush2.msra.mxu1 %v2349_v6  ;;  %v1818_v5 = vunpack.c.l.bf16 %v1355_v14  ;;  %v2234_v6 = vunpack.c.l.bf16 %v1579_v51  ;;  %v1292_v14 = vld [vmem:[%s12575_s15 + $0x18] sm:$0xff] }
 0x240   :  { %2866 = vmatprep.subr.mxu0 %v1921_v10  ;;  %2937 = vmatprep.subr.mxu1 %v2337_v11  ;;  %v1806_v10 = vunpack.c.h.bf16 %v1348_v0  ;;  %v2222_v11 = vunpack.c.h.bf16 %v1572_v1  ;;  %v1516_v51 = vld [vmem:[%s12575_s15 + $0x698] sm:$0xff] }
 0x241   :  { %2867 = vmatpush2.msra.mxu0 %v1920_v12  ;;  %2938 = vmatpush2.msra.mxu1 %v2336_v13  ;;  %v1805_v12 = vunpack.c.l.bf16 %v1348_v0  ;;  %v2221_v13 = vunpack.c.l.bf16 %v1572_v1  ;;  %v1509_v0 = vld [vmem:[%s12575_s15 + $0x664] sm:$0xff]  ;;  %v1691_v1 = vld [vmem:[%s12575_s15 + $0xbac] sm:$0xff] }
 0x242   :  { %2868 = vmatprep.subr.mxu0 %v1908_v15  ;;  %2939 = vmatprep.subr.mxu1 %v2324_v16  ;;  %v1334_v15 = vld [vmem:[%s12575_s15 + $0x150] sm:$0xff] }
 0x243   :  { %2869 = vmatpush2.msra.mxu0 %v1907_v19  ;;  %2940 = vmatpush2.msra.mxu1 %v2323_v20  ;;  %v1558_v16 = vld [vmem:[%s12575_s15 + $0x7d0] sm:$0xff]  ;;  %v1792_v19 = vunpack.c.l.bf16 %v1341_v7  ;;  %v2208_v20 = vunpack.c.l.bf16 %v1565_v8  ;;  %v1780_v23 = vunpack.c.h.bf16 %v1334_v15  ;;  %v1684_v8 = vld [vmem:[%s12575_s15 + $0xb78] sm:$0xff] }
 0x244   :  { %2871 = vmatmul.mubr.f32.vlgmr.msra.gmra.mxu0 %v9005_v62  ;;  %2942 = vmatmul.mubr.f32.vlgmr.msra.gmra.mxu1 %v9007_v63  ;;  %v2196_v24 = vunpack.c.h.bf16 %v1558_v16  ;;  %v1502_v7 = vld [vmem:[%s12575_s15 + $0x630] sm:$0xff] }
 0x245   :  { %2948 = vmatprep.subr.mxu1 %v1897_v21  ;;  %3019 = vmatprep.subr.mxu0 %v2313_v22  ;;  %v1327_v21 = vld [vmem:[%s12575_s15 + $0x11c] sm:$0xff] }
 0x246   :  { %2949 = vmatpush1.msra.mxu1 %v1896_v25  ;;  %3012 = vmatprep.mubr.f32.mxu1 %v9001_v60  ;;  %v1551_v22 = vld [vmem:[%s12575_s15 + $0x79c] sm:$0xff]  ;;  %v1779_v25 = vunpack.c.l.bf16 %v1334_v15 }
 0x247   :  { %3020 = vmatpush1.msra.mxu0 %v2312_v26  ;;  %8096 = vmatprep.mubr.msk.f32.mxu0 %vm2518_vm6, %v9003_v61  ;;  %v2195_v26 = vunpack.c.l.bf16 %v1558_v16  ;;  %v1495_v15 = vld [vmem:[%s12575_s15 + $0x5fc] sm:$0xff]  ;;  %v1677_v16 = vld [vmem:[%s12575_s15 + $0xb44] sm:$0xff] }
 0x248   :  { %2950 = vmatprep.subr.mxu1 %v1884_v30  ;;  %3021 = vmatprep.subr.mxu0 %v2300_v31  ;;  %v1767_v30 = vunpack.c.h.bf16 %v1327_v21  ;;  %v2183_v31 = vunpack.c.h.bf16 %v1551_v22 }
 0x249   :  { %2951 = vmatpush1.msra.mxu1 %v1883_v32  ;;  %3022 = vmatpush1.msra.mxu0 %v2299_v33  ;;  %v1766_v32 = vunpack.c.l.bf16 %v1327_v21  ;;  %v2182_v33 = vunpack.c.l.bf16 %v1551_v22  ;;  %v1488_v21 = vld [vmem:[%s12575_s15 + $0x5c8] sm:$0xff]  ;;  %v1670_v22 = vld [vmem:[%s12575_s15 + $0xb10] sm:$0xff] }
 0x24a   :  { %2952 = vmatprep.subr.mxu1 %v1871_v37  ;;  %3023 = vmatprep.subr.mxu0 %v2287_v38  ;;  %v1754_v37 = vunpack.c.h.bf16 %v1320_v28  ;;  %v2170_v38 = vunpack.c.h.bf16 %v1544_v29 }
 0x24b   :  { %2953 = vmatpush1.msra.mxu1 %v1870_v40  ;;  %3024 = vmatpush1.msra.mxu0 %v2286_v41  ;;  %v1753_v40 = vunpack.c.l.bf16 %v1320_v28  ;;  %v2169_v41 = vunpack.c.l.bf16 %v1544_v29  ;;  %v1481_v28 = vld [vmem:[%s12575_s15 + $0x594] sm:$0xff]  ;;  %v1663_v29 = vld [vmem:[%s12575_s15 + $0xadc] sm:$0xff] }
 0x24c   :  { %2954 = vmatprep.subr.mxu1 %v1858_v44  ;;  %3025 = vmatprep.subr.mxu0 %v2274_v45  ;;  %v1741_v44 = vunpack.c.h.bf16 %v1313_v35  ;;  %v2157_v45 = vunpack.c.h.bf16 %v1537_v36 }
 0x24d   :  { %2955 = vmatpush1.msra.mxu1 %v1857_v46  ;;  %3026 = vmatpush1.msra.mxu0 %v2273_v47  ;;  %v1740_v46 = vunpack.c.l.bf16 %v1313_v35  ;;  %v2156_v47 = vunpack.c.l.bf16 %v1537_v36  ;;  %v1474_v35 = vld [vmem:[%s12575_s15 + $0x560] sm:$0xff]  ;;  %v1656_v36 = vld [vmem:[%s12575_s15 + $0xaa8] sm:$0xff] }
 0x24e   :  { %2956 = vmatprep.subr.mxu1 %v1845_v59  ;;  %3027 = vmatprep.subr.mxu0 %v2261_v49  ;;  %v1728_v59 = vunpack.c.h.bf16 %v1306_v42  ;;  %v2144_v49 = vunpack.c.h.bf16 %v1530_v43 }
 0x24f   :  { %2957 = vmatpush1.msra.mxu1 %v1844_v9  ;;  %3028 = vmatpush1.msra.mxu0 %v2260_v50  ;;  %v1727_v9 = vunpack.c.l.bf16 %v1306_v42  ;;  %v2143_v50 = vunpack.c.l.bf16 %v1530_v43  ;;  %v1467_v42 = vld [vmem:[%s12575_s15 + $0x52c] sm:$0xff]  ;;  %v1649_v43 = vld [vmem:[%s12575_s15 + $0xa74] sm:$0xff] }
 0x250   :  { %2958 = vmatprep.subr.mxu1 %v1832_v53  ;;  %3029 = vmatprep.subr.mxu0 %v2248_v54  ;;  %v1715_v53 = vunpack.c.h.bf16 %v1299_v58  ;;  %v2131_v54 = vunpack.c.h.bf16 %v1523_v48 }
 0x251   :  { %2959 = vmatpush1.msra.mxu1 %v1831_v56  ;;  %3030 = vmatpush1.msra.mxu0 %v2247_v57  ;;  %v1714_v56 = vunpack.c.l.bf16 %v1299_v58  ;;  %v2130_v57 = vunpack.c.l.bf16 %v1523_v48  ;;  %v1460_v58 = vld [vmem:[%s12575_s15 + $0x4f8] sm:$0xff]  ;;  %v1642_v48 = vld [vmem:[%s12575_s15 + $0xa40] sm:$0xff] }
 0x252   :  { %2960 = vmatprep.subr.mxu1 %v1819_v2  ;;  %3031 = vmatprep.subr.mxu0 %v2235_v4  ;;  %v1702_v2 = vunpack.c.h.bf16 %v1292_v14  ;;  %v2118_v4 = vunpack.c.h.bf16 %v1516_v51 }
 0x253   :  { %2961 = vmatpush1.msra.mxu1 %v1818_v5  ;;  %3032 = vmatpush1.msra.mxu0 %v2234_v6  ;;  %v1701_v5 = vunpack.c.l.bf16 %v1292_v14  ;;  %v2117_v6 = vunpack.c.l.bf16 %v1516_v51  ;;  %v1453_v14 = vld [vmem:[%s12575_s15 + $0x4c4] sm:$0xff]  ;;  %v1635_v51 = vld [vmem:[%s12575_s15 + $0xa0c] sm:$0xff] }
 0x254   :  { %2962 = vmatprep.subr.mxu1 %v1806_v10  ;;  %3033 = vmatprep.subr.mxu0 %v2222_v11  ;;  %v2105_v10 = vunpack.c.h.bf16 %v1509_v0  ;;  %v2443_v11 = vunpack.c.h.bf16 %v1691_v1 }
 0x255   :  { %2963 = vmatpush1.msra.mxu1 %v1805_v12  ;;  %3034 = vmatpush1.msra.mxu0 %v2221_v13  ;;  %v2104_v12 = vunpack.c.l.bf16 %v1509_v0  ;;  %v2442_v13 = vunpack.c.l.bf16 %v1691_v1  ;;  %v1446_v0 = vld [vmem:[%s12575_s15 + $0x490] sm:$0xff]  ;;  %v1628_v1 = vld [vmem:[%s12575_s15 + $0x9d8] sm:$0xff] }
 0x256   :  { %2964 = vmatprep.subr.mxu1 %v1793_v17  ;;  %3035 = vmatprep.subr.mxu0 %v2209_v18  ;;  %v2092_v17 = vunpack.c.h.bf16 %v1502_v7  ;;  %v2430_v18 = vunpack.c.h.bf16 %v1684_v8 }
 0x257   :  { %2965 = vmatpush1.msra.mxu1 %v1792_v19  ;;  %3036 = vmatpush1.msra.mxu0 %v2208_v20  ;;  %v2091_v19 = vunpack.c.l.bf16 %v1502_v7  ;;  %v2429_v20 = vunpack.c.l.bf16 %v1684_v8  ;;  %v1439_v7 = vld [vmem:[%s12575_s15 + $0x45c] sm:$0xff]  ;;  %v1988_v8 = vunpack.c.h.bf16 %v1446_v0 }
 0x258   :  { %2966 = vmatprep.subr.mxu1 %v1780_v23  ;;  %3037 = vmatprep.subr.mxu0 %v2196_v24  ;;  %v2079_v23 = vunpack.c.h.bf16 %v1495_v15  ;;  %v2417_v24 = vunpack.c.h.bf16 %v1677_v16 }
 0x259   :  { %2967 = vmatpush1.msra.mxu1 %v1779_v25  ;;  %3038 = vmatpush1.msra.mxu0 %v2195_v26  ;;  %v2078_v25 = vunpack.c.l.bf16 %v1495_v15  ;;  %v2416_v26 = vunpack.c.l.bf16 %v1677_v16  ;;  %v1975_v15 = vunpack.c.h.bf16 %v1439_v7  ;;  %v1432_v16 = vld [vmem:[%s12575_s15 + $0x428] sm:$0xff] }
 0x25a   :  { %2968 = vmatprep.subr.mxu1 %v1767_v30  ;;  %3039 = vmatprep.subr.mxu0 %v2183_v31  ;;  %v2066_v30 = vunpack.c.h.bf16 %v1488_v21  ;;  %v2404_v31 = vunpack.c.h.bf16 %v1670_v22 }
 0x25b   :  { %2969 = vmatpush1.msra.mxu1 %v1766_v32  ;;  %3040 = vmatpush1.msra.mxu0 %v2182_v33  ;;  %v2065_v32 = vunpack.c.l.bf16 %v1488_v21  ;;  %v2403_v33 = vunpack.c.l.bf16 %v1670_v22  ;;  %v1425_v21 = vld [vmem:[%s12575_s15 + $0x3f4] sm:$0xff]  ;;  %v1384_v22 = vld [vmem:[%s12575_s15 + $0x2c4] sm:$0xff] }
 0x25c   :  { %2970 = vmatprep.subr.mxu1 %v1754_v37  ;;  %3041 = vmatprep.subr.mxu0 %v2170_v38  ;;  %v2053_v37 = vunpack.c.h.bf16 %v1481_v28  ;;  %v2391_v38 = vunpack.c.h.bf16 %v1663_v29 }
 0x25d   :  { %2971 = vmatpush1.msra.mxu1 %v1753_v40  ;;  %3042 = vmatpush1.msra.mxu0 %v2169_v41  ;;  %v2052_v40 = vunpack.c.l.bf16 %v1481_v28  ;;  %v2390_v41 = vunpack.c.l.bf16 %v1663_v29  ;;  %v1418_v28 = vld [vmem:[%s12575_s15 + $0x3c0] sm:$0xff]  ;;  %v1377_v29 = vld [vmem:[%s12575_s15 + $0x290] sm:$0xff] }
 0x25e   :  { %2972 = vmatprep.subr.mxu1 %v1741_v44  ;;  %3043 = vmatprep.subr.mxu0 %v2157_v45  ;;  %v2040_v44 = vunpack.c.h.bf16 %v1474_v35  ;;  %v2378_v45 = vunpack.c.h.bf16 %v1656_v36 }
 0x25f   :  { %2973 = vmatpush1.msra.mxu1 %v1740_v46  ;;  %3044 = vmatpush1.msra.mxu0 %v2156_v47  ;;  %v2039_v46 = vunpack.c.l.bf16 %v1474_v35  ;;  %v2377_v47 = vunpack.c.l.bf16 %v1656_v36  ;;  %v1411_v35 = vld [vmem:[%s12575_s15 + $0x38c] sm:$0xff]  ;;  %v1370_v36 = vld [vmem:[%s12575_s15 + $0x25c] sm:$0xff] }
 0x260   :  { %2974 = vmatprep.subr.mxu1 %v1728_v59  ;;  %3045 = vmatprep.subr.mxu0 %v2144_v49  ;;  %v2027_v59 = vunpack.c.h.bf16 %v1467_v42  ;;  %v2365_v49 = vunpack.c.h.bf16 %v1649_v43 }
 0x261   :  { %2975 = vmatpush1.msra.mxu1 %v1727_v9  ;;  %3046 = vmatpush1.msra.mxu0 %v2143_v50  ;;  %v2026_v9 = vunpack.c.l.bf16 %v1467_v42  ;;  %v2364_v50 = vunpack.c.l.bf16 %v1649_v43  ;;  %v1404_v42 = vld [vmem:[%s12575_s15 + $0x358] sm:$0xff]  ;;  %v1363_v43 = vld [vmem:[%s12575_s15 + $0x228] sm:$0xff] }
 0x262   :  { %2976 = vmatprep.subr.mxu1 %v1715_v53  ;;  %3047 = vmatprep.subr.mxu0 %v2131_v54  ;;  %v2014_v53 = vunpack.c.h.bf16 %v1460_v58  ;;  %v2352_v54 = vunpack.c.h.bf16 %v1642_v48 }
 0x263   :  { %2977 = vmatpush1.msra.mxu1 %v1714_v56  ;;  %3048 = vmatpush1.msra.mxu0 %v2130_v57  ;;  %v2013_v56 = vunpack.c.l.bf16 %v1460_v58  ;;  %v2351_v57 = vunpack.c.l.bf16 %v1642_v48  ;;  %v1356_v58 = vld [vmem:[%s12575_s15 + $0x1f4] sm:$0xff]  ;;  %v1910_v48 = vunpack.c.h.bf16 %v1404_v42 }
 0x264   :  { %2978 = vmatprep.subr.mxu1 %v1702_v2  ;;  %3049 = vmatprep.subr.mxu0 %v2118_v4  ;;  %v2001_v2 = vunpack.c.h.bf16 %v1453_v14  ;;  %v2339_v4 = vunpack.c.h.bf16 %v1635_v51 }
 0x265   :  { %2979 = vmatpush1.msra.mxu1 %v1701_v5  ;;  %3050 = vmatpush1.msra.mxu0 %v2117_v6  ;;  %v2000_v5 = vunpack.c.l.bf16 %v1453_v14  ;;  %v2338_v6 = vunpack.c.l.bf16 %v1635_v51  ;;  %v1821_v14 = vunpack.c.h.bf16 %v1356_v58  ;;  %v1349_v51 = vld [vmem:[%s12575_s15 + $0x1c0] sm:$0xff] }
 0x266   :  { %2980 = vmatprep.subr.mxu1 %v2105_v10  ;;  %3063 = vmatprep.subr.mxu0 %v2443_v11  ;;  %v2326_v10 = vunpack.c.h.bf16 %v1628_v1  ;;  %v1398_v11 = vld [vmem:[%s12575_s15 + $0x32c] sm:$0xff] }
 0x267   :  { %2981 = vmatpush2.msra.mxu1 %v2104_v12  ;;  %3064 = vmatpush2.msra.mxu0 %v2442_v13  ;;  %v1987_v12 = vunpack.c.l.bf16 %v1446_v0  ;;  %v2325_v13 = vunpack.c.l.bf16 %v1628_v1  ;;  %v1342_v0 = vld [vmem:[%s12575_s15 + $0x18c] sm:$0xff]  ;;  %v1608_v1 = vld [vmem:[%s12575_s15 + $0x944] sm:$0xff] }
 0x268   :  { %2982 = vmatprep.subr.mxu1 %v2092_v17  ;;  %3065 = vmatprep.subr.mxu0 %v2430_v18  ;;  %v1391_v17 = vld [vmem:[%s12575_s15 + $0x2f8] sm:$0xff]  ;;  %v1974_v18 = vunpack.c.l.bf16 %v1439_v7 }
 0x269   :  { %2983 = vmatpush2.msra.mxu1 %v2091_v19  ;;  %3066 = vmatpush2.msra.mxu0 %v2429_v20  ;;  %v1899_v19 = vunpack.c.h.bf16 %v1398_v11  ;;  %v1898_v20 = vunpack.c.l.bf16 %v1398_v11  ;;  %v1335_v7 = vld [vmem:[%s12575_s15 + $0x158] sm:$0xff]  ;;  %v2289_v11 = vunpack.c.h.bf16 %v1608_v1 }
 0x26a   :  { %2984 = vmatprep.subr.mxu1 %v2079_v23  ;;  %3067 = vmatprep.subr.mxu0 %v2417_v24  ;;  %v1962_v23 = vunpack.c.h.bf16 %v1432_v16  ;;  %v1886_v24 = vunpack.c.h.bf16 %v1391_v17 }
 0x26b   :  { %2985 = vmatpush2.msra.mxu1 %v2078_v25  ;;  %3068 = vmatpush2.msra.mxu0 %v2416_v26  ;;  %v1961_v25 = vunpack.c.l.bf16 %v1432_v16  ;;  %v1885_v26 = vunpack.c.l.bf16 %v1391_v17  ;;  %v1594_v16 = vld [vmem:[%s12575_s15 + $0x8dc] sm:$0xff]  ;;  %v1782_v17 = vunpack.c.h.bf16 %v1335_v7 }
 0x26c   :  { %2986 = vmatprep.subr.mxu1 %v2066_v30  ;;  %3069 = vmatprep.subr.mxu0 %v2404_v31  ;;  %v1949_v30 = vunpack.c.h.bf16 %v1425_v21  ;;  %v1873_v31 = vunpack.c.h.bf16 %v1384_v22 }
 0x26d   :  { %2987 = vmatpush2.msra.mxu1 %v2065_v32  ;;  %3070 = vmatpush2.msra.mxu0 %v2403_v33  ;;  %v1948_v32 = vunpack.c.l.bf16 %v1425_v21  ;;  %v1872_v33 = vunpack.c.l.bf16 %v1384_v22  ;;  %v1321_v21 = vld [vmem:[%s12575_s15 + $0xf0] sm:$0xff]  ;;  %v1587_v22 = vld [vmem:[%s12575_s15 + $0x8a8] sm:$0xff] }
 0x26e   :  { %2988 = vmatprep.subr.mxu1 %v2053_v37  ;;  %3071 = vmatprep.subr.mxu0 %v2391_v38  ;;  %v1936_v37 = vunpack.c.h.bf16 %v1418_v28  ;;  %v1860_v38 = vunpack.c.h.bf16 %v1377_v29 }
 0x26f   :  { %2989 = vmatpush2.msra.mxu1 %v2052_v40  ;;  %3072 = vmatpush2.msra.mxu0 %v2390_v41  ;;  %v1935_v40 = vunpack.c.l.bf16 %v1418_v28  ;;  %v1859_v41 = vunpack.c.l.bf16 %v1377_v29  ;;  %v1314_v28 = vld [vmem:[%s12575_s15 + $0xbc] sm:$0xff]  ;;  %v1580_v29 = vld [vmem:[%s12575_s15 + $0x874] sm:$0xff] }
 0x270   :  { %2990 = vmatprep.subr.mxu1 %v2040_v44  ;;  %3073 = vmatprep.subr.mxu0 %v2378_v45  ;;  %v1923_v44 = vunpack.c.h.bf16 %v1411_v35  ;;  %v1847_v45 = vunpack.c.h.bf16 %v1370_v36 }
 0x271   :  { %2991 = vmatpush2.msra.mxu1 %v2039_v46  ;;  %3074 = vmatpush2.msra.mxu0 %v2377_v47  ;;  %v1922_v46 = vunpack.c.l.bf16 %v1411_v35  ;;  %v1846_v47 = vunpack.c.l.bf16 %v1370_v36  ;;  %v1307_v35 = vld [vmem:[%s12575_s15 + $0x88] sm:$0xff]  ;;  %v1573_v36 = vld [vmem:[%s12575_s15 + $0x840] sm:$0xff] }
 0x272   :  { %2992 = vmatprep.subr.mxu1 %v2027_v59  ;;  %3075 = vmatprep.subr.mxu0 %v2365_v49  ;;  %v1834_v59 = vunpack.c.h.bf16 %v1363_v43  ;;  %v1622_v49 = vld [vmem:[%s12575_s15 + $0x9ac] sm:$0xff] }
 0x273   :  { %2993 = vmatpush2.msra.mxu1 %v2026_v9  ;;  %3076 = vmatpush2.msra.mxu0 %v2364_v50  ;;  %v1909_v9 = vunpack.c.l.bf16 %v1404_v42  ;;  %v1833_v50 = vunpack.c.l.bf16 %v1363_v43  ;;  %v1300_v42 = vld [vmem:[%s12575_s15 + $0x54] sm:$0xff]  ;;  %v1566_v43 = vld [vmem:[%s12575_s15 + $0x80c] sm:$0xff] }
 0x274   :  { %2994 = vmatprep.subr.mxu1 %v2014_v53  ;;  %3077 = vmatprep.subr.mxu0 %v2352_v54  ;;  %v1615_v53 = vld [vmem:[%s12575_s15 + $0x978] sm:$0xff]  ;;  %v1820_v54 = vunpack.c.l.bf16 %v1356_v58  ;;  %v1293_v58 = vld [vmem:[%s12575_s15 + $0x20] sm:$0xff] }
 0x275   :  { %2995 = vmatpush2.msra.mxu1 %v2013_v56  ;;  %3078 = vmatpush2.msra.mxu0 %v2351_v57  ;;  %v2315_v56 = vunpack.c.h.bf16 %v1622_v49  ;;  %v2314_v57 = vunpack.c.l.bf16 %v1622_v49  ;;  %v2211_v49 = vunpack.c.h.bf16 %v1566_v43 }
 0x276   :  { %2996 = vmatprep.subr.mxu1 %v2001_v2  ;;  %3079 = vmatprep.subr.mxu0 %v2339_v4  ;;  %v1808_v2 = vunpack.c.h.bf16 %v1349_v51  ;;  %v2302_v4 = vunpack.c.h.bf16 %v1615_v53 }
 0x277   :  { %2997 = vmatpush2.msra.mxu1 %v2000_v5  ;;  %3080 = vmatpush2.msra.mxu0 %v2338_v6  ;;  %v1807_v5 = vunpack.c.l.bf16 %v1349_v51  ;;  %v2301_v6 = vunpack.c.l.bf16 %v1615_v53  ;;  %v1552_v51 = vld [vmem:[%s12575_s15 + $0x7a4] sm:$0xff]  ;;  %v1704_v53 = vunpack.c.h.bf16 %v1293_v58 }
 0x278   :  { %2998 = vmatprep.subr.mxu1 %v1988_v8  ;;  %3081 = vmatprep.subr.mxu0 %v2326_v10  ;;  %v1601_v8 = vld [vmem:[%s12575_s15 + $0x910] sm:$0xff]  ;;  %v1795_v10 = vunpack.c.h.bf16 %v1342_v0 }
 0x279   :  { %2999 = vmatpush2.msra.mxu1 %v1987_v12  ;;  %3082 = vmatpush2.msra.mxu0 %v2325_v13  ;;  %v1794_v12 = vunpack.c.l.bf16 %v1342_v0  ;;  %v2288_v13 = vunpack.c.l.bf16 %v1608_v1  ;;  %v1503_v0 = vld [vmem:[%s12575_s15 + $0x638] sm:$0xff]  ;;  %v1545_v1 = vld [vmem:[%s12575_s15 + $0x770] sm:$0xff] }
 0x27a   :  { %3000 = vmatprep.subr.mxu1 %v1975_v15  ;;  %3084 = vmatmul.mubr.f32.vlgmr.msra.gmra.mxu0 %v9007_v63  ;;  %v1328_v15 = vld [vmem:[%s12575_s15 + $0x124] sm:$0xff] }
 0x27b   :  { %3090 = vmatprep.subr.mxu0 %v1899_v19  ;;  %3001 = vmatpush2.msra.mxu1 %v1974_v18  ;;  %v2276_v18 = vunpack.c.h.bf16 %v1601_v8  ;;  %v1781_v19 = vunpack.c.l.bf16 %v1335_v7  ;;  %v1496_v7 = vld [vmem:[%s12575_s15 + $0x604] sm:$0xff] }
 0x27c   :  { %3091 = vmatpush1.msra.mxu0 %v1898_v20  ;;  %3154 = vmatprep.mubr.f32.mxu0 %v9001_v60  ;;  %v2275_v20 = vunpack.c.l.bf16 %v1601_v8  ;;  %v1538_v8 = vld [vmem:[%s12575_s15 + $0x73c] sm:$0xff] }
 0x27d   :  { %3002 = vmatprep.subr.mxu1 %v1962_v23  ;;  %3092 = vmatprep.subr.mxu0 %v1886_v24  ;;  %v1769_v23 = vunpack.c.h.bf16 %v1328_v15  ;;  %v2263_v24 = vunpack.c.h.bf16 %v1594_v16 }
 0x27e   :  { %3003 = vmatpush2.msra.mxu1 %v1961_v25  ;;  %3093 = vmatpush1.msra.mxu0 %v1885_v26  ;;  %v1768_v25 = vunpack.c.l.bf16 %v1328_v15  ;;  %v2262_v26 = vunpack.c.l.bf16 %v1594_v16  ;;  %v1489_v15 = vld [vmem:[%s12575_s15 + $0x5d0] sm:$0xff]  ;;  %v1531_v16 = vld [vmem:[%s12575_s15 + $0x708] sm:$0xff] }
 0x27f   :  { %3004 = vmatprep.subr.mxu1 %v1949_v30  ;;  %3094 = vmatprep.subr.mxu0 %v1873_v31  ;;  %v1756_v30 = vunpack.c.h.bf16 %v1321_v21  ;;  %v2250_v31 = vunpack.c.h.bf16 %v1587_v22 }
 0x280   :  { %3005 = vmatpush2.msra.mxu1 %v1948_v32  ;;  %3095 = vmatpush1.msra.mxu0 %v1872_v33  ;;  %v1755_v32 = vunpack.c.l.bf16 %v1321_v21  ;;  %v2249_v33 = vunpack.c.l.bf16 %v1587_v22  ;;  %v1482_v21 = vld [vmem:[%s12575_s15 + $0x59c] sm:$0xff]  ;;  %v1524_v22 = vld [vmem:[%s12575_s15 + $0x6d4] sm:$0xff] }
 0x281   :  { %3006 = vmatprep.subr.mxu1 %v1936_v37  ;;  %3096 = vmatprep.subr.mxu0 %v1860_v38  ;;  %v1743_v37 = vunpack.c.h.bf16 %v1314_v28  ;;  %v2237_v38 = vunpack.c.h.bf16 %v1580_v29 }
 0x282   :  { %3007 = vmatpush2.msra.mxu1 %v1935_v40  ;;  %3097 = vmatpush1.msra.mxu0 %v1859_v41  ;;  %v1742_v40 = vunpack.c.l.bf16 %v1314_v28  ;;  %v2236_v41 = vunpack.c.l.bf16 %v1580_v29  ;;  %v1475_v28 = vld [vmem:[%s12575_s15 + $0x568] sm:$0xff]  ;;  %v1517_v29 = vld [vmem:[%s12575_s15 + $0x6a0] sm:$0xff] }
 0x283   :  { %3008 = vmatprep.subr.mxu1 %v1923_v44  ;;  %3098 = vmatprep.subr.mxu0 %v1847_v45  ;;  %v1730_v44 = vunpack.c.h.bf16 %v1307_v35  ;;  %v2224_v45 = vunpack.c.h.bf16 %v1573_v36 }
 0x284   :  { %3009 = vmatpush2.msra.mxu1 %v1922_v46  ;;  %3099 = vmatpush1.msra.mxu0 %v1846_v47  ;;  %v1729_v46 = vunpack.c.l.bf16 %v1307_v35  ;;  %v2223_v47 = vunpack.c.l.bf16 %v1573_v36  ;;  %v1468_v35 = vld [vmem:[%s12575_s15 + $0x534] sm:$0xff] }
 0x285   :  { %3010 = vmatprep.subr.mxu1 %v1910_v48  ;;  %3100 = vmatprep.subr.mxu0 %v1834_v59  ;;  %v1559_v48 = vld [vmem:[%s12575_s15 + $0x7d8] sm:$0xff]  ;;  %v1717_v59 = vunpack.c.h.bf16 %v1300_v42 }
 0x286   :  { %3011 = vmatpush2.msra.mxu1 %v1909_v9  ;;  %3101 = vmatpush1.msra.mxu0 %v1833_v50  ;;  %v1716_v9 = vunpack.c.l.bf16 %v1300_v42  ;;  %v2210_v50 = vunpack.c.l.bf16 %v1566_v43  ;;  %v1692_v36 = vld [vmem:[%s12575_s15 + $0xbb4] sm:$0xff]  ;;  %v1461_v42 = vld [vmem:[%s12575_s15 + $0x500] sm:$0xff] }
 0x287   :  { %3013 = vmatmul.mubr.f32.vlgmr.msra.gmra.mxu1 %v9005_v62  ;;  %3102 = vmatprep.subr.mxu0 %v1821_v14  ;;  %v1510_v14 = vld [vmem:[%s12575_s15 + $0x66c] sm:$0xff]  ;;  %v1685_v43 = vld [vmem:[%s12575_s15 + $0xb80] sm:$0xff] }
 0x288   :  { %3161 = vmatprep.subr.mxu1 %v2315_v56  ;;  %3103 = vmatpush1.msra.mxu0 %v1820_v54  ;;  %v2198_v54 = vunpack.c.h.bf16 %v1559_v48  ;;  %v1703_v56 = vunpack.c.l.bf16 %v1293_v58  ;;  %v1454_v58 = vld [vmem:[%s12575_s15 + $0x4cc] sm:$0xff] }
 0x289   :  { %3162 = vmatpush1.msra.mxu1 %v2314_v57  ;;  %8097 = vmatprep.mubr.msk.f32.mxu1 %vm2518_vm6, %v9003_v61  ;;  %v2197_v57 = vunpack.c.l.bf16 %v1559_v48  ;;  %v1678_v48 = vld [vmem:[%s12575_s15 + $0xb4c] sm:$0xff] }
 0x28a   :  { %3104 = vmatprep.subr.mxu0 %v1808_v2  ;;  %3163 = vmatprep.subr.mxu1 %v2302_v4  ;;  %v2107_v2 = vunpack.c.h.bf16 %v1510_v14  ;;  %v2185_v4 = vunpack.c.h.bf16 %v1552_v51 }
 0x28b   :  { %3105 = vmatpush1.msra.mxu0 %v1807_v5  ;;  %3164 = vmatpush1.msra.mxu1 %v2301_v6  ;;  %v2106_v5 = vunpack.c.l.bf16 %v1510_v14  ;;  %v2184_v6 = vunpack.c.l.bf16 %v1552_v51  ;;  %v1447_v14 = vld [vmem:[%s12575_s15 + $0x498] sm:$0xff] }
 0x28c   :  { %3106 = vmatprep.subr.mxu0 %v1795_v10  ;;  %3165 = vmatprep.subr.mxu1 %v2289_v11  ;;  %v2094_v10 = vunpack.c.h.bf16 %v1503_v0  ;;  %v2172_v11 = vunpack.c.h.bf16 %v1545_v1  ;;  %v1671_v51 = vld [vmem:[%s12575_s15 + $0xb18] sm:$0xff] }
 0x28d   :  { %3107 = vmatpush1.msra.mxu0 %v1794_v12  ;;  %3166 = vmatpush1.msra.mxu1 %v2288_v13  ;;  %v2093_v12 = vunpack.c.l.bf16 %v1503_v0  ;;  %v2171_v13 = vunpack.c.l.bf16 %v1545_v1  ;;  %v1440_v0 = vld [vmem:[%s12575_s15 + $0x464] sm:$0xff] }
 0x28e   :  { %3108 = vmatprep.subr.mxu0 %v1782_v17  ;;  %3167 = vmatprep.subr.mxu1 %v2276_v18  ;;  %v2081_v17 = vunpack.c.h.bf16 %v1496_v7  ;;  %v2159_v18 = vunpack.c.h.bf16 %v1538_v8  ;;  %v1664_v1 = vld [vmem:[%s12575_s15 + $0xae4] sm:$0xff] }
 0x28f   :  { %3109 = vmatpush1.msra.mxu0 %v1781_v19  ;;  %3168 = vmatpush1.msra.mxu1 %v2275_v20  ;;  %v2080_v19 = vunpack.c.l.bf16 %v1496_v7  ;;  %v2158_v20 = vunpack.c.l.bf16 %v1538_v8  ;;  %v1433_v7 = vld [vmem:[%s12575_s15 + $0x430] sm:$0xff] }
 0x290   :  { %3110 = vmatprep.subr.mxu0 %v1769_v23  ;;  %3169 = vmatprep.subr.mxu1 %v2263_v24  ;;  %v2068_v23 = vunpack.c.h.bf16 %v1489_v15  ;;  %v2146_v24 = vunpack.c.h.bf16 %v1531_v16  ;;  %v1657_v8 = vld [vmem:[%s12575_s15 + $0xab0] sm:$0xff] }
 0x291   :  { %3111 = vmatpush1.msra.mxu0 %v1768_v25  ;;  %3170 = vmatpush1.msra.mxu1 %v2262_v26  ;;  %v2067_v25 = vunpack.c.l.bf16 %v1489_v15  ;;  %v2145_v26 = vunpack.c.l.bf16 %v1531_v16  ;;  %v1426_v15 = vld [vmem:[%s12575_s15 + $0x3fc] sm:$0xff] }
 0x292   :  { %3112 = vmatprep.subr.mxu0 %v1756_v30  ;;  %3171 = vmatprep.subr.mxu1 %v2250_v31  ;;  %v2055_v30 = vunpack.c.h.bf16 %v1482_v21  ;;  %v2133_v31 = vunpack.c.h.bf16 %v1524_v22  ;;  %v1650_v16 = vld [vmem:[%s12575_s15 + $0xa7c] sm:$0xff] }
 0x293   :  { %3113 = vmatpush1.msra.mxu0 %v1755_v32  ;;  %3172 = vmatpush1.msra.mxu1 %v2249_v33  ;;  %v2054_v32 = vunpack.c.l.bf16 %v1482_v21  ;;  %v2132_v33 = vunpack.c.l.bf16 %v1524_v22  ;;  %v1419_v21 = vld [vmem:[%s12575_s15 + $0x3c8] sm:$0xff] }
 0x294   :  { %3114 = vmatprep.subr.mxu0 %v1743_v37  ;;  %3173 = vmatprep.subr.mxu1 %v2237_v38  ;;  %v2042_v37 = vunpack.c.h.bf16 %v1475_v28  ;;  %v2120_v38 = vunpack.c.h.bf16 %v1517_v29  ;;  %v1643_v22 = vld [vmem:[%s12575_s15 + $0xa48] sm:$0xff] }
 0x295   :  { %3115 = vmatpush1.msra.mxu0 %v1742_v40  ;;  %3174 = vmatpush1.msra.mxu1 %v2236_v41  ;;  %v2041_v40 = vunpack.c.l.bf16 %v1475_v28  ;;  %v2119_v41 = vunpack.c.l.bf16 %v1517_v29  ;;  %v1412_v28 = vld [vmem:[%s12575_s15 + $0x394] sm:$0xff] }
 0x296   :  { %3116 = vmatprep.subr.mxu0 %v1730_v44  ;;  %3175 = vmatprep.subr.mxu1 %v2224_v45  ;;  %v2029_v44 = vunpack.c.h.bf16 %v1468_v35  ;;  %v2445_v45 = vunpack.c.h.bf16 %v1692_v36  ;;  %v1636_v29 = vld [vmem:[%s12575_s15 + $0xa14] sm:$0xff] }
 0x297   :  { %3117 = vmatpush1.msra.mxu0 %v1729_v46  ;;  %3176 = vmatpush1.msra.mxu1 %v2223_v47  ;;  %v2028_v46 = vunpack.c.l.bf16 %v1468_v35  ;;  %v2444_v47 = vunpack.c.l.bf16 %v1692_v36  ;;  %v1405_v35 = vld [vmem:[%s12575_s15 + $0x360] sm:$0xff] }
 0x298   :  { %3118 = vmatprep.subr.mxu0 %v1717_v59  ;;  %3177 = vmatprep.subr.mxu1 %v2211_v49  ;;  %v2016_v59 = vunpack.c.h.bf16 %v1461_v42  ;;  %v2432_v49 = vunpack.c.h.bf16 %v1685_v43  ;;  %v1629_v36 = vld [vmem:[%s12575_s15 + $0x9e0] sm:$0xff] }
 0x299   :  { %3119 = vmatpush1.msra.mxu0 %v1716_v9  ;;  %3178 = vmatpush1.msra.mxu1 %v2210_v50  ;;  %v2015_v9 = vunpack.c.l.bf16 %v1461_v42  ;;  %v2431_v50 = vunpack.c.l.bf16 %v1685_v43  ;;  %v1912_v42 = vunpack.c.h.bf16 %v1405_v35  ;;  %v2328_v43 = vunpack.c.h.bf16 %v1629_v36 }
 0x29a   :  { %3120 = vmatprep.subr.mxu0 %v1704_v53  ;;  %3179 = vmatprep.subr.mxu1 %v2198_v54  ;;  %v2003_v53 = vunpack.c.h.bf16 %v1454_v58  ;;  %v2419_v54 = vunpack.c.h.bf16 %v1678_v48 }
 0x29b   :  { %3121 = vmatpush1.msra.mxu0 %v1703_v56  ;;  %3180 = vmatpush1.msra.mxu1 %v2197_v57  ;;  %v2002_v56 = vunpack.c.l.bf16 %v1454_v58  ;;  %v2418_v57 = vunpack.c.l.bf16 %v1678_v48 }
 0x29c   :  { %3122 = vmatprep.subr.mxu0 %v2107_v2  ;;  %3181 = vmatprep.subr.mxu1 %v2185_v4  ;;  %v1990_v2 = vunpack.c.h.bf16 %v1447_v14  ;;  %v2406_v4 = vunpack.c.h.bf16 %v1671_v51 }
 0x29d   :  { %3123 = vmatpush2.msra.mxu0 %v2106_v5  ;;  %3182 = vmatpush1.msra.mxu1 %v2184_v6  ;;  %v1989_v5 = vunpack.c.l.bf16 %v1447_v14  ;;  %v2405_v6 = vunpack.c.l.bf16 %v1671_v51  ;;  %v1385_v14 = vld [vmem:[%s12575_s15 + $0x2cc] sm:$0xff] }
 0x29e   :  { %3124 = vmatprep.subr.mxu0 %v2094_v10  ;;  %3183 = vmatprep.subr.mxu1 %v2172_v11  ;;  %v1977_v10 = vunpack.c.h.bf16 %v1440_v0  ;;  %v2393_v11 = vunpack.c.h.bf16 %v1664_v1  ;;  %v1609_v51 = vld [vmem:[%s12575_s15 + $0x94c] sm:$0xff] }
 0x29f   :  { %3125 = vmatpush2.msra.mxu0 %v2093_v12  ;;  %3184 = vmatpush1.msra.mxu1 %v2171_v13  ;;  %v1976_v12 = vunpack.c.l.bf16 %v1440_v0  ;;  %v2392_v13 = vunpack.c.l.bf16 %v1664_v1  ;;  %v1378_v0 = vld [vmem:[%s12575_s15 + $0x298] sm:$0xff] }
 0x2a0   :  { %3126 = vmatprep.subr.mxu0 %v2081_v17  ;;  %3185 = vmatprep.subr.mxu1 %v2159_v18  ;;  %v1964_v17 = vunpack.c.h.bf16 %v1433_v7  ;;  %v2380_v18 = vunpack.c.h.bf16 %v1657_v8  ;;  %v1602_v1 = vld [vmem:[%s12575_s15 + $0x918] sm:$0xff] }
 0x2a1   :  { %3127 = vmatpush2.msra.mxu0 %v2080_v19  ;;  %3186 = vmatpush1.msra.mxu1 %v2158_v20  ;;  %v1963_v19 = vunpack.c.l.bf16 %v1433_v7  ;;  %v2379_v20 = vunpack.c.l.bf16 %v1657_v8  ;;  %v1371_v7 = vld [vmem:[%s12575_s15 + $0x264] sm:$0xff] }
 0x2a2   :  { %3128 = vmatprep.subr.mxu0 %v2068_v23  ;;  %3187 = vmatprep.subr.mxu1 %v2146_v24  ;;  %v1951_v23 = vunpack.c.h.bf16 %v1426_v15  ;;  %v2367_v24 = vunpack.c.h.bf16 %v1650_v16  ;;  %v1595_v8 = vld [vmem:[%s12575_s15 + $0x8e4] sm:$0xff] }
 0x2a3   :  { %3129 = vmatpush2.msra.mxu0 %v2067_v25  ;;  %3188 = vmatpush1.msra.mxu1 %v2145_v26  ;;  %v1950_v25 = vunpack.c.l.bf16 %v1426_v15  ;;  %v2366_v26 = vunpack.c.l.bf16 %v1650_v16  ;;  %v1364_v15 = vld [vmem:[%s12575_s15 + $0x230] sm:$0xff] }
 0x2a4   :  { %3130 = vmatprep.subr.mxu0 %v2055_v30  ;;  %3189 = vmatprep.subr.mxu1 %v2133_v31  ;;  %v1938_v30 = vunpack.c.h.bf16 %v1419_v21  ;;  %v2354_v31 = vunpack.c.h.bf16 %v1643_v22  ;;  %v1588_v16 = vld [vmem:[%s12575_s15 + $0x8b0] sm:$0xff] }
 0x2a5   :  { %3131 = vmatpush2.msra.mxu0 %v2054_v32  ;;  %3190 = vmatpush1.msra.mxu1 %v2132_v33  ;;  %v1937_v32 = vunpack.c.l.bf16 %v1419_v21  ;;  %v2353_v33 = vunpack.c.l.bf16 %v1643_v22  ;;  %v1357_v21 = vld [vmem:[%s12575_s15 + $0x1fc] sm:$0xff] }
 0x2a6   :  { %3132 = vmatprep.subr.mxu0 %v2042_v37  ;;  %3191 = vmatprep.subr.mxu1 %v2120_v38  ;;  %v1925_v37 = vunpack.c.h.bf16 %v1412_v28  ;;  %v2341_v38 = vunpack.c.h.bf16 %v1636_v29  ;;  %v1581_v22 = vld [vmem:[%s12575_s15 + $0x87c] sm:$0xff] }
 0x2a7   :  { %3133 = vmatpush2.msra.mxu0 %v2041_v40  ;;  %3192 = vmatpush1.msra.mxu1 %v2119_v41  ;;  %v1924_v40 = vunpack.c.l.bf16 %v1412_v28  ;;  %v2340_v41 = vunpack.c.l.bf16 %v1636_v29  ;;  %v1350_v28 = vld [vmem:[%s12575_s15 + $0x1c8] sm:$0xff] }
 0x2a8   :  { %3134 = vmatprep.subr.mxu0 %v2029_v44  ;;  %3205 = vmatprep.subr.mxu1 %v2445_v45  ;;  %v1399_v44 = vld [vmem:[%s12575_s15 + $0x334] sm:$0xff]  ;;  %v1574_v29 = vld [vmem:[%s12575_s15 + $0x848] sm:$0xff] }
 0x2a9   :  { %3135 = vmatpush2.msra.mxu0 %v2028_v46  ;;  %3206 = vmatpush2.msra.mxu1 %v2444_v47  ;;  %v1623_v45 = vld [vmem:[%s12575_s15 + $0x9b4] sm:$0xff]  ;;  %v1911_v46 = vunpack.c.l.bf16 %v1405_v35  ;;  %v2327_v47 = vunpack.c.l.bf16 %v1629_v36  ;;  %v1901_v58 = vunpack.c.h.bf16 %v1399_v44 }
 0x2aa   :  { %3136 = vmatprep.subr.mxu0 %v2016_v59  ;;  %3207 = vmatprep.subr.mxu1 %v2432_v49  ;;  %v2317_v48 = vunpack.c.h.bf16 %v1623_v45  ;;  %v1392_v59 = vld [vmem:[%s12575_s15 + $0x300] sm:$0xff]  ;;  %v1343_v35 = vld [vmem:[%s12575_s15 + $0x194] sm:$0xff] }
 0x2ab   :  { %3137 = vmatpush2.msra.mxu0 %v2015_v9  ;;  %3208 = vmatpush2.msra.mxu1 %v2431_v50  ;;  %v1616_v49 = vld [vmem:[%s12575_s15 + $0x980] sm:$0xff]  ;;  %v1900_v9 = vunpack.c.l.bf16 %v1399_v44  ;;  %v2316_v50 = vunpack.c.l.bf16 %v1623_v45  ;;  %v1567_v36 = vld [vmem:[%s12575_s15 + $0x814] sm:$0xff]  ;;  %v1797_v44 = vunpack.c.h.bf16 %v1343_v35 }
 0x2ac   :  { %3138 = vmatprep.subr.mxu0 %v2003_v53  ;;  %3209 = vmatprep.subr.mxu1 %v2419_v54  ;;  %v1888_v53 = vunpack.c.h.bf16 %v1392_v59  ;;  %v2304_v54 = vunpack.c.h.bf16 %v1616_v49  ;;  %v2213_v45 = vunpack.c.h.bf16 %v1567_v36 }
 0x2ad   :  { %3139 = vmatpush2.msra.mxu0 %v2002_v56  ;;  %3210 = vmatpush2.msra.mxu1 %v2418_v57  ;;  %v1887_v56 = vunpack.c.l.bf16 %v1392_v59  ;;  %v2303_v57 = vunpack.c.l.bf16 %v1616_v49 }
 0x2ae   :  { %3140 = vmatprep.subr.mxu0 %v1990_v2  ;;  %3211 = vmatprep.subr.mxu1 %v2406_v4  ;;  %v1875_v2 = vunpack.c.h.bf16 %v1385_v14  ;;  %v2291_v4 = vunpack.c.h.bf16 %v1609_v51 }
 0x2af   :  { %3141 = vmatpush2.msra.mxu0 %v1989_v5  ;;  %3212 = vmatpush2.msra.mxu1 %v2405_v6  ;;  %v1874_v5 = vunpack.c.l.bf16 %v1385_v14  ;;  %v2290_v6 = vunpack.c.l.bf16 %v1609_v51  ;;  %v1322_v14 = vld [vmem:[%s12575_s15 + $0xf8] sm:$0xff] }
 0x2b0   :  { %3142 = vmatprep.subr.mxu0 %v1977_v10  ;;  %3213 = vmatprep.subr.mxu1 %v2393_v11  ;;  %v1862_v10 = vunpack.c.h.bf16 %v1378_v0  ;;  %v2278_v11 = vunpack.c.h.bf16 %v1602_v1  ;;  %v1546_v51 = vld [vmem:[%s12575_s15 + $0x778] sm:$0xff] }
 0x2b1   :  { %3143 = vmatpush2.msra.mxu0 %v1976_v12  ;;  %3214 = vmatpush2.msra.mxu1 %v2392_v13  ;;  %v1861_v12 = vunpack.c.l.bf16 %v1378_v0  ;;  %v2277_v13 = vunpack.c.l.bf16 %v1602_v1  ;;  %v1315_v0 = vld [vmem:[%s12575_s15 + $0xc4] sm:$0xff] }
 0x2b2   :  { %3144 = vmatprep.subr.mxu0 %v1964_v17  ;;  %3215 = vmatprep.subr.mxu1 %v2380_v18  ;;  %v1849_v17 = vunpack.c.h.bf16 %v1371_v7  ;;  %v2265_v18 = vunpack.c.h.bf16 %v1595_v8  ;;  %v1539_v1 = vld [vmem:[%s12575_s15 + $0x744] sm:$0xff] }
 0x2b3   :  { %3145 = vmatpush2.msra.mxu0 %v1963_v19  ;;  %3216 = vmatpush2.msra.mxu1 %v2379_v20  ;;  %v1848_v19 = vunpack.c.l.bf16 %v1371_v7  ;;  %v2264_v20 = vunpack.c.l.bf16 %v1595_v8  ;;  %v1308_v7 = vld [vmem:[%s12575_s15 + $0x90] sm:$0xff] }
 0x2b4   :  { %3146 = vmatprep.subr.mxu0 %v1951_v23  ;;  %3217 = vmatprep.subr.mxu1 %v2367_v24  ;;  %v1836_v23 = vunpack.c.h.bf16 %v1364_v15  ;;  %v2252_v24 = vunpack.c.h.bf16 %v1588_v16  ;;  %v1532_v8 = vld [vmem:[%s12575_s15 + $0x710] sm:$0xff] }
 0x2b5   :  { %3147 = vmatpush2.msra.mxu0 %v1950_v25  ;;  %3218 = vmatpush2.msra.mxu1 %v2366_v26  ;;  %v1835_v25 = vunpack.c.l.bf16 %v1364_v15  ;;  %v2251_v26 = vunpack.c.l.bf16 %v1588_v16  ;;  %v1301_v15 = vld [vmem:[%s12575_s15 + $0x5c] sm:$0xff] }
 0x2b6   :  { %3148 = vmatprep.subr.mxu0 %v1938_v30  ;;  %3219 = vmatprep.subr.mxu1 %v2354_v31  ;;  %v1823_v30 = vunpack.c.h.bf16 %v1357_v21  ;;  %v2239_v31 = vunpack.c.h.bf16 %v1581_v22  ;;  %v1525_v16 = vld [vmem:[%s12575_s15 + $0x6dc] sm:$0xff] }
 0x2b7   :  { %3149 = vmatpush2.msra.mxu0 %v1937_v32  ;;  %3220 = vmatpush2.msra.mxu1 %v2353_v33  ;;  %v1822_v32 = vunpack.c.l.bf16 %v1357_v21  ;;  %v2238_v33 = vunpack.c.l.bf16 %v1581_v22  ;;  %v1294_v21 = vld [vmem:[%s12575_s15 + $0x28] sm:$0xff] }
 0x2b8   :  { %3150 = vmatprep.subr.mxu0 %v1925_v37  ;;  %3221 = vmatprep.subr.mxu1 %v2341_v38  ;;  %v1810_v37 = vunpack.c.h.bf16 %v1350_v28  ;;  %v2226_v38 = vunpack.c.h.bf16 %v1574_v29  ;;  %v1518_v22 = vld [vmem:[%s12575_s15 + $0x6a8] sm:$0xff] }
 0x2b9   :  { %3151 = vmatpush2.msra.mxu0 %v1924_v40  ;;  %3222 = vmatpush2.msra.mxu1 %v2340_v41  ;;  %v1809_v40 = vunpack.c.l.bf16 %v1350_v28  ;;  %v2225_v41 = vunpack.c.l.bf16 %v1574_v29  ;;  %v1511_v28 = vld [vmem:[%s12575_s15 + $0x674] sm:$0xff]  ;;  %v1693_v29 = vld [vmem:[%s12575_s15 + $0xbbc] sm:$0xff] }
 0x2ba   :  { %3152 = vmatprep.subr.mxu0 %v1912_v42  ;;  %3223 = vmatprep.subr.mxu1 %v2328_v43  ;;  %v1336_v42 = vld [vmem:[%s12575_s15 + $0x160] sm:$0xff] }
 0x2bb   :  { %3153 = vmatpush2.msra.mxu0 %v1911_v46  ;;  %3224 = vmatpush2.msra.mxu1 %v2327_v47  ;;  %v1560_v43 = vld [vmem:[%s12575_s15 + $0x7e0] sm:$0xff]  ;;  %v1796_v46 = vunpack.c.l.bf16 %v1343_v35  ;;  %v2212_v47 = vunpack.c.l.bf16 %v1567_v36  ;;  %v1784_v59 = vunpack.c.h.bf16 %v1336_v42  ;;  %v1686_v36 = vld [vmem:[%s12575_s15 + $0xb88] sm:$0xff] }
 0x2bc   :  { %3155 = vmatmul.mubr.f32.vlgmr.msra.gmra.mxu0 %v9005_v62  ;;  %3226 = vmatmul.mubr.f32.vlgmr.msra.gmra.mxu1 %v9007_v63  ;;  %v2200_v49 = vunpack.c.h.bf16 %v1560_v43  ;;  %v1504_v35 = vld [vmem:[%s12575_s15 + $0x640] sm:$0xff] }
 0x2bd   :  { %3232 = vmatprep.subr.mxu1 %v1901_v58  ;;  %3303 = vmatprep.subr.mxu0 %v2317_v48  ;;  %v1329_v58 = vld [vmem:[%s12575_s15 + $0x12c] sm:$0xff] }
 0x2be   :  { %3233 = vmatpush1.msra.mxu1 %v1900_v9  ;;  %3296 = vmatprep.mubr.f32.mxu1 %v9001_v60  ;;  %v1553_v48 = vld [vmem:[%s12575_s15 + $0x7ac] sm:$0xff]  ;;  %v1783_v9 = vunpack.c.l.bf16 %v1336_v42 }
 0x2bf   :  { %3304 = vmatpush1.msra.mxu0 %v2316_v50  ;;  %8098 = vmatprep.mubr.msk.f32.mxu0 %vm2518_vm6, %v9003_v61  ;;  %v2199_v50 = vunpack.c.l.bf16 %v1560_v43  ;;  %v1497_v42 = vld [vmem:[%s12575_s15 + $0x60c] sm:$0xff]  ;;  %v1679_v43 = vld [vmem:[%s12575_s15 + $0xb54] sm:$0xff] }
 0x2c0   :  { %3234 = vmatprep.subr.mxu1 %v1888_v53  ;;  %3305 = vmatprep.subr.mxu0 %v2304_v54  ;;  %v1771_v53 = vunpack.c.h.bf16 %v1329_v58  ;;  %v2187_v54 = vunpack.c.h.bf16 %v1553_v48 }
 0x2c1   :  { %3235 = vmatpush1.msra.mxu1 %v1887_v56  ;;  %3306 = vmatpush1.msra.mxu0 %v2303_v57  ;;  %v1770_v56 = vunpack.c.l.bf16 %v1329_v58  ;;  %v2186_v57 = vunpack.c.l.bf16 %v1553_v48  ;;  %v1490_v58 = vld [vmem:[%s12575_s15 + $0x5d8] sm:$0xff]  ;;  %v1672_v48 = vld [vmem:[%s12575_s15 + $0xb20] sm:$0xff] }
 0x2c2   :  { %3236 = vmatprep.subr.mxu1 %v1875_v2  ;;  %3307 = vmatprep.subr.mxu0 %v2291_v4  ;;  %v1758_v2 = vunpack.c.h.bf16 %v1322_v14  ;;  %v2174_v4 = vunpack.c.h.bf16 %v1546_v51 }
 0x2c3   :  { %3237 = vmatpush1.msra.mxu1 %v1874_v5  ;;  %3308 = vmatpush1.msra.mxu0 %v2290_v6  ;;  %v1757_v5 = vunpack.c.l.bf16 %v1322_v14  ;;  %v2173_v6 = vunpack.c.l.bf16 %v1546_v51  ;;  %v1483_v14 = vld [vmem:[%s12575_s15 + $0x5a4] sm:$0xff]  ;;  %v1665_v51 = vld [vmem:[%s12575_s15 + $0xaec] sm:$0xff] }
 0x2c4   :  { %3238 = vmatprep.subr.mxu1 %v1862_v10  ;;  %3309 = vmatprep.subr.mxu0 %v2278_v11  ;;  %v1745_v10 = vunpack.c.h.bf16 %v1315_v0  ;;  %v2161_v11 = vunpack.c.h.bf16 %v1539_v1 }
 0x2c5   :  { %3239 = vmatpush1.msra.mxu1 %v1861_v12  ;;  %3310 = vmatpush1.msra.mxu0 %v2277_v13  ;;  %v1744_v12 = vunpack.c.l.bf16 %v1315_v0  ;;  %v2160_v13 = vunpack.c.l.bf16 %v1539_v1  ;;  %v1476_v0 = vld [vmem:[%s12575_s15 + $0x570] sm:$0xff]  ;;  %v1658_v1 = vld [vmem:[%s12575_s15 + $0xab8] sm:$0xff] }
 0x2c6   :  { %3240 = vmatprep.subr.mxu1 %v1849_v17  ;;  %3311 = vmatprep.subr.mxu0 %v2265_v18  ;;  %v1732_v17 = vunpack.c.h.bf16 %v1308_v7  ;;  %v2148_v18 = vunpack.c.h.bf16 %v1532_v8 }
 0x2c7   :  { %3241 = vmatpush1.msra.mxu1 %v1848_v19  ;;  %3312 = vmatpush1.msra.mxu0 %v2264_v20  ;;  %v1731_v19 = vunpack.c.l.bf16 %v1308_v7  ;;  %v2147_v20 = vunpack.c.l.bf16 %v1532_v8  ;;  %v1469_v7 = vld [vmem:[%s12575_s15 + $0x53c] sm:$0xff]  ;;  %v1651_v8 = vld [vmem:[%s12575_s15 + $0xa84] sm:$0xff] }
 0x2c8   :  { %3242 = vmatprep.subr.mxu1 %v1836_v23  ;;  %3313 = vmatprep.subr.mxu0 %v2252_v24  ;;  %v1719_v23 = vunpack.c.h.bf16 %v1301_v15  ;;  %v2135_v24 = vunpack.c.h.bf16 %v1525_v16 }
 0x2c9   :  { %3243 = vmatpush1.msra.mxu1 %v1835_v25  ;;  %3314 = vmatpush1.msra.mxu0 %v2251_v26  ;;  %v1718_v25 = vunpack.c.l.bf16 %v1301_v15  ;;  %v2134_v26 = vunpack.c.l.bf16 %v1525_v16  ;;  %v1462_v15 = vld [vmem:[%s12575_s15 + $0x508] sm:$0xff]  ;;  %v1644_v16 = vld [vmem:[%s12575_s15 + $0xa50] sm:$0xff] }
 0x2ca   :  { %3244 = vmatprep.subr.mxu1 %v1823_v30  ;;  %3315 = vmatprep.subr.mxu0 %v2239_v31  ;;  %v1706_v30 = vunpack.c.h.bf16 %v1294_v21  ;;  %v2122_v31 = vunpack.c.h.bf16 %v1518_v22 }
 0x2cb   :  { %3245 = vmatpush1.msra.mxu1 %v1822_v32  ;;  %3316 = vmatpush1.msra.mxu0 %v2238_v33  ;;  %v1705_v32 = vunpack.c.l.bf16 %v1294_v21  ;;  %v2121_v33 = vunpack.c.l.bf16 %v1518_v22  ;;  %v1455_v21 = vld [vmem:[%s12575_s15 + $0x4d4] sm:$0xff]  ;;  %v1637_v22 = vld [vmem:[%s12575_s15 + $0xa1c] sm:$0xff] }
 0x2cc   :  { %3246 = vmatprep.subr.mxu1 %v1810_v37  ;;  %3317 = vmatprep.subr.mxu0 %v2226_v38  ;;  %v2109_v37 = vunpack.c.h.bf16 %v1511_v28  ;;  %v2447_v38 = vunpack.c.h.bf16 %v1693_v29 }
 0x2cd   :  { %3247 = vmatpush1.msra.mxu1 %v1809_v40  ;;  %3318 = vmatpush1.msra.mxu0 %v2225_v41  ;;  %v2108_v40 = vunpack.c.l.bf16 %v1511_v28  ;;  %v2446_v41 = vunpack.c.l.bf16 %v1693_v29  ;;  %v1448_v28 = vld [vmem:[%s12575_s15 + $0x4a0] sm:$0xff]  ;;  %v1630_v29 = vld [vmem:[%s12575_s15 + $0x9e8] sm:$0xff] }
 0x2ce   :  { %3248 = vmatprep.subr.mxu1 %v1797_v44  ;;  %3319 = vmatprep.subr.mxu0 %v2213_v45  ;;  %v2096_v44 = vunpack.c.h.bf16 %v1504_v35  ;;  %v2434_v45 = vunpack.c.h.bf16 %v1686_v36 }
 0x2cf   :  { %3249 = vmatpush1.msra.mxu1 %v1796_v46  ;;  %3320 = vmatpush1.msra.mxu0 %v2212_v47  ;;  %v2095_v46 = vunpack.c.l.bf16 %v1504_v35  ;;  %v2433_v47 = vunpack.c.l.bf16 %v1686_v36  ;;  %v1441_v35 = vld [vmem:[%s12575_s15 + $0x46c] sm:$0xff]  ;;  %v1992_v36 = vunpack.c.h.bf16 %v1448_v28 }
 0x2d0   :  { %3250 = vmatprep.subr.mxu1 %v1784_v59  ;;  %3321 = vmatprep.subr.mxu0 %v2200_v49  ;;  %v2083_v59 = vunpack.c.h.bf16 %v1497_v42  ;;  %v2421_v49 = vunpack.c.h.bf16 %v1679_v43 }
 0x2d1   :  { %3251 = vmatpush1.msra.mxu1 %v1783_v9  ;;  %3322 = vmatpush1.msra.mxu0 %v2199_v50  ;;  %v2082_v9 = vunpack.c.l.bf16 %v1497_v42  ;;  %v2420_v50 = vunpack.c.l.bf16 %v1679_v43  ;;  %v1400_v42 = vld [vmem:[%s12575_s15 + $0x308] ss:$52 sps:$4 sm:$0xff]   ;;  %v1979_v43 = vunpack.c.h.bf16 %v1441_v35 }
 0x2d2   :  { %3252 = vmatprep.subr.mxu1 %v1771_v53  ;;  %3323 = vmatprep.subr.mxu0 %v2187_v54  ;;  %v2070_v53 = vunpack.c.h.bf16 %v1490_v58  ;;  %v2408_v54 = vunpack.c.h.bf16 %v1672_v48 }
 0x2d3   :  { %3253 = vmatpush1.msra.mxu1 %v1770_v56  ;;  %3324 = vmatpush1.msra.mxu0 %v2186_v57  ;;  %v2069_v56 = vunpack.c.l.bf16 %v1490_v58  ;;  %v2407_v57 = vunpack.c.l.bf16 %v1672_v48  ;;  %v1427_v58 = vld [vmem:[%s12575_s15 + $0x404] sm:$0xff]  ;;  %v1498_v48 = vld [vmem:[%s12575_s15 + $0x5e0] ss:$52 sps:$4 sm:$0xff]  }
 0x2d4   :  { %3254 = vmatprep.subr.mxu1 %v1758_v2  ;;  %3325 = vmatprep.subr.mxu0 %v2174_v4  ;;  %v2057_v2 = vunpack.c.h.bf16 %v1483_v14  ;;  %v2395_v4 = vunpack.c.h.bf16 %v1665_v51 }
 0x2d5   :  { %3255 = vmatpush1.msra.mxu1 %v1757_v5  ;;  %3326 = vmatpush1.msra.mxu0 %v2173_v6  ;;  %v2056_v5 = vunpack.c.l.bf16 %v1483_v14  ;;  %v2394_v6 = vunpack.c.l.bf16 %v1665_v51  ;;  %v1889_v14 = vunpack.c.l.bf16 %v1400_v42  ;;  %v1420_v51 = vld [vmem:[%s12575_s15 + $0x3d0] sm:$0xff] }
 0x2d6   :  { %3256 = vmatprep.subr.mxu1 %v1745_v10  ;;  %3327 = vmatprep.subr.mxu0 %v2161_v11  ;;  %v2044_v10 = vunpack.c.h.bf16 %v1476_v0  ;;  %v2382_v11 = vunpack.c.h.bf16 %v1658_v1 }
 0x2d7   :  { %3257 = vmatpush1.msra.mxu1 %v1744_v12  ;;  %3328 = vmatpush1.msra.mxu0 %v2160_v13  ;;  %v2043_v12 = vunpack.c.l.bf16 %v1476_v0  ;;  %v2381_v13 = vunpack.c.l.bf16 %v1658_v1  ;;  %v1413_v0 = vld [vmem:[%s12575_s15 + $0x39c] sm:$0xff]  ;;  %v1484_v1 = vld [vmem:[%s12575_s15 + $0x578] ss:$52 sps:$4 sm:$0xff]  }
 0x2d8   :  { %3258 = vmatprep.subr.mxu1 %v1732_v17  ;;  %3329 = vmatprep.subr.mxu0 %v2148_v18  ;;  %v2031_v17 = vunpack.c.h.bf16 %v1469_v7  ;;  %v2369_v18 = vunpack.c.h.bf16 %v1651_v8 }
 0x2d9   :  { %3259 = vmatpush1.msra.mxu1 %v1731_v19  ;;  %3330 = vmatpush1.msra.mxu0 %v2147_v20  ;;  %v2030_v19 = vunpack.c.l.bf16 %v1469_v7  ;;  %v2368_v20 = vunpack.c.l.bf16 %v1651_v8  ;;  %v1406_v7 = vld [vmem:[%s12575_s15 + $0x368] sm:$0xff]  ;;  %v1927_v8 = vunpack.c.h.bf16 %v1413_v0 }
 0x2da   :  { %3260 = vmatprep.subr.mxu1 %v1719_v23  ;;  %3331 = vmatprep.subr.mxu0 %v2135_v24  ;;  %v2018_v23 = vunpack.c.h.bf16 %v1462_v15  ;;  %v2356_v24 = vunpack.c.h.bf16 %v1644_v16 }
 0x2db   :  { %3261 = vmatpush1.msra.mxu1 %v1718_v25  ;;  %3332 = vmatpush1.msra.mxu0 %v2134_v26  ;;  %v2017_v25 = vunpack.c.l.bf16 %v1462_v15  ;;  %v2355_v26 = vunpack.c.l.bf16 %v1644_v16  ;;  %v1914_v15 = vunpack.c.h.bf16 %v1406_v7  ;;  %v2045_v16 = vunpack.c.l.bf16 %v1484_v1 }
 0x2dc   :  { %3262 = vmatprep.subr.mxu1 %v1706_v30  ;;  %3333 = vmatprep.subr.mxu0 %v2122_v31  ;;  %v2005_v30 = vunpack.c.h.bf16 %v1455_v21  ;;  %v2343_v31 = vunpack.c.h.bf16 %v1637_v22 }
 0x2dd   :  { %3263 = vmatpush1.msra.mxu1 %v1705_v32  ;;  %3334 = vmatpush1.msra.mxu0 %v2121_v33  ;;  %v2004_v32 = vunpack.c.l.bf16 %v1455_v21  ;;  %v2342_v33 = vunpack.c.l.bf16 %v1637_v22  ;;  %v1351_v22 = vld [vmem:[%s12575_s15 + $0x1d0] ss:$1976 sps:$4 sm:$0xff]  }
 0x2de   :  { %3264 = vmatprep.subr.mxu1 %v2109_v37  ;;  %3347 = vmatprep.subr.mxu0 %v2447_v38  ;;  %v2330_v37 = vunpack.c.h.bf16 %v1630_v29  ;;  %v1512_v38 = vld [vmem:[%s12575_s15 + $0x648] ss:$52 sps:$4 sm:$0xff]  }
 0x2df   :  { %3265 = vmatpush2.msra.mxu1 %v2108_v40  ;;  %3348 = vmatpush2.msra.mxu0 %v2446_v41  ;;  %v1991_v40 = vunpack.c.l.bf16 %v1448_v28  ;;  %v2329_v41 = vunpack.c.l.bf16 %v1630_v29  ;;  %v1811_v28 = vunpack.c.l.bf16 %v1351_v22  ;;  %v2305_v29 = vunpack.c.h.bf16 %v1351_v22 }
 0x2e0   :  { %3266 = vmatprep.subr.mxu1 %v2096_v44  ;;  %3349 = vmatprep.subr.mxu0 %v2434_v45  ;;  %v1434_v44 = vld [vmem:[%s12575_s15 + $0x438] sm:$0xff]  ;;  %v1978_v45 = vunpack.c.l.bf16 %v1441_v35  ;;  %v1442_v35 = vld [vmem:[%s12575_s15 + $0x474] ss:$1144 sps:$4 sm:$0xff]  }
 0x2e1   :  { %3267 = vmatpush2.msra.mxu1 %v2095_v46  ;;  %3350 = vmatpush2.msra.mxu0 %v2433_v47  ;;  %v2110_v46 = vunpack.c.h.bf16 %v1512_v38  ;;  %v1902_v47 = vunpack.c.h.bf16 %v1400_v42 }
 0x2e2   :  { %3268 = vmatprep.subr.mxu1 %v2083_v59  ;;  %3351 = vmatprep.subr.mxu0 %v2421_v49  ;;  %v1966_v59 = vunpack.c.h.bf16 %v1434_v44  ;;  %v2097_v49 = vunpack.c.l.bf16 %v1512_v38 }
 0x2e3   :  { %3269 = vmatpush2.msra.mxu1 %v2082_v9  ;;  %3352 = vmatpush2.msra.mxu0 %v2420_v50  ;;  %v1386_v9 = vld [vmem:[%s12575_s15 + $0x2a0] ss:$52 sps:$4 sm:$0xff]   ;;  %v1965_v50 = vunpack.c.l.bf16 %v1434_v44  ;;  %v1428_v44 = vld [vmem:[%s12575_s15 + $0x40c] ss:$1144 sps:$4 sm:$0xff]  }
 0x2e4   :  { %3270 = vmatprep.subr.mxu1 %v2070_v53  ;;  %3353 = vmatprep.subr.mxu0 %v2408_v54  ;;  %v1953_v53 = vunpack.c.h.bf16 %v1427_v58  ;;  %v2084_v54 = vunpack.c.h.bf16 %v1498_v48 }
 0x2e5   :  { %3271 = vmatpush2.msra.mxu1 %v2069_v56  ;;  %3354 = vmatpush2.msra.mxu0 %v2407_v57  ;;  %v1952_v56 = vunpack.c.l.bf16 %v1427_v58  ;;  %v1876_v57 = vunpack.c.h.bf16 %v1386_v9 }
 0x2e6   :  { %3272 = vmatprep.subr.mxu1 %v2057_v2  ;;  %3355 = vmatprep.subr.mxu0 %v2395_v4  ;;  %v1940_v2 = vunpack.c.h.bf16 %v1420_v51  ;;  %v2071_v4 = vunpack.c.l.bf16 %v1498_v48  ;;  %v1954_v48 = vunpack.c.l.bf16 %v1428_v44 }
 0x2e7   :  { %3273 = vmatpush2.msra.mxu1 %v2056_v5  ;;  %3356 = vmatpush2.msra.mxu0 %v2394_v6  ;;  %v1372_v5 = vld [vmem:[%s12575_s15 + $0x238] ss:$52 sps:$4 sm:$0xff]   ;;  %v1863_v6 = vunpack.c.l.bf16 %v1386_v9  ;;  %v2240_v9 = vunpack.c.h.bf16 %v1428_v44 }
 0x2e8   :  { %3274 = vmatprep.subr.mxu1 %v2044_v10  ;;  %3357 = vmatprep.subr.mxu0 %v2382_v11  ;;  %v2058_v10 = vunpack.c.h.bf16 %v1484_v1  ;;  %v1926_v11 = vunpack.c.l.bf16 %v1413_v0 }
 0x2e9   :  { %3275 = vmatpush2.msra.mxu1 %v2043_v12  ;;  %3358 = vmatpush2.msra.mxu0 %v2381_v13  ;;  %v1850_v12 = vunpack.c.h.bf16 %v1372_v5  ;;  %v1470_v13 = vld [vmem:[%s12575_s15 + $0x544] ss:$1144 sps:$4 sm:$0xff]  }
 0x2ea   :  { %3276 = vmatprep.subr.mxu1 %v2031_v17  ;;  %3359 = vmatprep.subr.mxu0 %v2369_v18  ;;  %v1358_v17 = vld [vmem:[%s12575_s15 + $0x204] ss:$780 sps:$4 sm:$0xff]   ;;  %v1913_v18 = vunpack.c.l.bf16 %v1406_v7  ;;  %v1540_v7 = vld [vmem:[%s12575_s15 + $0x718] ss:$52 sps:$4 sm:$0xff]  }
 0x2eb   :  { %3277 = vmatpush2.msra.mxu1 %v2030_v19  ;;  %3360 = vmatpush2.msra.mxu0 %v2368_v20  ;;  %v1837_v19 = vunpack.c.l.bf16 %v1372_v5  ;;  %v2032_v20 = vunpack.c.l.bf16 %v1470_v13  ;;  %v1824_v21 = vunpack.c.l.bf16 %v1358_v17 }
 0x2ec   :  { %3278 = vmatprep.subr.mxu1 %v2018_v23  ;;  %3361 = vmatprep.subr.mxu0 %v2356_v24  ;;  %v2318_v23 = vunpack.c.h.bf16 %v1470_v13  ;;  %v1456_v24 = vld [vmem:[%s12575_s15 + $0x4dc] ss:$1144 sps:$4 sm:$0xff]  }
 0x2ed   :  { %3279 = vmatpush2.msra.mxu1 %v2017_v25  ;;  %3362 = vmatpush2.msra.mxu0 %v2355_v26  ;;  %v2019_v25 = vunpack.c.h.bf16 %v1358_v17  ;;  %v1344_v26 = vld [vmem:[%s12575_s15 + $0x19c] ss:$780 sps:$4 sm:$0xff]  }
 0x2ee   :  { %3280 = vmatprep.subr.mxu1 %v2005_v30  ;;  %3363 = vmatprep.subr.mxu0 %v2343_v31  ;;  %v2006_v30 = vunpack.c.l.bf16 %v1456_v24  ;;  %v1337_v31 = vld [vmem:[%s12575_s15 + $0x168] ss:$1976 sps:$4 sm:$0xff]  }
 0x2ef   :  { %3281 = vmatpush2.msra.mxu1 %v2004_v32  ;;  %3364 = vmatpush2.msra.mxu0 %v2342_v33  ;;  %v1798_v32 = vunpack.c.l.bf16 %v1344_v26  ;;  %v2292_v33 = vunpack.c.h.bf16 %v1456_v24  ;;  %v1785_v38 = vunpack.c.l.bf16 %v1337_v31  ;;  %v1680_v17 = vld [vmem:[%s12575_s15 + $0xb28] ss:$52 sps:$4 sm:$0xff]  }
 0x2f0   :  { %3282 = vmatprep.subr.mxu1 %v1992_v36  ;;  %3365 = vmatprep.subr.mxu0 %v2330_v37  ;;  %v1993_v36 = vunpack.c.h.bf16 %v1344_v26  ;;  %v1330_v37 = vld [vmem:[%s12575_s15 + $0x134] ss:$780 sps:$4 sm:$0xff]   ;;  %v1638_v26 = vld [vmem:[%s12575_s15 + $0x9f0] ss:$52 sps:$4 sm:$0xff]  }
 0x2f1   :  { %3283 = vmatpush2.msra.mxu1 %v1991_v40  ;;  %3366 = vmatpush2.msra.mxu0 %v2329_v41  ;;  %v2279_v40 = vunpack.c.h.bf16 %v1337_v31  ;;  %v1323_v41 = vld [vmem:[%s12575_s15 + $0x100] ss:$1976 sps:$4 sm:$0xff]   ;;  %v1772_v42 = vunpack.c.l.bf16 %v1330_v37  ;;  %v3852_v31 = vld [vmem:[%s12579_s19 + $0x1a4] sm:$0xff] }
 0x2f2   :  { %3284 = vmatprep.subr.mxu1 %v1979_v43  ;;  %3368 = vmatmul.mubr.f32.vlgmr.msra.gmra.mxu0 %v9007_v63  ;;  %v2266_v43 = vunpack.c.h.bf16 %v1442_v35  ;;  %v2253_v58 = vunpack.c.h.bf16 %v1323_v41 }
 0x2f3   :  { %8104 = vmatprep.subr.mxu0 %v2110_v46  ;;  %3285 = vmatpush2.msra.mxu1 %v1978_v45  ;;  %v1967_v45 = vunpack.c.h.bf16 %v1330_v37  ;;  %v1316_v46 = vld [vmem:[%s12575_s15 + $0xcc] ss:$780 sps:$4 sm:$0xff]  }
 0x2f4   :  { %8105 = vmatpush3.msra.mxu0 %v1902_v47  ;;  %3438 = vmatprep.mubr.f32.mxu0 %v9001_v60  ;;  %v1939_v60 = vunpack.c.l.bf16 %v1420_v51  ;;  %v1759_v47 = vunpack.c.l.bf16 %v1323_v41  ;;  %v1302_v51 = vld [vmem:[%s12575_s15 + $0x64] ss:$780 sps:$4 sm:$0xff]  }
 0x2f5   :  { %3286 = vmatprep.subr.mxu1 %v1966_v59  ;;  %8106 = vmatprep.subr.mxu0 %v2097_v49  ;;  %v1309_v59 = vld [vmem:[%s12575_s15 + $0x98] ss:$1976 sps:$4 sm:$0xff]   ;;  %v1746_v49 = vunpack.c.l.bf16 %v1316_v46  ;;  %v1720_v0 = vunpack.c.l.bf16 %v1302_v51 }
 0x2f6   :  { %3287 = vmatpush2.msra.mxu1 %v1965_v50  ;;  %8107 = vmatpush3.msra.mxu0 %v1889_v14  ;;  %v1414_v50 = vld [vmem:[%s12575_s15 + $0x3a4] ss:$1144 sps:$4 sm:$0xff]   ;;  %v1941_v14 = vunpack.c.h.bf16 %v1316_v46  ;;  %v3972_v41 = vld [vmem:[%s12579_s19 + $0x4ec] sm:$0xff] }
 0x2f7   :  { %3288 = vmatprep.subr.mxu1 %v1953_v53  ;;  %8108 = vmatprep.subr.mxu0 %v2084_v54  ;;  %v1733_v53 = vunpack.c.l.bf16 %v1309_v59  ;;  %v2227_v54 = vunpack.c.h.bf16 %v1309_v59  ;;  %v2214_v1 = vunpack.c.h.bf16 %v1414_v50  ;;  %v3836_v59 = vld [vmem:[%s12579_s19 + $0x134] sm:$0xff] }
 0x2f8   :  { %3289 = vmatpush2.msra.mxu1 %v1952_v56  ;;  %8109 = vmatpush3.msra.mxu0 %v1876_v57  ;;  %v1928_v56 = vunpack.c.l.bf16 %v1414_v50  ;;  %v1295_v57 = vld [vmem:[%s12575_s15 + $0x30] ss:$1976 sps:$4 sm:$0xff]  }
 0x2f9   :  { %3290 = vmatprep.subr.mxu1 %v1940_v2  ;;  %8110 = vmatprep.subr.mxu0 %v2071_v4  ;;  %v1915_v2 = vunpack.c.h.bf16 %v1302_v51  ;;  %v1554_v4 = vld [vmem:[%s12575_s15 + $0x780] ss:$52 sps:$4 sm:$0xff]   ;;  %v1707_v5 = vunpack.c.l.bf16 %v1295_v57  ;;  %v3832_v51 = vld [vmem:[%s12579_s19 + $0x118] sm:$0xff] }
 0x2fa   :  { %3291 = vmatpush2.msra.mxu1 %v1939_v60  ;;  %8111 = vmatpush3.msra.mxu0 %v1863_v6  ;;  %v2201_v60 = vunpack.c.h.bf16 %v1295_v57  ;;  %v2188_v6 = vunpack.c.h.bf16 %v1554_v4  ;;  %v4669_v57 = vunpack.c.l.bf16 %v3836_v59 }
 0x2fb   :  { %3292 = vmatprep.subr.mxu1 %v1927_v8  ;;  %8112 = vmatprep.subr.mxu0 %v2058_v10  ;;  %v2175_v8 = vunpack.c.l.bf16 %v1554_v4  ;;  %v2162_v10 = vunpack.c.h.bf16 %v1540_v7 }
 0x2fc   :  { %3293 = vmatpush2.msra.mxu1 %v1926_v11  ;;  %8113 = vmatpush3.msra.mxu0 %v1850_v12  ;;  %v1526_v11 = vld [vmem:[%s12575_s15 + $0x6b0] ss:$52 sps:$4 sm:$0xff]   ;;  %v2149_v12 = vunpack.c.l.bf16 %v1540_v7 }
 0x2fd   :  { %3294 = vmatprep.subr.mxu1 %v1914_v15  ;;  %8114 = vmatprep.subr.mxu0 %v2045_v16  ;;  %v2136_v13 = vunpack.c.h.bf16 %v1526_v11  ;;  %v2123_v15 = vunpack.c.l.bf16 %v1526_v11 }
 0x2fe   :  { %3295 = vmatpush2.msra.mxu1 %v1913_v18  ;;  %8115 = vmatpush3.msra.mxu0 %v1837_v19  ;;  %v2422_v19 = vunpack.c.h.bf16 %v1680_v17 }
 0x2ff   :  { %3297 = vmatmul.mubr.f32.vlgmr.msra.gmra.mxu1 %v9005_v62  ;;  %8116 = vmatprep.subr.mxu0 %v2032_v20  ;;  %v1666_v20 = vld [vmem:[%s12575_s15 + $0xac0] ss:$52 sps:$4 sm:$0xff]  }
 0x300   :  { %3444 = vmatprep.subr.mxu1 %v8399_v3  ;;  %8117 = vmatpush3.msra.mxu0 %v1824_v21  ;;  %v2409_v21 = vunpack.c.l.bf16 %v1680_v17  ;;  %v2396_v22 = vunpack.c.h.bf16 %v1666_v20  ;;  %v2383_v24 = vunpack.c.l.bf16 %v1666_v20 }
 0x301   :  { %3445 = vmatpush1.msra.mxu1 %v2318_v23  ;;  %8099 = vmatprep.mubr.msk.f32.mxu1 %vm2518_vm6, %v9003_v61  ;;  %v1980_v61 = vunpack.c.l.bf16 %v1442_v35  ;;  %v1652_v23 = vld [vmem:[%s12575_s15 + $0xa58] ss:$52 sps:$4 sm:$0xff]   ;;  %v4697_v35 = vunpack.c.l.bf16 %v3852_v31 }
 0x302   :  { %8118 = vmatprep.subr.mxu0 %v2019_v25  ;;  %3446 = vmatprep.subr.mxu1 %v8399_v3  ;;  %v2370_v25 = vunpack.c.h.bf16 %v1652_v23 }
 0x303   :  { %8119 = vmatpush3.msra.mxu0 %v1811_v28  ;;  %3447 = vmatpush1.msra.mxu1 %v2305_v29  ;;  %v2357_v28 = vunpack.c.l.bf16 %v1652_v23  ;;  %v2344_v29 = vunpack.c.h.bf16 %v1638_v26 }
 0x304   :  { %8120 = vmatprep.subr.mxu0 %v2006_v30  ;;  %3448 = vmatprep.subr.mxu1 %v8399_v3  ;;  %v2331_v30 = vunpack.c.l.bf16 %v1638_v26 }
 0x305   :  { %8121 = vmatpush3.msra.mxu0 %v1798_v32  ;;  %3449 = vmatpush1.msra.mxu1 %v2292_v33  ;;  %v3980_v32 = vld [vmem:[%s12579_s19 + $0x524] sm:$0xff] }
 0x306   :  { %8122 = vmatprep.subr.mxu0 %v1993_v36  ;;  %3450 = vmatprep.subr.mxu1 %v8399_v3  ;;  %v3848_v33 = vld [vmem:[%s12579_s19 + $0x188] sm:$0xff]  ;;  %v4698_v36 = vunpack.c.h.bf16 %v3852_v31  ;;  %v4921_v37 = vunpack.c.l.bf16 %v3980_v32 }
 0x307   :  { %8123 = vmatpush3.msra.mxu0 %v1785_v38  ;;  %3451 = vmatpush1.msra.mxu1 %v2279_v40  ;;  %v4922_v38 = vunpack.c.h.bf16 %v3980_v32  ;;  %v3844_v40 = vld [vmem:[%s12579_s19 + $0x16c] sm:$0xff] }
 0x308   :  { %8124 = vmatprep.subr.mxu0 %v1980_v61  ;;  %3452 = vmatprep.subr.mxu1 %v8399_v3  ;;  %v4690_v61 = vunpack.c.l.bf16 %v3848_v33  ;;  %v4683_v46 = vunpack.c.l.bf16 %v3844_v40  ;;  %v3940_v31 = vld [vmem:[%s12579_s19 + $0x40c] sm:$0xff] }
 0x309   :  { %8125 = vmatpush3.msra.mxu0 %v1772_v42  ;;  %3453 = vmatpush1.msra.mxu1 %v2266_v43  ;;  %v4691_v42 = vunpack.c.h.bf16 %v3848_v33 }
 0x30a   :  { %8126 = vmatprep.subr.mxu0 %v1967_v45  ;;  %3454 = vmatprep.subr.mxu1 %v8399_v3  ;;  %v3840_v45 = vld [vmem:[%s12579_s19 + $0x150] sm:$0xff] }
 0x30b   :  { %8127 = vmatpush3.msra.mxu0 %v1759_v47  ;;  %3455 = vmatpush1.msra.mxu1 %v2253_v58  ;;  %v3968_v47 = vld [vmem:[%s12579_s19 + $0x4d0] sm:$0xff]  ;;  %v4684_v58 = vunpack.c.h.bf16 %v3844_v40  ;;  %v4676_v50 = vunpack.c.l.bf16 %v3840_v45  ;;  %v4852_v40 = vunpack.c.h.bf16 %v3940_v31 }
 0x30c   :  { %8128 = vmatprep.subr.mxu0 %v1954_v48  ;;  %3456 = vmatprep.subr.mxu1 %v8399_v3  ;;  %v4907_v48 = vunpack.c.l.bf16 %v3972_v41 }
 0x30d   :  { %8129 = vmatpush3.msra.mxu0 %v1746_v49  ;;  %3457 = vmatpush1.msra.mxu1 %v2240_v9  ;;  %v3964_v49 = vld [vmem:[%s12579_s19 + $0x4b4] sm:$0xff]  ;;  %v4908_v9 = vunpack.c.h.bf16 %v3972_v41  ;;  %v4851_v41 = vunpack.c.l.bf16 %v3940_v31  ;;  %v10132_v31 = vsub.s32 5, %v8820_v27 }
 0x30e   :  { %8130 = vmatprep.subr.mxu0 %v1941_v14  ;;  %3458 = vmatprep.subr.mxu1 %v8399_v3  ;;  %v4677_v14 = vunpack.c.h.bf16 %v3840_v45  ;;  %v4893_v4 = vunpack.c.l.bf16 %v3964_v49 }
 0x30f   :  { %8131 = vmatpush3.msra.mxu0 %v1733_v53  ;;  %3459 = vmatpush1.msra.mxu1 %v2227_v54  ;;  %v4900_v53 = vunpack.c.l.bf16 %v3968_v47  ;;  %v4901_v54 = vunpack.c.h.bf16 %v3968_v47 }
 0x310   :  { %8132 = vmatprep.subr.mxu0 %v1928_v56  ;;  %3460 = vmatprep.subr.mxu1 %v8399_v3  ;;  %v3960_v56 = vld [vmem:[%s12579_s19 + $0x498] sm:$0xff] }
 0x311   :  { %8133 = vmatpush3.msra.mxu0 %v1720_v0  ;;  %3461 = vmatpush1.msra.mxu1 %v2214_v1  ;;  %v4670_v0 = vunpack.c.h.bf16 %v3836_v59  ;;  %v4894_v1 = vunpack.c.h.bf16 %v3964_v49  ;;  %v4887_v7 = vunpack.c.h.bf16 %v3960_v56 }
 0x312   :  { %8134 = vmatprep.subr.mxu0 %v1915_v2  ;;  %3462 = vmatprep.subr.mxu1 %v8399_v3  ;;  %v3828_v2 = vld [vmem:[%s12579_s19 + $0xfc] sm:$0xff] }
 0x313   :  { %8135 = vmatpush3.msra.mxu0 %v1707_v5  ;;  %3463 = vmatpush1.msra.mxu1 %v2201_v60  ;;  %v4663_v5 = vunpack.c.h.bf16 %v3832_v51  ;;  %v3956_v60 = vld [vmem:[%s12579_s19 + $0x47c] sm:$0xff]  ;;  %v4656_v11 = vunpack.c.h.bf16 %v3828_v2 }
 0x314   :  { %3439 = vmatmul.mubr.f32.vlgmr.msra.gmra.mxu0 %v9005_v62  ;;  %3464 = vmatprep.subr.mxu1 %v8399_v3  ;;  %v1694_v62 = vld [vmem:[%s12575_s15 + $0xb90] ss:$52 sps:$4 sm:$0xff]  }
 0x315   :  { %3465 = vmatpush1.msra.mxu1 %v2188_v6  ;;  %v2448_v16 = vunpack.c.h.bf16 %v1694_v62  ;;  %v2435_v18 = vunpack.c.l.bf16 %v1694_v62  ;;  %6033 = vmatprep.subr.mxu0 %v4698_v36  ;;  %v4662_v6 = vunpack.c.l.bf16 %v3832_v51  ;;  %v4880_v62 = vunpack.c.h.bf16 %v3956_v60  ;;  %v3924_v51 = vld [vmem:[%s12579_s19 + $0x39c] sm:$0xff] }
 0x316   :  { %3466 = vmatprep.subr.mxu1 %v8399_v3  ;;  %6034 = vmatpush1.msra.mxu0 %v4697_v35  ;;  %v3808_v35 = vld [vmem:[%s12579_s19 + $0x70] sm:$0xff] }
 0x317   :  { %3467 = vmatpush1.msra.mxu1 %v2175_v8  ;;  %6035 = vmatprep.subr.mxu0 %v4691_v42  ;;  %v3824_v8 = vld [vmem:[%s12579_s19 + $0xe0] sm:$0xff]  ;;  %v4621_v42 = vunpack.c.h.bf16 %v3808_v35 }
 0x318   :  { %3468 = vmatprep.subr.mxu1 %v8399_v3  ;;  %6036 = vmatpush1.msra.mxu0 %v4690_v61  ;;  %v4649_v17 = vunpack.c.h.bf16 %v3824_v8  ;;  %v3804_v61 = vld [vmem:[%s12579_s19 + $0x54] sm:$0xff] }
 0x319   :  { %3469 = vmatpush1.msra.mxu1 %v2162_v10  ;;  %6037 = vmatprep.subr.mxu0 %v4684_v58  ;;  %v4886_v10 = vunpack.c.l.bf16 %v3960_v56  ;;  %v4614_v58 = vunpack.c.h.bf16 %v3804_v61  ;;  %v4613_v59 = vunpack.c.l.bf16 %v3804_v61  ;;  %v3792_v56 = vld [vmem:[%s12579_s19] sm:$0xff] }
 0x31a   :  { %3470 = vmatprep.subr.mxu1 %v8399_v3  ;;  %6038 = vmatpush1.msra.mxu0 %v4683_v46  ;;  %v3800_v46 = vld [vmem:[%s12579_s19 + $0x38] sm:$0xff] }
 0x31b   :  { %3471 = vmatpush1.msra.mxu1 %v2149_v12  ;;  %6039 = vmatprep.subr.mxu0 %v4677_v14  ;;  %v3952_v12 = vld [vmem:[%s12579_s19 + $0x460] sm:$0xff]  ;;  %v4607_v14 = vunpack.c.h.bf16 %v3800_v46 }
 0x31c   :  { %3472 = vmatprep.subr.mxu1 %v8399_v3  ;;  %6040 = vmatpush1.msra.mxu0 %v4676_v50  ;;  %v4873_v20 = vunpack.c.h.bf16 %v3952_v12 }
 0x31d   :  { %3473 = vmatpush1.msra.mxu1 %v2136_v13  ;;  %6041 = vmatprep.subr.mxu0 %v4670_v0  ;;  %v4655_v13 = vunpack.c.l.bf16 %v3828_v2 }
 0x31e   :  { %3474 = vmatprep.subr.mxu1 %v8399_v3  ;;  %6042 = vmatpush1.msra.mxu0 %v4669_v57 }
 0x31f   :  { %3475 = vmatpush1.msra.mxu1 %v2123_v15  ;;  %v3820_v15 = vld [vmem:[%s12579_s19 + $0xc4] sm:$0xff]  ;;  %6043 = vmatprep.subr.mxu0 %v4663_v5  ;;  %v4823_v5 = vunpack.c.l.bf16 %v3924_v51 }
 0x320   :  { %3488 = vmatprep.subr.mxu1 %v8399_v3  ;;  %6044 = vmatpush1.msra.mxu0 %v4662_v6  ;;  %v4642_v23 = vunpack.c.h.bf16 %v3820_v15  ;;  %v4592_v6 = vunpack.c.l.bf16 %v3792_v56 }
 0x321   :  { %3489 = vmatpush2.msra.mxu1 %v2448_v16  ;;  %v4879_v16 = vunpack.c.l.bf16 %v3956_v60  ;;  %6045 = vmatprep.subr.mxu0 %v4656_v11  ;;  %v4593_v60 = vunpack.c.h.bf16 %v3792_v56  ;;  %v2659_v11 = vpop.f32.mrf.mxu1 }
 0x322   :  { %3490 = vmatprep.subr.mxu1 %v8399_v3  ;;  %6046 = vmatpush1.msra.mxu0 %v4655_v13 }
 0x323   :  { %3491 = vmatpush2.msra.mxu1 %v2435_v18  ;;  %v3948_v18 = vld [vmem:[%s12579_s19 + $0x444] sm:$0xff]  ;;  %6047 = vmatprep.subr.mxu0 %v4649_v17 }
 0x324   :  { %3492 = vmatprep.subr.mxu1 %v8399_v3  ;;  %v4866_v26 = vunpack.c.h.bf16 %v3948_v18 }
 0x325   :  { %3493 = vmatpush2.msra.mxu1 %v2422_v19  ;;  %v4648_v19 = vunpack.c.l.bf16 %v3824_v8 }
 0x326   :  { %3494 = vmatprep.subr.mxu1 %v8399_v3 }
 0x327   :  { %3495 = vmatpush2.msra.mxu1 %v2409_v21  ;;  %v3816_v21 = vld [vmem:[%s12579_s19 + $0xa8] sm:$0xff]  ;;  %6048 = vmatpush1.msra.mxu0 %v4648_v19 }
 0x328   :  { %3496 = vmatprep.subr.mxu1 %v8399_v3  ;;  %v4634_v32 = vunpack.c.l.bf16 %v3816_v21  ;;  %6049 = vmatprep.subr.mxu0 %v4642_v23 }
 0x329   :  { %3497 = vmatpush2.msra.mxu1 %v2396_v22  ;;  %v4872_v22 = vunpack.c.l.bf16 %v3952_v12  ;;  %v10114_v12 = vld [vmem:[%s12580_s16] sm:$0xff] }
 0x32a   :  { %3498 = vmatprep.subr.mxu1 %v8399_v3 }
 0x32b   :  { %3499 = vmatpush2.msra.mxu1 %v2383_v24  ;;  %v3944_v24 = vld [vmem:[%s12579_s19 + $0x428] sm:$0xff] }
 0x32c   :  { %3500 = vmatprep.subr.mxu1 %v8399_v3  ;;  %v4859_v33 = vunpack.c.h.bf16 %v3944_v24  ;;  %v4858_v36 = vunpack.c.l.bf16 %v3944_v24 }
 0x32d   :  { %3501 = vmatpush2.msra.mxu1 %v2370_v25  ;;  %v4641_v25 = vunpack.c.l.bf16 %v3820_v15  ;;  %v2456_v15 = vrot.slane %v10114_v12, %v8823_v34 }
 0x32e   :  { %3502 = vmatprep.subr.mxu1 %v8399_v3 }
 0x32f   :  { %3503 = vmatpush2.msra.mxu1 %v2357_v28  ;;  %v3812_v28 = vld [vmem:[%s12579_s19 + $0x8c] sm:$0xff]  ;;  %6050 = vmatpush1.msra.mxu0 %v4641_v25  ;;  %v2468_v25 = vrot.slane %v10114_v12, %v8837_v55 }
 0x330   :  { %3504 = vmatprep.subr.mxu1 %v8399_v3 }
 0x331   :  { %3505 = vmatpush2.msra.mxu1 %v2344_v29  ;;  %v4865_v29 = vunpack.c.l.bf16 %v3948_v18  ;;  %v2464_v18 = vrot.slane %v10114_v12, %v8834_v52 }
 0x332   :  { %3506 = vmatprep.subr.mxu1 %v8399_v3 }
 0x333   :  { %3507 = vmatpush2.msra.mxu1 %v2331_v30  ;;  %v4635_v30 = vunpack.c.h.bf16 %v3816_v21  ;;  %v10123_v21 = vsub.s32 4, %v8820_v27 }
 0x334   :  { %3509 = vmatmul.mubr.f32.vlgmr.msra.gmra.mxu1 %v9007_v63  ;;  %v3976_v63 = vld [vmem:[%s12579_s19 + $0x508] sm:$0xff]  ;;  %6104 = vmatprep.subr.mxu1 %v4922_v38  ;;  %v3936_v38 = vld [vmem:[%s12579_s19 + $0x3f0] sm:$0xff] }
 0x335   :  { %v4914_v43 = vunpack.c.l.bf16 %v3976_v63  ;;  %v4915_v44 = vunpack.c.h.bf16 %v3976_v63  ;;  %6105 = vmatpush1.msra.mxu1 %v4921_v37  ;;  %v4628_v37 = vunpack.c.h.bf16 %v3812_v28  ;;  %v4627_v63 = vunpack.c.l.bf16 %v3812_v28  ;;  %6051 = vmatprep.subr.mxu0 %v4635_v30 }
 0x336   :  { %6052 = vmatpush1.msra.mxu0 %v4634_v32  ;;  %v4845_v45 = vunpack.c.h.bf16 %v3936_v38  ;;  %v4844_v47 = vunpack.c.l.bf16 %v3936_v38  ;;  %v2472_v30 = vrot.slane %v10114_v12, %v10123_v21 }
 0x337   :  { %6106 = vmatprep.subr.mxu1 %v4915_v44  ;;  %v4620_v44 = vunpack.c.l.bf16 %v3808_v35  ;;  %6053 = vmatprep.subr.mxu0 %v4628_v37  ;;  %v10139_v37 = vsub.s32 6, %v8820_v27 }
 0x338   :  { %6107 = vmatpush1.msra.mxu1 %v4914_v43  ;;  %v3932_v43 = vld [vmem:[%s12579_s19 + $0x3d4] sm:$0xff]  ;;  %6054 = vmatpush1.msra.mxu0 %v4627_v63 }
 0x339   :  { %6108 = vmatprep.subr.mxu1 %v4908_v9  ;;  %v4838_v49 = vunpack.c.h.bf16 %v3932_v43  ;;  %v3796_v9 = vld [vmem:[%s12579_s19 + $0x1c] sm:$0xff]  ;;  %6055 = vmatprep.subr.mxu0 %v4621_v42  ;;  %v4837_v50 = vunpack.c.l.bf16 %v3932_v43 }
 0x33a   :  { %6109 = vmatpush1.msra.mxu1 %v4907_v48  ;;  %v3928_v48 = vld [vmem:[%s12579_s19 + $0x3b8] sm:$0xff]  ;;  %6056 = vmatpush1.msra.mxu0 %v4620_v44  ;;  %v4600_v0 = vunpack.c.h.bf16 %v3796_v9  ;;  %v4599_v2 = vunpack.c.l.bf16 %v3796_v9 }
 0x33b   :  { %6110 = vmatprep.subr.mxu1 %v4901_v54  ;;  %v4831_v54 = vunpack.c.h.bf16 %v3928_v48  ;;  %6057 = vmatprep.subr.mxu0 %v4614_v58  ;;  %v4830_v57 = vunpack.c.l.bf16 %v3928_v48 }
 0x33c   :  { %6111 = vmatpush1.msra.mxu1 %v4900_v53  ;;  %v4606_v53 = vunpack.c.l.bf16 %v3800_v46  ;;  %6058 = vmatpush1.msra.mxu0 %v4613_v59  ;;  %v10152_v46 = vsub.s32 7, %v8820_v27  ;;  %v2480_v59 = vrot.slane %v10114_v12, %v10139_v37 }
 0x33d   :  { %6112 = vmatprep.subr.mxu1 %v4894_v1  ;;  %v3920_v1 = vld [vmem:[%s12579_s19 + $0x380] sm:$0xff]  ;;  %6059 = vmatprep.subr.mxu0 %v4607_v14 }
 0x33e   :  { %6113 = vmatpush1.msra.mxu1 %v4893_v4  ;;  %v4824_v4 = vunpack.c.h.bf16 %v3924_v51  ;;  %6060 = vmatpush1.msra.mxu0 %v4606_v53  ;;  %v4816_v8 = vunpack.c.l.bf16 %v3920_v1 }
 0x33f   :  { %6114 = vmatprep.subr.mxu1 %v4887_v7  ;;  %v4817_v7 = vunpack.c.h.bf16 %v3920_v1  ;;  %6061 = vmatprep.subr.mxu0 %v4600_v0  ;;  %v10171_v0 = vld [vmem:[%s12580_s16 + $0x8] sm:$0x1f] }
 0x340   :  { %6115 = vmatpush1.msra.mxu1 %v4886_v10  ;;  %6062 = vmatpush1.msra.mxu0 %v4599_v2  ;;  %v2588_v10 = vpop.f32.mrf.mxu0 }
 0x341   :  { %6116 = vmatprep.subr.mxu1 %v4880_v62  ;;  %6063 = vmatprep.subr.mxu0 %v4593_v60  ;;  %v2460_v62 = vrot.slane %v10114_v12, %v8829_v39 }
 0x342   :  { %6117 = vmatpush1.msra.mxu1 %v4879_v16  ;;  %6064 = vmatpush1.msra.mxu0 %v4592_v6  ;;  %v2590_v13 = vpop.f32.mrf.mxu0  ;;  %v2661_v16 = vpop.f32.mrf.mxu1 }
 0x343   :  { %6118 = vmatprep.subr.mxu1 %v4873_v20  ;;  %v2591_v20 = vadd.f32 %v2590_v13, %v2460_v62 }
 0x344   :  { %6119 = vmatpush1.msra.mxu1 %v4872_v22  ;;  %v2801_v17 = vpop.f32.mrf.mxu0  ;;  %v2730_v19 = vpop.f32.mrf.mxu1  ;;  %v2589_v22 = vadd.f32 %v2588_v10, %v2456_v15 }
 0x345   :  { %6120 = vmatprep.subr.mxu1 %v4866_v26  ;;  %v2731_v24 = vadd.f32 %v2730_v19, %v2464_v18 }
 0x346   :  { %6121 = vmatpush1.msra.mxu1 %v4865_v29  ;;  %v2803_v23 = vpop.f32.mrf.mxu0  ;;  %v2732_v26 = vpop.f32.mrf.mxu1  ;;  %v10127_v29 = vadd.f32 %v2661_v16, %v2591_v20  ;;  %v10134_v32 = vadd.f32 %v2659_v11, %v2589_v22  ;;  %v2492_v20 = vrot.slane %v10171_v0, %v8829_v39 }
 0x347   :  { %6122 = vmatprep.subr.mxu1 %v4859_v33  ;;  %v10136_v35 = vadd.f32 %v2801_v17, %v2731_v24 }
 0x348   :  { %6123 = vmatpush1.msra.mxu1 %v4858_v36  ;;  %v2872_v28 = vpop.f32.mrf.mxu0  ;;  %v2943_v33 = vpop.f32.mrf.mxu1  ;;  %v2733_v36 = vadd.f32 %v2732_v26, %v2468_v25  ;;  %v3515_v63 = vsel %vm1194_vm4, %v10127_v29, 0.0  ;;  %v3514_v42 = vsel %vm1194_vm4, %v10134_v32, 0.0  ;;  %v3544_v43 = vmul.f32 %v10134_v32, %v10134_v32 }
 0x349   :  { %6124 = vmatprep.subr.mxu1 %v4852_v40  ;;  %v3545_v40 = vmul.f32 %v10127_v29, %v10127_v29  ;;  %v2873_v61 = vadd.f32 %v2872_v28, %v2472_v30  ;;  %v3546_v58 = vmul.f32 %v10136_v35, %v10136_v35 }
 0x34a   :  { %6125 = vmatpush1.msra.mxu1 %v4851_v41  ;;  %v2874_v38 = vpop.f32.mrf.mxu0  ;;  %v2476_v41 = vrot.slane %v10114_v12, %v10132_v31  ;;  %v2945_v44 = vpop.f32.mrf.mxu1  ;;  %v10158_v48 = vadd.f32 %v2803_v23, %v2733_v36  ;;  %v3557_v53 = vsel %vm1194_vm4, %v3544_v43, 0.0 }
 0x34b   :  { %6126 = vmatprep.subr.mxu1 %v4845_v45  ;;  %v10163_v14 = vadd.f32 %v2943_v33, %v2873_v61  ;;  %v3560_v1 = vsel %vm1194_vm4, %v3546_v58, 0.0 }
 0x34c   :  { %6127 = vmatpush1.msra.mxu1 %v4844_v47  ;;  %v3085_v45 = vpop.f32.mrf.mxu0  ;;  %v3517_v47 = vsel %vm1194_vm4, %v10136_v35, 0.0  ;;  %v3014_v9 = vpop.f32.mrf.mxu1  ;;  %v2875_v51 = vadd.f32 %v2874_v38, %v2476_v41  ;;  %v3519_v2 = vsel %vm1194_vm4, %v10158_v48, 0.0 }
 0x34d   :  { %6128 = vmatprep.subr.mxu1 %v4838_v49  ;;  %v3516_v49 = vadd.f32 %v3515_v63, %v3514_v42  ;;  %v3548_v10 = vmul.f32 %v10163_v14, %v10163_v14 }
 0x34e   :  { %6129 = vmatpush1.msra.mxu1 %v4837_v50  ;;  %v3558_v50 = vsel %vm1194_vm4, %v3545_v40, 0.0  ;;  %v3087_v56 = vpop.f32.mrf.mxu0  ;;  %v3016_v6 = vpop.f32.mrf.mxu1  ;;  %v10182_v11 = vadd.f32 %v2945_v44, %v2875_v51  ;;  %v2496_v40 = vrot.slane %v10171_v0, %v8834_v52 }
 0x34f   :  { %6130 = vmatprep.subr.mxu1 %v4831_v54  ;;  %v3518_v54 = vadd.f32 %v3517_v47, %v3516_v49  ;;  %v3559_v60 = vadd.f32 %v3558_v50, %v3557_v53  ;;  %v3564_v23 = vsel %vm1194_vm4, %v3548_v10, 0.0 }
 0x350   :  { %6131 = vmatpush1.msra.mxu1 %v4830_v57  ;;  %v2484_v57 = vrot.slane %v10114_v12, %v10152_v46  ;;  %v2488_v12 = vrot.slane %v10171_v0, %v8823_v34  ;;  %v3523_v24 = vsel %vm1194_vm4, %v10182_v11, 0.0  ;;  %v3549_v25 = vmul.f32 %v10182_v11, %v10182_v11 }
 0x351   :  { %6132 = vmatprep.subr.mxu1 %v4824_v4  ;;  %v3547_v4 = vmul.f32 %v10158_v48, %v10158_v48  ;;  %v3561_v13 = vadd.f32 %v3560_v1, %v3559_v60  ;;  %v3520_v62 = vadd.f32 %v3519_v2, %v3518_v54 }
 0x352   :  { %6133 = vmatpush1.msra.mxu1 %v4823_v5  ;;  %v3015_v5 = vadd.f32 %v3014_v9, %v2480_v59  ;;  %v3017_v18 = vadd.f32 %v3016_v6, %v2484_v57  ;;  %v3566_v43 = vsel %vm1194_vm4, %v3549_v25, 0.0  ;;  %v2500_v59 = vrot.slane %v10171_v0, %v8837_v55 }
 0x353   :  { %6134 = vmatprep.subr.mxu1 %v4817_v7  ;;  %v3562_v16 = vsel %vm1194_vm4, %v3547_v4, 0.0 }
 0x354   :  { %6135 = vmatpush1.msra.mxu1 %v4816_v8  ;;  %v3521_v8 = vsel %vm1194_vm4, %v10163_v14, 0.0  ;;  %v10187_v17 = vadd.f32 %v3085_v45, %v3015_v5  ;;  %v3563_v28 = vadd.f32 %v3562_v16, %v3561_v13  ;;  %v10200_v63 = vadd.f32 %v3087_v56, %v3017_v18 }
 0x355   :  { %v3522_v19 = vadd.f32 %v3521_v8, %v3520_v62  ;;  %v2504_v16 = vrot.slane %v10171_v0, %v10123_v21 }
 0x356   :  { %v3525_v36 = vsel %vm1194_vm4, %v10187_v17, 0.0  ;;  %v3550_v38 = vmul.f32 %v10187_v17, %v10187_v17  ;;  %v3565_v61 = vadd.f32 %v3564_v23, %v3563_v28  ;;  %v3527_v9 = vsel %vm1194_vm4, %v10200_v63, 0.0 }
 0x357   :  { %v3524_v41 = vadd.f32 %v3523_v24, %v3522_v19  ;;  %v3551_v50 = vmul.f32 %v10200_v63, %v10200_v63 }
 0x358   :  { %v3568_v49 = vsel %vm1194_vm4, %v3550_v38, 0.0  ;;  %v3567_v53 = vadd.f32 %v3566_v43, %v3565_v61 }
 0x359   :  { %v3526_v47 = vadd.f32 %v3525_v36, %v3524_v41  ;;  %v3570_v60 = vsel %vm1194_vm4, %v3551_v50, 0.0  ;;  %v3916_v50 = vld [vmem:[%s12579_s19 + $0x364] sm:$0xff] }
 0x35a   :  { %v3569_v4 = vadd.f32 %v3568_v49, %v3567_v53  ;;  %v4810_v53 = vunpack.c.h.bf16 %v3916_v50 }
 0x35b   :  { %v3528_v5 = vadd.f32 %v3527_v9, %v3526_v47 }
 0x35c   :  { %6065 = vmatprep.subr.mxu0 %v4810_v53  ;;  %v4016_v53 = vld [vmem:[%s12579_s19 + $0x620] sm:$0xff] }
 0x37c   :  { %v3156_v7 = vpop.f32.mrf.mxu0  ;;  %v3227_v15 = vpop.f32.mrf.mxu1 }
 0x37d   :  { %v3157_v26 = vadd.f32 %v3156_v7, %v2488_v12 }
 0x37e   :  { %v3158_v22 = vpop.f32.mrf.mxu0  ;;  %v3229_v30 = vpop.f32.mrf.mxu1 }
 0x37f   :  { %v10205_v44 = vadd.f32 %v3227_v15, %v3157_v26  ;;  %v3159_v45 = vadd.f32 %v3158_v22, %v2492_v20  ;;  %v3571_v15 = vadd.f32 %v3570_v60, %v3569_v4  ;;  %v4040_v4 = vld [vmem:[%s12579_s19 + $0x6c8] sm:$0xff] }
 0x381   :  { %v3529_v57 = vsel %vm1194_vm4, %v10205_v44, 0.0  ;;  %v3552_v1 = vmul.f32 %v10205_v44, %v10205_v44  ;;  %v10218_v2 = vadd.f32 %v3229_v30, %v3159_v45 }
 0x382   :  { %v3530_v8 = vadd.f32 %v3529_v57, %v3528_v5 }
 0x383   :  { %v3572_v12 = vsel %vm1194_vm4, %v3552_v1, 0.0  ;;  %v3531_v13 = vsel %vm1194_vm4, %v10218_v2, 0.0  ;;  %v3553_v62 = vmul.f32 %v10218_v2, %v10218_v2  ;;  %v3912_v1 = vld [vmem:[%s12579_s19 + $0x348] sm:$0xff] }
 0x384   :  { %v3573_v23 = vadd.f32 %v3572_v12, %v3571_v15  ;;  %v3532_v24 = vadd.f32 %v3531_v13, %v3530_v8  ;;  %v4802_v5 = vunpack.c.l.bf16 %v3912_v1  ;;  %v4803_v60 = vunpack.c.h.bf16 %v3912_v1  ;;  %v4036_v12 = vld [vmem:[%s12579_s19 + $0x6ac] sm:$0xff] }
 0x385   :  { %v3574_v25 = vsel %vm1194_vm4, %v3553_v62, 0.0  ;;  %v5027_v8 = vunpack.c.h.bf16 %v4040_v4  ;;  %v5020_v62 = vunpack.c.h.bf16 %v4036_v12  ;;  %v4984_v1 = vunpack.c.l.bf16 %v4016_v53 }
 0x386   :  { %v3575_v38 = vadd.f32 %v3574_v25, %v3573_v23 }
 0x3b2   :  { %v3369_v33 = vpop.f32.mrf.mxu0 }
 0x3b4   :  { %v3371_v58 = vpop.f32.mrf.mxu0 }
 0x3bf   :  { %v3298_v42 = vpop.f32.mrf.mxu1 }
 0x3c0   :  { %v3299_v51 = vadd.f32 %v3298_v42, %v2496_v40 }
 0x3c1   :  { %v3300_v54 = vpop.f32.mrf.mxu1 }
 0x3c2   :  { %v10221_v6 = vadd.f32 %v3369_v33, %v3299_v51  ;;  %v3301_v7 = vadd.f32 %v3300_v54, %v2500_v59  ;;  %v4044_v51 = vld [vmem:[%s12579_s19 + $0x6e4] sm:$0xff] }
 0x3c3   :  { %v5034_v54 = vunpack.c.h.bf16 %v4044_v51  ;;  %v5033_v57 = vunpack.c.l.bf16 %v4044_v51  ;;  %v3888_v51 = vld [vmem:[%s12579_s19 + $0x2a0] sm:$0xff] }
 0x3c4   :  { %v3554_v18 = vmul.f32 %v10221_v6, %v10221_v6  ;;  %v10232_v19 = vadd.f32 %v3371_v58, %v3301_v7  ;;  %v3533_v22 = vsel %vm1194_vm4, %v10221_v6, 0.0  ;;  %v5026_v7 = vunpack.c.l.bf16 %v4040_v4 }
 0x3c5   :  { %v3534_v26 = vadd.f32 %v3533_v22, %v3532_v24  ;;  %6136 = vmatprep.subr.mxu1 %v5034_v54  ;;  %v3884_v54 = vld [vmem:[%s12579_s19 + $0x284] sm:$0xff]  ;;  %v4985_v4 = vunpack.c.h.bf16 %v4016_v53 }
 0x3c6   :  { %v3535_v30 = vsel %vm1194_vm4, %v10232_v19, 0.0  ;;  %v3555_v0 = vmul.f32 %v10232_v19, %v10232_v19  ;;  %v3576_v33 = vsel %vm1194_vm4, %v3554_v18, 0.0  ;;  %6137 = vmatpush2.msra.mxu1 %v5033_v57  ;;  %v3904_v18 = vld [vmem:[%s12579_s19 + $0x310] sm:$0xff]  ;;  %v4761_v57 = vunpack.c.h.bf16 %v3888_v51 }
 0x3c7   :  { %v3536_v41 = vadd.f32 %v3535_v30, %v3534_v26  ;;  %v3577_v42 = vadd.f32 %v3576_v33, %v3575_v38  ;;  %6138 = vmatprep.subr.mxu1 %v5027_v8  ;;  %v4789_v22 = vunpack.c.h.bf16 %v3904_v18  ;;  %v4788_v24 = vunpack.c.l.bf16 %v3904_v18  ;;  %v3900_v26 = vld [vmem:[%s12579_s19 + $0x2f4] sm:$0xff] }
 0x3c8   :  { %v3578_v47 = vsel %vm1194_vm4, %v3555_v0, 0.0  ;;  %6139 = vmatpush2.msra.mxu1 %v5026_v7  ;;  %v4782_v30 = vunpack.c.h.bf16 %v3900_v26  ;;  %v4781_v33 = vunpack.c.l.bf16 %v3900_v26  ;;  %v3896_v38 = vld [vmem:[%s12579_s19 + $0x2d8] sm:$0xff]  ;;  %v4008_v7 = vld [vmem:[%s12579_s19 + $0x5e8] sm:$0xff]  ;;  %v4754_v8 = vunpack.c.h.bf16 %v3884_v54 }
 0x3c9   :  { %v3579_v49 = vadd.f32 %v3578_v47, %v3577_v42  ;;  %6140 = vmatprep.subr.mxu1 %v5020_v62  ;;  %v3892_v47 = vld [vmem:[%s12579_s19 + $0x2bc] sm:$0xff]  ;;  %v3876_v62 = vld [vmem:[%s12579_s19 + $0x24c] sm:$0xff]  ;;  %v4971_v18 = vunpack.c.h.bf16 %v4008_v7 }
 0x3d4   :  { %v8136_v56 = vpop.f32.mrf.mxu0 }
 0x3d6   :  { %v8137_v10 = vpop.f32.mrf.mxu0 }
 0x3d7   :  { %v8138_v20 = vadd.f32 %v8137_v10, %v8136_v56  ;;  %v4809_v56 = vunpack.c.l.bf16 %v3916_v50  ;;  %v3908_v10 = vld [vmem:[%s12579_s19 + $0x32c] sm:$0xff] }
 0x3d8   :  { %v4796_v13 = vunpack.c.h.bf16 %v3908_v10  ;;  %v4795_v15 = vunpack.c.l.bf16 %v3908_v10 }
 0x3d9   :  { %v3441_v28 = vadd.f32 %v8138_v20, %v2504_v16  ;;  %6066 = vmatpush2.msra.mxu0 %v4809_v56  ;;  %v5019_v16 = vunpack.c.l.bf16 %v4036_v12  ;;  %v4032_v20 = vld [vmem:[%s12579_s19 + $0x690] sm:$0xff]  ;;  %v4760_v56 = vunpack.c.l.bf16 %v3888_v51  ;;  %v4753_v12 = vunpack.c.l.bf16 %v3884_v54 }
 0x3da   :  { %6067 = vmatprep.subr.mxu0 %v4803_v60  ;;  %v5013_v23 = vunpack.c.h.bf16 %v4032_v20  ;;  %v5012_v25 = vunpack.c.l.bf16 %v4032_v20  ;;  %v3880_v60 = vld [vmem:[%s12579_s19 + $0x268] sm:$0xff] }
 0x3db   :  { %6068 = vmatpush2.msra.mxu0 %v4802_v5  ;;  %6141 = vmatpush2.msra.mxu1 %v5019_v16  ;;  %v4012_v5 = vld [vmem:[%s12579_s19 + $0x604] sm:$0xff]  ;;  %v4747_v16 = vunpack.c.h.bf16 %v3880_v60  ;;  %v4746_v20 = vunpack.c.l.bf16 %v3880_v60 }
 0x3dc   :  { %6069 = vmatprep.subr.mxu0 %v4796_v13  ;;  %6142 = vmatprep.subr.mxu1 %v5013_v23  ;;  %v4978_v10 = vunpack.c.h.bf16 %v4012_v5  ;;  %v4977_v13 = vunpack.c.l.bf16 %v4012_v5  ;;  %v3872_v23 = vld [vmem:[%s12579_s19 + $0x230] sm:$0xff] }
 0x3dd   :  { %6070 = vmatpush2.msra.mxu0 %v4795_v15  ;;  %6143 = vmatpush2.msra.mxu1 %v5012_v25  ;;  %v4004_v15 = vld [vmem:[%s12579_s19 + $0x5cc] sm:$0xff]  ;;  %v4740_v25 = vunpack.c.h.bf16 %v3876_v62 }
 0x3de   :  { %6071 = vmatprep.subr.mxu0 %v4789_v22  ;;  %v4970_v22 = vunpack.c.l.bf16 %v4008_v7  ;;  %v4964_v26 = vunpack.c.h.bf16 %v4004_v15 }
 0x3df   :  { %6072 = vmatpush2.msra.mxu0 %v4788_v24  ;;  %v4000_v24 = vld [vmem:[%s12579_s19 + $0x5b0] sm:$0xff] }
 0x3e0   :  { %6073 = vmatprep.subr.mxu0 %v4782_v30  ;;  %v4963_v30 = vunpack.c.l.bf16 %v4004_v15 }
 0x3e1   :  { %6074 = vmatpush2.msra.mxu0 %v4781_v33  ;;  %v3996_v33 = vld [vmem:[%s12579_s19 + $0x594] sm:$0xff] }
 0x3f4   :  { %v3510_v36 = vpop.f32.mrf.mxu1 }
 0x3f5   :  { %v10242_v40 = vadd.f32 %v3510_v36, %v3441_v28  ;;  %v4028_v28 = vld [vmem:[%s12579_s19 + $0x674] sm:$0xff] }
 0x3f6   :  { %v3512_v61 = vpop.f32.mrf.mxu1  ;;  %v5006_v0 = vunpack.c.h.bf16 %v4028_v28  ;;  %v5005_v36 = vunpack.c.l.bf16 %v4028_v28  ;;  %v4739_v28 = vunpack.c.l.bf16 %v3876_v62  ;;  %v10352_v62 = vld [vmem:[%s12579_s19 + $0xc24] sm:$0xff] }
 0x3f7   :  { %v3538_v43 = vsel %vm3537_vm7, %v10242_v40, 0.0  ;;  %v3556_v45 = vmul.f32 %v10242_v40, %v10242_v40  ;;  %v4024_v61 = vld [vmem:[%s12579_s19 + $0x658] sm:$0xff] }
 0x3f8   :  { %v3539_v58 = vadd.f32 %v3538_v43, %v3536_v41  ;;  %6144 = vmatprep.subr.mxu1 %v5006_v0  ;;  %v4775_v41 = vunpack.c.h.bf16 %v3896_v38  ;;  %v4999_v42 = vunpack.c.h.bf16 %v4024_v61  ;;  %v4774_v43 = vunpack.c.l.bf16 %v3896_v38  ;;  %v3868_v0 = vld [vmem:[%s12579_s19 + $0x214] sm:$0xff] }
 0x3f9   :  { %v3580_v59 = vsel %vm3537_vm7, %v3556_v45, 0.0  ;;  %6145 = vmatpush2.msra.mxu1 %v5005_v36  ;;  %v4998_v45 = vunpack.c.l.bf16 %v4024_v61  ;;  %v4733_v36 = vunpack.c.h.bf16 %v3872_v23  ;;  %v4957_v38 = vunpack.c.h.bf16 %v4000_v24 }
 0x3fa   :  { %3540 = vadd.xlane.f32.xlu1 %v3539_v58  ;;  %v3581_v9 = vadd.f32 %v3580_v59, %v3579_v49  ;;  %v4020_v58 = vld [vmem:[%s12579_s19 + $0x63c] sm:$0xff]  ;;  %6075 = vmatprep.subr.mxu0 %v4775_v41  ;;  %v4767_v59 = vunpack.c.l.bf16 %v3892_v47  ;;  %v4768_v49 = vunpack.c.h.bf16 %v3892_v47  ;;  %v4732_v61 = vunpack.c.l.bf16 %v3872_v23 }
 0x3fb   :  { %6146 = vmatprep.subr.mxu1 %v4999_v42  ;;  %v4992_v50 = vunpack.c.h.bf16 %v4020_v58  ;;  %6076 = vmatpush2.msra.mxu0 %v4774_v43  ;;  %v4956_v41 = vunpack.c.l.bf16 %v4000_v24  ;;  %v3864_v42 = vld [vmem:[%s12579_s19 + $0x1f8] sm:$0xff]  ;;  %v4950_v47 = vunpack.c.h.bf16 %v3996_v33 }
 0x3fc   :  { %6147 = vmatpush2.msra.mxu1 %v4998_v45  ;;  %6077 = vmatprep.subr.mxu0 %v4768_v49  ;;  %v3992_v43 = vld [vmem:[%s12579_s19 + $0x578] sm:$0xff]  ;;  %v4726_v45 = vunpack.c.h.bf16 %v3868_v0  ;;  %v4718_v53 = vunpack.c.l.bf16 %v3864_v42 }
 0x3fd   :  { %6148 = vmatprep.subr.mxu1 %v4992_v50  ;;  %6078 = vmatpush2.msra.mxu0 %v4767_v59  ;;  %v4949_v59 = vunpack.c.l.bf16 %v3996_v33  ;;  %v3860_v49 = vld [vmem:[%s12579_s19 + $0x1dc] sm:$0xff]  ;;  %v4719_v50 = vunpack.c.h.bf16 %v3864_v42  ;;  %v4943_v51 = vunpack.c.h.bf16 %v3992_v43  ;;  %v4942_v54 = vunpack.c.l.bf16 %v3992_v43 }
 0x3fe   :  { %3582 = vadd.xlane.f32.xlu1 %v3581_v9  ;;  %v4991_v9 = vunpack.c.l.bf16 %v4020_v58  ;;  %6079 = vmatprep.subr.mxu0 %v4761_v57  ;;  %v4725_v58 = vunpack.c.l.bf16 %v3868_v0  ;;  %v3984_v57 = vld [vmem:[%s12579_s19 + $0x540] sm:$0xff]  ;;  %v4711_v5 = vunpack.c.l.bf16 %v3860_v49 }
 0x3ff   :  { %6080 = vmatpush2.msra.mxu0 %v4760_v56  ;;  %v3856_v56 = vld [vmem:[%s12579_s19 + $0x1c0] sm:$0xff] }
 0x400   :  { %6149 = vmatpush2.msra.mxu1 %v4991_v9  ;;  %6081 = vmatprep.subr.mxu0 %v4754_v8  ;;  %v3988_v9 = vld [vmem:[%s12579_s19 + $0x55c] sm:$0xff]  ;;  %v4705_v7 = vunpack.c.h.bf16 %v3856_v56  ;;  %v4929_v8 = vunpack.c.h.bf16 %v3984_v57 }
 0x401   :  { %6150 = vmatprep.subr.mxu1 %v4985_v4  ;;  %6082 = vmatpush2.msra.mxu0 %v4753_v12  ;;  %v4936_v4 = vunpack.c.h.bf16 %v3988_v9  ;;  %v4935_v60 = vunpack.c.l.bf16 %v3988_v9  ;;  %v4928_v12 = vunpack.c.l.bf16 %v3984_v57 }
 0x402   :  { %6151 = vmatpush2.msra.mxu1 %v4984_v1  ;;  %6083 = vmatprep.subr.mxu0 %v4747_v16  ;;  %v4712_v1 = vunpack.c.h.bf16 %v3860_v49  ;;  %v5370_v16 = vunpack.c.h.bf16 %v10352_v62 }
 0x403   :  { %6152 = vmatprep.subr.mxu1 %v4978_v10  ;;  %6084 = vmatpush2.msra.mxu0 %v4746_v20  ;;  %v4704_v10 = vunpack.c.l.bf16 %v3856_v56 }
 0x404   :  { %6153 = vmatpush2.msra.mxu1 %v4977_v13  ;;  %6085 = vmatprep.subr.mxu0 %v4740_v25  ;;  %v10347_v13 = vld [vmem:[%s12579_s19 + $0x8a4] sm:$0xff] }
 0x405   :  { %6154 = vmatprep.subr.mxu1 %v4971_v18  ;;  %6086 = vmatpush2.msra.mxu0 %v4739_v28  ;;  %v5146_v15 = vunpack.c.h.bf16 %v10347_v13  ;;  %v3615_v28 = vld [vmem:[%s12581_s17] sm:$0xff] }
 0x406   :  { %6155 = vmatpush2.msra.mxu1 %v4970_v22  ;;  %6087 = vmatprep.subr.mxu0 %v4733_v36  ;;  %v3650_v0 = vrot.slane %v3615_v28, %v10152_v46  ;;  %v3626_v33 = vrot.slane %v3615_v28, %v8829_v39  ;;  %v3634_v36 = vrot.slane %v3615_v28, %v8837_v55 }
 0x407   :  { %6156 = vmatprep.subr.mxu1 %v4964_v26  ;;  %6088 = vmatpush2.msra.mxu0 %v4732_v61  ;;  %v3630_v61 = vrot.slane %v3615_v28, %v8834_v52  ;;  %v3638_v9 = vrot.slane %v3615_v28, %v10123_v21 }
 0x408   :  { %6157 = vmatpush2.msra.mxu1 %v4963_v30  ;;  %6089 = vmatprep.subr.mxu0 %v4726_v45  ;;  %v3697_v30 = vld [vmem:[%s12582_s18] sm:$0xff] }
 0x409   :  { %6158 = vmatprep.subr.mxu1 %v4957_v38  ;;  %6090 = vmatpush2.msra.mxu0 %v4725_v58  ;;  %v3622_v38 = vrot.slane %v3615_v28, %v8823_v34  ;;  %v3708_v42 = vrot.slane %v3697_v30, %v8829_v39  ;;  %v3716_v43 = vrot.slane %v3697_v30, %v8837_v55  ;;  %v10379_v58 = vld [vmem:[%s12581_s17 + $0x8] sm:$0x1f] }
 0x40a   :  { %6159 = vmatpush2.msra.mxu1 %v4956_v41  ;;  %6091 = vmatprep.subr.mxu0 %v4719_v50  ;;  %v3642_v41 = vrot.slane %v3615_v28, %v10132_v31  ;;  %v3704_v45 = vrot.slane %v3697_v30, %v8823_v34  ;;  %v3732_v49 = vrot.slane %v3697_v30, %v10152_v46 }
 0x40b   :  { %6160 = vmatprep.subr.mxu1 %v4950_v47  ;;  %6092 = vmatpush2.msra.mxu0 %v4718_v53  ;;  %v3712_v47 = vrot.slane %v3697_v30, %v8834_v52  ;;  %v3720_v50 = vrot.slane %v3697_v30, %v10123_v21  ;;  %v5369_v53 = vunpack.c.l.bf16 %v10352_v62  ;;  %v3728_v56 = vrot.slane %v3697_v30, %v10139_v37 }
 0x40c   :  { %6161 = vmatpush2.msra.mxu1 %v4949_v59  ;;  %6093 = vmatprep.subr.mxu0 %v4712_v1  ;;  %v3724_v59 = vrot.slane %v3697_v30, %v10132_v31  ;;  %v3658_v46 = vrot.slane %v10379_v58, %v8829_v39 }
 0x40d   :  { %6162 = vmatprep.subr.mxu1 %v4943_v51  ;;  %6094 = vmatpush2.msra.mxu0 %v4711_v5  ;;  %v5145_v51 = vunpack.c.l.bf16 %v10347_v13 }
 0x40e   :  { %6163 = vmatpush2.msra.mxu1 %v4942_v54  ;;  %6095 = vmatprep.subr.mxu0 %v4705_v7  ;;  %v3646_v54 = vrot.slane %v3615_v28, %v10139_v37 }
 0x40f   :  { %6164 = vmatprep.subr.mxu1 %v4936_v4  ;;  %6096 = vmatpush2.msra.mxu0 %v4704_v10  ;;  %v3666_v4 = vrot.slane %v10379_v58, %v8837_v55 }
 0x410   :  { %6165 = vmatpush2.msra.mxu1 %v4935_v60  ;;  %6175 = vmatprep.subr.mxu0 %v5146_v15 }
 0x411   :  { %6166 = vmatprep.subr.mxu1 %v4929_v8 }
 0x412   :  { %6167 = vmatpush2.msra.mxu1 %v4928_v12 }
 0x413   :  { %6246 = vmatprep.subr.mxu1 %v5370_v16 }
 0x483   :  { %v3541_v18 = vpop.xlane.xlu1 %3540 }
 0x484   :  { %v10356_v20 = vmul.f32 0.000625, %v3541_v18 }
 0x486   :  { %v3585_v23 = vmul.f32 %v10356_v20, %v10356_v20  ;;  %v3588_v57 = vsub.f32 %v10127_v29, %v10356_v20  ;;  %v3590_v1 = vsub.f32 %v10158_v48, %v10356_v20  ;;  %v3587_v5 = vsub.f32 %v10134_v32, %v10356_v20 }
 0x487   :  { %v3583_v22 = vpop.xlane.xlu1 %3582  ;;  %v3589_v60 = vsub.f32 %v10136_v35, %v10356_v20  ;;  %v3592_v7 = vsub.f32 %v10182_v11, %v10356_v20  ;;  %v3594_v29 = vsub.f32 %v10200_v63, %v10356_v20  ;;  %v3591_v48 = vsub.f32 %v10163_v14, %v10356_v20 }
 0x488   :  { %v3584_v24 = vmul.f32 0.000625, %v3583_v22  ;;  %v3593_v10 = vsub.f32 %v10187_v17, %v10356_v20  ;;  %v3596_v32 = vsub.f32 %v10218_v2, %v10356_v20  ;;  %v3598_v35 = vsub.f32 %v10232_v19, %v10356_v20 }
 0x48a   :  { %v3586_v25 = vsub.f32 %v3584_v24, %v3585_v23 }
 0x48c   :  { %v3600_v26 = vadd.f32 1e-05, %v3586_v25 }
 0x48e   :  { %8382 = vrsqrt.f32 %v3600_v26 }
 0x49b   :  { %v10405_v8 = vpop.eup %8382 }
 0x49c   :  { %v3603_v12 = vmul.f32 %v10405_v8, %v3588_v57  ;;  %v3605_v11 = vmul.f32 %v10405_v8, %v3590_v1  ;;  %v3602_v63 = vmul.f32 %v10405_v8, %v3587_v5  ;;  %v3604_v15 = vmul.f32 %v10405_v8, %v3589_v60  ;;  %v4104_v60 = vld [vmem:[%s12579_s19 + $0x888] sm:$0xff] }
 0x49d   :  { %v3607_v16 = vmul.f32 %v10405_v8, %v3592_v7  ;;  %v3609_v14 = vmul.f32 %v10405_v8, %v3594_v29  ;;  %v3606_v17 = vmul.f32 %v10405_v8, %v3591_v48  ;;  %v3608_v18 = vmul.f32 %v10405_v8, %v3593_v10  ;;  %v10429_v7 = vld [vmem:[%s12582_s18 + $0x8] sm:$0x1f] }
 0x49e   :  { %v3685_v2 = vmul.f32 %v3626_v33, %v3603_v12  ;;  %v3687_v22 = vmul.f32 %v3634_v36, %v3605_v11  ;;  %v3684_v23 = vmul.f32 %v3622_v38, %v3602_v63  ;;  %v3686_v19 = vmul.f32 %v3630_v61, %v3604_v15  ;;  %v4096_v63 = vld [vmem:[%s12579_s19 + $0x850] sm:$0xff] }
 0x49f   :  { %v3689_v24 = vmul.f32 %v3642_v41, %v3607_v16  ;;  %v3691_v25 = vmul.f32 %v3650_v0, %v3609_v14  ;;  %v3688_v26 = vmul.f32 %v3638_v9, %v3606_v17  ;;  %v3690_v28 = vmul.f32 %v3646_v54, %v3608_v18  ;;  %v4232_v0 = vld [vmem:[%s12579_s19 + $0xc08] sm:$0xff]  ;;  %v4092_v16 = vld [vmem:[%s12579_s19 + $0x834] sm:$0xff] }
 0x4a0   :  { %v3767_v30 = vadd.f32 %v3708_v42, %v3685_v2  ;;  %v3769_v57 = vadd.f32 %v3716_v43, %v3687_v22  ;;  %v3766_v1 = vadd.f32 %v3704_v45, %v3684_v23  ;;  %v3768_v5 = vadd.f32 %v3712_v47, %v3686_v19  ;;  %v4100_v47 = vld [vmem:[%s12579_s19 + $0x86c] sm:$0xff] }
 0x4a1   :  { %v3771_v33 = vadd.f32 %v3724_v59, %v3689_v24  ;;  %v3773_v36 = vadd.f32 %v3732_v49, %v3691_v25  ;;  %v10434_v38 = vadd.f32 %v3720_v50, %v3688_v26  ;;  %v10436_v61 = vadd.f32 %v3728_v56, %v3690_v28  ;;  %v4228_v49 = vld [vmem:[%s12579_s19 + $0xbec] sm:$0xff]  ;;  %v4216_v24 = vld [vmem:[%s12579_s19 + $0xb98] sm:$0xff] }
 0x4a2   :  { %v10438_v41 = vmax.f32 %v3767_v30, 0.0  ;;  %v10440_v42 = vmax.f32 %v3769_v57, 0.0  ;;  %v10442_v43 = vmax.f32 %v3766_v1, 0.0  ;;  %v10444_v45 = vmax.f32 %v3768_v5, 0.0 }
 0x4a3   :  { %v5139_v59 = vunpack.c.h.bf16 %v4104_v60  ;;  %v3740_v9 = vrot.slane %v10429_v7, %v8829_v39  ;;  %v5363_v50 = vunpack.c.h.bf16 %v4232_v0  ;;  %v3611_v54 = vmul.f32 %v10405_v8, %v3596_v32  ;;  %v4224_v32 = vld [vmem:[%s12579_s19 + $0xbd0] sm:$0xff] }
 0x4a4   :  { %6097 = vmatprep.mubr.f32.mxu0 %v10438_v41  ;;  %6168 = vmatprep.mubr.f32.mxu1 %v10440_v42  ;;  %v3613_v56 = vmul.f32 %v10405_v8, %v3598_v35  ;;  %v3748_v29 = vrot.slane %v10429_v7, %v8837_v55  ;;  %v5138_v48 = vunpack.c.l.bf16 %v4104_v60  ;;  %v10462_v10 = vmax.f32 %v3771_v33, 0.0  ;;  %v4084_v33 = vld [vmem:[%s12579_s19 + $0x7fc] sm:$0xff] }
 0x4a5   :  { %6098 = vmatmul.mubr.f32.vlgmr.msra.gmra.mxu0 %v10442_v43  ;;  %6169 = vmatmul.mubr.f32.vlgmr.msra.gmra.mxu1 %v10444_v45  ;;  %v5362_v12 = vunpack.c.l.bf16 %v4232_v0  ;;  %v5132_v11 = vunpack.c.h.bf16 %v4100_v47  ;;  %v10474_v35 = vmax.f32 %v3773_v36, 0.0  ;;  %v5356_v15 = vunpack.c.h.bf16 %v4228_v49  ;;  %v4212_v0 = vld [vmem:[%s12579_s19 + $0xb7c] sm:$0xff] }
 0x4a6   :  { %6176 = vmatpush1.msra.mxu0 %v5145_v51  ;;  %6247 = vmatpush1.msra.mxu1 %v5369_v53  ;;  %v3693_v14 = vmul.f32 %v3658_v46, %v3611_v54  ;;  %v3695_v17 = vmul.f32 %v3666_v4, %v3613_v56  ;;  %v5131_v13 = vunpack.c.l.bf16 %v4100_v47  ;;  %v5355_v62 = vunpack.c.l.bf16 %v4228_v49  ;;  %v4220_v51 = vld [vmem:[%s12579_s19 + $0xbb4] sm:$0xff]  ;;  %v4208_v54 = vld [vmem:[%s12579_s19 + $0xb60] sm:$0xff] }
 0x4a7   :  { %6177 = vmatprep.subr.mxu0 %v5139_v59  ;;  %6239 = vmatprep.mubr.f32.mxu0 %v10462_v10  ;;  %v5125_v53 = vunpack.c.h.bf16 %v4096_v63  ;;  %v5349_v18 = vunpack.c.h.bf16 %v4224_v32  ;;  %v4088_v46 = vld [vmem:[%s12579_s19 + $0x818] sm:$0xff]  ;;  %v5124_v22 = vunpack.c.l.bf16 %v4096_v63  ;;  %v5348_v23 = vunpack.c.l.bf16 %v4224_v32  ;;  %v4076_v32 = vld [vmem:[%s12579_s19 + $0x7c4] sm:$0xff] }
 0x4a8   :  { %6248 = vmatprep.subr.mxu1 %v5363_v50  ;;  %6310 = vmatprep.mubr.f32.mxu1 %v10474_v35  ;;  %v10493_v2 = vadd.f32 %v3740_v9, %v3693_v14  ;;  %v10495_v4 = vadd.f32 %v3748_v29, %v3695_v17  ;;  %v5118_v19 = vunpack.c.h.bf16 %v4092_v16  ;;  %v3654_v25 = vrot.slane %v10379_v58, %v8823_v34  ;;  %v4080_v50 = vld [vmem:[%s12579_s19 + $0x7e0] sm:$0xff] }
 0x4a9   :  { %6178 = vmatpush1.msra.mxu0 %v5138_v48  ;;  %6249 = vmatpush1.msra.mxu1 %v5362_v12  ;;  %v5342_v26 = vunpack.c.h.bf16 %v4220_v51  ;;  %v3595_v28 = vsub.f32 %v10205_v44, %v10356_v20  ;;  %v3597_v30 = vsub.f32 %v10221_v6, %v10356_v20  ;;  %v3662_v57 = vrot.slane %v10379_v58, %v8834_v52 }
 0x4aa   :  { %6179 = vmatprep.subr.mxu0 %v5132_v11  ;;  %6250 = vmatprep.subr.mxu1 %v5356_v15  ;;  %v5117_v1 = vunpack.c.l.bf16 %v4092_v16  ;;  %v5341_v5 = vunpack.c.l.bf16 %v4220_v51  ;;  %v5111_v60 = vunpack.c.h.bf16 %v4088_v46  ;;  %v3736_v44 = vrot.slane %v10429_v7, %v8823_v34  ;;  %v4204_v15 = vld [vmem:[%s12579_s19 + $0xb44] sm:$0xff] }
 0x4ab   :  { %6180 = vmatpush1.msra.mxu0 %v5131_v13  ;;  %6251 = vmatpush1.msra.mxu1 %v5355_v62  ;;  %v5335_v6 = vunpack.c.h.bf16 %v4216_v24  ;;  %v3610_v36 = vmul.f32 %v10405_v8, %v3595_v28  ;;  %v3612_v47 = vmul.f32 %v10405_v8, %v3597_v30  ;;  %v3744_v59 = vrot.slane %v10429_v7, %v8834_v52 }
 0x4ac   :  { %6181 = vmatprep.subr.mxu0 %v5125_v53  ;;  %6252 = vmatprep.subr.mxu1 %v5349_v18  ;;  %v5110_v49 = vunpack.c.l.bf16 %v4088_v46  ;;  %v5334_v9 = vunpack.c.l.bf16 %v4216_v24  ;;  %v5104_v56 = vunpack.c.h.bf16 %v4084_v33  ;;  %v5328_v29 = vunpack.c.h.bf16 %v4212_v0  ;;  %v4072_v46 = vld [vmem:[%s12579_s19 + $0x7a8] sm:$0xff] }
 0x4ad   :  { %6182 = vmatpush1.msra.mxu0 %v5124_v22  ;;  %6253 = vmatpush1.msra.mxu1 %v5348_v23  ;;  %v3692_v48 = vmul.f32 %v3654_v25, %v3610_v36  ;;  %v3694_v12 = vmul.f32 %v3662_v57, %v3612_v47  ;;  %v5103_v11 = vunpack.c.l.bf16 %v4084_v33  ;;  %v5327_v63 = vunpack.c.l.bf16 %v4212_v0  ;;  %v4068_v25 = vld [vmem:[%s12579_s19 + $0x78c] sm:$0xff]  ;;  %v4060_v36 = vld [vmem:[%s12579_s19 + $0x754] sm:$0xff] }
 0x4ae   :  { %6183 = vmatprep.subr.mxu0 %v5118_v19  ;;  %6254 = vmatprep.subr.mxu1 %v5342_v26  ;;  %v3599_v16 = vsub.f32 %v10242_v40, %v10356_v20  ;;  %v3670_v14 = vrot.slane %v10379_v58, %v10123_v21  ;;  %v5097_v17 = vunpack.c.h.bf16 %v4080_v50  ;;  %v5321_v13 = vunpack.c.h.bf16 %v4208_v54  ;;  %v4200_v40 = vld [vmem:[%s12579_s19 + $0xb28] sm:$0xff]  ;;  %v4188_v47 = vld [vmem:[%s12579_s19 + $0xad4] sm:$0xff] }
 0x4af   :  { %6184 = vmatpush1.msra.mxu0 %v5117_v1  ;;  %6255 = vmatpush1.msra.mxu1 %v5341_v5  ;;  %v10536_v62 = vadd.f32 %v3736_v44, %v3692_v48  ;;  %v10538_v51 = vadd.f32 %v3744_v59, %v3694_v12  ;;  %v5096_v53 = vunpack.c.l.bf16 %v4080_v50  ;;  %v5320_v18 = vunpack.c.l.bf16 %v4208_v54  ;;  %v4196_v26 = vld [vmem:[%s12579_s19 + $0xb0c] sm:$0xff]  ;;  %v4056_v54 = vld [vmem:[%s12579_s19 + $0x738] sm:$0xff] }
 0x4b0   :  { %6185 = vmatprep.subr.mxu0 %v5111_v60  ;;  %6256 = vmatprep.subr.mxu1 %v5335_v6  ;;  %v3614_v20 = vmul.f32 %v10405_v8, %v3599_v16  ;;  %v3752_v58 = vrot.slane %v10429_v7, %v10123_v21  ;;  %v5090_v22 = vunpack.c.h.bf16 %v4076_v32  ;;  %v5314_v23 = vunpack.c.h.bf16 %v4204_v15  ;;  %v4064_v1 = vld [vmem:[%s12579_s19 + $0x770] sm:$0xff] }
 0x4b1   :  { %6186 = vmatpush1.msra.mxu0 %v5110_v49  ;;  %6257 = vmatpush1.msra.mxu1 %v5334_v9  ;;  %v5089_v19 = vunpack.c.l.bf16 %v4076_v32  ;;  %v5313_v24 = vunpack.c.l.bf16 %v4204_v15  ;;  %v5083_v7 = vunpack.c.h.bf16 %v4072_v46  ;;  %v5307_v28 = vunpack.c.h.bf16 %v4200_v40  ;;  %v4192_v5 = vld [vmem:[%s12579_s19 + $0xaf0] sm:$0xff]  ;;  %v4180_v32 = vld [vmem:[%s12579_s19 + $0xa9c] sm:$0xff] }
 0x4b2   :  { %6187 = vmatprep.subr.mxu0 %v5104_v56  ;;  %6258 = vmatprep.subr.mxu1 %v5328_v29  ;;  %v3696_v8 = vmul.f32 %v3670_v14, %v3614_v20  ;;  %v5082_v30 = vunpack.c.l.bf16 %v4072_v46  ;;  %v5306_v57 = vunpack.c.l.bf16 %v4200_v40  ;;  %v5076_v33 = vunpack.c.h.bf16 %v4068_v25  ;;  %v4184_v56 = vld [vmem:[%s12579_s19 + $0xab8] sm:$0xff] }
 0x4b3   :  { %6188 = vmatpush1.msra.mxu0 %v5103_v11  ;;  %6259 = vmatpush1.msra.mxu1 %v5327_v63  ;;  %v5300_v0 = vunpack.c.h.bf16 %v4196_v26  ;;  %v5075_v44 = vunpack.c.l.bf16 %v4068_v25  ;;  %v5299_v6 = vunpack.c.l.bf16 %v4196_v26  ;;  %v5069_v59 = vunpack.c.h.bf16 %v4064_v1  ;;  %v4052_v63 = vld [vmem:[%s12579_s19 + $0x71c] sm:$0xff]  ;;  %v4168_v26 = vld [vmem:[%s12579_s19 + $0xa48] sm:$0xff] }
 0x4b4   :  { %6189 = vmatprep.subr.mxu0 %v5097_v17  ;;  %6260 = vmatprep.subr.mxu1 %v5321_v13  ;;  %v10561_v60 = vadd.f32 %v3752_v58, %v3696_v8  ;;  %v5293_v49 = vunpack.c.h.bf16 %v4192_v5  ;;  %v5068_v9 = vunpack.c.l.bf16 %v4064_v1  ;;  %v5292_v50 = vunpack.c.l.bf16 %v4192_v5  ;;  %v4048_v13 = vld [vmem:[%s12579_s19 + $0x700] sm:$0xff]  ;;  %v4296_v8 = vld [vmem:[%s12579_s19 + $0xdc8] sm:$0xff] }
 0x4b5   :  { %6190 = vmatpush1.msra.mxu0 %v5096_v53  ;;  %6261 = vmatpush1.msra.mxu1 %v5320_v18  ;;  %v5062_v29 = vunpack.c.h.bf16 %v4060_v36  ;;  %v5286_v48 = vunpack.c.h.bf16 %v4188_v47  ;;  %v5061_v12 = vunpack.c.l.bf16 %v4060_v36  ;;  %v5285_v11 = vunpack.c.l.bf16 %v4188_v47  ;;  %v4176_v53 = vld [vmem:[%s12579_s19 + $0xa80] sm:$0xff]  ;;  %v4164_v1 = vld [vmem:[%s12579_s19 + $0xa2c] sm:$0xff] }
 0x4b6   :  { %6191 = vmatprep.subr.mxu0 %v5090_v22  ;;  %6262 = vmatprep.subr.mxu1 %v5314_v23  ;;  %v5055_v15 = vunpack.c.h.bf16 %v4056_v54  ;;  %v5279_v16 = vunpack.c.h.bf16 %v4184_v56  ;;  %v5054_v14 = vunpack.c.l.bf16 %v4056_v54  ;;  %v5278_v17 = vunpack.c.l.bf16 %v4184_v56  ;;  %v4172_v58 = vld [vmem:[%s12579_s19 + $0xa64] sm:$0xff]  ;;  %v4292_v5 = vld [vmem:[%s12579_s19 + $0xdac] sm:$0xff]  ;;  %v4156_v54 = vld [vmem:[%s12579_s19 + $0x9f4] sm:$0xff] }
 0x4b7   :  { %6192 = vmatpush1.msra.mxu0 %v5089_v19  ;;  %6263 = vmatpush1.msra.mxu1 %v5313_v24  ;;  %v5048_v18 = vunpack.c.h.bf16 %v4052_v63  ;;  %v5272_v46 = vunpack.c.h.bf16 %v4180_v32  ;;  %v5047_v40 = vunpack.c.l.bf16 %v4052_v63  ;;  %v5271_v20 = vunpack.c.l.bf16 %v4180_v32  ;;  %v4300_v22 = vld [vmem:[%s12579_s19 + $0xde4] sm:$0xff]  ;;  %v4160_v36 = vld [vmem:[%s12579_s19 + $0xa10] sm:$0xff]  ;;  %v4152_v63 = vld [vmem:[%s12579_s19 + $0x9d8] sm:$0xff] }
 0x4b8   :  { %6193 = vmatprep.subr.mxu0 %v5083_v7  ;;  %6264 = vmatprep.subr.mxu1 %v5307_v28  ;;  %v5041_v23 = vunpack.c.h.bf16 %v4048_v13  ;;  %v5265_v19 = vunpack.c.h.bf16 %v4176_v53  ;;  %v5040_v24 = vunpack.c.l.bf16 %v4048_v13  ;;  %v5264_v25 = vunpack.c.l.bf16 %v4176_v53  ;;  %v4288_v47 = vld [vmem:[%s12579_s19 + $0xd90] sm:$0xff]  ;;  %v4280_v32 = vld [vmem:[%s12579_s19 + $0xd58] sm:$0xff] }
 0x4b9   :  { %6194 = vmatpush1.msra.mxu0 %v5082_v30  ;;  %6265 = vmatpush1.msra.mxu1 %v5306_v57  ;;  %v5258_v7 = vunpack.c.h.bf16 %v4172_v58  ;;  %v5482_v28 = vunpack.c.h.bf16 %v4300_v22  ;;  %v5257_v30 = vunpack.c.l.bf16 %v4172_v58  ;;  %v5481_v57 = vunpack.c.l.bf16 %v4300_v22  ;;  %v4284_v56 = vld [vmem:[%s12579_s19 + $0xd74] sm:$0xff]  ;;  %v4148_v13 = vld [vmem:[%s12579_s19 + $0x9bc] sm:$0xff] }
 0x4ba   :  { %6195 = vmatprep.subr.mxu0 %v5076_v33  ;;  %6266 = vmatprep.subr.mxu1 %v5300_v0  ;;  %v5251_v33 = vunpack.c.h.bf16 %v4168_v26  ;;  %v5475_v0 = vunpack.c.h.bf16 %v4296_v8  ;;  %v4276_v53 = vld [vmem:[%s12579_s19 + $0xd3c] sm:$0xff] }
 0x4bb   :  { %6196 = vmatpush1.msra.mxu0 %v5075_v44  ;;  %6267 = vmatpush1.msra.mxu1 %v5299_v6  ;;  %v5250_v44 = vunpack.c.l.bf16 %v4168_v26  ;;  %v5474_v6 = vunpack.c.l.bf16 %v4296_v8  ;;  %v4144_v58 = vld [vmem:[%s12579_s19 + $0x9a0] sm:$0xff] }
 0x4bc   :  { %6197 = vmatprep.subr.mxu0 %v5069_v59  ;;  %6268 = vmatprep.subr.mxu1 %v5293_v49  ;;  %v5244_v59 = vunpack.c.h.bf16 %v4164_v1  ;;  %v5468_v49 = vunpack.c.h.bf16 %v4292_v5  ;;  %v4272_v22 = vld [vmem:[%s12579_s19 + $0xd20] sm:$0xff] }
 0x4bd   :  { %6198 = vmatpush1.msra.mxu0 %v5068_v9  ;;  %6269 = vmatpush1.msra.mxu1 %v5292_v50  ;;  %v5243_v9 = vunpack.c.l.bf16 %v4164_v1  ;;  %v5467_v50 = vunpack.c.l.bf16 %v4292_v5  ;;  %v4140_v26 = vld [vmem:[%s12579_s19 + $0x984] sm:$0xff] }
 0x4be   :  { %6199 = vmatprep.subr.mxu0 %v5062_v29  ;;  %6270 = vmatprep.subr.mxu1 %v5286_v48  ;;  %v5237_v29 = vunpack.c.h.bf16 %v4160_v36  ;;  %v5461_v48 = vunpack.c.h.bf16 %v4288_v47  ;;  %v4268_v8 = vld [vmem:[%s12579_s19 + $0xd04] sm:$0xff] }
 0x4bf   :  { %6200 = vmatpush1.msra.mxu0 %v5061_v12  ;;  %6271 = vmatpush1.msra.mxu1 %v5285_v11  ;;  %v5236_v12 = vunpack.c.l.bf16 %v4160_v36  ;;  %v5460_v11 = vunpack.c.l.bf16 %v4288_v47  ;;  %v4136_v1 = vld [vmem:[%s12579_s19 + $0x968] sm:$0xff] }
 0x4c0   :  { %6201 = vmatprep.subr.mxu0 %v5055_v15  ;;  %6272 = vmatprep.subr.mxu1 %v5279_v16  ;;  %v5230_v15 = vunpack.c.h.bf16 %v4156_v54  ;;  %v5454_v16 = vunpack.c.h.bf16 %v4284_v56  ;;  %v4264_v5 = vld [vmem:[%s12579_s19 + $0xce8] sm:$0xff] }
 0x4c1   :  { %6202 = vmatpush1.msra.mxu0 %v5054_v14  ;;  %6273 = vmatpush1.msra.mxu1 %v5278_v17  ;;  %v5229_v14 = vunpack.c.l.bf16 %v4156_v54  ;;  %v5453_v17 = vunpack.c.l.bf16 %v4284_v56  ;;  %v4132_v36 = vld [vmem:[%s12579_s19 + $0x94c] sm:$0xff] }
 0x4c2   :  { %6203 = vmatprep.subr.mxu0 %v5048_v18  ;;  %6274 = vmatprep.subr.mxu1 %v5272_v46  ;;  %v5223_v18 = vunpack.c.h.bf16 %v4152_v63  ;;  %v5447_v46 = vunpack.c.h.bf16 %v4280_v32  ;;  %v4260_v47 = vld [vmem:[%s12579_s19 + $0xccc] sm:$0xff] }
 0x4c3   :  { %6204 = vmatpush1.msra.mxu0 %v5047_v40  ;;  %6275 = vmatpush1.msra.mxu1 %v5271_v20  ;;  %v5222_v40 = vunpack.c.l.bf16 %v4152_v63  ;;  %v5446_v20 = vunpack.c.l.bf16 %v4280_v32  ;;  %v4128_v54 = vld [vmem:[%s12579_s19 + $0x930] sm:$0xff] }
 0x4c4   :  { %6205 = vmatprep.subr.mxu0 %v5041_v23  ;;  %6276 = vmatprep.subr.mxu1 %v5265_v19  ;;  %v5216_v23 = vunpack.c.h.bf16 %v4148_v13  ;;  %v5440_v19 = vunpack.c.h.bf16 %v4276_v53  ;;  %v4256_v56 = vld [vmem:[%s12579_s19 + $0xcb0] sm:$0xff] }
 0x4c5   :  { %6206 = vmatpush1.msra.mxu0 %v5040_v24  ;;  %6277 = vmatpush1.msra.mxu1 %v5264_v25  ;;  %v5215_v24 = vunpack.c.l.bf16 %v4148_v13  ;;  %v5439_v25 = vunpack.c.l.bf16 %v4276_v53  ;;  %v4124_v63 = vld [vmem:[%s12579_s19 + $0x914] sm:$0xff] }
 0x4c6   :  { %6207 = vmatprep.subr.mxu0 %v5258_v7  ;;  %6278 = vmatprep.subr.mxu1 %v5482_v28  ;;  %v5209_v7 = vunpack.c.h.bf16 %v4144_v58  ;;  %v5433_v28 = vunpack.c.h.bf16 %v4272_v22  ;;  %v4252_v32 = vld [vmem:[%s12579_s19 + $0xc94] sm:$0xff] }
 0x4c7   :  { %6208 = vmatpush2.msra.mxu0 %v5257_v30  ;;  %6279 = vmatpush2.msra.mxu1 %v5481_v57  ;;  %v5208_v30 = vunpack.c.l.bf16 %v4144_v58  ;;  %v5432_v57 = vunpack.c.l.bf16 %v4272_v22  ;;  %v4120_v13 = vld [vmem:[%s12579_s19 + $0x8f8] sm:$0xff] }
 0x4c8   :  { %6209 = vmatprep.subr.mxu0 %v5251_v33  ;;  %6280 = vmatprep.subr.mxu1 %v5475_v0  ;;  %v5202_v33 = vunpack.c.h.bf16 %v4140_v26  ;;  %v5426_v0 = vunpack.c.h.bf16 %v4268_v8  ;;  %v4248_v53 = vld [vmem:[%s12579_s19 + $0xc78] sm:$0xff] }
 0x4c9   :  { %6210 = vmatpush2.msra.mxu0 %v5250_v44  ;;  %6281 = vmatpush2.msra.mxu1 %v5474_v6  ;;  %v5201_v44 = vunpack.c.l.bf16 %v4140_v26  ;;  %v5425_v6 = vunpack.c.l.bf16 %v4268_v8  ;;  %v4116_v58 = vld [vmem:[%s12579_s19 + $0x8dc] sm:$0xff] }
 0x4ca   :  { %6211 = vmatprep.subr.mxu0 %v5244_v59  ;;  %6282 = vmatprep.subr.mxu1 %v5468_v49  ;;  %v5195_v59 = vunpack.c.h.bf16 %v4136_v1  ;;  %v5419_v49 = vunpack.c.h.bf16 %v4264_v5  ;;  %v4244_v22 = vld [vmem:[%s12579_s19 + $0xc5c] sm:$0xff] }
 0x4cb   :  { %6212 = vmatpush2.msra.mxu0 %v5243_v9  ;;  %6283 = vmatpush2.msra.mxu1 %v5467_v50  ;;  %v5194_v9 = vunpack.c.l.bf16 %v4136_v1  ;;  %v5418_v50 = vunpack.c.l.bf16 %v4264_v5  ;;  %v4112_v26 = vld [vmem:[%s12579_s19 + $0x8c0] sm:$0xff] }
 0x4cc   :  { %6213 = vmatprep.subr.mxu0 %v5237_v29  ;;  %6284 = vmatprep.subr.mxu1 %v5461_v48  ;;  %v5188_v29 = vunpack.c.h.bf16 %v4132_v36  ;;  %v5412_v48 = vunpack.c.h.bf16 %v4260_v47  ;;  %v4240_v8 = vld [vmem:[%s12579_s19 + $0xc40] sm:$0xff]  ;;  %v5153_v1 = vunpack.c.h.bf16 %v4112_v26 }
 0x4cd   :  { %6214 = vmatpush2.msra.mxu0 %v5236_v12  ;;  %6285 = vmatpush2.msra.mxu1 %v5460_v11  ;;  %v5187_v12 = vunpack.c.l.bf16 %v4132_v36  ;;  %v5411_v11 = vunpack.c.l.bf16 %v4260_v47  ;;  %v5377_v5 = vunpack.c.h.bf16 %v4240_v8 }
 0x4ce   :  { %6215 = vmatprep.subr.mxu0 %v5230_v15  ;;  %6286 = vmatprep.subr.mxu1 %v5454_v16  ;;  %v5181_v15 = vunpack.c.h.bf16 %v4128_v54  ;;  %v5405_v16 = vunpack.c.h.bf16 %v4256_v56 }
 0x4cf   :  { %6216 = vmatpush2.msra.mxu0 %v5229_v14  ;;  %6287 = vmatpush2.msra.mxu1 %v5453_v17  ;;  %v5180_v14 = vunpack.c.l.bf16 %v4128_v54  ;;  %v5404_v17 = vunpack.c.l.bf16 %v4256_v56 }
 0x4d0   :  { %6217 = vmatprep.subr.mxu0 %v5223_v18  ;;  %6288 = vmatprep.subr.mxu1 %v5447_v46  ;;  %v5174_v18 = vunpack.c.h.bf16 %v4124_v63  ;;  %v5398_v46 = vunpack.c.h.bf16 %v4252_v32 }
 0x4d1   :  { %6218 = vmatpush2.msra.mxu0 %v5222_v40  ;;  %6289 = vmatpush2.msra.mxu1 %v5446_v20  ;;  %v5173_v40 = vunpack.c.l.bf16 %v4124_v63  ;;  %v5397_v20 = vunpack.c.l.bf16 %v4252_v32 }
 0x4d2   :  { %6219 = vmatprep.subr.mxu0 %v5216_v23  ;;  %6290 = vmatprep.subr.mxu1 %v5440_v19  ;;  %v5167_v23 = vunpack.c.h.bf16 %v4120_v13  ;;  %v5391_v19 = vunpack.c.h.bf16 %v4248_v53 }
 0x4d3   :  { %6220 = vmatpush2.msra.mxu0 %v5215_v24  ;;  %6291 = vmatpush2.msra.mxu1 %v5439_v25  ;;  %v5166_v24 = vunpack.c.l.bf16 %v4120_v13  ;;  %v5390_v25 = vunpack.c.l.bf16 %v4248_v53  ;;  %v4348_v13 = vld [vmem:[%s12579_s19 + $0xf34] sm:$0xff] }
 0x4d4   :  { %6221 = vmatprep.subr.mxu0 %v5209_v7  ;;  %6292 = vmatprep.subr.mxu1 %v5433_v28  ;;  %v5160_v7 = vunpack.c.h.bf16 %v4116_v58  ;;  %v5384_v28 = vunpack.c.h.bf16 %v4244_v22  ;;  %v4476_v53 = vld [vmem:[%s12579_s19 + $0x12b4] sm:$0xff] }
 0x4d5   :  { %6222 = vmatpush2.msra.mxu0 %v5208_v30  ;;  %6293 = vmatpush2.msra.mxu1 %v5432_v57  ;;  %v5159_v30 = vunpack.c.l.bf16 %v4116_v58  ;;  %v5383_v57 = vunpack.c.l.bf16 %v4244_v22  ;;  %v4344_v58 = vld [vmem:[%s12579_s19 + $0xf18] sm:$0xff] }
 0x4d6   :  { %6223 = vmatprep.subr.mxu0 %v5202_v33  ;;  %6294 = vmatprep.subr.mxu1 %v5426_v0  ;;  %v4364_v33 = vld [vmem:[%s12579_s19 + $0xfa4] sm:$0xff]  ;;  %v4472_v22 = vld [vmem:[%s12579_s19 + $0x1298] sm:$0xff] }
 0x4d7   :  { %6224 = vmatpush2.msra.mxu0 %v5201_v44  ;;  %6295 = vmatpush2.msra.mxu1 %v5425_v6  ;;  %v4492_v0 = vld [vmem:[%s12579_s19 + $0x1324] sm:$0xff]  ;;  %v5152_v44 = vunpack.c.l.bf16 %v4112_v26  ;;  %v5376_v6 = vunpack.c.l.bf16 %v4240_v8  ;;  %v5594_v36 = vunpack.c.h.bf16 %v4364_v33  ;;  %v5593_v54 = vunpack.c.l.bf16 %v4364_v33  ;;  %v4340_v26 = vld [vmem:[%s12579_s19 + $0xefc] sm:$0xff] }
 0x4d8   :  { %6225 = vmatprep.subr.mxu0 %v5195_v59  ;;  %6296 = vmatprep.subr.mxu1 %v5419_v49  ;;  %v5818_v47 = vunpack.c.h.bf16 %v4492_v0  ;;  %v4360_v59 = vld [vmem:[%s12579_s19 + $0xf88] sm:$0xff]  ;;  %v5817_v56 = vunpack.c.l.bf16 %v4492_v0  ;;  %v4468_v8 = vld [vmem:[%s12579_s19 + $0x127c] sm:$0xff]  ;;  %v5552_v33 = vunpack.c.h.bf16 %v4340_v26 }
 0x4d9   :  { %6226 = vmatpush2.msra.mxu0 %v5194_v9  ;;  %6297 = vmatpush2.msra.mxu1 %v5418_v50  ;;  %v4488_v49 = vld [vmem:[%s12579_s19 + $0x1308] sm:$0xff]  ;;  %v10696_v9 = vmax.f32 %v10434_v38, 0.0  ;;  %v10699_v50 = vmax.f32 %v10436_v61, 0.0  ;;  %v10710_v38 = vmax.f32 %v10493_v2, 0.0  ;;  %v5587_v61 = vunpack.c.h.bf16 %v4360_v59 }
 0x4da   :  { %6227 = vmatprep.subr.mxu0 %v5188_v29  ;;  %6298 = vmatprep.subr.mxu1 %v5412_v48  ;;  %v4356_v29 = vld [vmem:[%s12579_s19 + $0xf6c] sm:$0xff]  ;;  %v5586_v63 = vunpack.c.l.bf16 %v4360_v59  ;;  %v5810_v32 = vunpack.c.l.bf16 %v4488_v49  ;;  %v5776_v0 = vunpack.c.h.bf16 %v4468_v8 }
 0x4db   :  { %6228 = vmatpush2.msra.mxu0 %v5187_v12  ;;  %6299 = vmatpush2.msra.mxu1 %v5411_v11  ;;  %v4484_v48 = vld [vmem:[%s12579_s19 + $0x12ec] sm:$0xff]  ;;  %v5811_v12 = vunpack.c.h.bf16 %v4488_v49  ;;  %v10713_v11 = vmax.f32 %v10495_v4, 0.0  ;;  %v5580_v2 = vunpack.c.h.bf16 %v4356_v29  ;;  %v5579_v4 = vunpack.c.l.bf16 %v4356_v29 }
 0x4dc   :  { %6229 = vmatprep.subr.mxu0 %v5181_v15  ;;  %6300 = vmatprep.subr.mxu1 %v5405_v16  ;;  %v4352_v15 = vld [vmem:[%s12579_s19 + $0xf50] sm:$0xff]  ;;  %v4328_v29 = vld [vmem:[%s12579_s19 + $0xea8] sm:$0xff] }
 0x4dd   :  { %6230 = vmatpush2.msra.mxu0 %v5180_v14  ;;  %6301 = vmatpush2.msra.mxu1 %v5404_v17  ;;  %v4480_v16 = vld [vmem:[%s12579_s19 + $0x12d0] sm:$0xff]  ;;  %v5804_v14 = vunpack.c.h.bf16 %v4484_v48  ;;  %v5803_v17 = vunpack.c.l.bf16 %v4484_v48  ;;  %v4456_v48 = vld [vmem:[%s12579_s19 + $0x1228] sm:$0xff] }
 0x4de   :  { %6231 = vmatprep.subr.mxu0 %v5174_v18  ;;  %6302 = vmatprep.subr.mxu1 %v5398_v46  ;;  %v5573_v18 = vunpack.c.h.bf16 %v4352_v15  ;;  %v5797_v46 = vunpack.c.h.bf16 %v4480_v16 }
 0x4df   :  { %6232 = vmatpush2.msra.mxu0 %v5173_v40  ;;  %6303 = vmatpush2.msra.mxu1 %v5397_v20  ;;  %v5572_v40 = vunpack.c.l.bf16 %v4352_v15  ;;  %v5796_v20 = vunpack.c.l.bf16 %v4480_v16  ;;  %v4324_v15 = vld [vmem:[%s12579_s19 + $0xe8c] sm:$0xff] }
 0x4e0   :  { %6233 = vmatprep.subr.mxu0 %v5167_v23  ;;  %6304 = vmatprep.subr.mxu1 %v5391_v19  ;;  %v5566_v23 = vunpack.c.h.bf16 %v4348_v13  ;;  %v5790_v19 = vunpack.c.h.bf16 %v4476_v53  ;;  %v4452_v16 = vld [vmem:[%s12579_s19 + $0x120c] sm:$0xff] }
 0x4e1   :  { %6234 = vmatpush2.msra.mxu0 %v5166_v24  ;;  %6305 = vmatpush2.msra.mxu1 %v5390_v25  ;;  %v5565_v24 = vunpack.c.l.bf16 %v4348_v13  ;;  %v5789_v25 = vunpack.c.l.bf16 %v4476_v53  ;;  %v4320_v13 = vld [vmem:[%s12579_s19 + $0xe70] sm:$0xff] }
 0x4e2   :  { %6235 = vmatprep.subr.mxu0 %v5160_v7  ;;  %6306 = vmatprep.subr.mxu1 %v5384_v28  ;;  %v5559_v7 = vunpack.c.h.bf16 %v4344_v58  ;;  %v5783_v28 = vunpack.c.h.bf16 %v4472_v22  ;;  %v4448_v53 = vld [vmem:[%s12579_s19 + $0x11f0] sm:$0xff] }
 0x4e3   :  { %6236 = vmatpush2.msra.mxu0 %v5159_v30  ;;  %6307 = vmatpush2.msra.mxu1 %v5383_v57  ;;  %v5558_v30 = vunpack.c.l.bf16 %v4344_v58  ;;  %v5782_v57 = vunpack.c.l.bf16 %v4472_v22  ;;  %v4316_v58 = vld [vmem:[%s12579_s19 + $0xe54] sm:$0xff] }
 0x4e4   :  { %6237 = vmatprep.subr.mxu0 %v5153_v1  ;;  %6308 = vmatprep.subr.mxu1 %v5377_v5  ;;  %v4336_v1 = vld [vmem:[%s12579_s19 + $0xee0] sm:$0xff]  ;;  %v4444_v22 = vld [vmem:[%s12579_s19 + $0x11d4] sm:$0xff] }
 0x4e5   :  { %6238 = vmatpush2.msra.mxu0 %v5152_v44  ;;  %6309 = vmatpush2.msra.mxu1 %v5376_v6  ;;  %v4464_v5 = vld [vmem:[%s12579_s19 + $0x1260] sm:$0xff]  ;;  %v5551_v44 = vunpack.c.l.bf16 %v4340_v26  ;;  %v5775_v6 = vunpack.c.l.bf16 %v4468_v8  ;;  %v5545_v59 = vunpack.c.h.bf16 %v4336_v1  ;;  %v4312_v26 = vld [vmem:[%s12579_s19 + $0xe38] sm:$0xff] }
 0x4e6   :  { %6240 = vmatmul.mubr.f32.vlgmr.msra.gmra.mxu0 %v10696_v9  ;;  %6311 = vmatmul.mubr.f32.vlgmr.msra.gmra.mxu1 %v10699_v50  ;;  %v5769_v49 = vunpack.c.h.bf16 %v4464_v5  ;;  %v4440_v8 = vld [vmem:[%s12579_s19 + $0x11b8] sm:$0xff] }
 0x4e7   :  { %6317 = vmatprep.subr.mxu0 %v5594_v36  ;;  %6388 = vmatprep.subr.mxu1 %v5818_v47  ;;  %v4332_v36 = vld [vmem:[%s12579_s19 + $0xec4] sm:$0xff] }
 0x4e8   :  { %6318 = vmatpush1.msra.mxu0 %v5593_v54  ;;  %6381 = vmatprep.mubr.f32.mxu0 %v10710_v38  ;;  %v4460_v47 = vld [vmem:[%s12579_s19 + $0x1244] sm:$0xff]  ;;  %v5544_v54 = vunpack.c.l.bf16 %v4336_v1  ;;  %v4308_v1 = vld [vmem:[%s12579_s19 + $0xe1c] sm:$0xff] }
 0x4e9   :  { %6389 = vmatpush1.msra.mxu1 %v5817_v56  ;;  %6452 = vmatprep.mubr.f32.mxu1 %v10713_v11  ;;  %v5768_v56 = vunpack.c.l.bf16 %v4464_v5  ;;  %v4436_v5 = vld [vmem:[%s12579_s19 + $0x119c] sm:$0xff] }
 0x4ea   :  { %6319 = vmatprep.subr.mxu0 %v5587_v61  ;;  %6390 = vmatprep.subr.mxu1 %v5811_v12  ;;  %v5538_v61 = vunpack.c.h.bf16 %v4332_v36  ;;  %v5762_v12 = vunpack.c.h.bf16 %v4460_v47 }
 0x4eb   :  { %6320 = vmatpush1.msra.mxu0 %v5586_v63  ;;  %6391 = vmatpush1.msra.mxu1 %v5810_v32  ;;  %v5537_v63 = vunpack.c.l.bf16 %v4332_v36  ;;  %v5761_v32 = vunpack.c.l.bf16 %v4460_v47  ;;  %v4304_v36 = vld [vmem:[%s12579_s19 + $0xe00] sm:$0xff] }
 0x4ec   :  { %6321 = vmatprep.subr.mxu0 %v5580_v2  ;;  %6392 = vmatprep.subr.mxu1 %v5804_v14  ;;  %v5531_v2 = vunpack.c.h.bf16 %v4328_v29  ;;  %v5755_v14 = vunpack.c.h.bf16 %v4456_v48  ;;  %v4432_v47 = vld [vmem:[%s12579_s19 + $0x1180] sm:$0xff] }
 0x4ed   :  { %6322 = vmatpush1.msra.mxu0 %v5579_v4  ;;  %6393 = vmatpush1.msra.mxu1 %v5803_v17  ;;  %v5530_v4 = vunpack.c.l.bf16 %v4328_v29  ;;  %v5754_v17 = vunpack.c.l.bf16 %v4456_v48  ;;  %v4428_v29 = vld [vmem:[%s12579_s19 + $0x1164] sm:$0xff] }
 0x4ee   :  { %6323 = vmatprep.subr.mxu0 %v5573_v18  ;;  %6394 = vmatprep.subr.mxu1 %v5797_v46  ;;  %v5524_v18 = vunpack.c.h.bf16 %v4324_v15  ;;  %v5748_v46 = vunpack.c.h.bf16 %v4452_v16  ;;  %v4556_v48 = vld [vmem:[%s12579_s19 + $0x14e4] sm:$0xff] }
 0x4ef   :  { %6324 = vmatpush1.msra.mxu0 %v5572_v40  ;;  %6395 = vmatpush1.msra.mxu1 %v5796_v20  ;;  %v5523_v40 = vunpack.c.l.bf16 %v4324_v15  ;;  %v5747_v20 = vunpack.c.l.bf16 %v4452_v16  ;;  %v4424_v15 = vld [vmem:[%s12579_s19 + $0x1148] sm:$0xff] }
 0x4f0   :  { %6325 = vmatprep.subr.mxu0 %v5566_v23  ;;  %6396 = vmatprep.subr.mxu1 %v5790_v19  ;;  %v5517_v23 = vunpack.c.h.bf16 %v4320_v13  ;;  %v5741_v19 = vunpack.c.h.bf16 %v4448_v53  ;;  %v4552_v16 = vld [vmem:[%s12579_s19 + $0x14c8] sm:$0xff] }
 0x4f1   :  { %6326 = vmatpush1.msra.mxu0 %v5565_v24  ;;  %6397 = vmatpush1.msra.mxu1 %v5789_v25  ;;  %v5516_v24 = vunpack.c.l.bf16 %v4320_v13  ;;  %v5740_v25 = vunpack.c.l.bf16 %v4448_v53  ;;  %v4420_v13 = vld [vmem:[%s12579_s19 + $0x112c] sm:$0xff] }
 0x4f2   :  { %6327 = vmatprep.subr.mxu0 %v5559_v7  ;;  %6398 = vmatprep.subr.mxu1 %v5783_v28  ;;  %v5510_v7 = vunpack.c.h.bf16 %v4316_v58  ;;  %v5734_v28 = vunpack.c.h.bf16 %v4444_v22  ;;  %v4548_v53 = vld [vmem:[%s12579_s19 + $0x14ac] sm:$0xff] }
 0x4f3   :  { %6328 = vmatpush1.msra.mxu0 %v5558_v30  ;;  %6399 = vmatpush1.msra.mxu1 %v5782_v57  ;;  %v5509_v30 = vunpack.c.l.bf16 %v4316_v58  ;;  %v5733_v57 = vunpack.c.l.bf16 %v4444_v22  ;;  %v4416_v58 = vld [vmem:[%s12579_s19 + $0x1110] sm:$0xff] }
 0x4f4   :  { %6329 = vmatprep.subr.mxu0 %v5552_v33  ;;  %6400 = vmatprep.subr.mxu1 %v5776_v0  ;;  %v5503_v33 = vunpack.c.h.bf16 %v4312_v26  ;;  %v5727_v0 = vunpack.c.h.bf16 %v4440_v8  ;;  %v4544_v22 = vld [vmem:[%s12579_s19 + $0x1490] sm:$0xff] }
 0x4f5   :  { %6330 = vmatpush1.msra.mxu0 %v5551_v44  ;;  %6401 = vmatpush1.msra.mxu1 %v5775_v6  ;;  %v5502_v44 = vunpack.c.l.bf16 %v4312_v26  ;;  %v5726_v6 = vunpack.c.l.bf16 %v4440_v8  ;;  %v4412_v26 = vld [vmem:[%s12579_s19 + $0x10f4] sm:$0xff] }
 0x4f6   :  { %6331 = vmatprep.subr.mxu0 %v5545_v59  ;;  %6402 = vmatprep.subr.mxu1 %v5769_v49  ;;  %v5496_v59 = vunpack.c.h.bf16 %v4308_v1  ;;  %v5720_v49 = vunpack.c.h.bf16 %v4436_v5  ;;  %v4540_v8 = vld [vmem:[%s12579_s19 + $0x1474] sm:$0xff] }
 0x4f7   :  { %6332 = vmatpush1.msra.mxu0 %v5544_v54  ;;  %6403 = vmatpush1.msra.mxu1 %v5768_v56  ;;  %v5495_v54 = vunpack.c.l.bf16 %v4308_v1  ;;  %v5719_v56 = vunpack.c.l.bf16 %v4436_v5  ;;  %v4408_v1 = vld [vmem:[%s12579_s19 + $0x10d8] sm:$0xff] }
 0x4f8   :  { %6333 = vmatprep.subr.mxu0 %v5538_v61  ;;  %6404 = vmatprep.subr.mxu1 %v5762_v12  ;;  %v5489_v61 = vunpack.c.h.bf16 %v4304_v36  ;;  %v5713_v12 = vunpack.c.h.bf16 %v4432_v47  ;;  %v4536_v5 = vld [vmem:[%s12579_s19 + $0x1458] sm:$0xff] }
 0x4f9   :  { %6334 = vmatpush1.msra.mxu0 %v5537_v63  ;;  %6405 = vmatpush1.msra.mxu1 %v5761_v32  ;;  %v5488_v63 = vunpack.c.l.bf16 %v4304_v36  ;;  %v5712_v32 = vunpack.c.l.bf16 %v4432_v47  ;;  %v4404_v36 = vld [vmem:[%s12579_s19 + $0x10bc] sm:$0xff] }
 0x4fa   :  { %6335 = vmatprep.subr.mxu0 %v5531_v2  ;;  %6406 = vmatprep.subr.mxu1 %v5755_v14  ;;  %v5706_v2 = vunpack.c.h.bf16 %v4428_v29  ;;  %v5930_v14 = vunpack.c.h.bf16 %v4556_v48  ;;  %v4532_v47 = vld [vmem:[%s12579_s19 + $0x143c] sm:$0xff] }
 0x4fb   :  { %6336 = vmatpush1.msra.mxu0 %v5530_v4  ;;  %6407 = vmatpush1.msra.mxu1 %v5754_v17  ;;  %v5705_v4 = vunpack.c.l.bf16 %v4428_v29  ;;  %v5929_v17 = vunpack.c.l.bf16 %v4556_v48  ;;  %v4400_v29 = vld [vmem:[%s12579_s19 + $0x10a0] sm:$0xff] }
 0x4fc   :  { %6337 = vmatprep.subr.mxu0 %v5524_v18  ;;  %6408 = vmatprep.subr.mxu1 %v5748_v46  ;;  %v5699_v18 = vunpack.c.h.bf16 %v4424_v15  ;;  %v5923_v46 = vunpack.c.h.bf16 %v4552_v16  ;;  %v4528_v48 = vld [vmem:[%s12579_s19 + $0x1420] sm:$0xff] }
 0x4fd   :  { %6338 = vmatpush1.msra.mxu0 %v5523_v40  ;;  %6409 = vmatpush1.msra.mxu1 %v5747_v20  ;;  %v5698_v40 = vunpack.c.l.bf16 %v4424_v15  ;;  %v5922_v20 = vunpack.c.l.bf16 %v4552_v16  ;;  %v4396_v15 = vld [vmem:[%s12579_s19 + $0x1084] sm:$0xff] }
 0x4fe   :  { %6339 = vmatprep.subr.mxu0 %v5517_v23  ;;  %6410 = vmatprep.subr.mxu1 %v5741_v19  ;;  %v5692_v23 = vunpack.c.h.bf16 %v4420_v13  ;;  %v5916_v19 = vunpack.c.h.bf16 %v4548_v53  ;;  %v4524_v16 = vld [vmem:[%s12579_s19 + $0x1404] sm:$0xff] }
 0x4ff   :  { %6340 = vmatpush1.msra.mxu0 %v5516_v24  ;;  %6411 = vmatpush1.msra.mxu1 %v5740_v25  ;;  %v5691_v24 = vunpack.c.l.bf16 %v4420_v13  ;;  %v5915_v25 = vunpack.c.l.bf16 %v4548_v53  ;;  %v4392_v13 = vld [vmem:[%s12579_s19 + $0x1068] sm:$0xff] }
 0x500   :  { %6341 = vmatprep.subr.mxu0 %v5510_v7  ;;  %6412 = vmatprep.subr.mxu1 %v5734_v28  ;;  %v5685_v7 = vunpack.c.h.bf16 %v4416_v58  ;;  %v5909_v28 = vunpack.c.h.bf16 %v4544_v22  ;;  %v4520_v53 = vld [vmem:[%s12579_s19 + $0x13e8] sm:$0xff] }
 0x501   :  { %6342 = vmatpush1.msra.mxu0 %v5509_v30  ;;  %6413 = vmatpush1.msra.mxu1 %v5733_v57  ;;  %v5684_v30 = vunpack.c.l.bf16 %v4416_v58  ;;  %v5908_v57 = vunpack.c.l.bf16 %v4544_v22  ;;  %v4388_v58 = vld [vmem:[%s12579_s19 + $0x104c] sm:$0xff] }
 0x502   :  { %6343 = vmatprep.subr.mxu0 %v5503_v33  ;;  %6414 = vmatprep.subr.mxu1 %v5727_v0  ;;  %v5678_v33 = vunpack.c.h.bf16 %v4412_v26  ;;  %v5902_v0 = vunpack.c.h.bf16 %v4540_v8  ;;  %v4516_v22 = vld [vmem:[%s12579_s19 + $0x13cc] sm:$0xff] }
 0x503   :  { %6344 = vmatpush1.msra.mxu0 %v5502_v44  ;;  %6415 = vmatpush1.msra.mxu1 %v5726_v6  ;;  %v5677_v44 = vunpack.c.l.bf16 %v4412_v26  ;;  %v5901_v6 = vunpack.c.l.bf16 %v4540_v8  ;;  %v4384_v26 = vld [vmem:[%s12579_s19 + $0x1030] sm:$0xff] }
 0x504   :  { %6345 = vmatprep.subr.mxu0 %v5496_v59  ;;  %6416 = vmatprep.subr.mxu1 %v5720_v49  ;;  %v5671_v59 = vunpack.c.h.bf16 %v4408_v1  ;;  %v5895_v49 = vunpack.c.h.bf16 %v4536_v5  ;;  %v4512_v8 = vld [vmem:[%s12579_s19 + $0x13b0] sm:$0xff] }
 0x505   :  { %6346 = vmatpush1.msra.mxu0 %v5495_v54  ;;  %6417 = vmatpush1.msra.mxu1 %v5719_v56  ;;  %v5670_v54 = vunpack.c.l.bf16 %v4408_v1  ;;  %v5894_v56 = vunpack.c.l.bf16 %v4536_v5  ;;  %v4380_v1 = vld [vmem:[%s12579_s19 + $0x1014] sm:$0xff] }
 0x506   :  { %6347 = vmatprep.subr.mxu0 %v5489_v61  ;;  %6418 = vmatprep.subr.mxu1 %v5713_v12  ;;  %v5664_v61 = vunpack.c.h.bf16 %v4404_v36  ;;  %v5888_v12 = vunpack.c.h.bf16 %v4532_v47  ;;  %v4508_v5 = vld [vmem:[%s12579_s19 + $0x1394] sm:$0xff] }
 0x507   :  { %6348 = vmatpush1.msra.mxu0 %v5488_v63  ;;  %6419 = vmatpush1.msra.mxu1 %v5712_v32  ;;  %v5663_v63 = vunpack.c.l.bf16 %v4404_v36  ;;  %v5887_v32 = vunpack.c.l.bf16 %v4532_v47  ;;  %v4376_v36 = vld [vmem:[%s12579_s19 + $0xff8] sm:$0xff] }
 0x508   :  { %6349 = vmatprep.subr.mxu0 %v5706_v2  ;;  %6420 = vmatprep.subr.mxu1 %v5930_v14  ;;  %v5657_v2 = vunpack.c.h.bf16 %v4400_v29  ;;  %v5881_v14 = vunpack.c.h.bf16 %v4528_v48  ;;  %v4504_v47 = vld [vmem:[%s12579_s19 + $0x1378] sm:$0xff] }
 0x509   :  { %6350 = vmatpush2.msra.mxu0 %v5705_v4  ;;  %6421 = vmatpush2.msra.mxu1 %v5929_v17  ;;  %v5656_v4 = vunpack.c.l.bf16 %v4400_v29  ;;  %v5880_v17 = vunpack.c.l.bf16 %v4528_v48  ;;  %v4372_v29 = vld [vmem:[%s12579_s19 + $0xfdc] sm:$0xff] }
 0x50a   :  { %6351 = vmatprep.subr.mxu0 %v5699_v18  ;;  %6422 = vmatprep.subr.mxu1 %v5923_v46  ;;  %v5650_v18 = vunpack.c.h.bf16 %v4396_v15  ;;  %v5874_v46 = vunpack.c.h.bf16 %v4524_v16  ;;  %v4500_v48 = vld [vmem:[%s12579_s19 + $0x135c] sm:$0xff] }
 0x50b   :  { %6352 = vmatpush2.msra.mxu0 %v5698_v40  ;;  %6423 = vmatpush2.msra.mxu1 %v5922_v20  ;;  %v5649_v40 = vunpack.c.l.bf16 %v4396_v15  ;;  %v5873_v20 = vunpack.c.l.bf16 %v4524_v16  ;;  %v4368_v15 = vld [vmem:[%s12579_s19 + $0xfc0] sm:$0xff] }
 0x50c   :  { %6353 = vmatprep.subr.mxu0 %v5692_v23  ;;  %6424 = vmatprep.subr.mxu1 %v5916_v19  ;;  %v5643_v23 = vunpack.c.h.bf16 %v4392_v13  ;;  %v5867_v19 = vunpack.c.h.bf16 %v4520_v53  ;;  %v4496_v16 = vld [vmem:[%s12579_s19 + $0x1340] sm:$0xff] }
 0x50d   :  { %6354 = vmatpush2.msra.mxu0 %v5691_v24  ;;  %6425 = vmatpush2.msra.mxu1 %v5915_v25  ;;  %v5642_v24 = vunpack.c.l.bf16 %v4392_v13  ;;  %v5866_v25 = vunpack.c.l.bf16 %v4520_v53  ;;  %v5601_v13 = vunpack.c.h.bf16 %v4368_v15  ;;  %v5825_v53 = vunpack.c.h.bf16 %v4496_v16 }
 0x50e   :  { %6355 = vmatprep.subr.mxu0 %v5685_v7  ;;  %6426 = vmatprep.subr.mxu1 %v5909_v28  ;;  %v5636_v7 = vunpack.c.h.bf16 %v4388_v58  ;;  %v5860_v28 = vunpack.c.h.bf16 %v4516_v22 }
 0x50f   :  { %6356 = vmatpush2.msra.mxu0 %v5684_v30  ;;  %6427 = vmatpush2.msra.mxu1 %v5908_v57  ;;  %v5635_v30 = vunpack.c.l.bf16 %v4388_v58  ;;  %v5859_v57 = vunpack.c.l.bf16 %v4516_v22  ;;  %v4584_v58 = vld [vmem:[%s12579_s19 + $0x15a8] sm:$0xff] }
 0x510   :  { %6357 = vmatprep.subr.mxu0 %v5678_v33  ;;  %6428 = vmatprep.subr.mxu1 %v5902_v0  ;;  %v5629_v33 = vunpack.c.h.bf16 %v4384_v26  ;;  %v5853_v0 = vunpack.c.h.bf16 %v4512_v8 }
 0x511   :  { %6358 = vmatpush2.msra.mxu0 %v5677_v44  ;;  %6429 = vmatpush2.msra.mxu1 %v5901_v6  ;;  %v5628_v44 = vunpack.c.l.bf16 %v4384_v26  ;;  %v5852_v6 = vunpack.c.l.bf16 %v4512_v8 }
 0x512   :  { %6359 = vmatprep.subr.mxu0 %v5671_v59  ;;  %6430 = vmatprep.subr.mxu1 %v5895_v49  ;;  %v5622_v59 = vunpack.c.h.bf16 %v4380_v1  ;;  %v5846_v49 = vunpack.c.h.bf16 %v4508_v5 }
 0x513   :  { %6360 = vmatpush2.msra.mxu0 %v5670_v54  ;;  %6431 = vmatpush2.msra.mxu1 %v5894_v56  ;;  %v5621_v54 = vunpack.c.l.bf16 %v4380_v1  ;;  %v5845_v56 = vunpack.c.l.bf16 %v4508_v5 }
 0x514   :  { %6361 = vmatprep.subr.mxu0 %v5664_v61  ;;  %6432 = vmatprep.subr.mxu1 %v5888_v12  ;;  %v5615_v61 = vunpack.c.h.bf16 %v4376_v36  ;;  %v5839_v12 = vunpack.c.h.bf16 %v4504_v47 }
 0x515   :  { %6362 = vmatpush2.msra.mxu0 %v5663_v63  ;;  %6433 = vmatpush2.msra.mxu1 %v5887_v32  ;;  %v5614_v63 = vunpack.c.l.bf16 %v4376_v36  ;;  %v5838_v32 = vunpack.c.l.bf16 %v4504_v47 }
 0x516   :  { %6363 = vmatprep.subr.mxu0 %v5657_v2  ;;  %6434 = vmatprep.subr.mxu1 %v5881_v14  ;;  %v5608_v2 = vunpack.c.h.bf16 %v4372_v29  ;;  %v5832_v14 = vunpack.c.h.bf16 %v4500_v48 }
 0x517   :  { %6364 = vmatpush2.msra.mxu0 %v5656_v4  ;;  %6435 = vmatpush2.msra.mxu1 %v5880_v17  ;;  %v5607_v4 = vunpack.c.l.bf16 %v4372_v29  ;;  %v5831_v17 = vunpack.c.l.bf16 %v4500_v48 }
 0x518   :  { %6365 = vmatprep.subr.mxu0 %v5650_v18  ;;  %6436 = vmatprep.subr.mxu1 %v5874_v46  ;;  %v4588_v18 = vld [vmem:[%s12579_s19 + $0x15c4] sm:$0xff]  ;;  %v3981_v46 = vld [vmem:[%s12579_s19 + $0x52c] sm:$0xff] }
 0x519   :  { %6366 = vmatpush2.msra.mxu0 %v5649_v40  ;;  %6437 = vmatpush2.msra.mxu1 %v5873_v20  ;;  %v5600_v40 = vunpack.c.l.bf16 %v4368_v15  ;;  %v5824_v20 = vunpack.c.l.bf16 %v4496_v16  ;;  %v5986_v22 = vunpack.c.h.bf16 %v4588_v18  ;;  %v5985_v26 = vunpack.c.l.bf16 %v4588_v18  ;;  %v3953_v18 = vld [vmem:[%s12579_s19 + $0x468] sm:$0xff] }
 0x51a   :  { %6367 = vmatprep.subr.mxu0 %v5643_v23  ;;  %6438 = vmatprep.subr.mxu1 %v5867_v19  ;;  %v4924_v23 = vunpack.c.h.bf16 %v3981_v46  ;;  %v3977_v19 = vld [vmem:[%s12579_s19 + $0x510] sm:$0xff]  ;;  %v4923_v8 = vunpack.c.l.bf16 %v3981_v46 }
 0x51b   :  { %6368 = vmatpush2.msra.mxu0 %v5642_v24  ;;  %6439 = vmatpush2.msra.mxu1 %v5866_v25  ;;  %v10904_v24 = vmax.f32 %v10536_v62, 0.0  ;;  %v10907_v25 = vmax.f32 %v10538_v51, 0.0  ;;  %v5978_v62 = vunpack.c.l.bf16 %v4584_v58  ;;  %v4917_v51 = vunpack.c.h.bf16 %v3977_v19 }
 0x51c   :  { %6369 = vmatprep.subr.mxu0 %v5636_v7  ;;  %6440 = vmatprep.subr.mxu1 %v5860_v28  ;;  %v4580_v7 = vld [vmem:[%s12579_s19 + $0x158c] sm:$0xff]  ;;  %v5979_v28 = vunpack.c.h.bf16 %v4584_v58  ;;  %v4916_v1 = vunpack.c.l.bf16 %v3977_v19  ;;  %v4875_v19 = vunpack.c.h.bf16 %v3953_v18 }
 0x51d   :  { %6370 = vmatpush2.msra.mxu0 %v5635_v30  ;;  %6441 = vmatpush2.msra.mxu1 %v5859_v57  ;;  %v3973_v30 = vld [vmem:[%s12579_s19 + $0x4f4] sm:$0xff]  ;;  %v5972_v5 = vunpack.c.h.bf16 %v4580_v7 }
 0x51e   :  { %6371 = vmatprep.subr.mxu0 %v5629_v33  ;;  %6442 = vmatprep.subr.mxu1 %v5853_v0  ;;  %v4576_v57 = vld [vmem:[%s12579_s19 + $0x1570] sm:$0xff]  ;;  %v3969_v33 = vld [vmem:[%s12579_s19 + $0x4d8] sm:$0xff]  ;;  %v5971_v0 = vunpack.c.l.bf16 %v4580_v7  ;;  %v4909_v36 = vunpack.c.l.bf16 %v3973_v30 }
 0x51f   :  { %6372 = vmatpush2.msra.mxu0 %v5628_v44  ;;  %6443 = vmatpush2.msra.mxu1 %v5852_v6  ;;  %v4910_v44 = vunpack.c.h.bf16 %v3973_v30  ;;  %v4572_v6 = vld [vmem:[%s12579_s19 + $0x1554] sm:$0xff]  ;;  %v5965_v47 = vunpack.c.h.bf16 %v4576_v57  ;;  %v4902_v29 = vunpack.c.l.bf16 %v3969_v33 }
 0x520   :  { %6373 = vmatprep.subr.mxu0 %v5622_v59  ;;  %6444 = vmatprep.subr.mxu1 %v5846_v49  ;;  %v3965_v59 = vld [vmem:[%s12579_s19 + $0x4bc] sm:$0xff]  ;;  %v5964_v49 = vunpack.c.l.bf16 %v4576_v57  ;;  %v5958_v48 = vunpack.c.h.bf16 %v4572_v6  ;;  %v3945_v30 = vld [vmem:[%s12579_s19 + $0x430] sm:$0xff]  ;;  %v10961_v57 = vmax.f32 %v10561_v60, 0.0 }
 0x521   :  { %6374 = vmatpush2.msra.mxu0 %v5621_v54  ;;  %6445 = vmatpush2.msra.mxu1 %v5845_v56  ;;  %v4903_v54 = vunpack.c.h.bf16 %v3969_v33  ;;  %v4568_v56 = vld [vmem:[%s12579_s19 + $0x1538] sm:$0xff]  ;;  %v4895_v15 = vunpack.c.l.bf16 %v3965_v59 }
 0x522   :  { %6375 = vmatprep.subr.mxu0 %v5615_v61  ;;  %6446 = vmatprep.subr.mxu1 %v5839_v12  ;;  %v3961_v61 = vld [vmem:[%s12579_s19 + $0x4a0] sm:$0xff]  ;;  %v5957_v12 = vunpack.c.l.bf16 %v4572_v6  ;;  %v5951_v16 = vunpack.c.h.bf16 %v4568_v56  ;;  %v3941_v33 = vld [vmem:[%s12579_s19 + $0x414] sm:$0xff]  ;;  %v4860_v6 = vunpack.c.l.bf16 %v3945_v30 }
 0x523   :  { %6376 = vmatpush2.msra.mxu0 %v5614_v63  ;;  %6447 = vmatpush2.msra.mxu1 %v5838_v32  ;;  %v4896_v63 = vunpack.c.h.bf16 %v3965_v59  ;;  %v4564_v32 = vld [vmem:[%s12579_s19 + $0x151c] sm:$0xff] }
 0x524   :  { %6377 = vmatprep.subr.mxu0 %v5608_v2  ;;  %6448 = vmatprep.subr.mxu1 %v5832_v14  ;;  %v3957_v2 = vld [vmem:[%s12579_s19 + $0x484] sm:$0xff]  ;;  %v5950_v14 = vunpack.c.l.bf16 %v4568_v56  ;;  %v5943_v46 = vunpack.c.l.bf16 %v4564_v32  ;;  %v4853_v56 = vunpack.c.l.bf16 %v3941_v33 }
 0x525   :  { %6378 = vmatpush2.msra.mxu0 %v5607_v4  ;;  %6449 = vmatpush2.msra.mxu1 %v5831_v17  ;;  %v4889_v4 = vunpack.c.h.bf16 %v3961_v61  ;;  %v4560_v17 = vld [vmem:[%s12579_s19 + $0x1500] sm:$0xff] }
 0x526   :  { %6379 = vmatprep.subr.mxu0 %v5601_v13  ;;  %6450 = vmatprep.subr.mxu1 %v5825_v53  ;;  %v4888_v13 = vunpack.c.l.bf16 %v3961_v61  ;;  %v5944_v53 = vunpack.c.h.bf16 %v4564_v32  ;;  %v5937_v58 = vunpack.c.h.bf16 %v4560_v17 }
 0x527   :  { %6380 = vmatpush2.msra.mxu0 %v5600_v40  ;;  %6451 = vmatpush2.msra.mxu1 %v5824_v20  ;;  %v4882_v40 = vunpack.c.h.bf16 %v3957_v2  ;;  %v4881_v20 = vunpack.c.l.bf16 %v3957_v2 }
 0x528   :  { %6382 = vmatmul.mubr.f32.vlgmr.msra.gmra.mxu0 %v10904_v24  ;;  %6453 = vmatmul.mubr.f32.vlgmr.msra.gmra.mxu1 %v10907_v25 }
 0x529   :  { %6475 = vmatprep.subr.mxu0 %v5986_v22  ;;  %6601 = vmatprep.subr.mxu1 %v4924_v23  ;;  %v3853_v22 = vld [vmem:[%s12579_s19 + $0x1ac] sm:$0xff]  ;;  %v5936_v23 = vunpack.c.l.bf16 %v4560_v17 }
 0x52a   :  { %6476 = vmatpush1.msra.mxu0 %v5985_v26  ;;  %6602 = vmatpush1.msra.mxu1 %v4923_v8  ;;  %v3949_v26 = vld [vmem:[%s12579_s19 + $0x44c] sm:$0xff]  ;;  %v4874_v8 = vunpack.c.l.bf16 %v3953_v18  ;;  %v4700_v7 = vunpack.c.h.bf16 %v3853_v22 }
 0x52b   :  { %6665 = vmatprep.mubr.f32.mxu1 %v10440_v42  ;;  %6477 = vmatprep.subr.mxu0 %v5979_v28  ;;  %v3849_v28 = vld [vmem:[%s12579_s19 + $0x190] sm:$0xff] }
 0x52c   :  { %6603 = vmatprep.subr.mxu1 %v4917_v51  ;;  %6478 = vmatpush1.msra.mxu0 %v5978_v62  ;;  %v4699_v62 = vunpack.c.l.bf16 %v3853_v22  ;;  %v4868_v51 = vunpack.c.h.bf16 %v3949_v26  ;;  %v4692_v60 = vunpack.c.l.bf16 %v3849_v28  ;;  %v3921_v22 = vld [vmem:[%s12579_s19 + $0x388] sm:$0xff] }
 0x52d   :  { %6604 = vmatpush1.msra.mxu1 %v4916_v1  ;;  %6479 = vmatprep.subr.mxu0 %v5972_v5  ;;  %v4867_v1 = vunpack.c.l.bf16 %v3949_v26  ;;  %v3845_v5 = vld [vmem:[%s12579_s19 + $0x174] sm:$0xff] }
 0x52e   :  { %6605 = vmatprep.subr.mxu1 %v4910_v44  ;;  %6480 = vmatpush1.msra.mxu0 %v5971_v0  ;;  %v4693_v0 = vunpack.c.h.bf16 %v3849_v28  ;;  %v4861_v44 = vunpack.c.h.bf16 %v3945_v30  ;;  %v4686_v59 = vunpack.c.h.bf16 %v3845_v5  ;;  %v4045_v28 = vld [vmem:[%s12579_s19 + $0x6ec] sm:$0xff] }
 0x52f   :  { %6606 = vmatpush1.msra.mxu1 %v4909_v36  ;;  %6481 = vmatprep.subr.mxu0 %v5965_v47  ;;  %v3841_v36 = vld [vmem:[%s12579_s19 + $0x158] sm:$0xff] }
 0x530   :  { %6607 = vmatprep.subr.mxu1 %v4903_v54  ;;  %6482 = vmatpush1.msra.mxu0 %v5964_v49  ;;  %v3937_v47 = vld [vmem:[%s12579_s19 + $0x3f8] sm:$0xff]  ;;  %v4854_v49 = vunpack.c.h.bf16 %v3941_v33  ;;  %v4685_v54 = vunpack.c.l.bf16 %v3845_v5  ;;  %v4679_v61 = vunpack.c.h.bf16 %v3841_v36  ;;  %v3817_v5 = vld [vmem:[%s12579_s19 + $0xb0] sm:$0xff] }
 0x531   :  { %6608 = vmatpush1.msra.mxu1 %v4902_v29  ;;  %6483 = vmatprep.subr.mxu0 %v5958_v48  ;;  %v3837_v29 = vld [vmem:[%s12579_s19 + $0x13c] sm:$0xff]  ;;  %v4846_v32 = vunpack.c.l.bf16 %v3937_v47  ;;  %v4041_v33 = vld [vmem:[%s12579_s19 + $0x6d0] sm:$0xff] }
 0x532   :  { %6609 = vmatprep.subr.mxu1 %v4896_v63  ;;  %6484 = vmatpush1.msra.mxu0 %v5957_v12  ;;  %v3933_v48 = vld [vmem:[%s12579_s19 + $0x3dc] sm:$0xff]  ;;  %v4847_v12 = vunpack.c.h.bf16 %v3937_v47  ;;  %v4678_v63 = vunpack.c.l.bf16 %v3841_v36  ;;  %v4672_v2 = vunpack.c.h.bf16 %v3837_v29  ;;  %v3813_v36 = vld [vmem:[%s12579_s19 + $0x94] sm:$0xff] }
 0x533   :  { %6610 = vmatpush1.msra.mxu1 %v4895_v15  ;;  %6485 = vmatprep.subr.mxu0 %v5951_v16  ;;  %v3833_v15 = vld [vmem:[%s12579_s19 + $0x120] sm:$0xff]  ;;  %v4839_v17 = vunpack.c.l.bf16 %v3933_v48  ;;  %v4037_v47 = vld [vmem:[%s12579_s19 + $0x6b4] sm:$0xff] }
 0x534   :  { %6611 = vmatprep.subr.mxu1 %v4889_v4  ;;  %6486 = vmatpush1.msra.mxu0 %v5950_v14  ;;  %v3929_v16 = vld [vmem:[%s12579_s19 + $0x3c0] sm:$0xff]  ;;  %v4840_v14 = vunpack.c.h.bf16 %v3933_v48  ;;  %v4671_v4 = vunpack.c.l.bf16 %v3837_v29  ;;  %v4665_v18 = vunpack.c.h.bf16 %v3833_v15  ;;  %v3809_v29 = vld [vmem:[%s12579_s19 + $0x78] sm:$0xff] }
 0x535   :  { %6612 = vmatpush1.msra.mxu1 %v4888_v13  ;;  %6487 = vmatprep.subr.mxu0 %v5944_v53  ;;  %v3829_v13 = vld [vmem:[%s12579_s19 + $0x104] sm:$0xff]  ;;  %v4033_v48 = vld [vmem:[%s12579_s19 + $0x698] sm:$0xff] }
 0x536   :  { %6613 = vmatprep.subr.mxu1 %v4882_v40  ;;  %6488 = vmatpush1.msra.mxu0 %v5943_v46  ;;  %v3925_v53 = vld [vmem:[%s12579_s19 + $0x3a4] sm:$0xff]  ;;  %v4833_v46 = vunpack.c.h.bf16 %v3929_v16  ;;  %v4664_v40 = vunpack.c.l.bf16 %v3833_v15  ;;  %v4657_v26 = vunpack.c.l.bf16 %v3829_v13  ;;  %v3805_v15 = vld [vmem:[%s12579_s19 + $0x5c] sm:$0xff] }
 0x537   :  { %6614 = vmatpush1.msra.mxu1 %v4881_v20  ;;  %6489 = vmatprep.subr.mxu0 %v5937_v58  ;;  %v4832_v20 = vunpack.c.l.bf16 %v3929_v16  ;;  %v3825_v58 = vld [vmem:[%s12579_s19 + $0xe8] sm:$0xff]  ;;  %v4029_v16 = vld [vmem:[%s12579_s19 + $0x67c] sm:$0xff] }
 0x538   :  { %6615 = vmatprep.subr.mxu1 %v4875_v19  ;;  %6490 = vmatpush1.msra.mxu0 %v5936_v23  ;;  %v4658_v23 = vunpack.c.h.bf16 %v3829_v13  ;;  %v4826_v19 = vunpack.c.h.bf16 %v3925_v53  ;;  %v4651_v30 = vunpack.c.h.bf16 %v3825_v58  ;;  %v3801_v13 = vld [vmem:[%s12579_s19 + $0x40] sm:$0xff] }
 0x539   :  { %6523 = vmatprep.mubr.f32.mxu0 %v8399_v3  ;;  %6616 = vmatpush1.msra.mxu1 %v4874_v8  ;;  %v4825_v8 = vunpack.c.l.bf16 %v3925_v53  ;;  %v4025_v53 = vld [vmem:[%s12579_s19 + $0x660] sm:$0xff] }
 0x53a   :  { %8100 = vmatmul.mubr.msk.f32.vlgmr.msra.gmra.mxu0 %vm6029_vm8, %v10961_v57  ;;  %6530 = vmatprep.subr.mxu0 %v4700_v7  ;;  %v3821_v7 = vld [vmem:[%s12579_s19 + $0xcc] sm:$0xff] }
 0x53b   :  { %6617 = vmatprep.subr.mxu1 %v4868_v51  ;;  %6531 = vmatpush1.msra.mxu0 %v4699_v62  ;;  %v4819_v62 = vunpack.c.h.bf16 %v3921_v22  ;;  %v4650_v51 = vunpack.c.l.bf16 %v3825_v58  ;;  %v3797_v58 = vld [vmem:[%s12579_s19 + $0x24] sm:$0xff] }
 0x53c   :  { %6594 = vmatprep.mubr.f32.mxu0 %v10438_v41  ;;  %6618 = vmatpush1.msra.mxu1 %v4867_v1  ;;  %v4818_v1 = vunpack.c.l.bf16 %v3921_v22  ;;  %v4021_v22 = vld [vmem:[%s12579_s19 + $0x644] sm:$0xff] }
 0x53d   :  { %6532 = vmatprep.subr.mxu0 %v4693_v0  ;;  %6619 = vmatprep.subr.mxu1 %v4861_v44  ;;  %v4644_v0 = vunpack.c.h.bf16 %v3821_v7  ;;  %v5036_v44 = vunpack.c.h.bf16 %v4045_v28 }
 0x53e   :  { %6533 = vmatpush1.msra.mxu0 %v4692_v60  ;;  %6620 = vmatpush1.msra.mxu1 %v4860_v6  ;;  %v4643_v60 = vunpack.c.l.bf16 %v3821_v7  ;;  %v5035_v6 = vunpack.c.l.bf16 %v4045_v28  ;;  %v3793_v7 = vld [vmem:[%s12579_s19 + $0x8] sm:$0xff] }
 0x53f   :  { %6534 = vmatprep.subr.mxu0 %v4686_v59  ;;  %6621 = vmatprep.subr.mxu1 %v4854_v49  ;;  %v4637_v59 = vunpack.c.h.bf16 %v3817_v5  ;;  %v5029_v49 = vunpack.c.h.bf16 %v4041_v33  ;;  %v4017_v28 = vld [vmem:[%s12579_s19 + $0x628] sm:$0xff] }
 0x540   :  { %6535 = vmatpush1.msra.mxu0 %v4685_v54  ;;  %6622 = vmatpush1.msra.mxu1 %v4853_v56  ;;  %v4636_v54 = vunpack.c.l.bf16 %v3817_v5  ;;  %v5028_v56 = vunpack.c.l.bf16 %v4041_v33  ;;  %v3917_v5 = vld [vmem:[%s12579_s19 + $0x36c] sm:$0xff] }
 0x541   :  { %6536 = vmatprep.subr.mxu0 %v4679_v61  ;;  %6623 = vmatprep.subr.mxu1 %v4847_v12  ;;  %v4630_v61 = vunpack.c.h.bf16 %v3813_v36  ;;  %v5022_v12 = vunpack.c.h.bf16 %v4037_v47  ;;  %v4013_v33 = vld [vmem:[%s12579_s19 + $0x60c] sm:$0xff] }
 0x542   :  { %6537 = vmatpush1.msra.mxu0 %v4678_v63  ;;  %6624 = vmatpush1.msra.mxu1 %v4846_v32  ;;  %v4629_v63 = vunpack.c.l.bf16 %v3813_v36  ;;  %v5021_v32 = vunpack.c.l.bf16 %v4037_v47  ;;  %v3913_v36 = vld [vmem:[%s12579_s19 + $0x350] sm:$0xff] }
 0x543   :  { %6538 = vmatprep.subr.mxu0 %v4672_v2  ;;  %6625 = vmatprep.subr.mxu1 %v4840_v14  ;;  %v4623_v2 = vunpack.c.h.bf16 %v3809_v29  ;;  %v5015_v14 = vunpack.c.h.bf16 %v4033_v48  ;;  %v4009_v47 = vld [vmem:[%s12579_s19 + $0x5f0] sm:$0xff] }
 0x544   :  { %6539 = vmatpush1.msra.mxu0 %v4671_v4  ;;  %6626 = vmatpush1.msra.mxu1 %v4839_v17  ;;  %v4622_v4 = vunpack.c.l.bf16 %v3809_v29  ;;  %v5014_v17 = vunpack.c.l.bf16 %v4033_v48  ;;  %v3909_v29 = vld [vmem:[%s12579_s19 + $0x334] sm:$0xff] }
 0x545   :  { %6540 = vmatprep.subr.mxu0 %v4665_v18  ;;  %6627 = vmatprep.subr.mxu1 %v4833_v46  ;;  %v4616_v18 = vunpack.c.h.bf16 %v3805_v15  ;;  %v5008_v46 = vunpack.c.h.bf16 %v4029_v16  ;;  %v4005_v48 = vld [vmem:[%s12579_s19 + $0x5d4] sm:$0xff] }
 0x546   :  { %6541 = vmatpush1.msra.mxu0 %v4664_v40  ;;  %6628 = vmatpush1.msra.mxu1 %v4832_v20  ;;  %v4615_v40 = vunpack.c.l.bf16 %v3805_v15  ;;  %v5007_v20 = vunpack.c.l.bf16 %v4029_v16  ;;  %v3905_v15 = vld [vmem:[%s12579_s19 + $0x318] sm:$0xff] }
 0x547   :  { %6542 = vmatprep.subr.mxu0 %v4658_v23  ;;  %6629 = vmatprep.subr.mxu1 %v4826_v19  ;;  %v4609_v23 = vunpack.c.h.bf16 %v3801_v13  ;;  %v5001_v19 = vunpack.c.h.bf16 %v4025_v53  ;;  %v4001_v16 = vld [vmem:[%s12579_s19 + $0x5b8] sm:$0xff] }
 0x548   :  { %6543 = vmatpush1.msra.mxu0 %v4657_v26  ;;  %6630 = vmatpush1.msra.mxu1 %v4825_v8  ;;  %v4608_v26 = vunpack.c.l.bf16 %v3801_v13  ;;  %v5000_v8 = vunpack.c.l.bf16 %v4025_v53  ;;  %v3901_v13 = vld [vmem:[%s12579_s19 + $0x2fc] sm:$0xff] }
 0x549   :  { %6544 = vmatprep.subr.mxu0 %v4651_v30  ;;  %6631 = vmatprep.subr.mxu1 %v4819_v62  ;;  %v4602_v30 = vunpack.c.h.bf16 %v3797_v58  ;;  %v4994_v62 = vunpack.c.h.bf16 %v4021_v22  ;;  %v3997_v53 = vld [vmem:[%s12579_s19 + $0x59c] sm:$0xff] }
 0x54a   :  { %6545 = vmatpush1.msra.mxu0 %v4650_v51  ;;  %6632 = vmatpush1.msra.mxu1 %v4818_v1  ;;  %v4601_v51 = vunpack.c.l.bf16 %v3797_v58  ;;  %v4993_v1 = vunpack.c.l.bf16 %v4021_v22  ;;  %v3897_v58 = vld [vmem:[%s12579_s19 + $0x2e0] sm:$0xff] }
 0x54b   :  { %6546 = vmatprep.subr.mxu0 %v4644_v0  ;;  %6633 = vmatprep.subr.mxu1 %v5036_v44  ;;  %v4595_v0 = vunpack.c.h.bf16 %v3793_v7  ;;  %v4987_v44 = vunpack.c.h.bf16 %v4017_v28  ;;  %v3993_v22 = vld [vmem:[%s12579_s19 + $0x580] sm:$0xff] }
 0x54c   :  { %6547 = vmatpush1.msra.mxu0 %v4643_v60  ;;  %6634 = vmatpush2.msra.mxu1 %v5035_v6  ;;  %v4594_v60 = vunpack.c.l.bf16 %v3793_v7  ;;  %v4986_v6 = vunpack.c.l.bf16 %v4017_v28  ;;  %v3893_v7 = vld [vmem:[%s12579_s19 + $0x2c4] sm:$0xff] }
 0x54d   :  { %6548 = vmatprep.subr.mxu0 %v4637_v59  ;;  %6635 = vmatprep.subr.mxu1 %v5029_v49  ;;  %v4812_v59 = vunpack.c.h.bf16 %v3917_v5  ;;  %v4980_v49 = vunpack.c.h.bf16 %v4013_v33  ;;  %v3989_v28 = vld [vmem:[%s12579_s19 + $0x564] sm:$0xff] }
 0x54e   :  { %6549 = vmatpush1.msra.mxu0 %v4636_v54  ;;  %6636 = vmatpush2.msra.mxu1 %v5028_v56  ;;  %v4811_v54 = vunpack.c.l.bf16 %v3917_v5  ;;  %v4979_v56 = vunpack.c.l.bf16 %v4013_v33  ;;  %v3889_v5 = vld [vmem:[%s12579_s19 + $0x2a8] sm:$0xff] }
 0x54f   :  { %6550 = vmatprep.subr.mxu0 %v4630_v61  ;;  %6637 = vmatprep.subr.mxu1 %v5022_v12  ;;  %v4805_v61 = vunpack.c.h.bf16 %v3913_v36  ;;  %v4973_v12 = vunpack.c.h.bf16 %v4009_v47  ;;  %v3985_v33 = vld [vmem:[%s12579_s19 + $0x548] sm:$0xff] }
 0x550   :  { %6551 = vmatpush1.msra.mxu0 %v4629_v63  ;;  %6638 = vmatpush2.msra.mxu1 %v5021_v32  ;;  %v4804_v63 = vunpack.c.l.bf16 %v3913_v36  ;;  %v4972_v32 = vunpack.c.l.bf16 %v4009_v47  ;;  %v3885_v36 = vld [vmem:[%s12579_s19 + $0x28c] sm:$0xff]  ;;  %v4763_v47 = vunpack.c.h.bf16 %v3889_v5 }
 0x551   :  { %6552 = vmatprep.subr.mxu0 %v4623_v2  ;;  %6639 = vmatprep.subr.mxu1 %v5015_v14  ;;  %v4798_v2 = vunpack.c.h.bf16 %v3909_v29  ;;  %v4966_v14 = vunpack.c.h.bf16 %v4005_v48 }
 0x552   :  { %6553 = vmatpush1.msra.mxu0 %v4622_v4  ;;  %6640 = vmatpush2.msra.mxu1 %v5014_v17  ;;  %v4797_v4 = vunpack.c.l.bf16 %v3909_v29  ;;  %v4965_v17 = vunpack.c.l.bf16 %v4005_v48  ;;  %v4756_v29 = vunpack.c.h.bf16 %v3885_v36  ;;  %v3881_v48 = vld [vmem:[%s12579_s19 + $0x270] sm:$0xff] }
 0x553   :  { %6554 = vmatprep.subr.mxu0 %v4616_v18  ;;  %6641 = vmatprep.subr.mxu1 %v5008_v46  ;;  %v4791_v18 = vunpack.c.h.bf16 %v3905_v15  ;;  %v4959_v46 = vunpack.c.h.bf16 %v4001_v16 }
 0x554   :  { %6555 = vmatpush1.msra.mxu0 %v4615_v40  ;;  %6642 = vmatpush2.msra.mxu1 %v5007_v20  ;;  %v4790_v40 = vunpack.c.l.bf16 %v3905_v15  ;;  %v4958_v20 = vunpack.c.l.bf16 %v4001_v16  ;;  %v3877_v15 = vld [vmem:[%s12579_s19 + $0x254] sm:$0xff] }
 0x555   :  { %6556 = vmatprep.subr.mxu0 %v4609_v23  ;;  %6643 = vmatprep.subr.mxu1 %v5001_v19  ;;  %v4784_v23 = vunpack.c.h.bf16 %v3901_v13  ;;  %v4952_v19 = vunpack.c.h.bf16 %v3997_v53  ;;  %v4229_v16 = vld [vmem:[%s12579_s19 + $0xbf4] sm:$0xff] }
 0x556   :  { %6557 = vmatpush1.msra.mxu0 %v4608_v26  ;;  %6644 = vmatpush2.msra.mxu1 %v5000_v8  ;;  %v4783_v26 = vunpack.c.l.bf16 %v3901_v13  ;;  %v4951_v8 = vunpack.c.l.bf16 %v3997_v53  ;;  %v3873_v13 = vld [vmem:[%s12579_s19 + $0x238] sm:$0xff] }
 0x557   :  { %6558 = vmatprep.subr.mxu0 %v4602_v30  ;;  %6645 = vmatprep.subr.mxu1 %v4994_v62  ;;  %v4777_v30 = vunpack.c.h.bf16 %v3897_v58  ;;  %v4945_v62 = vunpack.c.h.bf16 %v3993_v22  ;;  %v4225_v53 = vld [vmem:[%s12579_s19 + $0xbd8] sm:$0xff] }
 0x558   :  { %6559 = vmatpush1.msra.mxu0 %v4601_v51  ;;  %6646 = vmatpush2.msra.mxu1 %v4993_v1  ;;  %v4776_v51 = vunpack.c.l.bf16 %v3897_v58  ;;  %v4944_v1 = vunpack.c.l.bf16 %v3993_v22  ;;  %v3869_v58 = vld [vmem:[%s12579_s19 + $0x21c] sm:$0xff] }
 0x559   :  { %6560 = vmatprep.subr.mxu0 %v4595_v0  ;;  %6647 = vmatprep.subr.mxu1 %v4987_v44  ;;  %v4770_v0 = vunpack.c.h.bf16 %v3893_v7  ;;  %v4938_v44 = vunpack.c.h.bf16 %v3989_v28  ;;  %v4221_v22 = vld [vmem:[%s12579_s19 + $0xbbc] sm:$0xff] }
 0x55a   :  { %6561 = vmatpush1.msra.mxu0 %v4594_v60  ;;  %6648 = vmatpush2.msra.mxu1 %v4986_v6  ;;  %v4769_v60 = vunpack.c.l.bf16 %v3893_v7  ;;  %v4937_v6 = vunpack.c.l.bf16 %v3989_v28  ;;  %v3865_v7 = vld [vmem:[%s12579_s19 + $0x200] sm:$0xff] }
 0x55b   :  { %6562 = vmatprep.subr.mxu0 %v4812_v59  ;;  %6649 = vmatprep.subr.mxu1 %v4980_v49  ;;  %v4931_v59 = vunpack.c.h.bf16 %v3985_v33  ;;  %v4237_v49 = vld [vmem:[%s12579_s19 + $0xc2c] sm:$0xff]  ;;  %v4217_v28 = vld [vmem:[%s12579_s19 + $0xba0] sm:$0xff] }
 0x55c   :  { %6563 = vmatpush2.msra.mxu0 %v4811_v54  ;;  %6650 = vmatpush2.msra.mxu1 %v4979_v56  ;;  %v4762_v54 = vunpack.c.l.bf16 %v3889_v5  ;;  %v4930_v56 = vunpack.c.l.bf16 %v3985_v33  ;;  %v3861_v5 = vld [vmem:[%s12579_s19 + $0x1e4] sm:$0xff] }
 0x55d   :  { %6564 = vmatprep.subr.mxu0 %v4805_v61  ;;  %6651 = vmatprep.subr.mxu1 %v4973_v12  ;;  %v4233_v61 = vld [vmem:[%s12579_s19 + $0xc10] sm:$0xff]  ;;  %v4755_v12 = vunpack.c.l.bf16 %v3885_v36  ;;  %v4213_v33 = vld [vmem:[%s12579_s19 + $0xb84] sm:$0xff] }
 0x55e   :  { %6565 = vmatpush2.msra.mxu0 %v4804_v63  ;;  %6652 = vmatpush2.msra.mxu1 %v4972_v32  ;;  %v5372_v63 = vunpack.c.h.bf16 %v4237_v49  ;;  %v5371_v32 = vunpack.c.l.bf16 %v4237_v49  ;;  %v3857_v36 = vld [vmem:[%s12579_s19 + $0x1c8] sm:$0xff]  ;;  %v5330_v49 = vunpack.c.h.bf16 %v4213_v33 }
 0x55f   :  { %6566 = vmatprep.subr.mxu0 %v4798_v2  ;;  %6653 = vmatprep.subr.mxu1 %v4966_v14  ;;  %v4749_v2 = vunpack.c.h.bf16 %v3881_v48  ;;  %v5365_v14 = vunpack.c.h.bf16 %v4233_v61 }
 0x560   :  { %6567 = vmatpush2.msra.mxu0 %v4797_v4  ;;  %6654 = vmatpush2.msra.mxu1 %v4965_v17  ;;  %v4748_v4 = vunpack.c.l.bf16 %v3881_v48  ;;  %v5364_v17 = vunpack.c.l.bf16 %v4233_v61  ;;  %v4707_v48 = vunpack.c.h.bf16 %v3857_v36 }
 0x561   :  { %6568 = vmatprep.subr.mxu0 %v4791_v18  ;;  %6655 = vmatprep.subr.mxu1 %v4959_v46  ;;  %v4742_v18 = vunpack.c.h.bf16 %v3877_v15  ;;  %v5358_v46 = vunpack.c.h.bf16 %v4229_v16 }
 0x562   :  { %6569 = vmatpush2.msra.mxu0 %v4790_v40  ;;  %6656 = vmatpush2.msra.mxu1 %v4958_v20  ;;  %v4741_v40 = vunpack.c.l.bf16 %v3877_v15  ;;  %v5357_v20 = vunpack.c.l.bf16 %v4229_v16  ;;  %v4105_v16 = vld [vmem:[%s12579_s19 + $0x890] sm:$0xff] }
 0x563   :  { %6570 = vmatprep.subr.mxu0 %v4784_v23  ;;  %6657 = vmatprep.subr.mxu1 %v4952_v19  ;;  %v4735_v23 = vunpack.c.h.bf16 %v3873_v13  ;;  %v5351_v19 = vunpack.c.h.bf16 %v4225_v53 }
 0x564   :  { %6571 = vmatpush2.msra.mxu0 %v4783_v26  ;;  %6658 = vmatpush2.msra.mxu1 %v4951_v8  ;;  %v4734_v26 = vunpack.c.l.bf16 %v3873_v13  ;;  %v5350_v8 = vunpack.c.l.bf16 %v4225_v53  ;;  %v4101_v13 = vld [vmem:[%s12579_s19 + $0x874] sm:$0xff] }
 0x565   :  { %6572 = vmatprep.subr.mxu0 %v4777_v30  ;;  %6659 = vmatprep.subr.mxu1 %v4945_v62  ;;  %v4728_v30 = vunpack.c.h.bf16 %v3869_v58  ;;  %v5344_v62 = vunpack.c.h.bf16 %v4221_v22  ;;  %v4197_v53 = vld [vmem:[%s12579_s19 + $0xb14] sm:$0xff] }
 0x566   :  { %6573 = vmatpush2.msra.mxu0 %v4776_v51  ;;  %6660 = vmatpush2.msra.mxu1 %v4944_v1  ;;  %v4727_v51 = vunpack.c.l.bf16 %v3869_v58  ;;  %v5343_v1 = vunpack.c.l.bf16 %v4221_v22  ;;  %v4097_v58 = vld [vmem:[%s12579_s19 + $0x858] sm:$0xff] }
 0x567   :  { %6574 = vmatprep.subr.mxu0 %v4770_v0  ;;  %6661 = vmatprep.subr.mxu1 %v4938_v44  ;;  %v4721_v0 = vunpack.c.h.bf16 %v3865_v7  ;;  %v5337_v44 = vunpack.c.h.bf16 %v4217_v28  ;;  %v4193_v22 = vld [vmem:[%s12579_s19 + $0xaf8] sm:$0xff] }
 0x568   :  { %6575 = vmatpush2.msra.mxu0 %v4769_v60  ;;  %6662 = vmatpush2.msra.mxu1 %v4937_v6  ;;  %v4720_v60 = vunpack.c.l.bf16 %v3865_v7  ;;  %v5336_v6 = vunpack.c.l.bf16 %v4217_v28  ;;  %v4093_v7 = vld [vmem:[%s12579_s19 + $0x83c] sm:$0xff] }
 0x569   :  { %6576 = vmatprep.subr.mxu0 %v4763_v47  ;;  %6663 = vmatprep.subr.mxu1 %v4931_v59  ;;  %v4209_v47 = vld [vmem:[%s12579_s19 + $0xb68] sm:$0xff]  ;;  %v4714_v59 = vunpack.c.h.bf16 %v3861_v5  ;;  %v4189_v28 = vld [vmem:[%s12579_s19 + $0xadc] sm:$0xff] }
 0x56a   :  { %6577 = vmatpush2.msra.mxu0 %v4762_v54  ;;  %6664 = vmatpush2.msra.mxu1 %v4930_v56  ;;  %v4713_v54 = vunpack.c.l.bf16 %v3861_v5  ;;  %v5329_v56 = vunpack.c.l.bf16 %v4213_v33  ;;  %v5323_v61 = vunpack.c.h.bf16 %v4209_v47  ;;  %v4089_v5 = vld [vmem:[%s12579_s19 + $0x820] sm:$0xff] }
 0x56b   :  { %6578 = vmatprep.subr.mxu0 %v4756_v29  ;;  %6666 = vmatmul.mubr.f32.vlgmr.msra.gmra.mxu1 %v10444_v45  ;;  %v4109_v29 = vld [vmem:[%s12579_s19 + $0x8ac] sm:$0xff]  ;;  %v4185_v33 = vld [vmem:[%s12579_s19 + $0xac0] sm:$0xff] }
 0x56c   :  { %6743 = vmatprep.subr.mxu1 %v5372_v63  ;;  %6579 = vmatpush2.msra.mxu0 %v4755_v12  ;;  %v4205_v12 = vld [vmem:[%s12579_s19 + $0xb4c] sm:$0xff]  ;;  %v4706_v63 = vunpack.c.l.bf16 %v3857_v36  ;;  %v5148_v15 = vunpack.c.h.bf16 %v4109_v29  ;;  %v4085_v36 = vld [vmem:[%s12579_s19 + $0x804] sm:$0xff] }
 0x56d   :  { %6744 = vmatpush1.msra.mxu1 %v5371_v32  ;;  %6807 = vmatprep.mubr.f32.mxu1 %v10474_v35  ;;  %v5322_v32 = vunpack.c.l.bf16 %v4209_v47  ;;  %v4181_v47 = vld [vmem:[%s12579_s19 + $0xaa4] sm:$0xff] }
 0x56e   :  { %6580 = vmatprep.subr.mxu0 %v4749_v2  ;;  %6745 = vmatprep.subr.mxu1 %v5365_v14  ;;  %v4201_v2 = vld [vmem:[%s12579_s19 + $0xb30] sm:$0xff]  ;;  %v5147_v14 = vunpack.c.l.bf16 %v4109_v29  ;;  %v4081_v29 = vld [vmem:[%s12579_s19 + $0x7e8] sm:$0xff] }
 0x56f   :  { %6581 = vmatpush2.msra.mxu0 %v4748_v4  ;;  %6746 = vmatpush1.msra.mxu1 %v5364_v17  ;;  %v5316_v4 = vunpack.c.h.bf16 %v4205_v12  ;;  %v5315_v17 = vunpack.c.l.bf16 %v4205_v12  ;;  %v5274_v12 = vunpack.c.h.bf16 %v4181_v47 }
 0x570   :  { %6582 = vmatprep.subr.mxu0 %v4742_v18  ;;  %6747 = vmatprep.subr.mxu1 %v5358_v46  ;;  %v5141_v18 = vunpack.c.h.bf16 %v4105_v16  ;;  %v5309_v46 = vunpack.c.h.bf16 %v4201_v2 }
 0x571   :  { %6583 = vmatpush2.msra.mxu0 %v4741_v40  ;;  %6748 = vmatpush1.msra.mxu1 %v5357_v20  ;;  %v5140_v40 = vunpack.c.l.bf16 %v4105_v16  ;;  %v5308_v20 = vunpack.c.l.bf16 %v4201_v2  ;;  %v4301_v16 = vld [vmem:[%s12579_s19 + $0xdec] sm:$0xff]  ;;  %v5099_v2 = vunpack.c.h.bf16 %v4081_v29 }
 0x572   :  { %6584 = vmatprep.subr.mxu0 %v4735_v23  ;;  %6749 = vmatprep.subr.mxu1 %v5351_v19  ;;  %v5134_v23 = vunpack.c.h.bf16 %v4101_v13  ;;  %v5302_v19 = vunpack.c.h.bf16 %v4197_v53 }
 0x573   :  { %6585 = vmatpush2.msra.mxu0 %v4734_v26  ;;  %6750 = vmatpush1.msra.mxu1 %v5350_v8  ;;  %v5133_v26 = vunpack.c.l.bf16 %v4101_v13  ;;  %v5301_v8 = vunpack.c.l.bf16 %v4197_v53  ;;  %v4073_v13 = vld [vmem:[%s12579_s19 + $0x7b0] sm:$0xff] }
 0x574   :  { %6586 = vmatprep.subr.mxu0 %v4728_v30  ;;  %6751 = vmatprep.subr.mxu1 %v5344_v62  ;;  %v5127_v30 = vunpack.c.h.bf16 %v4097_v58  ;;  %v5295_v62 = vunpack.c.h.bf16 %v4193_v22  ;;  %v4297_v53 = vld [vmem:[%s12579_s19 + $0xdd0] sm:$0xff] }
 0x575   :  { %6587 = vmatpush2.msra.mxu0 %v4727_v51  ;;  %6752 = vmatpush1.msra.mxu1 %v5343_v1  ;;  %v5126_v51 = vunpack.c.l.bf16 %v4097_v58  ;;  %v5294_v1 = vunpack.c.l.bf16 %v4193_v22  ;;  %v4069_v58 = vld [vmem:[%s12579_s19 + $0x794] sm:$0xff] }
 0x576   :  { %6588 = vmatprep.subr.mxu0 %v4721_v0  ;;  %6753 = vmatprep.subr.mxu1 %v5337_v44  ;;  %v5120_v0 = vunpack.c.h.bf16 %v4093_v7  ;;  %v5288_v44 = vunpack.c.h.bf16 %v4189_v28  ;;  %v4293_v22 = vld [vmem:[%s12579_s19 + $0xdb4] sm:$0xff] }
 0x577   :  { %6589 = vmatpush2.msra.mxu0 %v4720_v60  ;;  %6754 = vmatpush1.msra.mxu1 %v5336_v6  ;;  %v5119_v60 = vunpack.c.l.bf16 %v4093_v7  ;;  %v5287_v6 = vunpack.c.l.bf16 %v4189_v28  ;;  %v4065_v7 = vld [vmem:[%s12579_s19 + $0x778] sm:$0xff] }
 0x578   :  { %6590 = vmatprep.subr.mxu0 %v4714_v59  ;;  %6755 = vmatprep.subr.mxu1 %v5330_v49  ;;  %v5113_v59 = vunpack.c.h.bf16 %v4089_v5  ;;  %v5281_v49 = vunpack.c.h.bf16 %v4185_v33  ;;  %v4289_v28 = vld [vmem:[%s12579_s19 + $0xd98] sm:$0xff] }
 0x579   :  { %6591 = vmatpush2.msra.mxu0 %v4713_v54  ;;  %6756 = vmatpush1.msra.mxu1 %v5329_v56  ;;  %v5112_v54 = vunpack.c.l.bf16 %v4089_v5  ;;  %v5280_v56 = vunpack.c.l.bf16 %v4185_v33  ;;  %v4061_v5 = vld [vmem:[%s12579_s19 + $0x75c] sm:$0xff] }
 0x57a   :  { %6592 = vmatprep.subr.mxu0 %v4707_v48  ;;  %6757 = vmatprep.subr.mxu1 %v5323_v61  ;;  %v4177_v48 = vld [vmem:[%s12579_s19 + $0xa88] sm:$0xff]  ;;  %v5106_v61 = vunpack.c.h.bf16 %v4085_v36  ;;  %v4285_v33 = vld [vmem:[%s12579_s19 + $0xd7c] sm:$0xff] }
 0x57b   :  { %6593 = vmatpush2.msra.mxu0 %v4706_v63  ;;  %6758 = vmatpush1.msra.mxu1 %v5322_v32  ;;  %v5105_v63 = vunpack.c.l.bf16 %v4085_v36  ;;  %v5273_v32 = vunpack.c.l.bf16 %v4181_v47  ;;  %v4057_v36 = vld [vmem:[%s12579_s19 + $0x740] sm:$0xff] }
 0x57c   :  { %6595 = vmatmul.mubr.f32.vlgmr.msra.gmra.mxu0 %v10442_v43  ;;  %6672 = vmatprep.subr.mxu0 %v5148_v15  ;;  %v4077_v15 = vld [vmem:[%s12579_s19 + $0x7cc] sm:$0xff]  ;;  %v4281_v47 = vld [vmem:[%s12579_s19 + $0xd60] sm:$0xff] }
 0x57d   :  { %6759 = vmatprep.subr.mxu1 %v5316_v4  ;;  %6673 = vmatpush1.msra.mxu0 %v5147_v14  ;;  %v5267_v14 = vunpack.c.h.bf16 %v4177_v48  ;;  %v5098_v4 = vunpack.c.l.bf16 %v4081_v29  ;;  %v4053_v29 = vld [vmem:[%s12579_s19 + $0x724] sm:$0xff] }
 0x57e   :  { %6736 = vmatprep.mubr.f32.mxu0 %v10462_v10  ;;  %6760 = vmatpush1.msra.mxu1 %v5315_v17  ;;  %v5266_v17 = vunpack.c.l.bf16 %v4177_v48  ;;  %v4277_v48 = vld [vmem:[%s12579_s19 + $0xd44] sm:$0xff] }
 0x57f   :  { %6674 = vmatprep.subr.mxu0 %v5141_v18  ;;  %6761 = vmatprep.subr.mxu1 %v5309_v46  ;;  %v5092_v18 = vunpack.c.h.bf16 %v4077_v15  ;;  %v5484_v46 = vunpack.c.h.bf16 %v4301_v16 }
 0x580   :  { %6675 = vmatpush1.msra.mxu0 %v5140_v40  ;;  %6762 = vmatpush1.msra.mxu1 %v5308_v20  ;;  %v5091_v40 = vunpack.c.l.bf16 %v4077_v15  ;;  %v5483_v20 = vunpack.c.l.bf16 %v4301_v16  ;;  %v4049_v15 = vld [vmem:[%s12579_s19 + $0x708] sm:$0xff] }
 0x581   :  { %6676 = vmatprep.subr.mxu0 %v5134_v23  ;;  %6763 = vmatprep.subr.mxu1 %v5302_v19  ;;  %v5085_v23 = vunpack.c.h.bf16 %v4073_v13  ;;  %v5477_v19 = vunpack.c.h.bf16 %v4297_v53  ;;  %v4273_v16 = vld [vmem:[%s12579_s19 + $0xd28] sm:$0xff] }
 0x582   :  { %6677 = vmatpush1.msra.mxu0 %v5133_v26  ;;  %6764 = vmatpush1.msra.mxu1 %v5301_v8  ;;  %v5084_v26 = vunpack.c.l.bf16 %v4073_v13  ;;  %v5476_v8 = vunpack.c.l.bf16 %v4297_v53  ;;  %v4173_v13 = vld [vmem:[%s12579_s19 + $0xa6c] sm:$0xff] }
 0x583   :  { %6678 = vmatprep.subr.mxu0 %v5127_v30  ;;  %6765 = vmatprep.subr.mxu1 %v5295_v62  ;;  %v5078_v30 = vunpack.c.h.bf16 %v4069_v58  ;;  %v5470_v62 = vunpack.c.h.bf16 %v4293_v22  ;;  %v4269_v53 = vld [vmem:[%s12579_s19 + $0xd0c] sm:$0xff] }
 0x584   :  { %6679 = vmatpush1.msra.mxu0 %v5126_v51  ;;  %6766 = vmatpush1.msra.mxu1 %v5294_v1  ;;  %v5077_v51 = vunpack.c.l.bf16 %v4069_v58  ;;  %v5469_v1 = vunpack.c.l.bf16 %v4293_v22  ;;  %v4169_v58 = vld [vmem:[%s12579_s19 + $0xa50] sm:$0xff] }
 0x585   :  { %6680 = vmatprep.subr.mxu0 %v5120_v0  ;;  %6767 = vmatprep.subr.mxu1 %v5288_v44  ;;  %v5071_v0 = vunpack.c.h.bf16 %v4065_v7  ;;  %v5463_v44 = vunpack.c.h.bf16 %v4289_v28  ;;  %v4265_v22 = vld [vmem:[%s12579_s19 + $0xcf0] sm:$0xff] }
 0x586   :  { %6681 = vmatpush1.msra.mxu0 %v5119_v60  ;;  %6768 = vmatpush1.msra.mxu1 %v5287_v6  ;;  %v5070_v60 = vunpack.c.l.bf16 %v4065_v7  ;;  %v5462_v6 = vunpack.c.l.bf16 %v4289_v28  ;;  %v4165_v7 = vld [vmem:[%s12579_s19 + $0xa34] sm:$0xff] }
 0x587   :  { %6682 = vmatprep.subr.mxu0 %v5113_v59  ;;  %6769 = vmatprep.subr.mxu1 %v5281_v49  ;;  %v5064_v59 = vunpack.c.h.bf16 %v4061_v5  ;;  %v5456_v49 = vunpack.c.h.bf16 %v4285_v33  ;;  %v4261_v28 = vld [vmem:[%s12579_s19 + $0xcd4] sm:$0xff] }
 0x588   :  { %6683 = vmatpush1.msra.mxu0 %v5112_v54  ;;  %6770 = vmatpush1.msra.mxu1 %v5280_v56  ;;  %v5063_v54 = vunpack.c.l.bf16 %v4061_v5  ;;  %v5455_v56 = vunpack.c.l.bf16 %v4285_v33  ;;  %v4161_v5 = vld [vmem:[%s12579_s19 + $0xa18] sm:$0xff] }
 0x589   :  { %6684 = vmatprep.subr.mxu0 %v5106_v61  ;;  %6771 = vmatprep.subr.mxu1 %v5274_v12  ;;  %v5057_v61 = vunpack.c.h.bf16 %v4057_v36  ;;  %v5449_v12 = vunpack.c.h.bf16 %v4281_v47  ;;  %v4257_v33 = vld [vmem:[%s12579_s19 + $0xcb8] sm:$0xff] }
 0x58a   :  { %6685 = vmatpush1.msra.mxu0 %v5105_v63  ;;  %6772 = vmatpush1.msra.mxu1 %v5273_v32  ;;  %v5056_v63 = vunpack.c.l.bf16 %v4057_v36  ;;  %v5448_v32 = vunpack.c.l.bf16 %v4281_v47  ;;  %v4157_v36 = vld [vmem:[%s12579_s19 + $0x9fc] sm:$0xff] }
 0x58b   :  { %6686 = vmatprep.subr.mxu0 %v5099_v2  ;;  %6773 = vmatprep.subr.mxu1 %v5267_v14  ;;  %v5050_v2 = vunpack.c.h.bf16 %v4053_v29  ;;  %v5442_v14 = vunpack.c.h.bf16 %v4277_v48  ;;  %v4253_v47 = vld [vmem:[%s12579_s19 + $0xc9c] sm:$0xff] }
 0x58c   :  { %6687 = vmatpush1.msra.mxu0 %v5098_v4  ;;  %6774 = vmatpush1.msra.mxu1 %v5266_v17  ;;  %v5049_v4 = vunpack.c.l.bf16 %v4053_v29  ;;  %v5441_v17 = vunpack.c.l.bf16 %v4277_v48  ;;  %v4153_v29 = vld [vmem:[%s12579_s19 + $0x9e0] sm:$0xff] }
 0x58d   :  { %6688 = vmatprep.subr.mxu0 %v5092_v18  ;;  %6775 = vmatprep.subr.mxu1 %v5484_v46  ;;  %v5043_v18 = vunpack.c.h.bf16 %v4049_v15  ;;  %v5435_v46 = vunpack.c.h.bf16 %v4273_v16  ;;  %v4249_v48 = vld [vmem:[%s12579_s19 + $0xc80] sm:$0xff] }
 0x58e   :  { %6689 = vmatpush1.msra.mxu0 %v5091_v40  ;;  %6776 = vmatpush2.msra.mxu1 %v5483_v20  ;;  %v5042_v40 = vunpack.c.l.bf16 %v4049_v15  ;;  %v5434_v20 = vunpack.c.l.bf16 %v4273_v16  ;;  %v4149_v15 = vld [vmem:[%s12579_s19 + $0x9c4] sm:$0xff] }
 0x58f   :  { %6690 = vmatprep.subr.mxu0 %v5085_v23  ;;  %6777 = vmatprep.subr.mxu1 %v5477_v19  ;;  %v5260_v23 = vunpack.c.h.bf16 %v4173_v13  ;;  %v5428_v19 = vunpack.c.h.bf16 %v4269_v53  ;;  %v4245_v16 = vld [vmem:[%s12579_s19 + $0xc64] sm:$0xff] }
 0x590   :  { %6691 = vmatpush1.msra.mxu0 %v5084_v26  ;;  %6778 = vmatpush2.msra.mxu1 %v5476_v8  ;;  %v5259_v26 = vunpack.c.l.bf16 %v4173_v13  ;;  %v5427_v8 = vunpack.c.l.bf16 %v4269_v53  ;;  %v4145_v13 = vld [vmem:[%s12579_s19 + $0x9a8] sm:$0xff] }
 0x591   :  { %6692 = vmatprep.subr.mxu0 %v5078_v30  ;;  %6779 = vmatprep.subr.mxu1 %v5470_v62  ;;  %v5253_v30 = vunpack.c.h.bf16 %v4169_v58  ;;  %v5421_v62 = vunpack.c.h.bf16 %v4265_v22  ;;  %v4241_v53 = vld [vmem:[%s12579_s19 + $0xc48] sm:$0xff] }
 0x592   :  { %6693 = vmatpush1.msra.mxu0 %v5077_v51  ;;  %6780 = vmatpush2.msra.mxu1 %v5469_v1  ;;  %v5252_v51 = vunpack.c.l.bf16 %v4169_v58  ;;  %v5420_v1 = vunpack.c.l.bf16 %v4265_v22  ;;  %v4141_v58 = vld [vmem:[%s12579_s19 + $0x98c] sm:$0xff]  ;;  %v5211_v22 = vunpack.c.h.bf16 %v4145_v13 }
 0x593   :  { %6694 = vmatprep.subr.mxu0 %v5071_v0  ;;  %6781 = vmatprep.subr.mxu1 %v5463_v44  ;;  %v5246_v0 = vunpack.c.h.bf16 %v4165_v7  ;;  %v5414_v44 = vunpack.c.h.bf16 %v4261_v28 }
 0x594   :  { %6695 = vmatpush1.msra.mxu0 %v5070_v60  ;;  %6782 = vmatpush2.msra.mxu1 %v5462_v6  ;;  %v5245_v60 = vunpack.c.l.bf16 %v4165_v7  ;;  %v5413_v6 = vunpack.c.l.bf16 %v4261_v28  ;;  %v5204_v7 = vunpack.c.h.bf16 %v4141_v58  ;;  %v4137_v28 = vld [vmem:[%s12579_s19 + $0x970] sm:$0xff] }
 0x595   :  { %6696 = vmatprep.subr.mxu0 %v5064_v59  ;;  %6783 = vmatprep.subr.mxu1 %v5456_v49  ;;  %v5239_v59 = vunpack.c.h.bf16 %v4161_v5  ;;  %v5407_v49 = vunpack.c.h.bf16 %v4257_v33 }
 0x596   :  { %6697 = vmatpush1.msra.mxu0 %v5063_v54  ;;  %6784 = vmatpush2.msra.mxu1 %v5455_v56  ;;  %v5238_v54 = vunpack.c.l.bf16 %v4161_v5  ;;  %v5406_v56 = vunpack.c.l.bf16 %v4257_v33  ;;  %v4133_v5 = vld [vmem:[%s12579_s19 + $0x954] sm:$0xff] }
 0x597   :  { %6698 = vmatprep.subr.mxu0 %v5057_v61  ;;  %6785 = vmatprep.subr.mxu1 %v5449_v12  ;;  %v5232_v61 = vunpack.c.h.bf16 %v4157_v36  ;;  %v5400_v12 = vunpack.c.h.bf16 %v4253_v47  ;;  %v4485_v33 = vld [vmem:[%s12579_s19 + $0x12f4] sm:$0xff] }
 0x598   :  { %6699 = vmatpush1.msra.mxu0 %v5056_v63  ;;  %6786 = vmatpush2.msra.mxu1 %v5448_v32  ;;  %v5231_v63 = vunpack.c.l.bf16 %v4157_v36  ;;  %v5399_v32 = vunpack.c.l.bf16 %v4253_v47  ;;  %v4129_v36 = vld [vmem:[%s12579_s19 + $0x938] sm:$0xff] }
 0x599   :  { %6700 = vmatprep.subr.mxu0 %v5050_v2  ;;  %6787 = vmatprep.subr.mxu1 %v5442_v14  ;;  %v5225_v2 = vunpack.c.h.bf16 %v4153_v29  ;;  %v5393_v14 = vunpack.c.h.bf16 %v4249_v48  ;;  %v4481_v47 = vld [vmem:[%s12579_s19 + $0x12d8] sm:$0xff] }
 0x59a   :  { %6701 = vmatpush1.msra.mxu0 %v5049_v4  ;;  %6788 = vmatpush2.msra.mxu1 %v5441_v17  ;;  %v5224_v4 = vunpack.c.l.bf16 %v4153_v29  ;;  %v5392_v17 = vunpack.c.l.bf16 %v4249_v48  ;;  %v4125_v29 = vld [vmem:[%s12579_s19 + $0x91c] sm:$0xff] }
 0x59b   :  { %6702 = vmatprep.subr.mxu0 %v5043_v18  ;;  %6789 = vmatprep.subr.mxu1 %v5435_v46  ;;  %v5218_v18 = vunpack.c.h.bf16 %v4149_v15  ;;  %v5386_v46 = vunpack.c.h.bf16 %v4245_v16  ;;  %v4477_v48 = vld [vmem:[%s12579_s19 + $0x12bc] sm:$0xff] }
 0x59c   :  { %6703 = vmatpush1.msra.mxu0 %v5042_v40  ;;  %6790 = vmatpush2.msra.mxu1 %v5434_v20  ;;  %v5217_v40 = vunpack.c.l.bf16 %v4149_v15  ;;  %v5385_v20 = vunpack.c.l.bf16 %v4245_v16  ;;  %v4121_v15 = vld [vmem:[%s12579_s19 + $0x900] sm:$0xff] }
 0x59d   :  { %6704 = vmatprep.subr.mxu0 %v5260_v23  ;;  %6791 = vmatprep.subr.mxu1 %v5428_v19  ;;  %v5379_v23 = vunpack.c.h.bf16 %v4241_v53  ;;  %v4493_v19 = vld [vmem:[%s12579_s19 + $0x132c] sm:$0xff]  ;;  %v4473_v16 = vld [vmem:[%s12579_s19 + $0x12a0] sm:$0xff] }
 0x59e   :  { %6705 = vmatpush2.msra.mxu0 %v5259_v26  ;;  %6792 = vmatpush2.msra.mxu1 %v5427_v8  ;;  %v5210_v26 = vunpack.c.l.bf16 %v4145_v13  ;;  %v5378_v8 = vunpack.c.l.bf16 %v4241_v53  ;;  %v4117_v13 = vld [vmem:[%s12579_s19 + $0x8e4] sm:$0xff] }
 0x59f   :  { %6706 = vmatprep.subr.mxu0 %v5253_v30  ;;  %6793 = vmatprep.subr.mxu1 %v5421_v62  ;;  %v4489_v30 = vld [vmem:[%s12579_s19 + $0x1310] sm:$0xff]  ;;  %v5203_v62 = vunpack.c.l.bf16 %v4141_v58  ;;  %v4469_v53 = vld [vmem:[%s12579_s19 + $0x1284] sm:$0xff] }
 0x5a0   :  { %6707 = vmatpush2.msra.mxu0 %v5252_v51  ;;  %6794 = vmatpush2.msra.mxu1 %v5420_v1  ;;  %v5820_v51 = vunpack.c.h.bf16 %v4493_v19  ;;  %v5819_v1 = vunpack.c.l.bf16 %v4493_v19  ;;  %v4113_v58 = vld [vmem:[%s12579_s19 + $0x8c8] sm:$0xff]  ;;  %v5778_v19 = vunpack.c.h.bf16 %v4469_v53 }
 0x5a1   :  { %6708 = vmatprep.subr.mxu0 %v5246_v0  ;;  %6795 = vmatprep.subr.mxu1 %v5414_v44  ;;  %v5197_v0 = vunpack.c.h.bf16 %v4137_v28  ;;  %v5813_v44 = vunpack.c.h.bf16 %v4489_v30 }
 0x5a2   :  { %6709 = vmatpush2.msra.mxu0 %v5245_v60  ;;  %6796 = vmatpush2.msra.mxu1 %v5413_v6  ;;  %v5196_v60 = vunpack.c.l.bf16 %v4137_v28  ;;  %v5812_v6 = vunpack.c.l.bf16 %v4489_v30  ;;  %v5155_v28 = vunpack.c.h.bf16 %v4113_v58 }
 0x5a3   :  { %6710 = vmatprep.subr.mxu0 %v5239_v59  ;;  %6797 = vmatprep.subr.mxu1 %v5407_v49  ;;  %v5190_v59 = vunpack.c.h.bf16 %v4133_v5  ;;  %v5806_v49 = vunpack.c.h.bf16 %v4485_v33 }
 0x5a4   :  { %6711 = vmatpush2.msra.mxu0 %v5238_v54  ;;  %6798 = vmatpush2.msra.mxu1 %v5406_v56  ;;  %v5189_v54 = vunpack.c.l.bf16 %v4133_v5  ;;  %v5805_v56 = vunpack.c.l.bf16 %v4485_v33  ;;  %v4361_v33 = vld [vmem:[%s12579_s19 + $0xf90] sm:$0xff] }
 0x5a5   :  { %6712 = vmatprep.subr.mxu0 %v5232_v61  ;;  %6799 = vmatprep.subr.mxu1 %v5400_v12  ;;  %v5183_v61 = vunpack.c.h.bf16 %v4129_v36  ;;  %v5799_v12 = vunpack.c.h.bf16 %v4481_v47 }
 0x5a6   :  { %6713 = vmatpush2.msra.mxu0 %v5231_v63  ;;  %6800 = vmatpush2.msra.mxu1 %v5399_v32  ;;  %v5182_v63 = vunpack.c.l.bf16 %v4129_v36  ;;  %v5798_v32 = vunpack.c.l.bf16 %v4481_v47  ;;  %v4357_v36 = vld [vmem:[%s12579_s19 + $0xf74] sm:$0xff] }
 0x5a7   :  { %6714 = vmatprep.subr.mxu0 %v5225_v2  ;;  %6801 = vmatprep.subr.mxu1 %v5393_v14  ;;  %v5176_v2 = vunpack.c.h.bf16 %v4125_v29  ;;  %v5792_v14 = vunpack.c.h.bf16 %v4477_v48  ;;  %v4453_v47 = vld [vmem:[%s12579_s19 + $0x1214] sm:$0xff] }
 0x5a8   :  { %6715 = vmatpush2.msra.mxu0 %v5224_v4  ;;  %6802 = vmatpush2.msra.mxu1 %v5392_v17  ;;  %v5175_v4 = vunpack.c.l.bf16 %v4125_v29  ;;  %v5791_v17 = vunpack.c.l.bf16 %v4477_v48  ;;  %v4353_v29 = vld [vmem:[%s12579_s19 + $0xf58] sm:$0xff] }
 0x5a9   :  { %6716 = vmatprep.subr.mxu0 %v5218_v18  ;;  %6803 = vmatprep.subr.mxu1 %v5386_v46  ;;  %v5169_v18 = vunpack.c.h.bf16 %v4121_v15  ;;  %v5785_v46 = vunpack.c.h.bf16 %v4473_v16  ;;  %v4449_v48 = vld [vmem:[%s12579_s19 + $0x11f8] sm:$0xff] }
 0x5aa   :  { %6717 = vmatpush2.msra.mxu0 %v5217_v40  ;;  %6804 = vmatpush2.msra.mxu1 %v5385_v20  ;;  %v5168_v40 = vunpack.c.l.bf16 %v4121_v15  ;;  %v5784_v20 = vunpack.c.l.bf16 %v4473_v16  ;;  %v4349_v15 = vld [vmem:[%s12579_s19 + $0xf3c] sm:$0xff] }
 0x5ab   :  { %6718 = vmatprep.subr.mxu0 %v5211_v22  ;;  %6805 = vmatprep.subr.mxu1 %v5379_v23  ;;  %v4465_v22 = vld [vmem:[%s12579_s19 + $0x1268] sm:$0xff]  ;;  %v5162_v23 = vunpack.c.h.bf16 %v4117_v13  ;;  %v4445_v16 = vld [vmem:[%s12579_s19 + $0x11dc] sm:$0xff] }
 0x5ac   :  { %6719 = vmatpush2.msra.mxu0 %v5210_v26  ;;  %6806 = vmatpush2.msra.mxu1 %v5378_v8  ;;  %v5161_v26 = vunpack.c.l.bf16 %v4117_v13  ;;  %v5777_v8 = vunpack.c.l.bf16 %v4469_v53  ;;  %v5771_v30 = vunpack.c.h.bf16 %v4465_v22  ;;  %v4345_v13 = vld [vmem:[%s12579_s19 + $0xf20] sm:$0xff] }
 0x5ad   :  { %6720 = vmatprep.subr.mxu0 %v5204_v7  ;;  %6808 = vmatmul.mubr.f32.vlgmr.msra.gmra.mxu1 %v10699_v50  ;;  %v4365_v7 = vld [vmem:[%s12579_s19 + $0xfac] sm:$0xff]  ;;  %v4441_v53 = vld [vmem:[%s12579_s19 + $0x11c0] sm:$0xff] }
 0x5ae   :  { %6885 = vmatprep.subr.mxu1 %v5820_v51  ;;  %6721 = vmatpush2.msra.mxu0 %v5203_v62  ;;  %v4461_v62 = vld [vmem:[%s12579_s19 + $0x124c] sm:$0xff]  ;;  %v5154_v51 = vunpack.c.l.bf16 %v4113_v58  ;;  %v5596_v5 = vunpack.c.h.bf16 %v4365_v7  ;;  %v4341_v58 = vld [vmem:[%s12579_s19 + $0xf04] sm:$0xff] }
 0x5af   :  { %6886 = vmatpush1.msra.mxu1 %v5819_v1  ;;  %6949 = vmatprep.mubr.f32.mxu1 %v10713_v11  ;;  %v5770_v1 = vunpack.c.l.bf16 %v4465_v22  ;;  %v4437_v22 = vld [vmem:[%s12579_s19 + $0x11a4] sm:$0xff] }
 0x5b0   :  { %6722 = vmatprep.subr.mxu0 %v5197_v0  ;;  %6887 = vmatprep.subr.mxu1 %v5813_v44  ;;  %v4457_v0 = vld [vmem:[%s12579_s19 + $0x1230] sm:$0xff]  ;;  %v5595_v44 = vunpack.c.l.bf16 %v4365_v7  ;;  %v4337_v7 = vld [vmem:[%s12579_s19 + $0xee8] sm:$0xff] }
 0x5b1   :  { %6723 = vmatpush2.msra.mxu0 %v5196_v60  ;;  %6888 = vmatpush1.msra.mxu1 %v5812_v6  ;;  %v5764_v60 = vunpack.c.h.bf16 %v4461_v62  ;;  %v5763_v6 = vunpack.c.l.bf16 %v4461_v62  ;;  %v5722_v62 = vunpack.c.h.bf16 %v4437_v22 }
 0x5b2   :  { %6724 = vmatprep.subr.mxu0 %v5190_v59  ;;  %6889 = vmatprep.subr.mxu1 %v5806_v49  ;;  %v5589_v59 = vunpack.c.h.bf16 %v4361_v33  ;;  %v5757_v49 = vunpack.c.h.bf16 %v4457_v0 }
 0x5b3   :  { %6725 = vmatpush2.msra.mxu0 %v5189_v54  ;;  %6890 = vmatpush1.msra.mxu1 %v5805_v56  ;;  %v5588_v54 = vunpack.c.l.bf16 %v4361_v33  ;;  %v5756_v56 = vunpack.c.l.bf16 %v4457_v0  ;;  %v4557_v33 = vld [vmem:[%s12579_s19 + $0x14ec] sm:$0xff]  ;;  %v5547_v0 = vunpack.c.h.bf16 %v4337_v7 }
 0x5b4   :  { %6726 = vmatprep.subr.mxu0 %v5183_v61  ;;  %6891 = vmatprep.subr.mxu1 %v5799_v12  ;;  %v5582_v61 = vunpack.c.h.bf16 %v4357_v36  ;;  %v5750_v12 = vunpack.c.h.bf16 %v4453_v47 }
 0x5b5   :  { %6727 = vmatpush2.msra.mxu0 %v5182_v63  ;;  %6892 = vmatpush1.msra.mxu1 %v5798_v32  ;;  %v5581_v63 = vunpack.c.l.bf16 %v4357_v36  ;;  %v5749_v32 = vunpack.c.l.bf16 %v4453_v47  ;;  %v4329_v36 = vld [vmem:[%s12579_s19 + $0xeb0] sm:$0xff] }
 0x5b6   :  { %6728 = vmatprep.subr.mxu0 %v5176_v2  ;;  %6893 = vmatprep.subr.mxu1 %v5792_v14  ;;  %v5575_v2 = vunpack.c.h.bf16 %v4353_v29  ;;  %v5743_v14 = vunpack.c.h.bf16 %v4449_v48  ;;  %v4553_v47 = vld [vmem:[%s12579_s19 + $0x14d0] sm:$0xff] }
 0x5b7   :  { %6729 = vmatpush2.msra.mxu0 %v5175_v4  ;;  %6894 = vmatpush1.msra.mxu1 %v5791_v17  ;;  %v5574_v4 = vunpack.c.l.bf16 %v4353_v29  ;;  %v5742_v17 = vunpack.c.l.bf16 %v4449_v48  ;;  %v4325_v29 = vld [vmem:[%s12579_s19 + $0xe94] sm:$0xff] }
 0x5b8   :  { %6730 = vmatprep.subr.mxu0 %v5169_v18  ;;  %6895 = vmatprep.subr.mxu1 %v5785_v46  ;;  %v5568_v18 = vunpack.c.h.bf16 %v4349_v15  ;;  %v5736_v46 = vunpack.c.h.bf16 %v4445_v16  ;;  %v4549_v48 = vld [vmem:[%s12579_s19 + $0x14b4] sm:$0xff] }
 0x5b9   :  { %6731 = vmatpush2.msra.mxu0 %v5168_v40  ;;  %6896 = vmatpush1.msra.mxu1 %v5784_v20  ;;  %v5567_v40 = vunpack.c.l.bf16 %v4349_v15  ;;  %v5735_v20 = vunpack.c.l.bf16 %v4445_v16  ;;  %v4321_v15 = vld [vmem:[%s12579_s19 + $0xe78] sm:$0xff] }
 0x5ba   :  { %6732 = vmatprep.subr.mxu0 %v5162_v23  ;;  %6897 = vmatprep.subr.mxu1 %v5778_v19  ;;  %v5561_v23 = vunpack.c.h.bf16 %v4345_v13  ;;  %v5729_v19 = vunpack.c.h.bf16 %v4441_v53  ;;  %v4545_v16 = vld [vmem:[%s12579_s19 + $0x1498] sm:$0xff] }
 0x5bb   :  { %6733 = vmatpush2.msra.mxu0 %v5161_v26  ;;  %6898 = vmatpush1.msra.mxu1 %v5777_v8  ;;  %v5560_v26 = vunpack.c.l.bf16 %v4345_v13  ;;  %v5728_v8 = vunpack.c.l.bf16 %v4441_v53  ;;  %v4317_v13 = vld [vmem:[%s12579_s19 + $0xe5c] sm:$0xff] }
 0x5bc   :  { %6734 = vmatprep.subr.mxu0 %v5155_v28  ;;  %6899 = vmatprep.subr.mxu1 %v5771_v30  ;;  %v4433_v28 = vld [vmem:[%s12579_s19 + $0x1188] sm:$0xff]  ;;  %v5554_v30 = vunpack.c.h.bf16 %v4341_v58  ;;  %v4541_v53 = vld [vmem:[%s12579_s19 + $0x147c] sm:$0xff] }
 0x5bd   :  { %6735 = vmatpush2.msra.mxu0 %v5154_v51  ;;  %6900 = vmatpush1.msra.mxu1 %v5770_v1  ;;  %v5553_v51 = vunpack.c.l.bf16 %v4341_v58  ;;  %v5721_v1 = vunpack.c.l.bf16 %v4437_v22  ;;  %v4313_v58 = vld [vmem:[%s12579_s19 + $0xe40] sm:$0xff] }
 0x5be   :  { %6737 = vmatmul.mubr.f32.vlgmr.msra.gmra.mxu0 %v10696_v9  ;;  %6814 = vmatprep.subr.mxu0 %v5596_v5  ;;  %v4333_v5 = vld [vmem:[%s12579_s19 + $0xecc] sm:$0xff]  ;;  %v4537_v22 = vld [vmem:[%s12579_s19 + $0x1460] sm:$0xff] }
 0x5bf   :  { %6901 = vmatprep.subr.mxu1 %v5764_v60  ;;  %6815 = vmatpush1.msra.mxu0 %v5595_v44  ;;  %v5715_v44 = vunpack.c.h.bf16 %v4433_v28  ;;  %v5546_v60 = vunpack.c.l.bf16 %v4337_v7  ;;  %v4309_v7 = vld [vmem:[%s12579_s19 + $0xe24] sm:$0xff] }
 0x5c0   :  { %6878 = vmatprep.mubr.f32.mxu0 %v10710_v38  ;;  %6902 = vmatpush1.msra.mxu1 %v5763_v6  ;;  %v5714_v6 = vunpack.c.l.bf16 %v4433_v28  ;;  %v4533_v28 = vld [vmem:[%s12579_s19 + $0x1444] sm:$0xff] }
 0x5c1   :  { %6816 = vmatprep.subr.mxu0 %v5589_v59  ;;  %6903 = vmatprep.subr.mxu1 %v5757_v49  ;;  %v5540_v59 = vunpack.c.h.bf16 %v4333_v5  ;;  %v5932_v49 = vunpack.c.h.bf16 %v4557_v33 }
 0x5c2   :  { %6817 = vmatpush1.msra.mxu0 %v5588_v54  ;;  %6904 = vmatpush1.msra.mxu1 %v5756_v56  ;;  %v5539_v54 = vunpack.c.l.bf16 %v4333_v5  ;;  %v5931_v56 = vunpack.c.l.bf16 %v4557_v33  ;;  %v4305_v5 = vld [vmem:[%s12579_s19 + $0xe08] sm:$0xff] }
 0x5c3   :  { %6818 = vmatprep.subr.mxu0 %v5582_v61  ;;  %6905 = vmatprep.subr.mxu1 %v5750_v12  ;;  %v5533_v61 = vunpack.c.h.bf16 %v4329_v36  ;;  %v5925_v12 = vunpack.c.h.bf16 %v4553_v47  ;;  %v4529_v33 = vld [vmem:[%s12579_s19 + $0x1428] sm:$0xff] }
 0x5c4   :  { %6819 = vmatpush1.msra.mxu0 %v5581_v63  ;;  %6906 = vmatpush1.msra.mxu1 %v5749_v32  ;;  %v5532_v63 = vunpack.c.l.bf16 %v4329_v36  ;;  %v5924_v32 = vunpack.c.l.bf16 %v4553_v47  ;;  %v4429_v36 = vld [vmem:[%s12579_s19 + $0x116c] sm:$0xff] }
 0x5c5   :  { %6820 = vmatprep.subr.mxu0 %v5575_v2  ;;  %6907 = vmatprep.subr.mxu1 %v5743_v14  ;;  %v5526_v2 = vunpack.c.h.bf16 %v4325_v29  ;;  %v5918_v14 = vunpack.c.h.bf16 %v4549_v48  ;;  %v4525_v47 = vld [vmem:[%s12579_s19 + $0x140c] sm:$0xff] }
 0x5c6   :  { %6821 = vmatpush1.msra.mxu0 %v5574_v4  ;;  %6908 = vmatpush1.msra.mxu1 %v5742_v17  ;;  %v5525_v4 = vunpack.c.l.bf16 %v4325_v29  ;;  %v5917_v17 = vunpack.c.l.bf16 %v4549_v48  ;;  %v4425_v29 = vld [vmem:[%s12579_s19 + $0x1150] sm:$0xff] }
 0x5c7   :  { %6822 = vmatprep.subr.mxu0 %v5568_v18  ;;  %6909 = vmatprep.subr.mxu1 %v5736_v46  ;;  %v5519_v18 = vunpack.c.h.bf16 %v4321_v15  ;;  %v5911_v46 = vunpack.c.h.bf16 %v4545_v16  ;;  %v4521_v48 = vld [vmem:[%s12579_s19 + $0x13f0] sm:$0xff] }
 0x5c8   :  { %6823 = vmatpush1.msra.mxu0 %v5567_v40  ;;  %6910 = vmatpush1.msra.mxu1 %v5735_v20  ;;  %v5518_v40 = vunpack.c.l.bf16 %v4321_v15  ;;  %v5910_v20 = vunpack.c.l.bf16 %v4545_v16  ;;  %v4421_v15 = vld [vmem:[%s12579_s19 + $0x1134] sm:$0xff] }
 0x5c9   :  { %6824 = vmatprep.subr.mxu0 %v5561_v23  ;;  %6911 = vmatprep.subr.mxu1 %v5729_v19  ;;  %v5512_v23 = vunpack.c.h.bf16 %v4317_v13  ;;  %v5904_v19 = vunpack.c.h.bf16 %v4541_v53  ;;  %v4517_v16 = vld [vmem:[%s12579_s19 + $0x13d4] sm:$0xff] }
 0x5ca   :  { %6825 = vmatpush1.msra.mxu0 %v5560_v26  ;;  %6912 = vmatpush1.msra.mxu1 %v5728_v8  ;;  %v5511_v26 = vunpack.c.l.bf16 %v4317_v13  ;;  %v5903_v8 = vunpack.c.l.bf16 %v4541_v53  ;;  %v4417_v13 = vld [vmem:[%s12579_s19 + $0x1118] sm:$0xff] }
 0x5cb   :  { %6826 = vmatprep.subr.mxu0 %v5554_v30  ;;  %6913 = vmatprep.subr.mxu1 %v5722_v62  ;;  %v5505_v30 = vunpack.c.h.bf16 %v4313_v58  ;;  %v5897_v62 = vunpack.c.h.bf16 %v4537_v22  ;;  %v4513_v53 = vld [vmem:[%s12579_s19 + $0x13b8] sm:$0xff] }
 0x5cc   :  { %6827 = vmatpush1.msra.mxu0 %v5553_v51  ;;  %6914 = vmatpush1.msra.mxu1 %v5721_v1  ;;  %v5504_v51 = vunpack.c.l.bf16 %v4313_v58  ;;  %v5896_v1 = vunpack.c.l.bf16 %v4537_v22  ;;  %v4413_v58 = vld [vmem:[%s12579_s19 + $0x10fc] sm:$0xff] }
 0x5cd   :  { %6828 = vmatprep.subr.mxu0 %v5547_v0  ;;  %6915 = vmatprep.subr.mxu1 %v5715_v44  ;;  %v5498_v0 = vunpack.c.h.bf16 %v4309_v7  ;;  %v5890_v44 = vunpack.c.h.bf16 %v4533_v28  ;;  %v4509_v22 = vld [vmem:[%s12579_s19 + $0x139c] sm:$0xff] }
 0x5ce   :  { %6829 = vmatpush1.msra.mxu0 %v5546_v60  ;;  %6916 = vmatpush1.msra.mxu1 %v5714_v6  ;;  %v5497_v60 = vunpack.c.l.bf16 %v4309_v7  ;;  %v5889_v6 = vunpack.c.l.bf16 %v4533_v28  ;;  %v4409_v7 = vld [vmem:[%s12579_s19 + $0x10e0] sm:$0xff] }
 0x5cf   :  { %6830 = vmatprep.subr.mxu0 %v5540_v59  ;;  %6917 = vmatprep.subr.mxu1 %v5932_v49  ;;  %v5491_v59 = vunpack.c.h.bf16 %v4305_v5  ;;  %v5883_v49 = vunpack.c.h.bf16 %v4529_v33  ;;  %v4505_v28 = vld [vmem:[%s12579_s19 + $0x1380] sm:$0xff] }
 0x5d0   :  { %6831 = vmatpush1.msra.mxu0 %v5539_v54  ;;  %6918 = vmatpush2.msra.mxu1 %v5931_v56  ;;  %v5490_v54 = vunpack.c.l.bf16 %v4305_v5  ;;  %v5882_v56 = vunpack.c.l.bf16 %v4529_v33  ;;  %v4405_v5 = vld [vmem:[%s12579_s19 + $0x10c4] sm:$0xff] }
 0x5d1   :  { %6832 = vmatprep.subr.mxu0 %v5533_v61  ;;  %6919 = vmatprep.subr.mxu1 %v5925_v12  ;;  %v5708_v61 = vunpack.c.h.bf16 %v4429_v36  ;;  %v5876_v12 = vunpack.c.h.bf16 %v4525_v47  ;;  %v4501_v33 = vld [vmem:[%s12579_s19 + $0x1364] sm:$0xff] }
 0x5d2   :  { %6833 = vmatpush1.msra.mxu0 %v5532_v63  ;;  %6920 = vmatpush2.msra.mxu1 %v5924_v32  ;;  %v5707_v63 = vunpack.c.l.bf16 %v4429_v36  ;;  %v5875_v32 = vunpack.c.l.bf16 %v4525_v47  ;;  %v4401_v36 = vld [vmem:[%s12579_s19 + $0x10a8] sm:$0xff] }
 0x5d3   :  { %6834 = vmatprep.subr.mxu0 %v5526_v2  ;;  %6921 = vmatprep.subr.mxu1 %v5918_v14  ;;  %v5701_v2 = vunpack.c.h.bf16 %v4425_v29  ;;  %v5869_v14 = vunpack.c.h.bf16 %v4521_v48  ;;  %v4497_v47 = vld [vmem:[%s12579_s19 + $0x1348] sm:$0xff] }
 0x5d4   :  { %6835 = vmatpush1.msra.mxu0 %v5525_v4  ;;  %6922 = vmatpush2.msra.mxu1 %v5917_v17  ;;  %v5700_v4 = vunpack.c.l.bf16 %v4425_v29  ;;  %v5868_v17 = vunpack.c.l.bf16 %v4521_v48  ;;  %v4397_v29 = vld [vmem:[%s12579_s19 + $0x108c] sm:$0xff]  ;;  %v5659_v48 = vunpack.c.h.bf16 %v4401_v36 }
 0x5d5   :  { %6836 = vmatprep.subr.mxu0 %v5519_v18  ;;  %6923 = vmatprep.subr.mxu1 %v5911_v46  ;;  %v5694_v18 = vunpack.c.h.bf16 %v4421_v15  ;;  %v5862_v46 = vunpack.c.h.bf16 %v4517_v16 }
 0x5d6   :  { %6837 = vmatpush1.msra.mxu0 %v5518_v40  ;;  %6924 = vmatpush2.msra.mxu1 %v5910_v20  ;;  %v5693_v40 = vunpack.c.l.bf16 %v4421_v15  ;;  %v5861_v20 = vunpack.c.l.bf16 %v4517_v16  ;;  %v5652_v15 = vunpack.c.h.bf16 %v4397_v29  ;;  %v4393_v16 = vld [vmem:[%s12579_s19 + $0x1070] sm:$0xff] }
 0x5d7   :  { %6838 = vmatprep.subr.mxu0 %v5512_v23  ;;  %6925 = vmatprep.subr.mxu1 %v5904_v19  ;;  %v5687_v23 = vunpack.c.h.bf16 %v4417_v13  ;;  %v5855_v19 = vunpack.c.h.bf16 %v4513_v53 }
 0x5d8   :  { %6839 = vmatpush1.msra.mxu0 %v5511_v26  ;;  %6926 = vmatpush2.msra.mxu1 %v5903_v8  ;;  %v5686_v26 = vunpack.c.l.bf16 %v4417_v13  ;;  %v5854_v8 = vunpack.c.l.bf16 %v4513_v53  ;;  %v4389_v13 = vld [vmem:[%s12579_s19 + $0x1054] sm:$0xff]  ;;  %v3846_v53 = vld [vmem:[%s12579_s19 + $0x17c] sm:$0xff] }
 0x5d9   :  { %6840 = vmatprep.subr.mxu0 %v5505_v30  ;;  %6927 = vmatprep.subr.mxu1 %v5897_v62  ;;  %v5680_v30 = vunpack.c.h.bf16 %v4413_v58  ;;  %v5848_v62 = vunpack.c.h.bf16 %v4509_v22 }
 0x5da   :  { %6841 = vmatpush1.msra.mxu0 %v5504_v51  ;;  %6928 = vmatpush2.msra.mxu1 %v5896_v1  ;;  %v5679_v51 = vunpack.c.l.bf16 %v4413_v58  ;;  %v5847_v1 = vunpack.c.l.bf16 %v4509_v22  ;;  %v4385_v58 = vld [vmem:[%s12579_s19 + $0x1038] sm:$0xff]  ;;  %v3842_v22 = vld [vmem:[%s12579_s19 + $0x160] sm:$0xff] }
 0x5db   :  { %6842 = vmatprep.subr.mxu0 %v5498_v0  ;;  %6929 = vmatprep.subr.mxu1 %v5890_v44  ;;  %v5673_v0 = vunpack.c.h.bf16 %v4409_v7  ;;  %v5841_v44 = vunpack.c.h.bf16 %v4505_v28 }
 0x5dc   :  { %6843 = vmatpush1.msra.mxu0 %v5497_v60  ;;  %6930 = vmatpush2.msra.mxu1 %v5889_v6  ;;  %v5672_v60 = vunpack.c.l.bf16 %v4409_v7  ;;  %v5840_v6 = vunpack.c.l.bf16 %v4505_v28  ;;  %v4381_v7 = vld [vmem:[%s12579_s19 + $0x101c] sm:$0xff]  ;;  %v3838_v28 = vld [vmem:[%s12579_s19 + $0x144] sm:$0xff] }
 0x5dd   :  { %6844 = vmatprep.subr.mxu0 %v5491_v59  ;;  %6931 = vmatprep.subr.mxu1 %v5883_v49  ;;  %v5666_v59 = vunpack.c.h.bf16 %v4405_v5  ;;  %v5834_v49 = vunpack.c.h.bf16 %v4501_v33 }
 0x5de   :  { %6845 = vmatpush1.msra.mxu0 %v5490_v54  ;;  %6932 = vmatpush2.msra.mxu1 %v5882_v56  ;;  %v5665_v54 = vunpack.c.l.bf16 %v4405_v5  ;;  %v5833_v56 = vunpack.c.l.bf16 %v4501_v33  ;;  %v4377_v5 = vld [vmem:[%s12579_s19 + $0x1000] sm:$0xff]  ;;  %v3834_v33 = vld [vmem:[%s12579_s19 + $0x128] sm:$0xff] }
 0x5df   :  { %6846 = vmatprep.subr.mxu0 %v5708_v61  ;;  %6933 = vmatprep.subr.mxu1 %v5876_v12  ;;  %v5827_v61 = vunpack.c.h.bf16 %v4497_v47  ;;  %v3854_v12 = vld [vmem:[%s12579_s19 + $0x1b4] sm:$0xff] }
 0x5e0   :  { %6847 = vmatpush2.msra.mxu0 %v5707_v63  ;;  %6934 = vmatpush2.msra.mxu1 %v5875_v32  ;;  %v5658_v63 = vunpack.c.l.bf16 %v4401_v36  ;;  %v5826_v32 = vunpack.c.l.bf16 %v4497_v47  ;;  %v4373_v36 = vld [vmem:[%s12579_s19 + $0xfe4] sm:$0xff]  ;;  %v3830_v47 = vld [vmem:[%s12579_s19 + $0x10c] sm:$0xff] }
 0x5e1   :  { %6848 = vmatprep.subr.mxu0 %v5701_v2  ;;  %6935 = vmatprep.subr.mxu1 %v5869_v14  ;;  %v3850_v2 = vld [vmem:[%s12579_s19 + $0x198] sm:$0xff]  ;;  %v5651_v14 = vunpack.c.l.bf16 %v4397_v29  ;;  %v4369_v29 = vld [vmem:[%s12579_s19 + $0xfc8] sm:$0xff] }
 0x5e2   :  { %6849 = vmatpush2.msra.mxu0 %v5700_v4  ;;  %6936 = vmatpush2.msra.mxu1 %v5868_v17  ;;  %v4702_v4 = vunpack.c.h.bf16 %v3854_v12  ;;  %v4701_v17 = vunpack.c.l.bf16 %v3854_v12  ;;  %v4660_v12 = vunpack.c.h.bf16 %v3830_v47 }
 0x5e3   :  { %6850 = vmatprep.subr.mxu0 %v5694_v18  ;;  %6937 = vmatprep.subr.mxu1 %v5862_v46  ;;  %v5645_v18 = vunpack.c.h.bf16 %v4393_v16  ;;  %v4695_v46 = vunpack.c.h.bf16 %v3850_v2 }
 0x5e4   :  { %6851 = vmatpush2.msra.mxu0 %v5693_v40  ;;  %6938 = vmatpush2.msra.mxu1 %v5861_v20  ;;  %v5644_v40 = vunpack.c.l.bf16 %v4393_v16  ;;  %v4694_v20 = vunpack.c.l.bf16 %v3850_v2  ;;  %v5603_v16 = vunpack.c.h.bf16 %v4369_v29 }
 0x5e5   :  { %6852 = vmatprep.subr.mxu0 %v5687_v23  ;;  %6939 = vmatprep.subr.mxu1 %v5855_v19  ;;  %v5638_v23 = vunpack.c.h.bf16 %v4389_v13  ;;  %v4688_v19 = vunpack.c.h.bf16 %v3846_v53 }
 0x5e6   :  { %6853 = vmatpush2.msra.mxu0 %v5686_v26  ;;  %6940 = vmatpush2.msra.mxu1 %v5854_v8  ;;  %v5637_v26 = vunpack.c.l.bf16 %v4389_v13  ;;  %v4687_v8 = vunpack.c.l.bf16 %v3846_v53  ;;  %v4585_v13 = vld [vmem:[%s12579_s19 + $0x15b0] sm:$0xff] }
 0x5e7   :  { %6854 = vmatprep.subr.mxu0 %v5680_v30  ;;  %6941 = vmatprep.subr.mxu1 %v5848_v62  ;;  %v5631_v30 = vunpack.c.h.bf16 %v4385_v58  ;;  %v4681_v62 = vunpack.c.h.bf16 %v3842_v22 }
 0x5e8   :  { %6855 = vmatpush2.msra.mxu0 %v5679_v51  ;;  %6942 = vmatpush2.msra.mxu1 %v5847_v1  ;;  %v5630_v51 = vunpack.c.l.bf16 %v4385_v58  ;;  %v4680_v1 = vunpack.c.l.bf16 %v3842_v22  ;;  %v5981_v22 = vunpack.c.h.bf16 %v4585_v13 }
 0x5e9   :  { %6856 = vmatprep.subr.mxu0 %v5673_v0  ;;  %6943 = vmatprep.subr.mxu1 %v5841_v44  ;;  %v5624_v0 = vunpack.c.h.bf16 %v4381_v7  ;;  %v4674_v44 = vunpack.c.h.bf16 %v3838_v28 }
 0x5ea   :  { %6857 = vmatpush2.msra.mxu0 %v5672_v60  ;;  %6944 = vmatpush2.msra.mxu1 %v5840_v6  ;;  %v5623_v60 = vunpack.c.l.bf16 %v4381_v7  ;;  %v4673_v6 = vunpack.c.l.bf16 %v3838_v28 }
 0x5eb   :  { %6858 = vmatprep.subr.mxu0 %v5666_v59  ;;  %6945 = vmatprep.subr.mxu1 %v5834_v49  ;;  %v5617_v59 = vunpack.c.h.bf16 %v4377_v5  ;;  %v4667_v49 = vunpack.c.h.bf16 %v3834_v33 }
 0x5ec   :  { %6859 = vmatpush2.msra.mxu0 %v5665_v54  ;;  %6946 = vmatpush2.msra.mxu1 %v5833_v56  ;;  %v5616_v54 = vunpack.c.l.bf16 %v4377_v5  ;;  %v4666_v56 = vunpack.c.l.bf16 %v3834_v33 }
 0x5ed   :  { %6860 = vmatprep.subr.mxu0 %v5659_v48  ;;  %6947 = vmatprep.subr.mxu1 %v5827_v61  ;;  %v3826_v48 = vld [vmem:[%s12579_s19 + $0xf0] sm:$0xff]  ;;  %v5610_v61 = vunpack.c.h.bf16 %v4373_v36 }
 0x5ee   :  { %6861 = vmatpush2.msra.mxu0 %v5658_v63  ;;  %6948 = vmatpush2.msra.mxu1 %v5826_v32  ;;  %v5609_v63 = vunpack.c.l.bf16 %v4373_v36  ;;  %v4659_v32 = vunpack.c.l.bf16 %v3830_v47  ;;  %v4653_v2 = vunpack.c.h.bf16 %v3826_v48 }
 0x5ef   :  { %6862 = vmatprep.subr.mxu0 %v5652_v15  ;;  %6950 = vmatmul.mubr.f32.vlgmr.msra.gmra.mxu1 %v10907_v25  ;;  %v4589_v15 = vld [vmem:[%s12579_s19 + $0x15cc] sm:$0xff] }
 0x5f0   :  { %7027 = vmatprep.subr.mxu1 %v4702_v4  ;;  %6863 = vmatpush2.msra.mxu0 %v5651_v14  ;;  %v3822_v14 = vld [vmem:[%s12579_s19 + $0xd4] sm:$0xff]  ;;  %v5602_v4 = vunpack.c.l.bf16 %v4369_v29  ;;  %v5988_v53 = vunpack.c.h.bf16 %v4589_v15 }
 0x5f1   :  { %7028 = vmatpush1.msra.mxu1 %v4701_v17  ;;  %7091 = vmatprep.mubr.f32.mxu1 %v10438_v41  ;;  %v4652_v17 = vunpack.c.l.bf16 %v3826_v48  ;;  %v4645_v58 = vunpack.c.l.bf16 %v3822_v14 }
 0x5f2   :  { %6864 = vmatprep.subr.mxu0 %v5645_v18  ;;  %7029 = vmatprep.subr.mxu1 %v4695_v46  ;;  %v3818_v18 = vld [vmem:[%s12579_s19 + $0xb8] sm:$0xff]  ;;  %v5987_v46 = vunpack.c.l.bf16 %v4589_v15 }
 0x5f3   :  { %6865 = vmatpush2.msra.mxu0 %v5644_v40  ;;  %7030 = vmatpush1.msra.mxu1 %v4694_v20  ;;  %v4646_v40 = vunpack.c.h.bf16 %v3822_v14  ;;  %v4581_v20 = vld [vmem:[%s12579_s19 + $0x1594] sm:$0xff]  ;;  %v4638_v7 = vunpack.c.l.bf16 %v3818_v18 }
 0x5f4   :  { %6866 = vmatprep.subr.mxu0 %v5638_v23  ;;  %7031 = vmatprep.subr.mxu1 %v4688_v19  ;;  %v3814_v23 = vld [vmem:[%s12579_s19 + $0x9c] sm:$0xff]  ;;  %v5980_v19 = vunpack.c.l.bf16 %v4585_v13  ;;  %v5974_v28 = vunpack.c.h.bf16 %v4581_v20 }
 0x5f5   :  { %6867 = vmatpush2.msra.mxu0 %v5637_v26  ;;  %7032 = vmatpush1.msra.mxu1 %v4687_v8  ;;  %v4639_v26 = vunpack.c.h.bf16 %v3818_v18  ;;  %v4577_v8 = vld [vmem:[%s12579_s19 + $0x1578] sm:$0xff]  ;;  %v4631_v5 = vunpack.c.l.bf16 %v3814_v23 }
 0x5f6   :  { %6868 = vmatprep.subr.mxu0 %v5631_v30  ;;  %7033 = vmatprep.subr.mxu1 %v4681_v62  ;;  %v3810_v30 = vld [vmem:[%s12579_s19 + $0x80] sm:$0xff]  ;;  %v5973_v62 = vunpack.c.l.bf16 %v4581_v20  ;;  %v5967_v33 = vunpack.c.h.bf16 %v4577_v8 }
 0x5f7   :  { %6869 = vmatpush2.msra.mxu0 %v5630_v51  ;;  %7034 = vmatpush1.msra.mxu1 %v4680_v1  ;;  %v4632_v51 = vunpack.c.h.bf16 %v3814_v23  ;;  %v4573_v1 = vld [vmem:[%s12579_s19 + $0x155c] sm:$0xff]  ;;  %v4624_v36 = vunpack.c.l.bf16 %v3810_v30 }
 0x5f8   :  { %6870 = vmatprep.subr.mxu0 %v5624_v0  ;;  %7035 = vmatprep.subr.mxu1 %v4674_v44  ;;  %v3806_v0 = vld [vmem:[%s12579_s19 + $0x64] sm:$0xff]  ;;  %v5966_v44 = vunpack.c.l.bf16 %v4577_v8  ;;  %v5960_v47 = vunpack.c.h.bf16 %v4573_v1  ;;  %v3978_v23 = vld [vmem:[%s12579_s19 + $0x518] sm:$0xff] }
 0x5f9   :  { %6871 = vmatpush2.msra.mxu0 %v5623_v60  ;;  %7036 = vmatpush1.msra.mxu1 %v4673_v6  ;;  %v4625_v60 = vunpack.c.h.bf16 %v3810_v30  ;;  %v4569_v6 = vld [vmem:[%s12579_s19 + $0x1540] sm:$0xff]  ;;  %v4617_v29 = vunpack.c.l.bf16 %v3806_v0 }
 0x5fa   :  { %6872 = vmatprep.subr.mxu0 %v5617_v59  ;;  %7037 = vmatprep.subr.mxu1 %v4667_v49  ;;  %v3802_v59 = vld [vmem:[%s12579_s19 + $0x48] sm:$0xff]  ;;  %v5959_v49 = vunpack.c.l.bf16 %v4573_v1  ;;  %v5953_v48 = vunpack.c.h.bf16 %v4569_v6  ;;  %v4918_v1 = vunpack.c.l.bf16 %v3978_v23 }
 0x5fb   :  { %6873 = vmatpush2.msra.mxu0 %v5616_v54  ;;  %7038 = vmatpush1.msra.mxu1 %v4666_v56  ;;  %v4618_v54 = vunpack.c.h.bf16 %v3806_v0  ;;  %v4565_v56 = vld [vmem:[%s12579_s19 + $0x1524] sm:$0xff]  ;;  %v4610_v15 = vunpack.c.l.bf16 %v3802_v59 }
 0x5fc   :  { %6874 = vmatprep.subr.mxu0 %v5610_v61  ;;  %7039 = vmatprep.subr.mxu1 %v4660_v12  ;;  %v3798_v61 = vld [vmem:[%s12579_s19 + $0x2c] sm:$0xff]  ;;  %v5952_v12 = vunpack.c.l.bf16 %v4569_v6  ;;  %v5945_v14 = vunpack.c.l.bf16 %v4565_v56 }
 0x5fd   :  { %6875 = vmatpush2.msra.mxu0 %v5609_v63  ;;  %7040 = vmatpush1.msra.mxu1 %v4659_v32  ;;  %v4611_v63 = vunpack.c.h.bf16 %v3802_v59  ;;  %v4561_v32 = vld [vmem:[%s12579_s19 + $0x1508] sm:$0xff] }
 0x5fe   :  { %6876 = vmatprep.subr.mxu0 %v5603_v16  ;;  %7041 = vmatprep.subr.mxu1 %v4653_v2  ;;  %v5946_v16 = vunpack.c.h.bf16 %v4565_v56  ;;  %v3794_v2 = vld [vmem:[%s12579_s19 + $0x10] sm:$0xff]  ;;  %v5939_v13 = vunpack.c.h.bf16 %v4561_v32  ;;  %v5938_v18 = vunpack.c.l.bf16 %v4561_v32 }
 0x5ff   :  { %6877 = vmatpush2.msra.mxu0 %v5602_v4  ;;  %7042 = vmatpush1.msra.mxu1 %v4652_v17  ;;  %v4604_v4 = vunpack.c.h.bf16 %v3798_v61  ;;  %v4603_v17 = vunpack.c.l.bf16 %v3798_v61  ;;  %v4596_v20 = vunpack.c.l.bf16 %v3794_v2 }
 0x600   :  { %6879 = vmatmul.mubr.f32.vlgmr.msra.gmra.mxu0 %v10904_v24  ;;  %6972 = vmatprep.subr.mxu0 %v5988_v53  ;;  %v3918_v53 = vld [vmem:[%s12579_s19 + $0x374] sm:$0xff] }
 0x601   :  { %7043 = vmatprep.subr.mxu1 %v4646_v40  ;;  %6973 = vmatpush1.msra.mxu0 %v5987_v46  ;;  %v4597_v46 = vunpack.c.h.bf16 %v3794_v2  ;;  %v3982_v40 = vld [vmem:[%s12579_s19 + $0x534] sm:$0xff] }
 0x602   :  { %7044 = vmatpush1.msra.mxu1 %v4645_v58  ;;  %6974 = vmatprep.subr.mxu0 %v5981_v22  ;;  %v4814_v58 = vunpack.c.h.bf16 %v3918_v53  ;;  %v3914_v22 = vld [vmem:[%s12579_s19 + $0x358] sm:$0xff]  ;;  %v4925_v8 = vunpack.c.l.bf16 %v3982_v40 }
 0x603   :  { %7045 = vmatprep.subr.mxu1 %v4639_v26  ;;  %6975 = vmatpush1.msra.mxu0 %v5980_v19  ;;  %v4813_v19 = vunpack.c.l.bf16 %v3918_v53  ;;  %v4926_v26 = vunpack.c.h.bf16 %v3982_v40  ;;  %v4807_v30 = vunpack.c.h.bf16 %v3914_v22  ;;  %v3954_v53 = vld [vmem:[%s12579_s19 + $0x470] sm:$0xff] }
 0x604   :  { %7046 = vmatpush1.msra.mxu1 %v4638_v7  ;;  %6976 = vmatprep.subr.mxu0 %v5974_v28  ;;  %v3910_v7 = vld [vmem:[%s12579_s19 + $0x33c] sm:$0xff] }
 0x605   :  { %7047 = vmatprep.subr.mxu1 %v4632_v51  ;;  %6977 = vmatpush1.msra.mxu0 %v5973_v62  ;;  %v3974_v28 = vld [vmem:[%s12579_s19 + $0x4fc] sm:$0xff]  ;;  %v4919_v62 = vunpack.c.h.bf16 %v3978_v23  ;;  %v4806_v51 = vunpack.c.l.bf16 %v3914_v22  ;;  %v4800_v0 = vunpack.c.h.bf16 %v3910_v7  ;;  %v3950_v22 = vld [vmem:[%s12579_s19 + $0x454] sm:$0xff] }
 0x606   :  { %7048 = vmatpush1.msra.mxu1 %v4631_v5  ;;  %6978 = vmatprep.subr.mxu0 %v5967_v33  ;;  %v3906_v5 = vld [vmem:[%s12579_s19 + $0x320] sm:$0xff]  ;;  %v4911_v6 = vunpack.c.l.bf16 %v3974_v28 }
 0x607   :  { %7049 = vmatprep.subr.mxu1 %v4625_v60  ;;  %6979 = vmatpush1.msra.mxu0 %v5966_v44  ;;  %v3970_v33 = vld [vmem:[%s12579_s19 + $0x4e0] sm:$0xff]  ;;  %v4912_v44 = vunpack.c.h.bf16 %v3974_v28  ;;  %v4799_v60 = vunpack.c.l.bf16 %v3910_v7  ;;  %v4793_v59 = vunpack.c.h.bf16 %v3906_v5  ;;  %v3882_v7 = vld [vmem:[%s12579_s19 + $0x278] sm:$0xff] }
 0x608   :  { %7050 = vmatpush1.msra.mxu1 %v4624_v36  ;;  %6980 = vmatprep.subr.mxu0 %v5960_v47  ;;  %v3902_v36 = vld [vmem:[%s12579_s19 + $0x304] sm:$0xff]  ;;  %v4904_v56 = vunpack.c.l.bf16 %v3970_v33  ;;  %v3946_v28 = vld [vmem:[%s12579_s19 + $0x438] sm:$0xff] }
 0x609   :  { %7051 = vmatprep.subr.mxu1 %v4618_v54  ;;  %6981 = vmatpush1.msra.mxu0 %v5959_v49  ;;  %v3966_v47 = vld [vmem:[%s12579_s19 + $0x4c4] sm:$0xff]  ;;  %v4905_v49 = vunpack.c.h.bf16 %v3970_v33  ;;  %v4792_v54 = vunpack.c.l.bf16 %v3906_v5  ;;  %v4786_v61 = vunpack.c.h.bf16 %v3902_v36  ;;  %v3878_v5 = vld [vmem:[%s12579_s19 + $0x25c] sm:$0xff] }
 0x60a   :  { %7052 = vmatpush1.msra.mxu1 %v4617_v29  ;;  %6982 = vmatprep.subr.mxu0 %v5953_v48  ;;  %v3898_v29 = vld [vmem:[%s12579_s19 + $0x2e8] sm:$0xff]  ;;  %v4897_v32 = vunpack.c.l.bf16 %v3966_v47  ;;  %v3942_v33 = vld [vmem:[%s12579_s19 + $0x41c] sm:$0xff] }
 0x60b   :  { %7053 = vmatprep.subr.mxu1 %v4611_v63  ;;  %6983 = vmatpush1.msra.mxu0 %v5952_v12  ;;  %v3962_v48 = vld [vmem:[%s12579_s19 + $0x4a8] sm:$0xff]  ;;  %v4898_v12 = vunpack.c.h.bf16 %v3966_v47  ;;  %v4785_v63 = vunpack.c.l.bf16 %v3902_v36  ;;  %v4779_v2 = vunpack.c.h.bf16 %v3898_v29  ;;  %v3874_v36 = vld [vmem:[%s12579_s19 + $0x240] sm:$0xff] }
 0x60c   :  { %7054 = vmatpush1.msra.mxu1 %v4610_v15  ;;  %6984 = vmatprep.subr.mxu0 %v5946_v16  ;;  %v3894_v15 = vld [vmem:[%s12579_s19 + $0x2cc] sm:$0xff]  ;;  %v3938_v47 = vld [vmem:[%s12579_s19 + $0x400] sm:$0xff] }
 0x60d   :  { %7055 = vmatprep.subr.mxu1 %v4604_v4  ;;  %6985 = vmatpush1.msra.mxu0 %v5945_v14  ;;  %v3958_v16 = vld [vmem:[%s12579_s19 + $0x48c] sm:$0xff]  ;;  %v4891_v14 = vunpack.c.h.bf16 %v3962_v48  ;;  %v4778_v4 = vunpack.c.l.bf16 %v3898_v29  ;;  %v4771_v40 = vunpack.c.l.bf16 %v3894_v15  ;;  %v3870_v29 = vld [vmem:[%s12579_s19 + $0x224] sm:$0xff] }
 0x60e   :  { %7056 = vmatpush1.msra.mxu1 %v4603_v17  ;;  %6986 = vmatprep.subr.mxu0 %v5939_v13  ;;  %v4890_v17 = vunpack.c.l.bf16 %v3962_v48  ;;  %v3890_v13 = vld [vmem:[%s12579_s19 + $0x2b0] sm:$0xff]  ;;  %v3934_v48 = vld [vmem:[%s12579_s19 + $0x3e4] sm:$0xff] }
 0x60f   :  { %7057 = vmatprep.subr.mxu1 %v4597_v46  ;;  %6987 = vmatpush1.msra.mxu0 %v5938_v18  ;;  %v4772_v18 = vunpack.c.h.bf16 %v3894_v15  ;;  %v4884_v46 = vunpack.c.h.bf16 %v3958_v16  ;;  %v4765_v23 = vunpack.c.h.bf16 %v3890_v13  ;;  %v3866_v15 = vld [vmem:[%s12579_s19 + $0x208] sm:$0xff] }
 0x610   :  { %7020 = vmatprep.mubr.f32.mxu0 %v8399_v3  ;;  %7058 = vmatpush1.msra.mxu1 %v4596_v20  ;;  %v4883_v20 = vunpack.c.l.bf16 %v3958_v16  ;;  %v3930_v16 = vld [vmem:[%s12579_s19 + $0x3c8] sm:$0xff] }
 0x611   :  { %8101 = vmatmul.mubr.msk.f32.vlgmr.msra.gmra.mxu0 %vm6029_vm8, %v10961_v57  ;;  %7059 = vmatprep.subr.mxu1 %v4814_v58  ;;  %v3886_v58 = vld [vmem:[%s12579_s19 + $0x294] sm:$0xff] }
 0x612   :  { %7098 = vmatprep.subr.mxu0 %v4926_v26  ;;  %7060 = vmatpush2.msra.mxu1 %v4813_v19  ;;  %v4877_v19 = vunpack.c.h.bf16 %v3954_v53  ;;  %v4764_v26 = vunpack.c.l.bf16 %v3890_v13  ;;  %v3862_v13 = vld [vmem:[%s12579_s19 + $0x1ec] sm:$0xff] }
 0x613   :  { %7099 = vmatpush1.msra.mxu0 %v4925_v8  ;;  %7162 = vmatprep.mubr.f32.mxu0 %v10440_v42  ;;  %v4876_v8 = vunpack.c.l.bf16 %v3954_v53  ;;  %v3926_v53 = vld [vmem:[%s12579_s19 + $0x3ac] sm:$0xff] }
 0x614   :  { %7061 = vmatprep.subr.mxu1 %v4807_v30  ;;  %7100 = vmatprep.subr.mxu0 %v4919_v62  ;;  %v4758_v30 = vunpack.c.h.bf16 %v3886_v58  ;;  %v4870_v62 = vunpack.c.h.bf16 %v3950_v22 }
 0x615   :  { %7062 = vmatpush2.msra.mxu1 %v4806_v51  ;;  %7101 = vmatpush1.msra.mxu0 %v4918_v1  ;;  %v4757_v51 = vunpack.c.l.bf16 %v3886_v58  ;;  %v4869_v1 = vunpack.c.l.bf16 %v3950_v22  ;;  %v3858_v58 = vld [vmem:[%s12579_s19 + $0x1d0] sm:$0xff] }
 0x616   :  { %7063 = vmatprep.subr.mxu1 %v4800_v0  ;;  %7102 = vmatprep.subr.mxu0 %v4912_v44  ;;  %v4751_v0 = vunpack.c.h.bf16 %v3882_v7  ;;  %v4863_v44 = vunpack.c.h.bf16 %v3946_v28  ;;  %v3922_v22 = vld [vmem:[%s12579_s19 + $0x390] sm:$0xff] }
 0x617   :  { %7064 = vmatpush2.msra.mxu1 %v4799_v60  ;;  %7103 = vmatpush1.msra.mxu0 %v4911_v6  ;;  %v4750_v60 = vunpack.c.l.bf16 %v3882_v7  ;;  %v4862_v6 = vunpack.c.l.bf16 %v3946_v28  ;;  %v4046_v7 = vld [vmem:[%s12579_s19 + $0x6f4] sm:$0xff]  ;;  %v4709_v28 = vunpack.c.h.bf16 %v3858_v58 }
 0x618   :  { %7065 = vmatprep.subr.mxu1 %v4793_v59  ;;  %7104 = vmatprep.subr.mxu0 %v4905_v49  ;;  %v4744_v59 = vunpack.c.h.bf16 %v3878_v5  ;;  %v4856_v49 = vunpack.c.h.bf16 %v3942_v33 }
 0x619   :  { %7066 = vmatpush2.msra.mxu1 %v4792_v54  ;;  %7105 = vmatpush1.msra.mxu0 %v4904_v56  ;;  %v4743_v54 = vunpack.c.l.bf16 %v3878_v5  ;;  %v4855_v56 = vunpack.c.l.bf16 %v3942_v33  ;;  %v5038_v5 = vunpack.c.h.bf16 %v4046_v7  ;;  %v4042_v33 = vld [vmem:[%s12579_s19 + $0x6d8] sm:$0xff] }
 0x61a   :  { %7067 = vmatprep.subr.mxu1 %v4786_v61  ;;  %7106 = vmatprep.subr.mxu0 %v4898_v12  ;;  %v4737_v61 = vunpack.c.h.bf16 %v3874_v36  ;;  %v4849_v12 = vunpack.c.h.bf16 %v3938_v47 }
 0x61b   :  { %7068 = vmatpush2.msra.mxu1 %v4785_v63  ;;  %7107 = vmatpush1.msra.mxu0 %v4897_v32  ;;  %v4736_v63 = vunpack.c.l.bf16 %v3874_v36  ;;  %v4848_v32 = vunpack.c.l.bf16 %v3938_v47  ;;  %v4038_v36 = vld [vmem:[%s12579_s19 + $0x6bc] sm:$0xff] }
 0x61c   :  { %7069 = vmatprep.subr.mxu1 %v4779_v2  ;;  %7108 = vmatprep.subr.mxu0 %v4891_v14  ;;  %v4730_v2 = vunpack.c.h.bf16 %v3870_v29  ;;  %v4842_v14 = vunpack.c.h.bf16 %v3934_v48  ;;  %v4102_v47 = vld [vmem:[%s12579_s19 + $0x87c] sm:$0xff] }
 0x61d   :  { %7070 = vmatpush2.msra.mxu1 %v4778_v4  ;;  %7109 = vmatpush1.msra.mxu0 %v4890_v17  ;;  %v4729_v4 = vunpack.c.l.bf16 %v3870_v29  ;;  %v4841_v17 = vunpack.c.l.bf16 %v3934_v48  ;;  %v4034_v29 = vld [vmem:[%s12579_s19 + $0x6a0] sm:$0xff] }
 0x61e   :  { %7071 = vmatprep.subr.mxu1 %v4772_v18  ;;  %7110 = vmatprep.subr.mxu0 %v4884_v46  ;;  %v4723_v18 = vunpack.c.h.bf16 %v3866_v15  ;;  %v4835_v46 = vunpack.c.h.bf16 %v3930_v16  ;;  %v4098_v48 = vld [vmem:[%s12579_s19 + $0x860] sm:$0xff] }
 0x61f   :  { %7072 = vmatpush2.msra.mxu1 %v4771_v40  ;;  %7111 = vmatpush1.msra.mxu0 %v4883_v20  ;;  %v4722_v40 = vunpack.c.l.bf16 %v3866_v15  ;;  %v4834_v20 = vunpack.c.l.bf16 %v3930_v16  ;;  %v4030_v15 = vld [vmem:[%s12579_s19 + $0x684] sm:$0xff] }
 0x620   :  { %7073 = vmatprep.subr.mxu1 %v4765_v23  ;;  %7112 = vmatprep.subr.mxu0 %v4877_v19  ;;  %v4716_v23 = vunpack.c.h.bf16 %v3862_v13  ;;  %v4828_v19 = vunpack.c.h.bf16 %v3926_v53  ;;  %v4094_v16 = vld [vmem:[%s12579_s19 + $0x844] sm:$0xff] }
 0x621   :  { %7074 = vmatpush2.msra.mxu1 %v4764_v26  ;;  %7113 = vmatpush1.msra.mxu0 %v4876_v8  ;;  %v4715_v26 = vunpack.c.l.bf16 %v3862_v13  ;;  %v4827_v8 = vunpack.c.l.bf16 %v3926_v53  ;;  %v4026_v13 = vld [vmem:[%s12579_s19 + $0x668] sm:$0xff] }
 0x622   :  { %7075 = vmatprep.subr.mxu1 %v4758_v30  ;;  %7114 = vmatprep.subr.mxu0 %v4870_v62  ;;  %v4821_v30 = vunpack.c.h.bf16 %v3922_v22  ;;  %v4110_v62 = vld [vmem:[%s12579_s19 + $0x8b4] sm:$0xff]  ;;  %v4090_v53 = vld [vmem:[%s12579_s19 + $0x828] sm:$0xff] }
 0x623   :  { %7076 = vmatpush2.msra.mxu1 %v4757_v51  ;;  %7115 = vmatpush1.msra.mxu0 %v4869_v1  ;;  %v4708_v51 = vunpack.c.l.bf16 %v3858_v58  ;;  %v4820_v1 = vunpack.c.l.bf16 %v3922_v22  ;;  %v4022_v58 = vld [vmem:[%s12579_s19 + $0x64c] sm:$0xff] }
 0x624   :  { %7077 = vmatprep.subr.mxu1 %v4751_v0  ;;  %7116 = vmatprep.subr.mxu0 %v4863_v44  ;;  %v4106_v0 = vld [vmem:[%s12579_s19 + $0x898] sm:$0xff]  ;;  %v5037_v44 = vunpack.c.l.bf16 %v4046_v7  ;;  %v4086_v22 = vld [vmem:[%s12579_s19 + $0x80c] sm:$0xff] }
 0x625   :  { %7078 = vmatpush2.msra.mxu1 %v4750_v60  ;;  %7117 = vmatpush1.msra.mxu0 %v4862_v6  ;;  %v5150_v60 = vunpack.c.h.bf16 %v4110_v62  ;;  %v5149_v6 = vunpack.c.l.bf16 %v4110_v62  ;;  %v4018_v7 = vld [vmem:[%s12579_s19 + $0x630] sm:$0xff]  ;;  %v5108_v62 = vunpack.c.h.bf16 %v4086_v22 }
 0x626   :  { %7079 = vmatprep.subr.mxu1 %v4744_v59  ;;  %7118 = vmatprep.subr.mxu0 %v4856_v49  ;;  %v5031_v59 = vunpack.c.h.bf16 %v4042_v33  ;;  %v5143_v49 = vunpack.c.h.bf16 %v4106_v0 }
 0x627   :  { %7080 = vmatpush2.msra.mxu1 %v4743_v54  ;;  %7119 = vmatpush1.msra.mxu0 %v4855_v56  ;;  %v5030_v54 = vunpack.c.l.bf16 %v4042_v33  ;;  %v5142_v56 = vunpack.c.l.bf16 %v4106_v0  ;;  %v4078_v33 = vld [vmem:[%s12579_s19 + $0x7d4] sm:$0xff]  ;;  %v4989_v0 = vunpack.c.h.bf16 %v4018_v7 }
 0x628   :  { %7081 = vmatprep.subr.mxu1 %v4737_v61  ;;  %7120 = vmatprep.subr.mxu0 %v4849_v12  ;;  %v5024_v61 = vunpack.c.h.bf16 %v4038_v36  ;;  %v5136_v12 = vunpack.c.h.bf16 %v4102_v47 }
 0x629   :  { %7082 = vmatpush2.msra.mxu1 %v4736_v63  ;;  %7121 = vmatpush1.msra.mxu0 %v4848_v32  ;;  %v5023_v63 = vunpack.c.l.bf16 %v4038_v36  ;;  %v5135_v32 = vunpack.c.l.bf16 %v4102_v47  ;;  %v4010_v36 = vld [vmem:[%s12579_s19 + $0x5f8] sm:$0xff] }
 0x62a   :  { %7083 = vmatprep.subr.mxu1 %v4730_v2  ;;  %7122 = vmatprep.subr.mxu0 %v4842_v14  ;;  %v5017_v2 = vunpack.c.h.bf16 %v4034_v29  ;;  %v5129_v14 = vunpack.c.h.bf16 %v4098_v48  ;;  %v4074_v47 = vld [vmem:[%s12579_s19 + $0x7b8] sm:$0xff] }
 0x62b   :  { %7084 = vmatpush2.msra.mxu1 %v4729_v4  ;;  %7123 = vmatpush1.msra.mxu0 %v4841_v17  ;;  %v5016_v4 = vunpack.c.l.bf16 %v4034_v29  ;;  %v5128_v17 = vunpack.c.l.bf16 %v4098_v48  ;;  %v4006_v29 = vld [vmem:[%s12579_s19 + $0x5dc] sm:$0xff] }
 0x62c   :  { %7085 = vmatprep.subr.mxu1 %v4723_v18  ;;  %7124 = vmatprep.subr.mxu0 %v4835_v46  ;;  %v5010_v18 = vunpack.c.h.bf16 %v4030_v15  ;;  %v5122_v46 = vunpack.c.h.bf16 %v4094_v16  ;;  %v4070_v48 = vld [vmem:[%s12579_s19 + $0x79c] sm:$0xff] }
 0x62d   :  { %7086 = vmatpush2.msra.mxu1 %v4722_v40  ;;  %7125 = vmatpush1.msra.mxu0 %v4834_v20  ;;  %v5009_v40 = vunpack.c.l.bf16 %v4030_v15  ;;  %v5121_v20 = vunpack.c.l.bf16 %v4094_v16  ;;  %v4002_v15 = vld [vmem:[%s12579_s19 + $0x5c0] sm:$0xff] }
 0x62e   :  { %7087 = vmatprep.subr.mxu1 %v4716_v23  ;;  %7126 = vmatprep.subr.mxu0 %v4828_v19  ;;  %v5003_v23 = vunpack.c.h.bf16 %v4026_v13  ;;  %v5115_v19 = vunpack.c.h.bf16 %v4090_v53  ;;  %v4066_v16 = vld [vmem:[%s12579_s19 + $0x780] sm:$0xff] }
 0x62f   :  { %7088 = vmatpush2.msra.mxu1 %v4715_v26  ;;  %7127 = vmatpush1.msra.mxu0 %v4827_v8  ;;  %v5002_v26 = vunpack.c.l.bf16 %v4026_v13  ;;  %v5114_v8 = vunpack.c.l.bf16 %v4090_v53  ;;  %v3998_v13 = vld [vmem:[%s12579_s19 + $0x5a4] sm:$0xff] }
 0x630   :  { %7089 = vmatprep.subr.mxu1 %v4709_v28  ;;  %7128 = vmatprep.subr.mxu0 %v4821_v30  ;;  %v4082_v28 = vld [vmem:[%s12579_s19 + $0x7f0] sm:$0xff]  ;;  %v4996_v30 = vunpack.c.h.bf16 %v4022_v58  ;;  %v4062_v53 = vld [vmem:[%s12579_s19 + $0x764] sm:$0xff] }
 0x631   :  { %7090 = vmatpush2.msra.mxu1 %v4708_v51  ;;  %7129 = vmatpush1.msra.mxu0 %v4820_v1  ;;  %v4995_v51 = vunpack.c.l.bf16 %v4022_v58  ;;  %v5107_v1 = vunpack.c.l.bf16 %v4086_v22  ;;  %v3994_v58 = vld [vmem:[%s12579_s19 + $0x588] sm:$0xff] }
 0x632   :  { %7092 = vmatmul.mubr.f32.vlgmr.msra.gmra.mxu1 %v10442_v43  ;;  %7130 = vmatprep.subr.mxu0 %v5038_v5  ;;  %v4014_v5 = vld [vmem:[%s12579_s19 + $0x614] sm:$0xff]  ;;  %v4058_v22 = vld [vmem:[%s12579_s19 + $0x748] sm:$0xff] }
 0x633   :  { %7169 = vmatprep.subr.mxu1 %v5150_v60  ;;  %7131 = vmatpush2.msra.mxu0 %v5037_v44  ;;  %v5101_v44 = vunpack.c.h.bf16 %v4082_v28  ;;  %v4988_v60 = vunpack.c.l.bf16 %v4018_v7  ;;  %v3990_v7 = vld [vmem:[%s12579_s19 + $0x56c] sm:$0xff] }
 0x634   :  { %7170 = vmatpush1.msra.mxu1 %v5149_v6  ;;  %7233 = vmatprep.mubr.f32.mxu1 %v10462_v10  ;;  %v5100_v6 = vunpack.c.l.bf16 %v4082_v28  ;;  %v4054_v28 = vld [vmem:[%s12579_s19 + $0x72c] sm:$0xff] }
 0x635   :  { %7132 = vmatprep.subr.mxu0 %v5031_v59  ;;  %7171 = vmatprep.subr.mxu1 %v5143_v49  ;;  %v4982_v59 = vunpack.c.h.bf16 %v4014_v5  ;;  %v5094_v49 = vunpack.c.h.bf16 %v4078_v33 }
 0x636   :  { %7133 = vmatpush2.msra.mxu0 %v5030_v54  ;;  %7172 = vmatpush1.msra.mxu1 %v5142_v56  ;;  %v4981_v54 = vunpack.c.l.bf16 %v4014_v5  ;;  %v5093_v56 = vunpack.c.l.bf16 %v4078_v33  ;;  %v3986_v5 = vld [vmem:[%s12579_s19 + $0x550] sm:$0xff] }
 0x637   :  { %7134 = vmatprep.subr.mxu0 %v5024_v61  ;;  %7173 = vmatprep.subr.mxu1 %v5136_v12  ;;  %v4975_v61 = vunpack.c.h.bf16 %v4010_v36  ;;  %v5087_v12 = vunpack.c.h.bf16 %v4074_v47  ;;  %v4050_v33 = vld [vmem:[%s12579_s19 + $0x710] sm:$0xff] }
 0x638   :  { %7135 = vmatpush2.msra.mxu0 %v5023_v63  ;;  %7174 = vmatpush1.msra.mxu1 %v5135_v32  ;;  %v4974_v63 = vunpack.c.l.bf16 %v4010_v36  ;;  %v5086_v32 = vunpack.c.l.bf16 %v4074_v47  ;;  %v4174_v36 = vld [vmem:[%s12579_s19 + $0xa74] sm:$0xff]  ;;  %v4933_v47 = vunpack.c.h.bf16 %v3986_v5 }
 0x639   :  { %7136 = vmatprep.subr.mxu0 %v5017_v2  ;;  %7175 = vmatprep.subr.mxu1 %v5129_v14  ;;  %v4968_v2 = vunpack.c.h.bf16 %v4006_v29  ;;  %v5080_v14 = vunpack.c.h.bf16 %v4070_v48 }
 0x63a   :  { %7137 = vmatpush2.msra.mxu0 %v5016_v4  ;;  %7176 = vmatpush1.msra.mxu1 %v5128_v17  ;;  %v4967_v4 = vunpack.c.l.bf16 %v4006_v29  ;;  %v5079_v17 = vunpack.c.l.bf16 %v4070_v48  ;;  %v5262_v29 = vunpack.c.h.bf16 %v4174_v36  ;;  %v4170_v48 = vld [vmem:[%s12579_s19 + $0xa58] sm:$0xff] }
 0x63b   :  { %7138 = vmatprep.subr.mxu0 %v5010_v18  ;;  %7177 = vmatprep.subr.mxu1 %v5122_v46  ;;  %v4961_v18 = vunpack.c.h.bf16 %v4002_v15  ;;  %v5073_v46 = vunpack.c.h.bf16 %v4066_v16 }
 0x63c   :  { %7139 = vmatpush2.msra.mxu0 %v5009_v40  ;;  %7178 = vmatpush1.msra.mxu1 %v5121_v20  ;;  %v4960_v40 = vunpack.c.l.bf16 %v4002_v15  ;;  %v5072_v20 = vunpack.c.l.bf16 %v4066_v16  ;;  %v4166_v15 = vld [vmem:[%s12579_s19 + $0xa3c] sm:$0xff] }
 0x63d   :  { %7140 = vmatprep.subr.mxu0 %v5003_v23  ;;  %7179 = vmatprep.subr.mxu1 %v5115_v19  ;;  %v4954_v23 = vunpack.c.h.bf16 %v3998_v13  ;;  %v5066_v19 = vunpack.c.h.bf16 %v4062_v53  ;;  %v4230_v16 = vld [vmem:[%s12579_s19 + $0xbfc] sm:$0xff] }
 0x63e   :  { %7141 = vmatpush2.msra.mxu0 %v5002_v26  ;;  %7180 = vmatpush1.msra.mxu1 %v5114_v8  ;;  %v4953_v26 = vunpack.c.l.bf16 %v3998_v13  ;;  %v5065_v8 = vunpack.c.l.bf16 %v4062_v53  ;;  %v4162_v13 = vld [vmem:[%s12579_s19 + $0xa20] sm:$0xff] }
 0x63f   :  { %7142 = vmatprep.subr.mxu0 %v4996_v30  ;;  %7181 = vmatprep.subr.mxu1 %v5108_v62  ;;  %v4947_v30 = vunpack.c.h.bf16 %v3994_v58  ;;  %v5059_v62 = vunpack.c.h.bf16 %v4058_v22  ;;  %v4226_v53 = vld [vmem:[%s12579_s19 + $0xbe0] sm:$0xff] }
 0x640   :  { %7143 = vmatpush2.msra.mxu0 %v4995_v51  ;;  %7182 = vmatpush1.msra.mxu1 %v5107_v1  ;;  %v4946_v51 = vunpack.c.l.bf16 %v3994_v58  ;;  %v5058_v1 = vunpack.c.l.bf16 %v4058_v22  ;;  %v4158_v58 = vld [vmem:[%s12579_s19 + $0xa04] sm:$0xff] }
 0x641   :  { %7144 = vmatprep.subr.mxu0 %v4989_v0  ;;  %7183 = vmatprep.subr.mxu1 %v5101_v44  ;;  %v4940_v0 = vunpack.c.h.bf16 %v3990_v7  ;;  %v5052_v44 = vunpack.c.h.bf16 %v4054_v28  ;;  %v4222_v22 = vld [vmem:[%s12579_s19 + $0xbc4] sm:$0xff] }
 0x642   :  { %7145 = vmatpush2.msra.mxu0 %v4988_v60  ;;  %7184 = vmatpush1.msra.mxu1 %v5100_v6  ;;  %v4939_v60 = vunpack.c.l.bf16 %v3990_v7  ;;  %v5051_v6 = vunpack.c.l.bf16 %v4054_v28  ;;  %v4154_v7 = vld [vmem:[%s12579_s19 + $0x9e8] sm:$0xff] }
 0x643   :  { %7146 = vmatprep.subr.mxu0 %v4982_v59  ;;  %7185 = vmatprep.subr.mxu1 %v5094_v49  ;;  %v5045_v59 = vunpack.c.h.bf16 %v4050_v33  ;;  %v4238_v49 = vld [vmem:[%s12579_s19 + $0xc34] sm:$0xff]  ;;  %v4218_v28 = vld [vmem:[%s12579_s19 + $0xba8] sm:$0xff] }
 0x644   :  { %7147 = vmatpush2.msra.mxu0 %v4981_v54  ;;  %7186 = vmatpush1.msra.mxu1 %v5093_v56  ;;  %v4932_v54 = vunpack.c.l.bf16 %v3986_v5  ;;  %v5044_v56 = vunpack.c.l.bf16 %v4050_v33  ;;  %v4150_v5 = vld [vmem:[%s12579_s19 + $0x9cc] sm:$0xff] }
 0x645   :  { %7148 = vmatprep.subr.mxu0 %v4975_v61  ;;  %7187 = vmatprep.subr.mxu1 %v5087_v12  ;;  %v4234_v61 = vld [vmem:[%s12579_s19 + $0xc18] sm:$0xff]  ;;  %v5261_v12 = vunpack.c.l.bf16 %v4174_v36  ;;  %v4214_v33 = vld [vmem:[%s12579_s19 + $0xb8c] sm:$0xff] }
 0x646   :  { %7149 = vmatpush2.msra.mxu0 %v4974_v63  ;;  %7188 = vmatpush1.msra.mxu1 %v5086_v32  ;;  %v5374_v63 = vunpack.c.h.bf16 %v4238_v49  ;;  %v5373_v32 = vunpack.c.l.bf16 %v4238_v49  ;;  %v4146_v36 = vld [vmem:[%s12579_s19 + $0x9b0] sm:$0xff]  ;;  %v5332_v49 = vunpack.c.h.bf16 %v4214_v33 }
 0x647   :  { %7150 = vmatprep.subr.mxu0 %v4968_v2  ;;  %7189 = vmatprep.subr.mxu1 %v5080_v14  ;;  %v5255_v2 = vunpack.c.h.bf16 %v4170_v48  ;;  %v5367_v14 = vunpack.c.h.bf16 %v4234_v61 }
 0x648   :  { %7151 = vmatpush2.msra.mxu0 %v4967_v4  ;;  %7190 = vmatpush1.msra.mxu1 %v5079_v17  ;;  %v5254_v4 = vunpack.c.l.bf16 %v4170_v48  ;;  %v5366_v17 = vunpack.c.l.bf16 %v4234_v61  ;;  %v4206_v48 = vld [vmem:[%s12579_s19 + $0xb54] sm:$0xff]  ;;  %v5213_v61 = vunpack.c.h.bf16 %v4146_v36 }
 0x649   :  { %7152 = vmatprep.subr.mxu0 %v4961_v18  ;;  %7191 = vmatprep.subr.mxu1 %v5073_v46  ;;  %v5248_v18 = vunpack.c.h.bf16 %v4166_v15  ;;  %v5360_v46 = vunpack.c.h.bf16 %v4230_v16 }
 0x64a   :  { %7153 = vmatpush2.msra.mxu0 %v4960_v40  ;;  %7192 = vmatpush1.msra.mxu1 %v5072_v20  ;;  %v5247_v40 = vunpack.c.l.bf16 %v4166_v15  ;;  %v5359_v20 = vunpack.c.l.bf16 %v4230_v16  ;;  %v4138_v15 = vld [vmem:[%s12579_s19 + $0x978] sm:$0xff] }
 0x64b   :  { %7154 = vmatprep.subr.mxu0 %v4954_v23  ;;  %7193 = vmatprep.subr.mxu1 %v5066_v19  ;;  %v5241_v23 = vunpack.c.h.bf16 %v4162_v13  ;;  %v5353_v19 = vunpack.c.h.bf16 %v4226_v53  ;;  %v4202_v16 = vld [vmem:[%s12579_s19 + $0xb38] sm:$0xff] }
 0x64c   :  { %7155 = vmatpush2.msra.mxu0 %v4953_v26  ;;  %7194 = vmatpush1.msra.mxu1 %v5065_v8  ;;  %v5240_v26 = vunpack.c.l.bf16 %v4162_v13  ;;  %v5352_v8 = vunpack.c.l.bf16 %v4226_v53  ;;  %v4134_v13 = vld [vmem:[%s12579_s19 + $0x95c] sm:$0xff] }
 0x64d   :  { %7156 = vmatprep.subr.mxu0 %v4947_v30  ;;  %7195 = vmatprep.subr.mxu1 %v5059_v62  ;;  %v5234_v30 = vunpack.c.h.bf16 %v4158_v58  ;;  %v5346_v62 = vunpack.c.h.bf16 %v4222_v22  ;;  %v4198_v53 = vld [vmem:[%s12579_s19 + $0xb1c] sm:$0xff] }
 0x64e   :  { %7157 = vmatpush2.msra.mxu0 %v4946_v51  ;;  %7196 = vmatpush1.msra.mxu1 %v5058_v1  ;;  %v5233_v51 = vunpack.c.l.bf16 %v4158_v58  ;;  %v5345_v1 = vunpack.c.l.bf16 %v4222_v22  ;;  %v4130_v58 = vld [vmem:[%s12579_s19 + $0x940] sm:$0xff] }
 0x64f   :  { %7158 = vmatprep.subr.mxu0 %v4940_v0  ;;  %7197 = vmatprep.subr.mxu1 %v5052_v44  ;;  %v5227_v0 = vunpack.c.h.bf16 %v4154_v7  ;;  %v5339_v44 = vunpack.c.h.bf16 %v4218_v28  ;;  %v4194_v22 = vld [vmem:[%s12579_s19 + $0xb00] sm:$0xff] }
 0x650   :  { %7159 = vmatpush2.msra.mxu0 %v4939_v60  ;;  %7198 = vmatpush1.msra.mxu1 %v5051_v6  ;;  %v5226_v60 = vunpack.c.l.bf16 %v4154_v7  ;;  %v5338_v6 = vunpack.c.l.bf16 %v4218_v28  ;;  %v4126_v7 = vld [vmem:[%s12579_s19 + $0x924] sm:$0xff] }
 0x651   :  { %7160 = vmatprep.subr.mxu0 %v4933_v47  ;;  %7199 = vmatprep.subr.mxu1 %v5045_v59  ;;  %v4210_v47 = vld [vmem:[%s12579_s19 + $0xb70] sm:$0xff]  ;;  %v5220_v59 = vunpack.c.h.bf16 %v4150_v5  ;;  %v4190_v28 = vld [vmem:[%s12579_s19 + $0xae4] sm:$0xff] }
 0x652   :  { %7161 = vmatpush2.msra.mxu0 %v4932_v54  ;;  %7200 = vmatpush1.msra.mxu1 %v5044_v56  ;;  %v5219_v54 = vunpack.c.l.bf16 %v4150_v5  ;;  %v5331_v56 = vunpack.c.l.bf16 %v4214_v33  ;;  %v4122_v5 = vld [vmem:[%s12579_s19 + $0x908] sm:$0xff] }
 0x653   :  { %7163 = vmatmul.mubr.f32.vlgmr.msra.gmra.mxu0 %v10444_v45  ;;  %7201 = vmatprep.subr.mxu1 %v5262_v29  ;;  %v4142_v29 = vld [vmem:[%s12579_s19 + $0x994] sm:$0xff]  ;;  %v4186_v33 = vld [vmem:[%s12579_s19 + $0xac8] sm:$0xff] }
 0x654   :  { %7240 = vmatprep.subr.mxu0 %v5374_v63  ;;  %7202 = vmatpush2.msra.mxu1 %v5261_v12  ;;  %v5325_v12 = vunpack.c.h.bf16 %v4210_v47  ;;  %v5212_v63 = vunpack.c.l.bf16 %v4146_v36  ;;  %v4118_v36 = vld [vmem:[%s12579_s19 + $0x8ec] sm:$0xff] }
 0x655   :  { %7241 = vmatpush1.msra.mxu0 %v5373_v32  ;;  %7304 = vmatprep.mubr.f32.mxu0 %v10474_v35  ;;  %v5324_v32 = vunpack.c.l.bf16 %v4210_v47  ;;  %v4182_v47 = vld [vmem:[%s12579_s19 + $0xaac] sm:$0xff] }
 0x656   :  { %7203 = vmatprep.subr.mxu1 %v5255_v2  ;;  %7242 = vmatprep.subr.mxu0 %v5367_v14  ;;  %v5206_v2 = vunpack.c.h.bf16 %v4142_v29  ;;  %v5318_v14 = vunpack.c.h.bf16 %v4206_v48 }
 0x657   :  { %7204 = vmatpush2.msra.mxu1 %v5254_v4  ;;  %7243 = vmatpush1.msra.mxu0 %v5366_v17  ;;  %v5205_v4 = vunpack.c.l.bf16 %v4142_v29  ;;  %v5317_v17 = vunpack.c.l.bf16 %v4206_v48  ;;  %v4114_v29 = vld [vmem:[%s12579_s19 + $0x8d0] sm:$0xff] }
 0x658   :  { %7205 = vmatprep.subr.mxu1 %v5248_v18  ;;  %7244 = vmatprep.subr.mxu0 %v5360_v46  ;;  %v5199_v18 = vunpack.c.h.bf16 %v4138_v15  ;;  %v5311_v46 = vunpack.c.h.bf16 %v4202_v16  ;;  %v4178_v48 = vld [vmem:[%s12579_s19 + $0xa90] sm:$0xff] }
 0x659   :  { %7206 = vmatpush2.msra.mxu1 %v5247_v40  ;;  %7245 = vmatpush1.msra.mxu0 %v5359_v20  ;;  %v5198_v40 = vunpack.c.l.bf16 %v4138_v15  ;;  %v5310_v20 = vunpack.c.l.bf16 %v4202_v16  ;;  %v4302_v15 = vld [vmem:[%s12579_s19 + $0xdf4] sm:$0xff]  ;;  %v5157_v16 = vunpack.c.h.bf16 %v4114_v29 }
 0x65a   :  { %7207 = vmatprep.subr.mxu1 %v5241_v23  ;;  %7246 = vmatprep.subr.mxu0 %v5353_v19  ;;  %v5192_v23 = vunpack.c.h.bf16 %v4134_v13  ;;  %v5304_v19 = vunpack.c.h.bf16 %v4198_v53 }
 0x65b   :  { %7208 = vmatpush2.msra.mxu1 %v5240_v26  ;;  %7247 = vmatpush1.msra.mxu0 %v5352_v8  ;;  %v5191_v26 = vunpack.c.l.bf16 %v4134_v13  ;;  %v5303_v8 = vunpack.c.l.bf16 %v4198_v53  ;;  %v5486_v13 = vunpack.c.h.bf16 %v4302_v15  ;;  %v4298_v53 = vld [vmem:[%s12579_s19 + $0xdd8] sm:$0xff] }
 0x65c   :  { %7209 = vmatprep.subr.mxu1 %v5234_v30  ;;  %7248 = vmatprep.subr.mxu0 %v5346_v62  ;;  %v5185_v30 = vunpack.c.h.bf16 %v4130_v58  ;;  %v5297_v62 = vunpack.c.h.bf16 %v4194_v22 }
 0x65d   :  { %7210 = vmatpush2.msra.mxu1 %v5233_v51  ;;  %7249 = vmatpush1.msra.mxu0 %v5345_v1  ;;  %v5184_v51 = vunpack.c.l.bf16 %v4130_v58  ;;  %v5296_v1 = vunpack.c.l.bf16 %v4194_v22  ;;  %v4294_v58 = vld [vmem:[%s12579_s19 + $0xdbc] sm:$0xff] }
 0x65e   :  { %7211 = vmatprep.subr.mxu1 %v5227_v0  ;;  %7250 = vmatprep.subr.mxu0 %v5339_v44  ;;  %v5178_v0 = vunpack.c.h.bf16 %v4126_v7  ;;  %v5290_v44 = vunpack.c.h.bf16 %v4190_v28  ;;  %v4358_v22 = vld [vmem:[%s12579_s19 + $0xf7c] sm:$0xff] }
 0x65f   :  { %7212 = vmatpush2.msra.mxu1 %v5226_v60  ;;  %7251 = vmatpush1.msra.mxu0 %v5338_v6  ;;  %v5177_v60 = vunpack.c.l.bf16 %v4126_v7  ;;  %v5289_v6 = vunpack.c.l.bf16 %v4190_v28  ;;  %v4290_v7 = vld [vmem:[%s12579_s19 + $0xda0] sm:$0xff] }
 0x660   :  { %7213 = vmatprep.subr.mxu1 %v5220_v59  ;;  %7252 = vmatprep.subr.mxu0 %v5332_v49  ;;  %v5171_v59 = vunpack.c.h.bf16 %v4122_v5  ;;  %v5283_v49 = vunpack.c.h.bf16 %v4186_v33  ;;  %v4354_v28 = vld [vmem:[%s12579_s19 + $0xf60] sm:$0xff] }
 0x661   :  { %7214 = vmatpush2.msra.mxu1 %v5219_v54  ;;  %7253 = vmatpush1.msra.mxu0 %v5331_v56  ;;  %v5170_v54 = vunpack.c.l.bf16 %v4122_v5  ;;  %v5282_v56 = vunpack.c.l.bf16 %v4186_v33  ;;  %v4286_v5 = vld [vmem:[%s12579_s19 + $0xd84] sm:$0xff] }
 0x662   :  { %7215 = vmatprep.subr.mxu1 %v5213_v61  ;;  %7254 = vmatprep.subr.mxu0 %v5325_v12  ;;  %v5164_v61 = vunpack.c.h.bf16 %v4118_v36  ;;  %v5276_v12 = vunpack.c.h.bf16 %v4182_v47  ;;  %v4350_v33 = vld [vmem:[%s12579_s19 + $0xf44] sm:$0xff] }
 0x663   :  { %7216 = vmatpush2.msra.mxu1 %v5212_v63  ;;  %7255 = vmatpush1.msra.mxu0 %v5324_v32  ;;  %v5163_v63 = vunpack.c.l.bf16 %v4118_v36  ;;  %v5275_v32 = vunpack.c.l.bf16 %v4182_v47  ;;  %v4282_v36 = vld [vmem:[%s12579_s19 + $0xd68] sm:$0xff] }
 0x664   :  { %7217 = vmatprep.subr.mxu1 %v5206_v2  ;;  %7256 = vmatprep.subr.mxu0 %v5318_v14  ;;  %v5269_v2 = vunpack.c.h.bf16 %v4178_v48  ;;  %v4366_v14 = vld [vmem:[%s12579_s19 + $0xfb4] sm:$0xff]  ;;  %v4346_v47 = vld [vmem:[%s12579_s19 + $0xf28] sm:$0xff] }
 0x665   :  { %7218 = vmatpush2.msra.mxu1 %v5205_v4  ;;  %7257 = vmatpush1.msra.mxu0 %v5317_v17  ;;  %v5156_v4 = vunpack.c.l.bf16 %v4114_v29  ;;  %v5268_v17 = vunpack.c.l.bf16 %v4178_v48  ;;  %v4278_v29 = vld [vmem:[%s12579_s19 + $0xd4c] sm:$0xff] }
 0x666   :  { %7219 = vmatprep.subr.mxu1 %v5199_v18  ;;  %7258 = vmatprep.subr.mxu0 %v5311_v46  ;;  %v4362_v18 = vld [vmem:[%s12579_s19 + $0xf98] sm:$0xff]  ;;  %v5485_v46 = vunpack.c.l.bf16 %v4302_v15  ;;  %v4342_v48 = vld [vmem:[%s12579_s19 + $0xf0c] sm:$0xff] }
 0x667   :  { %7220 = vmatpush2.msra.mxu1 %v5198_v40  ;;  %7259 = vmatpush1.msra.mxu0 %v5310_v20  ;;  %v5598_v40 = vunpack.c.h.bf16 %v4366_v14  ;;  %v5597_v20 = vunpack.c.l.bf16 %v4366_v14  ;;  %v4274_v15 = vld [vmem:[%s12579_s19 + $0xd30] sm:$0xff]  ;;  %v5556_v14 = vunpack.c.h.bf16 %v4342_v48 }
 0x668   :  { %7221 = vmatprep.subr.mxu1 %v5192_v23  ;;  %7260 = vmatprep.subr.mxu0 %v5304_v19  ;;  %v5479_v23 = vunpack.c.h.bf16 %v4298_v53  ;;  %v5591_v19 = vunpack.c.h.bf16 %v4362_v18 }
 0x669   :  { %7222 = vmatpush2.msra.mxu1 %v5191_v26  ;;  %7261 = vmatpush1.msra.mxu0 %v5303_v8  ;;  %v5478_v26 = vunpack.c.l.bf16 %v4298_v53  ;;  %v5590_v8 = vunpack.c.l.bf16 %v4362_v18  ;;  %v4334_v53 = vld [vmem:[%s12579_s19 + $0xed4] sm:$0xff]  ;;  %v5437_v18 = vunpack.c.h.bf16 %v4274_v15 }
 0x66a   :  { %7223 = vmatprep.subr.mxu1 %v5185_v30  ;;  %7262 = vmatprep.subr.mxu0 %v5297_v62  ;;  %v5472_v30 = vunpack.c.h.bf16 %v4294_v58  ;;  %v5584_v62 = vunpack.c.h.bf16 %v4358_v22 }
 0x66b   :  { %7224 = vmatpush2.msra.mxu1 %v5184_v51  ;;  %7263 = vmatpush1.msra.mxu0 %v5296_v1  ;;  %v5471_v51 = vunpack.c.l.bf16 %v4294_v58  ;;  %v5583_v1 = vunpack.c.l.bf16 %v4358_v22  ;;  %v4266_v58 = vld [vmem:[%s12579_s19 + $0xcf8] sm:$0xff] }
 0x66c   :  { %7225 = vmatprep.subr.mxu1 %v5178_v0  ;;  %7264 = vmatprep.subr.mxu0 %v5290_v44  ;;  %v5465_v0 = vunpack.c.h.bf16 %v4290_v7  ;;  %v5577_v44 = vunpack.c.h.bf16 %v4354_v28  ;;  %v4330_v22 = vld [vmem:[%s12579_s19 + $0xeb8] sm:$0xff] }
 0x66d   :  { %7226 = vmatpush2.msra.mxu1 %v5177_v60  ;;  %7265 = vmatpush1.msra.mxu0 %v5289_v6  ;;  %v5464_v60 = vunpack.c.l.bf16 %v4290_v7  ;;  %v5576_v6 = vunpack.c.l.bf16 %v4354_v28  ;;  %v4262_v7 = vld [vmem:[%s12579_s19 + $0xcdc] sm:$0xff] }
 0x66e   :  { %7227 = vmatprep.subr.mxu1 %v5171_v59  ;;  %7266 = vmatprep.subr.mxu0 %v5283_v49  ;;  %v5458_v59 = vunpack.c.h.bf16 %v4286_v5  ;;  %v5570_v49 = vunpack.c.h.bf16 %v4350_v33  ;;  %v4326_v28 = vld [vmem:[%s12579_s19 + $0xe9c] sm:$0xff] }
 0x66f   :  { %7228 = vmatpush2.msra.mxu1 %v5170_v54  ;;  %7267 = vmatpush1.msra.mxu0 %v5282_v56  ;;  %v5457_v54 = vunpack.c.l.bf16 %v4286_v5  ;;  %v5569_v56 = vunpack.c.l.bf16 %v4350_v33  ;;  %v4258_v5 = vld [vmem:[%s12579_s19 + $0xcc0] sm:$0xff] }
 0x670   :  { %7229 = vmatprep.subr.mxu1 %v5164_v61  ;;  %7268 = vmatprep.subr.mxu0 %v5276_v12  ;;  %v5451_v61 = vunpack.c.h.bf16 %v4282_v36  ;;  %v5563_v12 = vunpack.c.h.bf16 %v4346_v47  ;;  %v4322_v33 = vld [vmem:[%s12579_s19 + $0xe80] sm:$0xff] }
 0x671   :  { %7230 = vmatpush2.msra.mxu1 %v5163_v63  ;;  %7269 = vmatpush1.msra.mxu0 %v5275_v32  ;;  %v5450_v63 = vunpack.c.l.bf16 %v4282_v36  ;;  %v5562_v32 = vunpack.c.l.bf16 %v4346_v47  ;;  %v4254_v36 = vld [vmem:[%s12579_s19 + $0xca4] sm:$0xff] }
 0x672   :  { %7231 = vmatprep.subr.mxu1 %v5157_v16  ;;  %7270 = vmatprep.subr.mxu0 %v5269_v2  ;;  %v4338_v16 = vld [vmem:[%s12579_s19 + $0xef0] sm:$0xff]  ;;  %v5444_v2 = vunpack.c.h.bf16 %v4278_v29  ;;  %v4318_v47 = vld [vmem:[%s12579_s19 + $0xe64] sm:$0xff] }
 0x673   :  { %7232 = vmatpush2.msra.mxu1 %v5156_v4  ;;  %7271 = vmatpush1.msra.mxu0 %v5268_v17  ;;  %v5443_v4 = vunpack.c.l.bf16 %v4278_v29  ;;  %v5555_v17 = vunpack.c.l.bf16 %v4342_v48  ;;  %v4250_v29 = vld [vmem:[%s12579_s19 + $0xc88] sm:$0xff] }
 0x674   :  { %7234 = vmatmul.mubr.f32.vlgmr.msra.gmra.mxu1 %v10696_v9  ;;  %7272 = vmatprep.subr.mxu0 %v5486_v13  ;;  %v4270_v13 = vld [vmem:[%s12579_s19 + $0xd14] sm:$0xff]  ;;  %v4314_v48 = vld [vmem:[%s12579_s19 + $0xe48] sm:$0xff] }
 0x675   :  { %7311 = vmatprep.subr.mxu1 %v5598_v40  ;;  %7273 = vmatpush2.msra.mxu0 %v5485_v46  ;;  %v5549_v46 = vunpack.c.h.bf16 %v4338_v16  ;;  %v5436_v40 = vunpack.c.l.bf16 %v4274_v15  ;;  %v4246_v15 = vld [vmem:[%s12579_s19 + $0xc6c] sm:$0xff] }
 0x676   :  { %7312 = vmatpush1.msra.mxu1 %v5597_v20  ;;  %7375 = vmatprep.mubr.f32.mxu1 %v10710_v38  ;;  %v5548_v20 = vunpack.c.l.bf16 %v4338_v16  ;;  %v4310_v16 = vld [vmem:[%s12579_s19 + $0xe2c] sm:$0xff] }
 0x677   :  { %7274 = vmatprep.subr.mxu0 %v5479_v23  ;;  %7313 = vmatprep.subr.mxu1 %v5591_v19  ;;  %v5430_v23 = vunpack.c.h.bf16 %v4270_v13  ;;  %v5542_v19 = vunpack.c.h.bf16 %v4334_v53 }
 0x678   :  { %7275 = vmatpush2.msra.mxu0 %v5478_v26  ;;  %7314 = vmatpush1.msra.mxu1 %v5590_v8  ;;  %v5429_v26 = vunpack.c.l.bf16 %v4270_v13  ;;  %v5541_v8 = vunpack.c.l.bf16 %v4334_v53  ;;  %v4242_v13 = vld [vmem:[%s12579_s19 + $0xc50] sm:$0xff] }
 0x679   :  { %7276 = vmatprep.subr.mxu0 %v5472_v30  ;;  %7315 = vmatprep.subr.mxu1 %v5584_v62  ;;  %v5423_v30 = vunpack.c.h.bf16 %v4266_v58  ;;  %v5535_v62 = vunpack.c.h.bf16 %v4330_v22  ;;  %v4306_v53 = vld [vmem:[%s12579_s19 + $0xe10] sm:$0xff] }
 0x67a   :  { %7277 = vmatpush2.msra.mxu0 %v5471_v51  ;;  %7316 = vmatpush1.msra.mxu1 %v5583_v1  ;;  %v5422_v51 = vunpack.c.l.bf16 %v4266_v58  ;;  %v5534_v1 = vunpack.c.l.bf16 %v4330_v22  ;;  %v4430_v58 = vld [vmem:[%s12579_s19 + $0x1174] sm:$0xff]  ;;  %v5381_v22 = vunpack.c.h.bf16 %v4242_v13 }
 0x67b   :  { %7278 = vmatprep.subr.mxu0 %v5465_v0  ;;  %7317 = vmatprep.subr.mxu1 %v5577_v44  ;;  %v5416_v0 = vunpack.c.h.bf16 %v4262_v7  ;;  %v5528_v44 = vunpack.c.h.bf16 %v4326_v28 }
 0x67c   :  { %7279 = vmatpush2.msra.mxu0 %v5464_v60  ;;  %7318 = vmatpush1.msra.mxu1 %v5576_v6  ;;  %v5415_v60 = vunpack.c.l.bf16 %v4262_v7  ;;  %v5527_v6 = vunpack.c.l.bf16 %v4326_v28  ;;  %v5710_v7 = vunpack.c.h.bf16 %v4430_v58  ;;  %v4426_v28 = vld [vmem:[%s12579_s19 + $0x1158] sm:$0xff] }
 0x67d   :  { %7280 = vmatprep.subr.mxu0 %v5458_v59  ;;  %7319 = vmatprep.subr.mxu1 %v5570_v49  ;;  %v5409_v59 = vunpack.c.h.bf16 %v4258_v5  ;;  %v5521_v49 = vunpack.c.h.bf16 %v4322_v33 }
 0x67e   :  { %7281 = vmatpush2.msra.mxu0 %v5457_v54  ;;  %7320 = vmatpush1.msra.mxu1 %v5569_v56  ;;  %v5408_v54 = vunpack.c.l.bf16 %v4258_v5  ;;  %v5520_v56 = vunpack.c.l.bf16 %v4322_v33  ;;  %v4422_v5 = vld [vmem:[%s12579_s19 + $0x113c] sm:$0xff] }
 0x67f   :  { %7282 = vmatprep.subr.mxu0 %v5451_v61  ;;  %7321 = vmatprep.subr.mxu1 %v5563_v12  ;;  %v5402_v61 = vunpack.c.h.bf16 %v4254_v36  ;;  %v5514_v12 = vunpack.c.h.bf16 %v4318_v47  ;;  %v4486_v33 = vld [vmem:[%s12579_s19 + $0x12fc] sm:$0xff] }
 0x680   :  { %7283 = vmatpush2.msra.mxu0 %v5450_v63  ;;  %7322 = vmatpush1.msra.mxu1 %v5562_v32  ;;  %v5401_v63 = vunpack.c.l.bf16 %v4254_v36  ;;  %v5513_v32 = vunpack.c.l.bf16 %v4318_v47  ;;  %v4418_v36 = vld [vmem:[%s12579_s19 + $0x1120] sm:$0xff] }
 0x681   :  { %7284 = vmatprep.subr.mxu0 %v5444_v2  ;;  %7323 = vmatprep.subr.mxu1 %v5556_v14  ;;  %v5395_v2 = vunpack.c.h.bf16 %v4250_v29  ;;  %v5507_v14 = vunpack.c.h.bf16 %v4314_v48  ;;  %v4482_v47 = vld [vmem:[%s12579_s19 + $0x12e0] sm:$0xff] }
 0x682   :  { %7285 = vmatpush2.msra.mxu0 %v5443_v4  ;;  %7324 = vmatpush1.msra.mxu1 %v5555_v17  ;;  %v5394_v4 = vunpack.c.l.bf16 %v4250_v29  ;;  %v5506_v17 = vunpack.c.l.bf16 %v4314_v48  ;;  %v4414_v29 = vld [vmem:[%s12579_s19 + $0x1104] sm:$0xff] }
 0x683   :  { %7286 = vmatprep.subr.mxu0 %v5437_v18  ;;  %7325 = vmatprep.subr.mxu1 %v5549_v46  ;;  %v5388_v18 = vunpack.c.h.bf16 %v4246_v15  ;;  %v5500_v46 = vunpack.c.h.bf16 %v4310_v16  ;;  %v4478_v48 = vld [vmem:[%s12579_s19 + $0x12c4] sm:$0xff] }
 0x684   :  { %7287 = vmatpush2.msra.mxu0 %v5436_v40  ;;  %7326 = vmatpush1.msra.mxu1 %v5548_v20  ;;  %v5387_v40 = vunpack.c.l.bf16 %v4246_v15  ;;  %v5499_v20 = vunpack.c.l.bf16 %v4310_v16  ;;  %v4410_v15 = vld [vmem:[%s12579_s19 + $0x10e8] sm:$0xff] }
 0x685   :  { %7288 = vmatprep.subr.mxu0 %v5430_v23  ;;  %7327 = vmatprep.subr.mxu1 %v5542_v19  ;;  %v5493_v23 = vunpack.c.h.bf16 %v4306_v53  ;;  %v4494_v19 = vld [vmem:[%s12579_s19 + $0x1334] sm:$0xff]  ;;  %v4474_v16 = vld [vmem:[%s12579_s19 + $0x12a8] sm:$0xff] }
 0x686   :  { %7289 = vmatpush2.msra.mxu0 %v5429_v26  ;;  %7328 = vmatpush1.msra.mxu1 %v5541_v8  ;;  %v5380_v26 = vunpack.c.l.bf16 %v4242_v13  ;;  %v5492_v8 = vunpack.c.l.bf16 %v4306_v53  ;;  %v4406_v13 = vld [vmem:[%s12579_s19 + $0x10cc] sm:$0xff] }
 0x687   :  { %7290 = vmatprep.subr.mxu0 %v5423_v30  ;;  %7329 = vmatprep.subr.mxu1 %v5535_v62  ;;  %v4490_v30 = vld [vmem:[%s12579_s19 + $0x1318] sm:$0xff]  ;;  %v5709_v62 = vunpack.c.l.bf16 %v4430_v58  ;;  %v4470_v53 = vld [vmem:[%s12579_s19 + $0x128c] sm:$0xff] }
 0x688   :  { %7291 = vmatpush2.msra.mxu0 %v5422_v51  ;;  %7330 = vmatpush1.msra.mxu1 %v5534_v1  ;;  %v5822_v51 = vunpack.c.h.bf16 %v4494_v19  ;;  %v5821_v1 = vunpack.c.l.bf16 %v4494_v19  ;;  %v4402_v58 = vld [vmem:[%s12579_s19 + $0x10b0] sm:$0xff]  ;;  %v5780_v19 = vunpack.c.h.bf16 %v4470_v53 }
 0x689   :  { %7292 = vmatprep.subr.mxu0 %v5416_v0  ;;  %7331 = vmatprep.subr.mxu1 %v5528_v44  ;;  %v5703_v0 = vunpack.c.h.bf16 %v4426_v28  ;;  %v5815_v44 = vunpack.c.h.bf16 %v4490_v30 }
 0x68a   :  { %7293 = vmatpush2.msra.mxu0 %v5415_v60  ;;  %7332 = vmatpush1.msra.mxu1 %v5527_v6  ;;  %v5702_v60 = vunpack.c.l.bf16 %v4426_v28  ;;  %v5814_v6 = vunpack.c.l.bf16 %v4490_v30  ;;  %v4462_v28 = vld [vmem:[%s12579_s19 + $0x1254] sm:$0xff]  ;;  %v5661_v30 = vunpack.c.h.bf16 %v4402_v58 }
 0x68b   :  { %7294 = vmatprep.subr.mxu0 %v5409_v59  ;;  %7333 = vmatprep.subr.mxu1 %v5521_v49  ;;  %v5696_v59 = vunpack.c.h.bf16 %v4422_v5  ;;  %v5808_v49 = vunpack.c.h.bf16 %v4486_v33 }
 0x68c   :  { %7295 = vmatpush2.msra.mxu0 %v5408_v54  ;;  %7334 = vmatpush1.msra.mxu1 %v5520_v56  ;;  %v5695_v54 = vunpack.c.l.bf16 %v4422_v5  ;;  %v5807_v56 = vunpack.c.l.bf16 %v4486_v33  ;;  %v4394_v5 = vld [vmem:[%s12579_s19 + $0x1078] sm:$0xff] }
 0x68d   :  { %7296 = vmatprep.subr.mxu0 %v5402_v61  ;;  %7335 = vmatprep.subr.mxu1 %v5514_v12  ;;  %v5689_v61 = vunpack.c.h.bf16 %v4418_v36  ;;  %v5801_v12 = vunpack.c.h.bf16 %v4482_v47  ;;  %v4458_v33 = vld [vmem:[%s12579_s19 + $0x1238] sm:$0xff] }
 0x68e   :  { %7297 = vmatpush2.msra.mxu0 %v5401_v63  ;;  %7336 = vmatpush1.msra.mxu1 %v5513_v32  ;;  %v5688_v63 = vunpack.c.l.bf16 %v4418_v36  ;;  %v5800_v32 = vunpack.c.l.bf16 %v4482_v47  ;;  %v5765_v36 = vunpack.c.l.bf16 %v4462_v28  ;;  %v4390_v47 = vld [vmem:[%s12579_s19 + $0x105c] sm:$0xff] }
 0x68f   :  { %7298 = vmatprep.subr.mxu0 %v5395_v2  ;;  %7337 = vmatprep.subr.mxu1 %v5507_v14  ;;  %v5682_v2 = vunpack.c.h.bf16 %v4414_v29  ;;  %v5794_v14 = vunpack.c.h.bf16 %v4478_v48 }
 0x690   :  { %7299 = vmatpush2.msra.mxu0 %v5394_v4  ;;  %7338 = vmatpush1.msra.mxu1 %v5506_v17  ;;  %v5681_v4 = vunpack.c.l.bf16 %v4414_v29  ;;  %v5793_v17 = vunpack.c.l.bf16 %v4478_v48  ;;  %v5758_v29 = vunpack.c.l.bf16 %v4458_v33  ;;  %v4386_v48 = vld [vmem:[%s12579_s19 + $0x1040] sm:$0xff] }
 0x691   :  { %7300 = vmatprep.subr.mxu0 %v5388_v18  ;;  %7339 = vmatprep.subr.mxu1 %v5500_v46  ;;  %v5675_v18 = vunpack.c.h.bf16 %v4410_v15  ;;  %v5787_v46 = vunpack.c.h.bf16 %v4474_v16 }
 0x692   :  { %7301 = vmatpush2.msra.mxu0 %v5387_v40  ;;  %7340 = vmatpush1.msra.mxu1 %v5499_v20  ;;  %v5674_v40 = vunpack.c.l.bf16 %v4410_v15  ;;  %v5786_v20 = vunpack.c.l.bf16 %v4474_v16  ;;  %v5639_v15 = vunpack.c.l.bf16 %v4390_v47 }
 0x693   :  { %7302 = vmatprep.subr.mxu0 %v5381_v22  ;;  %7341 = vmatprep.subr.mxu1 %v5493_v23  ;;  %v4466_v22 = vld [vmem:[%s12579_s19 + $0x1270] sm:$0xff]  ;;  %v5668_v23 = vunpack.c.h.bf16 %v4406_v13 }
 0x694   :  { %7303 = vmatpush2.msra.mxu0 %v5380_v26  ;;  %7342 = vmatpush1.msra.mxu1 %v5492_v8  ;;  %v5667_v26 = vunpack.c.l.bf16 %v4406_v13  ;;  %v5779_v8 = vunpack.c.l.bf16 %v4470_v53  ;;  %v5632_v53 = vunpack.c.l.bf16 %v4386_v48 }
 0x695   :  { %7305 = vmatmul.mubr.f32.vlgmr.msra.gmra.mxu0 %v10699_v50  ;;  %7343 = vmatprep.subr.mxu1 %v5710_v7  ;;  %v4398_v7 = vld [vmem:[%s12579_s19 + $0x1094] sm:$0xff] }
 0x696   :  { %7382 = vmatprep.subr.mxu0 %v5822_v51  ;;  %7344 = vmatpush2.msra.mxu1 %v5709_v62  ;;  %v5773_v62 = vunpack.c.h.bf16 %v4466_v22  ;;  %v5660_v51 = vunpack.c.l.bf16 %v4402_v58 }
 0x697   :  { %7383 = vmatpush1.msra.mxu0 %v5821_v1  ;;  %7446 = vmatprep.mubr.f32.mxu0 %v10713_v11  ;;  %v5772_v1 = vunpack.c.l.bf16 %v4466_v22 }
 0x698   :  { %7345 = vmatprep.subr.mxu1 %v5703_v0  ;;  %7384 = vmatprep.subr.mxu0 %v5815_v44  ;;  %v5654_v0 = vunpack.c.h.bf16 %v4398_v7  ;;  %v5766_v44 = vunpack.c.h.bf16 %v4462_v28 }
 0x699   :  { %7346 = vmatpush2.msra.mxu1 %v5702_v60  ;;  %7385 = vmatpush1.msra.mxu0 %v5814_v6  ;;  %v12046_v60 = vpop.f32.mrf.mxu0  ;;  %v5653_v6 = vunpack.c.l.bf16 %v4398_v7 }
 0x69a   :  { %7347 = vmatprep.subr.mxu1 %v5696_v59  ;;  %7386 = vmatprep.subr.mxu0 %v5808_v49  ;;  %v4454_v59 = vld [vmem:[%s12579_s19 + $0x121c] sm:$0xff]  ;;  %v5647_v49 = vunpack.c.h.bf16 %v4394_v5 }
 0x69b   :  { %7348 = vmatpush2.msra.mxu1 %v5695_v54  ;;  %7387 = vmatpush1.msra.mxu0 %v5807_v56  ;;  %v5759_v54 = vunpack.c.h.bf16 %v4458_v33  ;;  %v5646_v56 = vunpack.c.l.bf16 %v4394_v5  ;;  %v5751_v16 = vunpack.c.l.bf16 %v4454_v59 }
 0x69c   :  { %7349 = vmatprep.subr.mxu1 %v5689_v61  ;;  %7388 = vmatprep.subr.mxu0 %v5801_v12  ;;  %v4450_v61 = vld [vmem:[%s12579_s19 + $0x1200] sm:$0xff]  ;;  %v5640_v12 = vunpack.c.h.bf16 %v4390_v47  ;;  %v4558_v47 = vld [vmem:[%s12579_s19 + $0x14f4] sm:$0xff] }
 0x69d   :  { %7350 = vmatpush2.msra.mxu1 %v5688_v63  ;;  %7389 = vmatpush1.msra.mxu0 %v5800_v32  ;;  %v5752_v63 = vunpack.c.h.bf16 %v4454_v59  ;;  %v12060_v32 = vpop.f32.mrf.mxu0 }
 0x69e   :  { %7351 = vmatprep.subr.mxu1 %v5682_v2  ;;  %7390 = vmatprep.subr.mxu0 %v5794_v14  ;;  %v4382_v2 = vld [vmem:[%s12579_s19 + $0x1024] sm:$0xff] }
 0x69f   :  { %7352 = vmatpush2.msra.mxu1 %v5681_v4  ;;  %7391 = vmatpush1.msra.mxu0 %v5793_v17  ;;  %v4446_v14 = vld [vmem:[%s12579_s19 + $0x11e4] sm:$0xff]  ;;  %v5633_v4 = vunpack.c.h.bf16 %v4386_v48  ;;  %v5745_v17 = vunpack.c.h.bf16 %v4450_v61  ;;  %v12068_v13 = vpop.f32.mrf.mxu0  ;;  %v5625_v22 = vunpack.c.l.bf16 %v4382_v2  ;;  %v4554_v48 = vld [vmem:[%s12579_s19 + $0x14d8] sm:$0xff] }
 0x6a0   :  { %7353 = vmatprep.subr.mxu1 %v5675_v18  ;;  %7392 = vmatprep.subr.mxu0 %v5787_v46  ;;  %v5744_v18 = vunpack.c.l.bf16 %v4450_v61  ;;  %v4378_v46 = vld [vmem:[%s12579_s19 + $0x1008] sm:$0xff]  ;;  %v5738_v58 = vunpack.c.h.bf16 %v4446_v14  ;;  %v5934_v61 = vunpack.c.h.bf16 %v4558_v47 }
 0x6a1   :  { %7354 = vmatpush2.msra.mxu1 %v5674_v40  ;;  %7393 = vmatpush1.msra.mxu0 %v5786_v20  ;;  %v4442_v40 = vld [vmem:[%s12579_s19 + $0x11c8] sm:$0xff]  ;;  %v5626_v20 = vunpack.c.h.bf16 %v4382_v2  ;;  %v12082_v28 = vpop.f32.mrf.mxu0 }
 0x6a2   :  { %7355 = vmatprep.subr.mxu1 %v5668_v23  ;;  %7394 = vmatprep.subr.mxu0 %v5780_v19  ;;  %v5737_v23 = vunpack.c.l.bf16 %v4446_v14  ;;  %v4374_v19 = vld [vmem:[%s12579_s19 + $0xfec] sm:$0xff]  ;;  %v5731_v7 = vunpack.c.h.bf16 %v4442_v40  ;;  %v4550_v14 = vld [vmem:[%s12579_s19 + $0x14bc] sm:$0xff] }
 0x6a3   :  { %7356 = vmatpush2.msra.mxu1 %v5667_v26  ;;  %7395 = vmatpush1.msra.mxu0 %v5779_v8  ;;  %v4438_v26 = vld [vmem:[%s12579_s19 + $0x11ac] sm:$0xff]  ;;  %v5619_v8 = vunpack.c.h.bf16 %v4378_v46  ;;  %v5612_v5 = vunpack.c.h.bf16 %v4374_v19 }
 0x6a4   :  { %7357 = vmatprep.subr.mxu1 %v5661_v30  ;;  %7396 = vmatprep.subr.mxu0 %v5773_v62  ;;  %v5618_v30 = vunpack.c.l.bf16 %v4378_v46  ;;  %v5730_v62 = vunpack.c.l.bf16 %v4442_v40  ;;  %v5724_v33 = vunpack.c.h.bf16 %v4438_v26  ;;  %v5926_v40 = vunpack.c.l.bf16 %v4554_v48 }
 0x6a5   :  { %7358 = vmatpush2.msra.mxu1 %v5660_v51  ;;  %7397 = vmatpush1.msra.mxu0 %v5772_v1  ;;  %v4370_v51 = vld [vmem:[%s12579_s19 + $0xfd0] sm:$0xff] }
 0x6a6   :  { %7359 = vmatprep.subr.mxu1 %v5654_v0  ;;  %7398 = vmatprep.subr.mxu0 %v5766_v44  ;;  %v4434_v1 = vld [vmem:[%s12579_s19 + $0x1190] sm:$0xff]  ;;  %v12090_v0 = vpop.f32.mrf.mxu1  ;;  %v12092_v44 = vpop.f32.mrf.mxu0  ;;  %v5605_v59 = vunpack.c.h.bf16 %v4370_v51 }
 0x6a7   :  { %7360 = vmatpush2.msra.mxu1 %v5653_v6  ;;  %7399 = vmatpush1.msra.mxu0 %v5765_v36  ;;  %v5611_v6 = vunpack.c.l.bf16 %v4374_v19  ;;  %v5723_v36 = vunpack.c.l.bf16 %v4438_v26  ;;  %v5920_v19 = vunpack.c.h.bf16 %v4550_v14  ;;  %v4578_v26 = vld [vmem:[%s12579_s19 + $0x1580] sm:$0xff] }
 0x6a8   :  { %7361 = vmatprep.subr.mxu1 %v5647_v49  ;;  %7400 = vmatprep.subr.mxu0 %v5759_v54  ;;  %v5717_v49 = vunpack.c.h.bf16 %v4434_v1  ;;  %v4590_v54 = vld [vmem:[%s12579_s19 + $0x15d4] sm:$0xff] }
 0x6a9   :  { %7362 = vmatpush2.msra.mxu1 %v5646_v56  ;;  %7401 = vmatpush1.msra.mxu0 %v5758_v29  ;;  %v5604_v56 = vunpack.c.l.bf16 %v4370_v51  ;;  %v5716_v29 = vunpack.c.l.bf16 %v4434_v1  ;;  %v5990_v2 = vunpack.c.h.bf16 %v4590_v54 }
 0x6aa   :  { %7363 = vmatprep.subr.mxu1 %v5640_v12  ;;  %7402 = vmatprep.subr.mxu0 %v5752_v63  ;;  %v4586_v12 = vld [vmem:[%s12579_s19 + $0x15b8] sm:$0xff]  ;;  %v12106_v63 = vpop.f32.mrf.mxu1 }
 0x6ab   :  { %7364 = vmatpush2.msra.mxu1 %v5639_v15  ;;  %7403 = vmatpush1.msra.mxu0 %v5751_v16  ;;  %v12108_v15 = vpop.f32.mrf.mxu0  ;;  %v5933_v16 = vunpack.c.l.bf16 %v4558_v47  ;;  %v4538_v47 = vld [vmem:[%s12579_s19 + $0x1468] sm:$0xff] }
 0x6ac   :  { %7365 = vmatprep.subr.mxu1 %v5633_v4  ;;  %7404 = vmatprep.subr.mxu0 %v5745_v17  ;;  %v5989_v4 = vunpack.c.l.bf16 %v4590_v54  ;;  %v5927_v17 = vunpack.c.h.bf16 %v4554_v48 }
 0x6ad   :  { %7366 = vmatpush2.msra.mxu1 %v5632_v53  ;;  %7405 = vmatpush1.msra.mxu0 %v5744_v18  ;;  %v4582_v53 = vld [vmem:[%s12579_s19 + $0x159c] sm:$0xff]  ;;  %v12116_v18 = vpop.f32.mrf.mxu1  ;;  %v12118_v46 = vpop.f32.mrf.mxu0 }
 0x6ae   :  { %7367 = vmatprep.subr.mxu1 %v5626_v20  ;;  %7406 = vmatprep.subr.mxu0 %v5738_v58  ;;  %v5983_v20 = vunpack.c.h.bf16 %v4586_v12  ;;  %v4546_v58 = vld [vmem:[%s12579_s19 + $0x14a0] sm:$0xff]  ;;  %v5975_v51 = vunpack.c.l.bf16 %v4582_v53 }
 0x6af   :  { %7368 = vmatpush2.msra.mxu1 %v5625_v22  ;;  %7407 = vmatpush1.msra.mxu0 %v5737_v23  ;;  %v12126_v22 = vld [vmem:[%s12583_s20] sm:$0x7f]  ;;  %v5982_v23 = vunpack.c.l.bf16 %v4586_v12  ;;  %v5913_v1 = vunpack.c.h.bf16 %v4546_v58 }
 0x6b0   :  { %7369 = vmatprep.subr.mxu1 %v5619_v8  ;;  %7408 = vmatprep.subr.mxu0 %v5731_v7  ;;  %v6001_v8 = vrot.slane %v12126_v22, %v8829_v39  ;;  %v5919_v7 = vunpack.c.l.bf16 %v4550_v14  ;;  %v5912_v39 = vunpack.c.l.bf16 %v4546_v58 }
 0x6b1   :  { %7370 = vmatpush2.msra.mxu1 %v5618_v30  ;;  %7409 = vmatpush1.msra.mxu0 %v5730_v62  ;;  %v5976_v30 = vunpack.c.h.bf16 %v4582_v53  ;;  %v4542_v62 = vld [vmem:[%s12579_s19 + $0x1484] sm:$0xff] }
 0x6b2   :  { %7371 = vmatprep.subr.mxu1 %v5612_v5  ;;  %7410 = vmatprep.subr.mxu0 %v5724_v33  ;;  %v4574_v5 = vld [vmem:[%s12579_s19 + $0x1564] sm:$0xff]  ;;  %v12140_v33 = vpop.f32.mrf.mxu1  ;;  %v5906_v54 = vunpack.c.h.bf16 %v4542_v62  ;;  %v5905_v12 = vunpack.c.l.bf16 %v4542_v62 }
 0x6b3   :  { %7372 = vmatpush2.msra.mxu1 %v5611_v6  ;;  %7411 = vmatpush1.msra.mxu0 %v5723_v36  ;;  %v12142_v6 = vpop.f32.mrf.mxu0  ;;  %v5969_v36 = vunpack.c.h.bf16 %v4578_v26  ;;  %v5961_v14 = vunpack.c.l.bf16 %v4574_v5 }
 0x6b4   :  { %7373 = vmatprep.subr.mxu1 %v5605_v59  ;;  %7412 = vmatprep.subr.mxu0 %v5717_v49  ;;  %v5997_v59 = vrot.slane %v12126_v22, %v8823_v34  ;;  %v5968_v49 = vunpack.c.l.bf16 %v4578_v26  ;;  %v12153_v48 = vpop.f32.mrf.mxu1  ;;  %v4534_v34 = vld [vmem:[%s12579_s19 + $0x144c] sm:$0xff] }
 0x6b5   :  { %7374 = vmatpush2.msra.mxu1 %v5604_v56  ;;  %7413 = vmatpush1.msra.mxu0 %v5716_v29  ;;  %v4570_v56 = vld [vmem:[%s12579_s19 + $0x1548] sm:$0xff]  ;;  %v6102_v29 = vadd.f32 %v12060_v32, %v6001_v8 }
 0x6b6   :  { %7376 = vmatmul.mubr.f32.vlgmr.msra.gmra.mxu1 %v10904_v24  ;;  %7414 = vmatprep.subr.mxu0 %v5934_v61  ;;  %v6596_v61 = vpop.f32.mrf.mxu0  ;;  %v4566_v32 = vld [vmem:[%s12579_s19 + $0x152c] sm:$0xff]  ;;  %v5955_v53 = vunpack.c.h.bf16 %v4570_v56  ;;  %v5954_v58 = vunpack.c.l.bf16 %v4570_v56  ;;  %v12173_v8 = vpop.f32.mrf.mxu1 }
 0x6b7   :  { %7469 = vmatprep.subr.mxu1 %v5990_v2  ;;  %7415 = vmatpush2.msra.mxu0 %v5933_v16  ;;  %v5962_v16 = vunpack.c.h.bf16 %v4574_v5  ;;  %v6005_v2 = vrot.slane %v12126_v22, %v8834_v52  ;;  %v6009_v52 = vrot.slane %v12126_v22, %v8837_v55  ;;  %v6173_v26 = vadd.f32 %v12106_v63, %v6102_v29  ;;  %v4522_v29 = vld [vmem:[%s12579_s19 + $0x13f8] sm:$0xff] }
 0x6b8   :  { %7470 = vmatpush1.msra.mxu1 %v5989_v4  ;;  %7416 = vmatprep.subr.mxu0 %v5927_v17  ;;  %v5899_v4 = vunpack.c.h.bf16 %v4538_v47  ;;  %v5898_v17 = vunpack.c.l.bf16 %v4538_v47  ;;  %v5947_v55 = vunpack.c.l.bf16 %v4566_v32  ;;  %v6667_v5 = vpop.f32.mrf.mxu1  ;;  %v4047_v47 = vld [vmem:[%s12579_s19 + $0x6e0] ss:$28 sps:$4 sm:$0xff]  }
 0x6b9   :  { %7471 = vmatprep.subr.mxu1 %v5983_v20  ;;  %7417 = vmatpush2.msra.mxu0 %v5926_v40  ;;  %v4530_v40 = vld [vmem:[%s12579_s19 + $0x1430] sm:$0xff]  ;;  %v6100_v20 = vadd.f32 %v12046_v60, %v5997_v59  ;;  %v5948_v60 = vunpack.c.h.bf16 %v4566_v32  ;;  %v6597_v62 = vadd.f32 %v6596_v61, %v6005_v2  ;;  %v4518_v32 = vld [vmem:[%s12579_s19 + $0x13dc] sm:$0xff] }
 0x6ba   :  { %7472 = vmatpush1.msra.mxu1 %v5982_v23  ;;  %7418 = vmatprep.subr.mxu0 %v5920_v19  ;;  %v5892_v23 = vunpack.c.h.bf16 %v4534_v34  ;;  %v4562_v19 = vld [vmem:[%s12579_s19 + $0x1510] sm:$0xff]  ;;  %v5885_v22 = vunpack.c.h.bf16 %v4530_v40  ;;  %v6669_v2 = vpop.f32.mrf.mxu1 }
 0x6bb   :  { %7473 = vmatprep.subr.mxu1 %v5976_v30  ;;  %7419 = vmatpush2.msra.mxu0 %v5919_v7  ;;  %v6598_v7 = vpop.f32.mrf.mxu0  ;;  %v5891_v30 = vunpack.c.l.bf16 %v4534_v34  ;;  %v6171_v59 = vadd.f32 %v12090_v0, %v6100_v20  ;;  %v3975_v20 = vld [vmem:[%s12579_s19 + $0x4e8] ss:$28 sps:$4 sm:$0xff]  }
 0x6bc   :  { %7474 = vmatpush1.msra.mxu1 %v5975_v51  ;;  %7420 = vmatprep.subr.mxu0 %v5913_v1  ;;  %v4526_v51 = vld [vmem:[%s12579_s19 + $0x1414] sm:$0xff]  ;;  %v6244_v1 = vadd.f32 %v12082_v28, %v6173_v26  ;;  %v3983_v28 = vld [vmem:[%s12579_s19 + $0x520] ss:$28 sps:$4 sm:$0xff]  }
 0x6bd   :  { %7475 = vmatprep.subr.mxu1 %v5969_v36  ;;  %7421 = vmatpush2.msra.mxu0 %v5912_v39  ;;  %v6738_v63 = vpop.f32.mrf.mxu0  ;;  %v5884_v39 = vunpack.c.l.bf16 %v4530_v40  ;;  %v5941_v36 = vunpack.c.h.bf16 %v4562_v19  ;;  %v5878_v56 = vunpack.c.h.bf16 %v4526_v51  ;;  %v6242_v61 = vadd.f32 %v12068_v13, %v6171_v59  ;;  %v4039_v13 = vld [vmem:[%s12579_s19 + $0x6a8] ss:$28 sps:$4 sm:$0xff]  }
 0x6be   :  { %7476 = vmatpush1.msra.mxu1 %v5968_v49  ;;  %7422 = vmatprep.subr.mxu0 %v5906_v54  ;;  %v6599_v49 = vadd.f32 %v6598_v7, %v6009_v52  ;;  %v5940_v54 = vunpack.c.l.bf16 %v4562_v19  ;;  %v5877_v0 = vunpack.c.l.bf16 %v4526_v51  ;;  %v6315_v34 = vadd.f32 %v12140_v33, %v6244_v1  ;;  %v4514_v7 = vld [vmem:[%s12579_s19 + $0x13c0] sm:$0xff]  ;;  %v4031_v1 = vld [vmem:[%s12579_s19 + $0x670] ss:$28 sps:$4 sm:$0xff]  }
 0x6bf   :  { %7477 = vmatprep.subr.mxu1 %v5962_v16  ;;  %7423 = vmatpush2.msra.mxu0 %v5905_v12  ;;  %v6668_v12 = vadd.f32 %v6667_v5, %v6597_v62  ;;  %v5039_v16 = vunpack.c.h.bf16 %v4047_v47  ;;  %v5871_v40 = vunpack.c.h.bf16 %v4522_v29  ;;  %v5032_v33 = vunpack.c.l.bf16 %v4047_v47  ;;  %v4510_v51 = vld [vmem:[%s12579_s19 + $0x13a4] sm:$0xff] }
 0x6c0   :  { %7478 = vmatpush1.msra.mxu1 %v5961_v14  ;;  %7424 = vmatprep.subr.mxu0 %v5899_v4  ;;  %v6740_v14 = vpop.f32.mrf.mxu0  ;;  %v4927_v4 = vunpack.c.h.bf16 %v3983_v28  ;;  %v6386_v52 = vadd.f32 %v12108_v15, %v6315_v34  ;;  %v5870_v19 = vunpack.c.l.bf16 %v4522_v29  ;;  %v4920_v26 = vunpack.c.l.bf16 %v3983_v28  ;;  %v4502_v34 = vld [vmem:[%s12579_s19 + $0x136c] sm:$0xff] }
 0x6c1   :  { %7479 = vmatprep.subr.mxu1 %v5955_v53  ;;  %7425 = vmatpush2.msra.mxu0 %v5898_v17  ;;  %v6739_v17 = vadd.f32 %v6738_v63, %v6668_v12  ;;  %v6670_v53 = vadd.f32 %v6669_v2, %v6599_v49  ;;  %v5864_v62 = vunpack.c.h.bf16 %v4518_v32  ;;  %v5863_v15 = vunpack.c.l.bf16 %v4518_v32  ;;  %v4023_v2 = vld [vmem:[%s12579_s19 + $0x638] ss:$28 sps:$4 sm:$0xff]  }
 0x6c2   :  { %7480 = vmatpush1.msra.mxu1 %v5954_v58  ;;  %7426 = vmatprep.subr.mxu0 %v5892_v23  ;;  %v6809_v58 = vpop.f32.mrf.mxu1  ;;  %v6880_v23 = vpop.f32.mrf.mxu0  ;;  %v5857_v63 = vunpack.c.h.bf16 %v4514_v7  ;;  %v5856_v49 = vunpack.c.l.bf16 %v4514_v7  ;;  %v5850_v29 = vunpack.c.h.bf16 %v4510_v51  ;;  %v3919_v7 = vld [vmem:[%s12579_s19 + $0x37c] sm:$0xf] }
 0x6c3   :  { %7481 = vmatprep.subr.mxu1 %v5948_v60  ;;  %7427 = vmatpush2.msra.mxu0 %v5891_v30  ;;  %v6313_v30 = vadd.f32 %v12116_v18, %v6242_v61  ;;  %v6741_v60 = vadd.f32 %v6740_v14, %v6670_v53  ;;  %v6810_v5 = vadd.f32 %v6809_v58, %v6739_v17  ;;  %v5011_v61 = vunpack.c.h.bf16 %v4031_v1 }
 0x6c4   :  { %7482 = vmatpush1.msra.mxu1 %v5947_v55  ;;  %7428 = vmatprep.subr.mxu0 %v5885_v22  ;;  %v5025_v55 = vunpack.c.h.bf16 %v4039_v13  ;;  %v4913_v22 = vunpack.c.h.bf16 %v3975_v20  ;;  %v6811_v47 = vpop.f32.mrf.mxu1  ;;  %v6882_v59 = vpop.f32.mrf.mxu0 }
 0x6c5   :  { %7483 = vmatprep.subr.mxu1 %v5941_v36  ;;  %7429 = vmatpush2.msra.mxu0 %v5884_v39  ;;  %v6384_v18 = vadd.f32 %v12092_v44, %v6313_v30  ;;  %v5018_v39 = vunpack.c.l.bf16 %v4039_v13  ;;  %v6457_v36 = vadd.f32 %v12173_v8, %v6386_v52  ;;  %v4506_v44 = vld [vmem:[%s12579_s19 + $0x1388] sm:$0xff]  ;;  %v6881_v28 = vadd.f32 %v6880_v23, %v6810_v5  ;;  %v3959_v13 = vld [vmem:[%s12579_s19 + $0x478] ss:$28 sps:$4 sm:$0xff]  }
 0x6c6   :  { %7484 = vmatpush1.msra.mxu1 %v5940_v54  ;;  %7517 = vmatprep.mubr.f32.mxu1 %v8399_v3  ;;  %v4906_v54 = vunpack.c.l.bf16 %v3975_v20  ;;  %v5849_v8 = vunpack.c.l.bf16 %v4510_v51  ;;  %v5843_v32 = vunpack.c.h.bf16 %v4506_v44  ;;  %v5842_v17 = vunpack.c.l.bf16 %v4506_v44 }
 0x6c7   :  { %7430 = vmatprep.subr.mxu0 %v5878_v56  ;;  %8102 = vmatmul.mubr.msk.f32.vlgmr.msra.gmra.mxu1 %vm6029_vm8, %v10961_v57  ;;  %v6812_v56 = vadd.f32 %v6811_v47, %v6741_v60  ;;  %v6528_v12 = vadd.f32 %v12142_v6, %v6457_v36  ;;  %v6455_v14 = vadd.f32 %v12153_v48, %v6384_v18  ;;  %v5004_v6 = vunpack.c.l.bf16 %v4031_v1  ;;  %v3951_v1 = vld [vmem:[%s12579_s19 + $0x45c] sm:$0xf] }
 0x6c8   :  { %8174 = vmatprep.subr.mxu1 %v5039_v16  ;;  %7431 = vmatpush2.msra.mxu0 %v5877_v0  ;;  %v6951_v0 = vpop.f32.mrf.mxu1  ;;  %v5836_v48 = vunpack.c.h.bf16 %v4502_v34  ;;  %v4997_v20 = vunpack.c.h.bf16 %v4023_v2  ;;  %v5835_v23 = vunpack.c.l.bf16 %v4502_v34  ;;  %v4878_v51 = vunpack.c.l.bf16 %v3959_v13  ;;  %v3939_v34 = vld [vmem:[%s12579_s19 + $0x3ec] ss:$28 sps:$4 sm:$0xff]  }
 0x6c9   :  { %8175 = vmatpush3.msra.mxu1 %v4927_v4  ;;  %7658 = vmatprep.mubr.f32.mxu1 %v10440_v42  ;;  %v3967_v42 = vld [vmem:[%s12579_s19 + $0x4b0] ss:$28 sps:$4 sm:$0xff]   ;;  %v6883_v4 = vadd.f32 %v6882_v59, %v6812_v56  ;;  %v6952_v52 = vadd.f32 %v6951_v0, %v6881_v28  ;;  %8384 = vtanh.f32 %v6528_v12  ;;  %v4815_v5 = vunpack.c.l.bf16 %v3919_v7  ;;  %v3851_v59 = vld [vmem:[%s12579_s19 + $0x184] ss:$28 sps:$4 sm:$0xff]  }
 0x6ca   :  { %7432 = vmatprep.subr.mxu0 %v5871_v40  ;;  %8176 = vmatprep.subr.mxu1 %v5032_v33  ;;  %v4899_v16 = vunpack.c.h.bf16 %v3967_v42  ;;  %v4892_v53 = vunpack.c.l.bf16 %v3967_v42  ;;  %v4498_v40 = vld [vmem:[%s12579_s19 + $0x1350] sm:$0xff]  ;;  %v6526_v33 = vadd.f32 %v12118_v46, %v6455_v14  ;;  %v6953_v58 = vpop.f32.mrf.mxu1  ;;  %v4990_v46 = vunpack.c.l.bf16 %v4023_v2  ;;  %v4011_v42 = vld [vmem:[%s12579_s19 + $0x5e4] ss:$28 sps:$4 sm:$0xff]   ;;  %v4003_v12 = vld [vmem:[%s12579_s19 + $0x5ac] ss:$28 sps:$4 sm:$0xff]  }
 0x6cb   :  { %7433 = vmatpush2.msra.mxu0 %v5870_v19  ;;  %8177 = vmatpush3.msra.mxu1 %v4920_v26  ;;  %v4885_v19 = vunpack.c.h.bf16 %v3959_v13  ;;  %v5829_v30 = vunpack.c.h.bf16 %v4498_v40  ;;  %v4976_v28 = vunpack.c.h.bf16 %v4011_v42  ;;  %v4696_v56 = vunpack.c.h.bf16 %v3851_v59 }
 0x6cc   :  { %7434 = vmatprep.subr.mxu0 %v5864_v62  ;;  %8178 = vmatprep.subr.mxu1 %v5025_v55  ;;  %v4015_v62 = vld [vmem:[%s12579_s19 + $0x61c] sm:$0xf]  ;;  %8386 = vtanh.f32 %v6526_v33  ;;  %v8400_v2 = vmov 1983009808   ;;  %v4962_v13 = vunpack.c.h.bf16 %v4003_v12  ;;  %v3995_v33 = vld [vmem:[%s12579_s19 + $0x574] ss:$28 sps:$4 sm:$0xff]  }
 0x6cd   :  { %7435 = vmatpush2.msra.mxu0 %v5863_v15  ;;  %8179 = vmatpush3.msra.mxu1 %v4913_v22  ;;  %v3855_v55 = vld [vmem:[%s12579_s19 + $0x1bc] sm:$0xf]  ;;  %v6954_v15 = vadd.f32 %v6953_v58, %v6883_v4  ;;  %v5828_v22 = vunpack.c.l.bf16 %v4498_v40  ;;  %v4983_v36 = vunpack.c.l.bf16 %v4015_v62  ;;  %v8031_v14 = vunpack.c.l.s4 %v8400_v2  ;;  %v3899_v40 = vld [vmem:[%s12579_s19 + $0x2d4] ss:$28 sps:$4 sm:$0xff]  }
 0x6ce   :  { %7436 = vmatprep.subr.mxu0 %v5857_v63  ;;  %8180 = vmatprep.subr.mxu1 %v5018_v39  ;;  %v3915_v39 = vld [vmem:[%s12579_s19 + $0x344] ss:$28 sps:$4 sm:$0xff]   ;;  %v4703_v47 = vunpack.c.l.bf16 %v3855_v55  ;;  %v4689_v4 = vunpack.c.l.bf16 %v3851_v59  ;;  %v4780_v7 = vunpack.c.h.bf16 %v3899_v40  ;;  %v3891_v62 = vld [vmem:[%s12579_s19 + $0x29c] ss:$28 sps:$4 sm:$0xff]  }
 0x6cf   :  { %7437 = vmatpush2.msra.mxu0 %v5856_v49  ;;  %8181 = vmatpush3.msra.mxu1 %v4906_v54  ;;  %v3947_v49 = vld [vmem:[%s12579_s19 + $0x424] ss:$28 sps:$4 sm:$0xff]   ;;  %v4871_v54 = vunpack.c.l.bf16 %v3951_v1  ;;  %v4808_v44 = vunpack.c.h.bf16 %v3915_v39  ;;  %v4801_v0 = vunpack.c.l.bf16 %v3915_v39  ;;  %v3987_v55 = vld [vmem:[%s12579_s19 + $0x558] ss:$2212 sps:$4 sm:$0xff]   ;;  %v4766_v59 = vunpack.c.h.bf16 %v3891_v62 }
 0x6d0   :  { %7438 = vmatprep.subr.mxu0 %v5850_v29  ;;  %8182 = vmatprep.subr.mxu1 %v5011_v61  ;;  %v4864_v29 = vunpack.c.h.bf16 %v3947_v49  ;;  %v3907_v61 = vld [vmem:[%s12579_s19 + $0x30c] ss:$28 sps:$4 sm:$0xff]   ;;  %v3827_v1 = vld [vmem:[%s12579_s19 + $0xdc] ss:$28 sps:$4 sm:$0xff]  }
 0x6d1   :  { %7439 = vmatpush2.msra.mxu0 %v5849_v8  ;;  %8183 = vmatpush3.msra.mxu1 %v4899_v16  ;;  %v7022_v26 = vpop.f32.mrf.mxu0  ;;  %v4969_v8 = vunpack.c.l.bf16 %v4011_v42  ;;  %v3843_v16 = vld [vmem:[%s12579_s19 + $0x14c] ss:$28 sps:$4 sm:$0xff]  }
 0x6d2   :  { %7440 = vmatprep.subr.mxu0 %v5843_v32  ;;  %8184 = vmatprep.subr.mxu1 %v5004_v6  ;;  %v7023_v60 = vadd.f32 %v7022_v26, %v6952_v52  ;;  %v4857_v32 = vunpack.c.l.bf16 %v3947_v49  ;;  %v4794_v6 = vunpack.c.h.bf16 %v3907_v61  ;;  %v3931_v52 = vld [vmem:[%s12579_s19 + $0x3b4] ss:$28 sps:$4 sm:$0xff]   ;;  %v4843_v26 = vunpack.c.l.bf16 %v3939_v34 }
 0x6d3   :  { %7441 = vmatpush2.msra.mxu0 %v5842_v17  ;;  %8185 = vmatpush3.msra.mxu1 %v4892_v53  ;;  %v7024_v18 = vpop.f32.mrf.mxu0  ;;  %v4682_v17 = vunpack.c.h.bf16 %v3843_v16  ;;  %v4850_v53 = vunpack.c.h.bf16 %v3939_v34  ;;  %v4934_v49 = vunpack.c.l.bf16 %v3987_v55  ;;  %v4235_v34 = vld [vmem:[%s12579_s19 + $0xc04] ss:$28 sps:$4 sm:$0xff]  }
 0x6d4   :  { %7442 = vmatprep.subr.mxu0 %v5836_v48  ;;  %8186 = vmatprep.subr.mxu1 %v4997_v20  ;;  %v7025_v63 = vadd.f32 %v7024_v18, %v6954_v15  ;;  %8388 = vtanh.f32 %v7023_v60  ;;  %v4955_v48 = vunpack.c.l.bf16 %v4003_v12  ;;  %v3835_v20 = vld [vmem:[%s12579_s19 + $0x114] ss:$28 sps:$4 sm:$0xff]   ;;  %v4836_v60 = vunpack.c.h.bf16 %v3931_v52  ;;  %v3923_v18 = vld [vmem:[%s12579_s19 + $0x398] ss:$2212 sps:$4 sm:$0xff]  }
 0x6d5   :  { %7443 = vmatpush2.msra.mxu0 %v5835_v23  ;;  %8187 = vmatpush3.msra.mxu1 %v4885_v19  ;;  %v8032_v23 = vunpack.c.0.s8 %v8031_v14  ;;  %v4675_v19 = vunpack.c.l.bf16 %v3843_v16  ;;  %v4661_v42 = vunpack.c.l.bf16 %v3835_v20  ;;  %v3819_v16 = vld [vmem:[%s12579_s19 + $0xa4] ss:$28 sps:$4 sm:$0xff]   ;;  %v5375_v2 = vunpack.c.h.bf16 %v3923_v18 }
 0x6d6   :  { %7444 = vmatprep.subr.mxu0 %v5829_v30  ;;  %8188 = vmatprep.subr.mxu1 %v4990_v46  ;;  %8390 = vtanh.f32 %v7025_v63  ;;  %v8385_v58 = vpop.eup %8384  ;;  %v4948_v30 = vunpack.c.h.bf16 %v3995_v33  ;;  %v4668_v46 = vunpack.c.h.bf16 %v3835_v20  ;;  %v5361_v20 = vunpack.c.l.bf16 %v4235_v34 }
 0x6d7   :  { %7445 = vmatpush2.msra.mxu0 %v5828_v22  ;;  %8189 = vmatpush3.msra.mxu1 %v4878_v51  ;;  %v4773_v22 = vunpack.c.l.bf16 %v3899_v40  ;;  %v4941_v51 = vunpack.c.l.bf16 %v3995_v33  ;;  %v12301_v39 = vsub.s32 %v8032_v23, %v8820_v27  ;;  %v3883_v27 = vld [vmem:[%s12579_s19 + $0x264] ss:$28 sps:$4 sm:$0xff]  }
 0x6d8   :  { %7447 = vmatmul.mubr.f32.vlgmr.msra.gmra.mxu0 %v10907_v25  ;;  %8139 = vmatprep.subr.mxu0 %v4815_v5  ;;  %v4745_v40 = vunpack.c.l.bf16 %v3883_v27 }
 0x6d9   :  { %8190 = vmatprep.subr.mxu1 %v4983_v36  ;;  %8140 = vmatpush3.msra.mxu0 %v4703_v47  ;;  %v8387_v15 = vpop.eup %8386  ;;  %v4829_v36 = vunpack.c.l.bf16 %v3931_v52 }
 0x6da   :  { %7588 = vmatprep.mubr.f32.mxu0 %v10438_v41  ;;  %8191 = vmatpush3.msra.mxu1 %v4871_v54  ;;  %v4787_v41 = vunpack.c.l.bf16 %v3907_v61  ;;  %v8028_v63 = vcombine.low %v8387_v15, %v8385_v58 }
 0x6db   :  { %8141 = vmatprep.subr.mxu0 %v4808_v44  ;;  %8192 = vmatprep.subr.mxu1 %v4976_v28  ;;  %v4654_v44 = vunpack.c.h.bf16 %v3827_v1  ;;  %v4822_v28 = vunpack.c.l.bf16 %v3923_v18  ;;  %v3859_v18 = vld [vmem:[%s12579_s19 + $0x1d8] ss:$2212 sps:$4 sm:$0xff]  }
 0x6dc   :  { %8142 = vmatpush3.msra.mxu0 %v4696_v56  ;;  %8193 = vmatpush3.msra.mxu1 %v4864_v29  ;;  %v4759_v56 = vunpack.c.l.bf16 %v3891_v62  ;;  %v4299_v29 = vld [vmem:[%s12579_s19 + $0xdc4] ss:$28 sps:$4 sm:$0xff]   ;;  %v8036_v61 = vrot.slane %v8028_v63, %v12301_v39 }
 0x6dd   :  { %8143 = vmatprep.subr.mxu0 %v4801_v0  ;;  %8194 = vmatprep.subr.mxu1 %v4969_v8  ;;  %v5487_v0 = vunpack.c.h.bf16 %v3987_v55  ;;  %v4647_v8 = vunpack.c.l.bf16 %v3827_v1  ;;  %v5473_v33 = vunpack.c.l.bf16 %v4299_v29 }
 0x6de   :  { %8144 = vmatpush3.msra.mxu0 %v4689_v4  ;;  %8195 = vmatpush3.msra.mxu1 %v4857_v32  ;;  %v4752_v4 = vunpack.c.h.bf16 %v3883_v27  ;;  %v5480_v32 = vunpack.c.h.bf16 %v4299_v29  ;;  %v5263_v27 = vunpack.c.h.bf16 %v3859_v18  ;;  %v4171_v29 = vld [vmem:[%s12579_s19 + $0xa44] ss:$28 sps:$4 sm:$0xff]  }
 0x6df   :  { %8145 = vmatprep.subr.mxu0 %v4794_v6  ;;  %8196 = vmatprep.subr.mxu1 %v4962_v13  ;;  %v4640_v6 = vunpack.c.h.bf16 %v3819_v16  ;;  %v5368_v13 = vunpack.c.h.bf16 %v4235_v34 }
 0x6e0   :  { %8146 = vmatpush3.msra.mxu0 %v4682_v17  ;;  %8197 = vmatpush3.msra.mxu1 %v4850_v53  ;;  %v3875_v17 = vld [vmem:[%s12579_s19 + $0x22c] ss:$28 sps:$4 sm:$0xff]  }
 0x6e1   :  { %8147 = vmatprep.subr.mxu0 %v4787_v41  ;;  %8198 = vmatprep.subr.mxu1 %v4955_v48  ;;  %v8389_v5 = vpop.eup %8388  ;;  %v4291_v53 = vld [vmem:[%s12579_s19 + $0xd8c] ss:$28 sps:$4 sm:$0xff]   ;;  %v4633_v48 = vunpack.c.l.bf16 %v3819_v16  ;;  %v4738_v52 = vunpack.c.h.bf16 %v3875_v17  ;;  %v4203_v16 = vld [vmem:[%s12579_s19 + $0xb24] ss:$28 sps:$4 sm:$0xff]  }
 0x6e2   :  { %8148 = vmatpush3.msra.mxu0 %v4675_v19  ;;  %8199 = vmatpush3.msra.mxu1 %v4843_v26  ;;  %v4227_v41 = vld [vmem:[%s12579_s19 + $0xbcc] ss:$28 sps:$4 sm:$0xff]   ;;  %v5466_v58 = vunpack.c.h.bf16 %v4291_v53  ;;  %v3867_v26 = vld [vmem:[%s12579_s19 + $0x1f4] ss:$28 sps:$4 sm:$0xff]  }
 0x6e3   :  { %v8391_v47 = vpop.eup %8390  ;;  %8149 = vmatprep.subr.mxu0 %v4780_v7  ;;  %8200 = vmatprep.subr.mxu1 %v4948_v30  ;;  %v5354_v19 = vunpack.c.h.bf16 %v4227_v41  ;;  %v4283_v7 = vld [vmem:[%s12579_s19 + $0xd54] ss:$28 sps:$4 sm:$0xff]   ;;  %v5459_v30 = vunpack.c.l.bf16 %v4291_v53  ;;  %v5347_v55 = vunpack.c.l.bf16 %v4227_v41  ;;  %v4724_v15 = vunpack.c.h.bf16 %v3867_v26 }
 0x6e4   :  { %v8029_v54 = vcombine.low %v8389_v5, %v8391_v47  ;;  %8150 = vmatpush3.msra.mxu0 %v4668_v46  ;;  %8201 = vmatpush3.msra.mxu1 %v4836_v60  ;;  %v3803_v46 = vld [vmem:[%s12579_s19 + $0x34] ss:$28 sps:$4 sm:$0xff]   ;;  %v4275_v5 = vld [vmem:[%s12579_s19 + $0xd1c] ss:$28 sps:$4 sm:$0xff]   ;;  %v4717_v63 = vunpack.c.l.bf16 %v3867_v26 }
 0x6e5   :  { %8151 = vmatprep.subr.mxu0 %v4773_v22  ;;  %8202 = vmatprep.subr.mxu1 %v4941_v51  ;;  %v4219_v60 = vld [vmem:[%s12579_s19 + $0xb94] ss:$28 sps:$4 sm:$0xff]   ;;  %v5452_v22 = vunpack.c.h.bf16 %v4283_v7  ;;  %v4612_v51 = vunpack.c.h.bf16 %v3803_v46  ;;  %v4211_v47 = vld [vmem:[%s12579_s19 + $0xb5c] ss:$28 sps:$4 sm:$0xff]  }
 0x6e6   :  { %v8043_v12 = vrot.slane %v8029_v54, %v12301_v39  ;;  %8152 = vmatpush3.msra.mxu0 %v4661_v42  ;;  %8203 = vmatpush3.msra.mxu1 %v4829_v36  ;;  %v5340_v1 = vunpack.c.h.bf16 %v4219_v60  ;;  %v5445_v42 = vunpack.c.l.bf16 %v4283_v7  ;;  %v3795_v36 = vld [vmem:[%s12579_s19 + $0x18] ss:$2212 sps:$4 sm:$0xff]   ;;  %v4710_v54 = vunpack.c.l.bf16 %v3859_v18  ;;  %v4091_v26 = vld [vmem:[%s12579_s19 + $0x814] ss:$28 sps:$4 sm:$0xff]  }
 0x6e7   :  { %8153 = vmatprep.subr.mxu0 %v4766_v59  ;;  %8204 = vmatprep.subr.mxu1 %v4934_v49  ;;  %v4605_v59 = vunpack.c.l.bf16 %v3803_v46  ;;  %v5333_v49 = vunpack.c.l.bf16 %v4219_v60  ;;  %v5319_v34 = vunpack.c.l.bf16 %v4211_v47  ;;  %v4187_v7 = vld [vmem:[%s12579_s19 + $0xab4] ss:$28 sps:$4 sm:$0xff]   ;;  %v4083_v18 = vld [vmem:[%s12579_s19 + $0x7dc] ss:$28 sps:$4 sm:$0xff]  }
 0x6e8   :  { %v8044_v14 = vcombine.low %v8036_v61, %v8043_v12  ;;  %8154 = vmatpush3.msra.mxu0 %v4654_v44  ;;  %8205 = vmatpush3.msra.mxu1 %v4822_v28  ;;  %v5438_v44 = vunpack.c.h.bf16 %v4275_v5  ;;  %v4598_v28 = vunpack.c.l.bf16 %v3795_v36  ;;  %v4267_v61 = vld [vmem:[%s12579_s19 + $0xce4] ss:$28 sps:$4 sm:$0xff]   ;;  %v5431_v12 = vunpack.c.l.bf16 %v4275_v5  ;;  %v4179_v5 = vld [vmem:[%s12579_s19 + $0xa98] ss:$2212 sps:$4 sm:$0xff]  }
 0x6e9   :  { %8155 = vmatprep.subr.mxu0 %v4759_v56  ;;  %7659 = vmatmul.mubr.f32.vlgmr.msra.gmra.mxu1 %v10444_v45  ;;  %v3811_v45 = vld [vmem:[%s12579_s19 + $0x6c] ss:$28 sps:$4 sm:$0xff]   ;;  %v5326_v56 = vunpack.c.h.bf16 %v4211_v47  ;;  %v5417_v53 = vunpack.c.l.bf16 %v4267_v61 }
 0x6ea   :  { %8063 = vst [vmem:[%s12584_s21] sm:$0xff] %v8044_v14  ;;  %8244 = vmatprep.subr.mxu1 %v5487_v0  ;;  %8156 = vmatpush3.msra.mxu0 %v4647_v8  ;;  %v4626_v23 = vunpack.c.h.bf16 %v3811_v45  ;;  %v4619_v62 = vunpack.c.l.bf16 %v3811_v45  ;;  %v5151_v0 = vunpack.c.h.bf16 %v3795_v36  ;;  %v4107_v8 = vld [vmem:[%s12579_s19 + $0x884] ss:$28 sps:$4 sm:$0xff]   ;;  %v5424_v14 = vunpack.c.h.bf16 %v4267_v61 }
 0x6eb   :  { %8245 = vmatpush3.msra.mxu1 %v5375_v2  ;;  %7798 = vmatprep.mubr.f32.mxu1 %v10474_v35  ;;  %v4731_v35 = vunpack.c.l.bf16 %v3875_v17  ;;  %v5256_v2 = vunpack.c.h.bf16 %v4171_v29  ;;  %v5249_v17 = vunpack.c.l.bf16 %v4171_v29  ;;  %v5305_v45 = vunpack.c.l.bf16 %v4203_v16  ;;  %v4075_v29 = vld [vmem:[%s12579_s19 + $0x7a4] ss:$28 sps:$4 sm:$0xff]  }
 0x6ec   :  { %8157 = vmatprep.subr.mxu0 %v4752_v4  ;;  %8246 = vmatprep.subr.mxu1 %v5480_v32  ;;  %v5144_v4 = vunpack.c.h.bf16 %v4107_v8  ;;  %v5312_v32 = vunpack.c.h.bf16 %v4203_v16  ;;  %v4491_v61 = vld [vmem:[%s12579_s19 + $0x1304] ss:$28 sps:$4 sm:$0xff]   ;;  %v5088_v16 = vunpack.c.h.bf16 %v4075_v29 }
 0x6ed   :  { %8158 = vmatpush3.msra.mxu0 %v4640_v6  ;;  %8247 = vmatpush3.msra.mxu1 %v5368_v13  ;;  %v4163_v6 = vld [vmem:[%s12579_s19 + $0xa0c] ss:$28 sps:$4 sm:$0xff]  }
 0x6ee   :  { %8159 = vmatprep.subr.mxu0 %v4745_v40  ;;  %8248 = vmatprep.subr.mxu1 %v5473_v33  ;;  %v4259_v13 = vld [vmem:[%s12579_s19 + $0xcac] ss:$28 sps:$4 sm:$0xff]   ;;  %v5137_v33 = vunpack.c.l.bf16 %v4107_v8  ;;  %v5242_v41 = vunpack.c.h.bf16 %v4163_v6 }
 0x6ef   :  { %8160 = vmatpush3.msra.mxu0 %v4633_v48  ;;  %8249 = vmatpush3.msra.mxu1 %v5361_v20  ;;  %v4099_v40 = vld [vmem:[%s12579_s19 + $0x84c] ss:$28 sps:$4 sm:$0xff]   ;;  %v5410_v48 = vunpack.c.h.bf16 %v4259_v13 }
 0x6f0   :  { %8161 = vmatprep.subr.mxu0 %v4738_v52  ;;  %8250 = vmatprep.subr.mxu1 %v5466_v58  ;;  %v5130_v20 = vunpack.c.h.bf16 %v4099_v40  ;;  %v4155_v58 = vld [vmem:[%s12579_s19 + $0x9d4] ss:$28 sps:$4 sm:$0xff]  }
 0x6f1   :  { %8162 = vmatpush3.msra.mxu0 %v4626_v23  ;;  %8251 = vmatpush3.msra.mxu1 %v5354_v19  ;;  %v4251_v23 = vld [vmem:[%s12579_s19 + $0xc74] ss:$28 sps:$4 sm:$0xff]   ;;  %v5403_v19 = vunpack.c.l.bf16 %v4259_v13  ;;  %v5228_v46 = vunpack.c.h.bf16 %v4155_v58  ;;  %v5081_v13 = vunpack.c.l.bf16 %v4075_v29 }
 0x6f2   :  { %8163 = vmatprep.subr.mxu0 %v4731_v35  ;;  %8252 = vmatprep.subr.mxu1 %v5459_v30  ;;  %v5123_v35 = vunpack.c.l.bf16 %v4099_v40  ;;  %v5396_v60 = vunpack.c.h.bf16 %v4251_v23 }
 0x6f3   :  { %8164 = vmatpush3.msra.mxu0 %v4619_v62  ;;  %8253 = vmatpush3.msra.mxu1 %v5347_v55  ;;  %v5116_v62 = vunpack.c.h.bf16 %v4091_v26  ;;  %v5284_v55 = vunpack.c.h.bf16 %v4187_v7 }
 0x6f4   :  { %8165 = vmatprep.subr.mxu0 %v4724_v15  ;;  %8254 = vmatprep.subr.mxu1 %v5452_v22  ;;  %v4147_v15 = vld [vmem:[%s12579_s19 + $0x99c] ss:$28 sps:$4 sm:$0xff]  }
 0x6f5   :  { %8166 = vmatpush3.msra.mxu0 %v4612_v51  ;;  %8255 = vmatpush3.msra.mxu1 %v5340_v1  ;;  %v4243_v22 = vld [vmem:[%s12579_s19 + $0xc58] ss:$2212 sps:$4 sm:$0xff]   ;;  %v5221_v51 = vunpack.c.l.bf16 %v4155_v58  ;;  %v5389_v1 = vunpack.c.l.bf16 %v4251_v23  ;;  %v5214_v36 = vunpack.c.h.bf16 %v4147_v15 }
 0x6f6   :  { %8167 = vmatprep.subr.mxu0 %v4717_v63  ;;  %8256 = vmatprep.subr.mxu1 %v5445_v42  ;;  %v5109_v63 = vunpack.c.l.bf16 %v4091_v26  ;;  %v5277_v42 = vunpack.c.l.bf16 %v4187_v7  ;;  %v5382_v47 = vunpack.c.l.bf16 %v4243_v22 }
 0x6f7   :  { %8168 = vmatpush3.msra.mxu0 %v4605_v59  ;;  %8257 = vmatpush3.msra.mxu1 %v5333_v49  ;;  %v5102_v59 = vunpack.c.h.bf16 %v4083_v18  ;;  %v5270_v49 = vunpack.c.l.bf16 %v4179_v5 }
 0x6f8   :  { %8169 = vmatprep.subr.mxu0 %v4710_v54  ;;  %8258 = vmatprep.subr.mxu1 %v5438_v44  ;;  %v5207_v54 = vunpack.c.l.bf16 %v4147_v15  ;;  %v4139_v44 = vld [vmem:[%s12579_s19 + $0x964] ss:$28 sps:$4 sm:$0xff]  }
 0x6f9   :  { %8170 = vmatpush3.msra.mxu0 %v4598_v28  ;;  %8259 = vmatpush3.msra.mxu1 %v5326_v56  ;;  %v4555_v28 = vld [vmem:[%s12579_s19 + $0x14c4] ss:$28 sps:$4 sm:$0xff]   ;;  %v5935_v56 = vunpack.c.h.bf16 %v4243_v22 }
 0x6fa   :  { %7589 = vmatmul.mubr.f32.vlgmr.msra.gmra.mxu0 %v10442_v43  ;;  %8209 = vmatprep.subr.mxu0 %v5263_v27  ;;  %v4195_v43 = vld [vmem:[%s12579_s19 + $0xaec] ss:$28 sps:$4 sm:$0xff]   ;;  %v5095_v27 = vunpack.c.l.bf16 %v4083_v18  ;;  %v5928_v8 = vunpack.c.h.bf16 %v4555_v28 }
 0x6fb   :  { %8260 = vmatprep.subr.mxu1 %v5431_v12  ;;  %8210 = vmatpush3.msra.mxu0 %v5151_v0  ;;  %v5298_v52 = vunpack.c.h.bf16 %v4195_v43  ;;  %v5291_v30 = vunpack.c.l.bf16 %v4195_v43  ;;  %v5823_v12 = vunpack.c.h.bf16 %v4179_v5  ;;  %v5200_v0 = vunpack.c.h.bf16 %v4139_v44 }
 0x6fc   :  { %7728 = vmatprep.mubr.f32.mxu0 %v10462_v10  ;;  %8261 = vmatpush3.msra.mxu1 %v5319_v34  ;;  %v5235_v10 = vunpack.c.l.bf16 %v4163_v6  ;;  %v5816_v34 = vunpack.c.h.bf16 %v4491_v61  ;;  %v4067_v6 = vld [vmem:[%s12579_s19 + $0x76c] ss:$28 sps:$4 sm:$0xff]  }
 0x6fd   :  { %8211 = vmatprep.subr.mxu0 %v5256_v2  ;;  %8262 = vmatprep.subr.mxu1 %v5424_v14  ;;  %v4131_v2 = vld [vmem:[%s12579_s19 + $0x92c] ss:$28 sps:$4 sm:$0xff]   ;;  %v5074_v43 = vunpack.c.h.bf16 %v4067_v6  ;;  %v5067_v58 = vunpack.c.l.bf16 %v4067_v6 }
 0x6fe   :  { %8212 = vmatpush3.msra.mxu0 %v5144_v4  ;;  %8263 = vmatpush3.msra.mxu1 %v5312_v32  ;;  %v4547_v14 = vld [vmem:[%s12579_s19 + $0x148c] ss:$28 sps:$4 sm:$0xff]   ;;  %v5193_v4 = vunpack.c.l.bf16 %v4139_v44  ;;  %v5921_v32 = vunpack.c.l.bf16 %v4555_v28 }
 0x6ff   :  { %8213 = vmatprep.subr.mxu0 %v5249_v17  ;;  %8264 = vmatprep.subr.mxu1 %v5417_v53  ;;  %v5809_v17 = vunpack.c.l.bf16 %v4491_v61  ;;  %v5186_v53 = vunpack.c.h.bf16 %v4131_v2  ;;  %v5914_v40 = vunpack.c.h.bf16 %v4547_v14  ;;  %v4419_v61 = vld [vmem:[%s12579_s19 + $0x110c] ss:$28 sps:$4 sm:$0xff]  }
 0x700   :  { %8214 = vmatpush3.msra.mxu0 %v5137_v33  ;;  %8265 = vmatpush3.msra.mxu1 %v5305_v45  ;;  %v4123_v45 = vld [vmem:[%s12579_s19 + $0x8f4] ss:$28 sps:$4 sm:$0xff]  }
 0x701   :  { %8215 = vmatprep.subr.mxu0 %v5242_v41  ;;  %8266 = vmatprep.subr.mxu1 %v5410_v48  ;;  %v4539_v41 = vld [vmem:[%s12579_s19 + $0x1454] ss:$28 sps:$4 sm:$0xff]   ;;  %v5907_v48 = vunpack.c.l.bf16 %v4547_v14  ;;  %v5690_v14 = vunpack.c.h.bf16 %v4419_v61 }
 0x702   :  { %8216 = vmatpush3.msra.mxu0 %v5130_v20  ;;  %8267 = vmatpush3.msra.mxu1 %v5298_v52  ;;  %v4059_v20 = vld [vmem:[%s12579_s19 + $0x734] ss:$28 sps:$4 sm:$0xff]  }
 0x703   :  { %8217 = vmatprep.subr.mxu0 %v5235_v10  ;;  %8268 = vmatprep.subr.mxu1 %v5403_v19  ;;  %v4475_v52 = vld [vmem:[%s12579_s19 + $0x1294] ss:$28 sps:$4 sm:$0xff]   ;;  %v5172_v10 = vunpack.c.h.bf16 %v4123_v45  ;;  %v5900_v19 = vunpack.c.h.bf16 %v4539_v41  ;;  %v5060_v26 = vunpack.c.h.bf16 %v4059_v20  ;;  %v5053_v15 = vunpack.c.l.bf16 %v4059_v20  ;;  %v4403_v20 = vld [vmem:[%s12579_s19 + $0x109c] ss:$28 sps:$4 sm:$0xff]  }
 0x704   :  { %8218 = vmatpush3.msra.mxu0 %v5123_v35  ;;  %8269 = vmatpush3.msra.mxu1 %v5291_v30  ;;  %v5788_v7 = vunpack.c.h.bf16 %v4475_v52  ;;  %v4115_v35 = vld [vmem:[%s12579_s19 + $0x8d8] ss:$2212 sps:$4 sm:$0xff]   ;;  %v5781_v22 = vunpack.c.l.bf16 %v4475_v52 }
 0x705   :  { %8219 = vmatprep.subr.mxu0 %v5228_v46  ;;  %8270 = vmatprep.subr.mxu1 %v5396_v60  ;;  %v4531_v30 = vld [vmem:[%s12579_s19 + $0x141c] ss:$28 sps:$4 sm:$0xff]   ;;  %v5165_v46 = vunpack.c.l.bf16 %v4123_v45  ;;  %v5893_v60 = vunpack.c.l.bf16 %v4539_v41 }
 0x706   :  { %8220 = vmatpush3.msra.mxu0 %v5116_v62  ;;  %8271 = vmatpush3.msra.mxu1 %v5284_v55  ;;  %v4051_v62 = vld [vmem:[%s12579_s19 + $0x718] ss:$2212 sps:$4 sm:$0xff]  }
 0x707   :  { %8221 = vmatprep.subr.mxu0 %v5221_v51  ;;  %8272 = vmatprep.subr.mxu1 %v5389_v1  ;;  %v4467_v55 = vld [vmem:[%s12579_s19 + $0x125c] ss:$28 sps:$4 sm:$0xff]   ;;  %v5158_v51 = vunpack.c.l.bf16 %v4115_v35  ;;  %v5886_v1 = vunpack.c.h.bf16 %v4531_v30  ;;  %v5046_v18 = vunpack.c.l.bf16 %v4051_v62 }
 0x708   :  { %8222 = vmatpush3.msra.mxu0 %v5109_v63  ;;  %8273 = vmatpush3.msra.mxu1 %v5277_v42  ;;  %v5774_v5 = vunpack.c.h.bf16 %v4467_v55  ;;  %v5711_v63 = vunpack.c.h.bf16 %v4115_v35  ;;  %v4427_v42 = vld [vmem:[%s12579_s19 + $0x1144] ss:$28 sps:$4 sm:$0xff]   ;;  %v5767_v44 = vunpack.c.l.bf16 %v4467_v55  ;;  %v4499_v52 = vld [vmem:[%s12579_s19 + $0xedc] ss:$1148 sps:$4 sm:$0xff]   ;;  %v5662_v35 = vunpack.c.h.bf16 %v4403_v20 }
 0x709   :  { %8223 = vmatprep.subr.mxu0 %v5214_v36  ;;  %8274 = vmatprep.subr.mxu1 %v5382_v47  ;;  %v4523_v36 = vld [vmem:[%s12579_s19 + $0x13e4] ss:$28 sps:$4 sm:$0xff]   ;;  %v5879_v47 = vunpack.c.l.bf16 %v4531_v30  ;;  %v5704_v28 = vunpack.c.h.bf16 %v4427_v42  ;;  %v5830_v30 = vunpack.c.h.bf16 %v4499_v52  ;;  %v5543_v55 = vunpack.c.l.bf16 %v4499_v52 }
 0x70a   :  { %8224 = vmatpush3.msra.mxu0 %v5102_v59  ;;  %8275 = vmatpush3.msra.mxu1 %v5270_v49  ;;  %v5599_v59 = vunpack.c.h.bf16 %v4051_v62  ;;  %v4363_v49 = vld [vmem:[%s12579_s19 + $0xf84] ss:$28 sps:$4 sm:$0xff]   ;;  %v5655_v62 = vunpack.c.l.bf16 %v4403_v20 }
 0x70b   :  { %8225 = vmatprep.subr.mxu0 %v5207_v54  ;;  %7799 = vmatmul.mubr.f32.vlgmr.msra.gmra.mxu1 %v10699_v50  ;;  %v4483_v50 = vld [vmem:[%s12579_s19 + $0x12cc] ss:$28 sps:$4 sm:$0xff]   ;;  %v4459_v54 = vld [vmem:[%s12579_s19 + $0x1224] ss:$28 sps:$4 sm:$0xff]  }
 0x70c   :  { %8314 = vmatprep.subr.mxu1 %v5935_v56  ;;  %8226 = vmatpush3.msra.mxu0 %v5095_v27  ;;  %v5802_v33 = vunpack.c.h.bf16 %v4483_v50  ;;  %v5795_v23 = vunpack.c.l.bf16 %v4483_v50  ;;  %v5872_v56 = vunpack.c.h.bf16 %v4523_v36  ;;  %v5592_v27 = vunpack.c.h.bf16 %v4363_v49  ;;  %v4411_v50 = vld [vmem:[%s12579_s19 + $0x10d4] ss:$28 sps:$4 sm:$0xff]  }
 0x70d   :  { %8315 = vmatpush3.msra.mxu1 %v5823_v12  ;;  %7938 = vmatprep.mubr.f32.mxu1 %v10713_v11  ;;  %v5179_v11 = vunpack.c.l.bf16 %v4131_v2  ;;  %v5760_v29 = vunpack.c.h.bf16 %v4459_v54  ;;  %v4515_v12 = vld [vmem:[%s12579_s19 + $0x13ac] ss:$28 sps:$4 sm:$0xff]   ;;  %v5753_v2 = vunpack.c.l.bf16 %v4459_v54  ;;  %v5676_v45 = vunpack.c.h.bf16 %v4411_v50 }
 0x70e   :  { %8227 = vmatprep.subr.mxu0 %v5200_v0  ;;  %8316 = vmatprep.subr.mxu1 %v5928_v8  ;;  %v5697_v0 = vunpack.c.l.bf16 %v4427_v42  ;;  %v5865_v8 = vunpack.c.l.bf16 %v4523_v36  ;;  %v4319_v36 = vld [vmem:[%s12579_s19 + $0xe50] ss:$28 sps:$4 sm:$0xff]  }
 0x70f   :  { %8228 = vmatpush3.msra.mxu0 %v5088_v16  ;;  %8317 = vmatpush3.msra.mxu1 %v5816_v34  ;;  %v4355_v16 = vld [vmem:[%s12579_s19 + $0xf4c] ss:$28 sps:$4 sm:$0xff]   ;;  %v5585_v34 = vunpack.c.l.bf16 %v4363_v49  ;;  %v5515_v49 = vunpack.c.h.bf16 %v4319_v36 }
 0x710   :  { %8229 = vmatprep.subr.mxu0 %v5193_v4  ;;  %8318 = vmatprep.subr.mxu1 %v5921_v32  ;;  %v5858_v4 = vunpack.c.h.bf16 %v4515_v12  ;;  %v5578_v32 = vunpack.c.h.bf16 %v4355_v16 }
 0x711   :  { %8230 = vmatpush3.msra.mxu0 %v5081_v13  ;;  %8319 = vmatpush3.msra.mxu1 %v5809_v17  ;;  %v4507_v13 = vld [vmem:[%s12579_s19 + $0x1374] ss:$28 sps:$4 sm:$0xff]   ;;  %v5851_v17 = vunpack.c.l.bf16 %v4515_v12 }
 0x712   :  { %8231 = vmatprep.subr.mxu0 %v5186_v53  ;;  %8320 = vmatprep.subr.mxu1 %v5914_v40  ;;  %v4347_v53 = vld [vmem:[%s12579_s19 + $0xf14] ss:$28 sps:$4 sm:$0xff]   ;;  %v5844_v41 = vunpack.c.h.bf16 %v4507_v13 }
 0x713   :  { %8232 = vmatpush3.msra.mxu0 %v5074_v43  ;;  %8321 = vmatpush3.msra.mxu1 %v5802_v33  ;;  %v4443_v40 = vld [vmem:[%s12579_s19 + $0x11b4] ss:$28 sps:$4 sm:$0xff]   ;;  %v5571_v43 = vunpack.c.l.bf16 %v4355_v16 }
 0x714   :  { %8233 = vmatprep.subr.mxu0 %v5179_v11  ;;  %8322 = vmatprep.subr.mxu1 %v5907_v48  ;;  %v5564_v11 = vunpack.c.h.bf16 %v4347_v53  ;;  %v5732_v48 = vunpack.c.h.bf16 %v4443_v40 }
 0x715   :  { %8234 = vmatpush3.msra.mxu0 %v5067_v58  ;;  %8323 = vmatpush3.msra.mxu1 %v5795_v23  ;;  %v5669_v58 = vunpack.c.l.bf16 %v4411_v50  ;;  %v5837_v23 = vunpack.c.l.bf16 %v4507_v13  ;;  %v7093_v50 = vpop.f32.mrf.mxu1  ;;  %v7164_v13 = vpop.f32.mrf.mxu0 }
 0x716   :  { %8235 = vmatprep.subr.mxu0 %v5172_v10  ;;  %8324 = vmatprep.subr.mxu1 %v5900_v19  ;;  %v4339_v10 = vld [vmem:[%s12579_s19 + $0xef8] ss:$392 sps:$4 sm:$0xff]  }
 0x717   :  { %8236 = vmatpush3.msra.mxu0 %v5060_v26  ;;  %8325 = vmatpush3.msra.mxu1 %v5788_v7  ;;  %v4435_v19 = vld [vmem:[%s12579_s19 + $0xec0] ss:$728 sps:$4 sm:$0xff]   ;;  %v5557_v26 = vunpack.c.l.bf16 %v4347_v53  ;;  %v5725_v7 = vunpack.c.l.bf16 %v4443_v40 }
 0x718   :  { %8237 = vmatprep.subr.mxu0 %v5165_v46  ;;  %8326 = vmatprep.subr.mxu1 %v5893_v60  ;;  %v5550_v46 = vunpack.c.l.bf16 %v4339_v10  ;;  %v5718_v60 = vunpack.c.h.bf16 %v4435_v19 }
 0x719   :  { %8238 = vmatpush3.msra.mxu0 %v5053_v15  ;;  %8327 = vmatpush3.msra.mxu1 %v5781_v22  ;;  %v4391_v15 = vld [vmem:[%s12579_s19 + $0x1048] ss:$28 sps:$4 sm:$0xff]   ;;  %v5648_v22 = vunpack.c.h.bf16 %v4339_v10 }
 0x71a   :  { %8239 = vmatprep.subr.mxu0 %v5158_v51  ;;  %8328 = vmatprep.subr.mxu1 %v5886_v1  ;;  %v4327_v51 = vld [vmem:[%s12579_s19 + $0xe88] ss:$28 sps:$4 sm:$0xff]   ;;  %v5536_v1 = vunpack.c.l.bf16 %v4435_v19  ;;  %v5634_v42 = vunpack.c.l.bf16 %v4391_v15 }
 0x71b   :  { %8240 = vmatpush3.msra.mxu0 %v5046_v18  ;;  %8329 = vmatpush3.msra.mxu1 %v5774_v5  ;;  %v5641_v18 = vunpack.c.h.bf16 %v4391_v15  ;;  %v5529_v5 = vunpack.c.h.bf16 %v4327_v51 }
 0x71c   :  { %7729 = vmatmul.mubr.f32.vlgmr.msra.gmra.mxu0 %v10696_v9  ;;  %8279 = vmatprep.subr.mxu0 %v5711_v63  ;;  %v4451_v9 = vld [vmem:[%s12579_s19 + $0x11ec] ss:$28 sps:$4 sm:$0xff]  }
 0x71d   :  { %8330 = vmatprep.subr.mxu1 %v5879_v47  ;;  %8280 = vmatpush3.msra.mxu0 %v5599_v59  ;;  %v5746_v6 = vunpack.c.h.bf16 %v4451_v9  ;;  %v5739_v33 = vunpack.c.l.bf16 %v4451_v9  ;;  %v4383_v63 = vld [vmem:[%s12579_s19 + $0x1010] ss:$28 sps:$4 sm:$0xff]   ;;  %v5522_v47 = vunpack.c.l.bf16 %v4327_v51 }
 0x71e   :  { %7868 = vmatprep.mubr.f32.mxu0 %v10710_v38  ;;  %8331 = vmatpush3.msra.mxu1 %v5767_v44  ;;  %v5683_v38 = vunpack.c.l.bf16 %v4419_v61  ;;  %v5627_v59 = vunpack.c.h.bf16 %v4383_v63  ;;  %v5620_v54 = vunpack.c.l.bf16 %v4383_v63  ;;  %v4311_v44 = vld [vmem:[%s12579_s19 + $0xe18] ss:$28 sps:$4 sm:$0xff]   ;;  %v4591_v61 = vld [vmem:[%s12579_s19 + $0x15c0] ss:$28 sps:$4 sm:$0xff]  }
 0x71f   :  { %8281 = vmatprep.subr.mxu0 %v5704_v28  ;;  %8332 = vmatprep.subr.mxu1 %v5872_v56  ;;  %v5508_v28 = vunpack.c.l.bf16 %v4319_v36  ;;  %v5494_v12 = vunpack.c.l.bf16 %v4311_v44  ;;  %v5984_v16 = vunpack.c.l.bf16 %v4591_v61 }
 0x720   :  { %8282 = vmatpush3.msra.mxu0 %v5592_v27  ;;  %8333 = vmatpush3.msra.mxu1 %v5760_v29  ;;  %v5501_v27 = vunpack.c.h.bf16 %v4311_v44 }
 0x721   :  { %8283 = vmatprep.subr.mxu0 %v5697_v0  ;;  %8334 = vmatprep.subr.mxu1 %v5865_v8  ;;  %v5991_v0 = vunpack.c.h.bf16 %v4591_v61  ;;  %v4583_v8 = vld [vmem:[%s12579_s19 + $0x1588] ss:$28 sps:$4 sm:$0xff]  }
 0x722   :  { %8284 = vmatpush3.msra.mxu0 %v5585_v34  ;;  %8335 = vmatpush3.msra.mxu1 %v5753_v2  ;;  %v5977_v9 = vunpack.c.h.bf16 %v4583_v8  ;;  %v4575_v34 = vld [vmem:[%s12579_s19 + $0x1550] ss:$28 sps:$4 sm:$0xff]   ;;  %v5970_v2 = vunpack.c.l.bf16 %v4583_v8 }
 0x723   :  { %8285 = vmatprep.subr.mxu0 %v5690_v14  ;;  %8336 = vmatprep.subr.mxu1 %v5858_v4  ;;  %v5963_v14 = vunpack.c.h.bf16 %v4575_v34  ;;  %v5956_v4 = vunpack.c.l.bf16 %v4575_v34 }
 0x724   :  { %8286 = vmatpush3.msra.mxu0 %v5578_v32  ;;  %8337 = vmatpush3.msra.mxu1 %v5746_v6 }
 0x725   :  { %8287 = vmatprep.subr.mxu0 %v5683_v38  ;;  %8338 = vmatprep.subr.mxu1 %v5851_v17  ;;  %v7095_v38 = vpop.f32.mrf.mxu1  ;;  %v7166_v17 = vpop.f32.mrf.mxu0 }
 0x726   :  { %8288 = vmatpush3.msra.mxu0 %v5571_v43  ;;  %8339 = vmatpush3.msra.mxu1 %v5739_v33 }
 0x727   :  { %8289 = vmatprep.subr.mxu0 %v5676_v45  ;;  %8340 = vmatprep.subr.mxu1 %v5844_v41 }
 0x728   :  { %8290 = vmatpush3.msra.mxu0 %v5564_v11  ;;  %8341 = vmatpush3.msra.mxu1 %v5732_v48 }
 0x729   :  { %8291 = vmatprep.subr.mxu0 %v5669_v58  ;;  %8342 = vmatprep.subr.mxu1 %v5837_v23 }
 0x72a   :  { %8292 = vmatpush3.msra.mxu0 %v5557_v26  ;;  %8343 = vmatpush3.msra.mxu1 %v5725_v7 }
 0x72b   :  { %8293 = vmatprep.subr.mxu0 %v5662_v35  ;;  %8344 = vmatprep.subr.mxu1 %v5830_v30 }
 0x72c   :  { %8294 = vmatpush3.msra.mxu0 %v5550_v46  ;;  %8345 = vmatpush3.msra.mxu1 %v5718_v60 }
 0x72d   :  { %8295 = vmatprep.subr.mxu0 %v5655_v62  ;;  %7939 = vmatmul.mubr.f32.vlgmr.msra.gmra.mxu1 %v10907_v25  ;;  %v4375_v25 = vld [vmem:[%s12579_s19 + $0xfd8] ss:$28 sps:$4 sm:$0xff]  }
 0x72e   :  { %8296 = vmatpush3.msra.mxu0 %v5543_v55  ;;  %v5613_v56 = vunpack.c.h.bf16 %v4375_v25  ;;  %v5606_v29 = vunpack.c.l.bf16 %v4375_v25 }
 0x72f   :  { %8297 = vmatprep.subr.mxu0 %v5648_v22 }
 0x730   :  { %8298 = vmatpush3.msra.mxu0 %v5536_v1 }
 0x731   :  { %8299 = vmatprep.subr.mxu0 %v5641_v18 }
 0x732   :  { %8300 = vmatpush3.msra.mxu0 %v5529_v5 }
 0x733   :  { %8301 = vmatprep.subr.mxu0 %v5634_v42 }
 0x734   :  { %8302 = vmatpush3.msra.mxu0 %v5522_v47  ;;  %v7235_v53 = vpop.f32.mrf.mxu1 }
 0x735   :  { %8303 = vmatprep.subr.mxu0 %v5627_v59 }
 0x736   :  { %8304 = vmatpush3.msra.mxu0 %v5515_v49  ;;  %v7237_v43 = vpop.f32.mrf.mxu1 }
 0x737   :  { %8305 = vmatprep.subr.mxu0 %v5620_v54 }
 0x738   :  { %8306 = vmatpush3.msra.mxu0 %v5508_v28 }
 0x739   :  { %8307 = vmatprep.subr.mxu0 %v5613_v56 }
 0x73a   :  { %8308 = vmatpush3.msra.mxu0 %v5501_v27 }
 0x73b   :  { %8309 = vmatprep.subr.mxu0 %v5606_v29 }
 0x73c   :  { %8310 = vmatpush3.msra.mxu0 %v5494_v12 }
 0x73d   :  { %7869 = vmatmul.mubr.f32.vlgmr.msra.gmra.mxu0 %v10904_v24  ;;  %8358 = vmatprep.subr.mxu0 %v8399_v3  ;;  %v4567_v24 = vld [vmem:[%s12579_s19 + $0x1518] ss:$28 sps:$4 sm:$0xff]  }
 0x73e   :  { %8359 = vmatpush3.msra.mxu0 %v5991_v0  ;;  %8374 = vmatprep.mubr.msk.f32.mxu0 %vm8401_vm9, %v8399_v3  ;;  %v5949_v32 = vunpack.c.h.bf16 %v4567_v24  ;;  %v5942_v6 = vunpack.c.l.bf16 %v4567_v24 }
 0x73f   :  { %8360 = vmatprep.subr.mxu0 %v8399_v3 }
 0x740   :  { %8361 = vmatpush3.msra.mxu0 %v5984_v16 }
 0x741   :  { %8362 = vmatprep.subr.mxu0 %v8399_v3 }
 0x742   :  { %8363 = vmatpush3.msra.mxu0 %v5977_v9 }
 0x743   :  { %8364 = vmatprep.subr.mxu0 %v8399_v3 }
 0x744   :  { %8365 = vmatpush3.msra.mxu0 %v5970_v2 }
 0x745   :  { %8366 = vmatprep.subr.mxu0 %v8399_v3 }
 0x746   :  { %8367 = vmatpush3.msra.mxu0 %v5963_v14 }
 0x747   :  { %8368 = vmatprep.subr.mxu0 %v8399_v3 }
 0x748   :  { %8369 = vmatpush3.msra.mxu0 %v5956_v4 }
 0x749   :  { %8370 = vmatprep.subr.mxu0 %v8399_v3 }
 0x74a   :  { %8371 = vmatpush3.msra.mxu0 %v5949_v32 }
 0x74b   :  { %8372 = vmatprep.subr.mxu0 %v8399_v3  ;;  %v8398_v3 = vld [vmem:[%s12583_s20] sm:$0x7f] }
 0x74c   :  { %8373 = vmatpush3.msra.mxu0 %v5942_v6  ;;  %v6013_v10 = vrot.slane %v8398_v3, %v10123_v21  ;;  %v6021_v35 = vrot.slane %v8398_v3, %v10139_v37 }
 0x74d   :  { %8375 = vmatmul.mubr.msk.f32.vlgmr.msra.gmra.mxu0 %vm6029_vm8, %v10961_v57  ;;  %v6017_v57 = vrot.slane %v8398_v3, %v10132_v31 }
 0x74e   :  { %v7094_v46 = vadd.f32 %v7093_v50, %v6013_v10 }
 0x74f   :  { %v7096_v7 = vadd.f32 %v7095_v38, %v6017_v57 }
 0x750   :  { %v7165_v15 = vadd.f32 %v7164_v13, %v7094_v46 }
 0x751   :  { %v7167_v60 = vadd.f32 %v7166_v17, %v7096_v7 }
 0x752   :  { %v7236_v31 = vadd.f32 %v7235_v53, %v7165_v15 }
 0x753   :  { %v7238_v22 = vadd.f32 %v7237_v43, %v7167_v60 }
 0x755   :  { %v7306_v40 = vpop.f32.mrf.mxu0 }
 0x756   :  { %v7307_v21 = vadd.f32 %v7306_v40, %v7236_v31 }
 0x757   :  { %v7308_v33 = vpop.f32.mrf.mxu0 }
 0x758   :  { %v7309_v5 = vadd.f32 %v7308_v33, %v7238_v22 }
 0x776   :  { %v7377_v45 = vpop.f32.mrf.mxu1 }
 0x777   :  { %v7378_v37 = vadd.f32 %v7377_v45, %v7307_v21 }
 0x778   :  { %v7379_v11 = vpop.f32.mrf.mxu1 }
 0x779   :  { %v7380_v36 = vadd.f32 %v7379_v11, %v7309_v5 }
 0x787   :  { %v7519_v20 = vpop.f32.mrf.mxu1 }
 0x789   :  { %v7521_v58 = vpop.f32.mrf.mxu1 }
 0x798   :  { %v7448_v41 = vpop.f32.mrf.mxu0 }
 0x799   :  { %v7449_v28 = vadd.f32 %v7448_v41, %v7378_v37 }
 0x79a   :  { %v7450_v48 = vpop.f32.mrf.mxu0 }
 0x79b   :  { %v7451_v25 = vadd.f32 %v7450_v48, %v7380_v36  ;;  %v7520_v0 = vadd.f32 %v7519_v20, %v7449_v28 }
 0x79d   :  { %v7522_v29 = vadd.f32 %v7521_v58, %v7451_v25 }
 0x79f   :  { %8392 = vtanh.f32 %v7522_v29 }
 0x7a0   :  { %8394 = vtanh.f32 %v7520_v0 }
 0x7a9   :  { %v8206_v19 = vpop.f32.mrf.mxu1 }
 0x7ab   :  { %v8207_v62 = vpop.f32.mrf.mxu1 }
 0x7ac   :  { %v8208_v63 = vadd.f32 %v8207_v62, %v8206_v19  ;;  %v8393_v24 = vpop.eup %8392 }
 0x7ad   :  { %v8395_v4 = vpop.eup %8394 }
 0x7ae   :  { %v8045_v32 = vcombine.low %v8395_v4, %v8393_v24 }
 0x7b0   :  { %v8052_v50 = vrot.slane %v8045_v32, %v12301_v39 }
 0x7ba   :  { %v8171_v52 = vpop.f32.mrf.mxu0 }
 0x7bc   :  { %v8172_v23 = vpop.f32.mrf.mxu0 }
 0x7bd   :  { %v8173_v30 = vadd.f32 %v8172_v23, %v8171_v52 }
 0x7bf   :  { %v7591_v51 = vadd.f32 %v8173_v30, %v6021_v35 }
 0x7c1   :  { %v7661_v47 = vadd.f32 %v8208_v63, %v7591_v51 }
 0x7cb   :  { %v8276_v1 = vpop.f32.mrf.mxu1 }
 0x7cd   :  { %v8277_v59 = vpop.f32.mrf.mxu1 }
 0x7ce   :  { %v8278_v56 = vadd.f32 %v8277_v59, %v8276_v1 }
 0x7dc   :  { %v8241_v26 = vpop.f32.mrf.mxu0 }
 0x7de   :  { %v8242_v55 = vpop.f32.mrf.mxu0 }
 0x7df   :  { %v8243_v42 = vadd.f32 %v8242_v55, %v8241_v26 }
 0x7e1   :  { %v7731_v54 = vadd.f32 %v8243_v42, %v7661_v47 }
 0x7e3   :  { %v7801_v61 = vadd.f32 %v8278_v56, %v7731_v54 }
 0x7ed   :  { %v8346_v44 = vpop.f32.mrf.mxu1 }
 0x7ef   :  { %v8347_v12 = vpop.f32.mrf.mxu1 }
 0x7f0   :  { %v8348_v16 = vadd.f32 %v8347_v12, %v8346_v44 }
 0x7fd   :  { %v8311_v18 = vpop.f32.mrf.mxu0 }
 0x7ff   :  { %v8312_v49 = vpop.f32.mrf.mxu0 }
 0x800   :  { %v8313_v27 = vadd.f32 %v8312_v49, %v8311_v18 }
 0x802   :  { %v7871_v8 = vadd.f32 %v8313_v27, %v7801_v61 }
 0x804   :  { %v7941_v9 = vadd.f32 %v8348_v16, %v7871_v8 }
 0x80d   :  { %v8010_v34 = vpop.f32.mrf.mxu0 }
 0x80e   :  { %v8011_v2 = vadd.f32 %v8010_v34, %v7941_v9 }
 0x80f   :  { %v8376_v14 = vpop.f32.mrf.mxu0 }
 0x810   :  { %8396 = vtanh.f32 %v8011_v2 }
 0x81d   :  { %v8397_v6 = vpop.eup %8396 }
 0x81e   :  { %v8059_v13 = vrot.slane %v8397_v6, %v12301_v39 }
 0x820   :  { %v8060_v38 = vcombine.low %v8052_v50, %v8059_v13 }
 0x822   :  { %8068 = vst.msk [vmem:[%s12584_s21 + $0x8] sm:$0x3f] %vm8067_vm13, %v8060_v38 }

</bundles_post_ra>
